<compile_context>
chip_gen: v5e
topology: v5e:2x2
jax: 0.10.0
libtpu: 0.0.40
codegen_flags: <defaults>
</compile_context>

<pallas_src>
import functools

import jax
import jax.numpy as jnp
import numpy as np
from jax.experimental import pallas as pl
from jax.experimental.pallas import tpu as pltpu


# ------------------------------ in-kernel helpers ---------------------------- #

def _pool2x2_into(y, out_ref, row_off, col_off):
    """2x2 / stride-2 max pool of a (BB, H, W, C) value `y`; writes the
    (BB, H//2, W//2, C) result into `out_ref` starting at static offsets
    [:, row_off, col_off, :].  Uses only unit-stride slices + elementwise max."""
    _, H, W, _ = y.shape
    Hp, Wp = H // 2, W // 2
    # pool along H -- unit-stride slices, concat along the H axis
    t = jnp.concatenate(
        [jnp.maximum(y[:, 2 * i:2 * i + 1], y[:, 2 * i + 1:2 * i + 2])
         for i in range(Hp)], axis=1)                              # (BB, Hp, W, C)
    # pool along W, storing each pooled column straight at its destination
    for j in range(Wp):
        out_ref[:, row_off:row_off + Hp, col_off + j:col_off + j + 1, :] = (
            jnp.maximum(t[:, :, 2 * j:2 * j + 1, :],
                        t[:, :, 2 * j + 1:2 * j + 2, :]))


# --------------------------------- fused kernel ------------------------------ #

def _fused_cnn_kernel(x_ref, w1_ref, b1_ref, w2_ref, b2_ref,
                      fc1w_ref, fc1b_ref, fc2w_ref, fc2b_ref,
                      logits_ref, embd_ref,
                      xp1_ref, pat1_ref, xp2_ref, pat2_ref, p2s_ref, fcin_ref,
                      *, BB, H, W):
    """One batch block (BB images) per grid step.  All intermediates in VMEM.

    x_ref   : (BB, H, W, 1)       w1_ref: (9, 32)     b1_ref: (1, 32)
    w2_ref  : (288, 64)           b2_ref: (1, 64)
    fc1w_ref: (1024, 128) rows in NHWC-flatten order  fc1b_ref: (1, 128)
    fc2w_ref: (128, NPAD) zero-padded cols            fc2b_ref: (1, NPAD)
    logits_ref: (BB, NPAD)        embd_ref: (BB, H4*W4, 64)  (NHWC order)
    """
    H2, W2 = H // 2, W // 2
    H4, W4 = H // 4, W // 4
    C1 = w1_ref.shape[1]          # 32
    C2 = w2_ref.shape[1]          # 64

    # ---------------- conv1: in-VMEM halo pad + im2col + one MXU matmul ------
    xp1_ref[...] = jnp.zeros_like(xp1_ref)
    xp1_ref[:, 1:H + 1, 1:W + 1, :] = x_ref[...]
    t = 0
    for dy in range(3):
        for dx in range(3):
            pat1_ref[:, t:t + 1] = (
                xp1_ref[:, dy:dy + H, dx:dx + W, :].reshape(BB * H * W, 1))
            t += 1
    y1 = jnp.dot(pat1_ref[...], w1_ref[...],
                 preferred_element_type=jnp.float32)              # (BB*H*W, 32)
    y1 = jnp.maximum(y1 + b1_ref[...], 0.0).reshape(BB, H, W, C1)

    # pool1 writes its result directly into the zero-padded conv2 input.
    xp2_ref[...] = jnp.zeros_like(xp2_ref)
    _pool2x2_into(y1, xp2_ref, 1, 1)                              # (BB, H2, W2, 32)

    # ---------------- conv2: im2col (K = 9*32 = 288) + one MXU matmul --------
    t = 0
    for dy in range(3):
        for dx in range(3):
            pat2_ref[:, t * C1:(t + 1) * C1] = (
                xp2_ref[:, dy:dy + H2, dx:dx + W2, :].reshape(BB * H2 * W2, C1))
            t += 1
    y2 = jnp.dot(pat2_ref[...], w2_ref[...],
                 preferred_element_type=jnp.float32)              # (BB*H2*W2, 64)
    y2 = jnp.maximum(y2 + b2_ref[...], 0.0).reshape(BB, H2, W2, C2)

    # pool2 into a small scratch map, flatten spatially in NHWC order.
    _pool2x2_into(y2, p2s_ref, 0, 0)                              # (BB, H4, W4, 64)
    p2f = p2s_ref[...].reshape(BB, H4 * W4, C2)                   # (BB, 16, 64)
    embd_ref[...] = p2f       # NHWC order; wrapper permutes to torch's NCHW

    # ---------------- fc1 + relu + dropout(identity, eval) + fc2 -------------
    # fc1 weights were pre-permuted to NHWC-flatten order, so the NCHW
    # transpose is folded into the weights.  Assemble the (BB, 1024)
    # activation rows in VMEM with lane-offset stores, then one K=1024 matmul.
    for s in range(H4 * W4):
        fcin_ref[:, s * C2:(s + 1) * C2] = p2f[:, s, :]
    h = jnp.dot(fcin_ref[...], fc1w_ref[...],
                preferred_element_type=jnp.float32)               # (BB, 128)
    h = jnp.maximum(h + fc1b_ref[...], 0.0)
    # TODO(synk): nn.Dropout(0.6) is identity in eval/inference; training-mode
    # random masking is not implemented here.
    logits_ref[...] = (jnp.dot(h, fc2w_ref[...],
                               preferred_element_type=jnp.float32)
                       + fc2b_ref[...])


# ----------------------------------- wrapper --------------------------------- #

def simple_cnn_forward(x_nchw, params):
    """Forward pass. Returns (logits, embd) exactly like the PyTorch module."""
    B = x_nchw.shape[0]
    H, W = x_nchw.shape[2], x_nchw.shape[3]
    assert H % 4 == 0 and W % 4 == 0
    H2, W2, H4, W4 = H // 2, W // 2, H // 4, W // 4
    C1, C2 = params["w1"].shape[3], params["w2"].shape[3]            # 32, 64
    num_classes = params["fc2_w"].shape[1]
    NPAD = max(128, ((num_classes + 127) // 128) * 128)              # lane-dense logits

    # Batch blocking: BB images per grid step (grid still splits across cores
    # for larger batches via the "parallel" dimension semantics).
    BB = min(B, 8)
    Bp = ((B + BB - 1) // BB) * BB

    # NCHW with Cin=1 -> NHWC is a pure reshape (no data movement).
    x_nhwc = x_nchw.reshape(B, H, W, 1).astype(jnp.float32)
    if Bp != B:
        x_nhwc = jnp.pad(x_nhwc, ((0, Bp - B), (0, 0), (0, 0), (0, 0)))

    # One-time weight re-layouts (tiny, weights only; stays off the data path).
    w1r = params["w1"].reshape(9, C1)                                # HWIO -> (9*Cin, Cout)
    w2r = params["w2"].reshape(9 * C1, C2)
    # Fold torch's NCHW flatten into fc1: permute rows to NHWC-flatten order.
    fc1w_p = (params["fc1_w"].reshape(C2, H4, W4, 128)
              .transpose(1, 2, 0, 3).reshape(C2 * H4 * W4, 128))
    fc2w_p = jnp.zeros((128, NPAD), jnp.float32).at[:, :num_classes].set(params["fc2_w"])
    fc2b_p = jnp.zeros((1, NPAD), jnp.float32).at[:, :num_classes].set(params["fc2_b"])

    kernel = functools.partial(_fused_cnn_kernel, BB=BB, H=H, W=W)
    logits_pad, p2_nhwc = pl.pallas_call(
        kernel,
        out_shape=(jax.ShapeDtypeStruct((Bp, NPAD), jnp.float32),
                   jax.ShapeDtypeStruct((Bp, H4 * W4, C2), jnp.float32)),
        grid=(Bp // BB,),
        in_specs=[
            pl.BlockSpec((BB, H, W, 1), lambda b: (b, 0, 0, 0)),
            pl.BlockSpec(w1r.shape, lambda b: (0, 0)),
            pl.BlockSpec(params["b1"].shape, lambda b: (0, 0)),
            pl.BlockSpec(w2r.shape, lambda b: (0, 0)),
            pl.BlockSpec(params["b2"].shape, lambda b: (0, 0)),
            pl.BlockSpec(fc1w_p.shape, lambda b: (0, 0)),
            pl.BlockSpec(params["fc1_b"].shape, lambda b: (0, 0)),
            pl.BlockSpec(fc2w_p.shape, lambda b: (0, 0)),
            pl.BlockSpec(fc2b_p.shape, lambda b: (0, 0)),
        ],
        out_specs=(pl.BlockSpec((BB, NPAD), lambda b: (b, 0)),
                   pl.BlockSpec((BB, H4 * W4, C2), lambda b: (b, 0, 0))),
        scratch_shapes=[
            pltpu.VMEM((BB, H + 2, W + 2, 1), jnp.float32),       # padded conv1 input
            pltpu.VMEM((BB * H * W, 9), jnp.float32),             # conv1 im2col patches
            pltpu.VMEM((BB, H2 + 2, W2 + 2, C1), jnp.float32),    # padded conv2 input (pool1 out)
            pltpu.VMEM((BB * H2 * W2, 9 * C1), jnp.float32),      # conv2 im2col patches
            pltpu.VMEM((BB, H4, W4, C2), jnp.float32),            # pool2 output
            pltpu.VMEM((BB, C2 * H4 * W4), jnp.float32),          # fc1 input rows
        ],
        compiler_params=pltpu.CompilerParams(
            dimension_semantics=("parallel",)),
    )(x_nhwc, w1r, params["b1"], w2r, params["b2"],
      fc1w_p, params["fc1_b"], fc2w_p, fc2b_p)

    logits = logits_pad[:B, :num_classes]
    # torch's x.view(B, -1) flattens NCHW: permute the NHWC-flat embd columns.
    embd = jnp.swapaxes(p2_nhwc[:B], 1, 2).reshape(B, C2 * H4 * W4)
    return logits, embd


# ---------------------------------- parameters ------------------------------- #

def init_params(key, H, W, num_classes):
    feat = 64 * (H // 4) * (W // 4)      # = 64 * 32 * (max_len//4) structure
    ks = jax.random.split(key, 8)
    s = 0.05
    return {
        "w1": jax.random.normal(ks[0], (3, 3, 1, 32), jnp.float32) * s,     # HWIO
        "b1": jax.random.normal(ks[1], (1, 32), jnp.float32) * s,
        "w2": jax.random.normal(ks[2], (3, 3, 32, 64), jnp.float32) * s,    # HWIO
        "b2": jax.random.normal(ks[3], (1, 64), jnp.float32) * s,
        "fc1_w": jax.random.normal(ks[4], (feat, 128), jnp.float32) * s,    # (in,out), NCHW-flat rows
        "fc1_b": jax.random.normal(ks[5], (1, 128), jnp.float32) * s,
        "fc2_w": jax.random.normal(ks[6], (128, num_classes), jnp.float32) * s,
        "fc2_b": jax.random.normal(ks[7], (1, num_classes), jnp.float32) * s,
    }


# ------------------------------ pure-JAX reference ---------------------------- #

def ref_forward(x_nchw, params):
    x = jnp.transpose(x_nchw, (0, 2, 3, 1)).astype(jnp.float32)
    dn1 = jax.lax.conv_dimension_numbers(x.shape, params["w1"].shape,
                                         ("NHWC", "HWIO", "NHWC"))
    y1 = jax.lax.conv_general_dilated(x, params["w1"], (1, 1), "SAME",
                                      dimension_numbers=dn1)
    y1 = jax.nn.relu(y1 + params["b1"].reshape(1, 1, 1, -1))
    p1 = jax.lax.reduce_window(y1, -jnp.inf, jax.lax.max,
                               (1, 2, 2, 1), (1, 2, 2, 1), "VALID")
    dn2 = jax.lax.conv_dimension_numbers(p1.shape, params["w2"].shape,
                                         ("NHWC", "HWIO", "NHWC"))
    y2 = jax.lax.conv_general_dilated(p1, params["w2"], (1, 1), "SAME",
                                      dimension_numbers=dn2)
    y2 = jax.nn.relu(y2 + params["b2"].reshape(1, 1, 1, -1))
    p2 = jax.lax.reduce_window(y2, -jnp.inf, jax.lax.max,
                               (1, 2, 2, 1), (1, 2, 2, 1), "VALID")
    embd = jnp.transpose(p2, (0, 3, 1, 2)).reshape(x.shape[0], -1)
    h = jax.nn.relu(embd @ params["fc1_w"] + params["fc1_b"])
    logits = h @ params["fc2_w"] + params["fc2_b"]
    return logits, embd


# -------------------------------------- main ---------------------------------- #

if __name__ == "__main__":
    key = jax.random.PRNGKey(0)
    B, H, W = 2, 16, 16          # H scaled down from 128; max_len = W = 16
    num_classes = 10

    kx, kp = jax.random.split(key)
    x = jax.random.normal(kx, (B, 1, H, W), jnp.float32)      # NCHW like PyTorch
    params = init_params(kp, H, W, num_classes)

    logits, embd = jax.jit(simple_cnn_forward)(x, params)
    jax.block_until_ready((logits, embd))

    # sanity check against pure-JAX reference
    ref_logits, ref_embd = ref_forward(x, params)
    np.testing.assert_allclose(np.asarray(embd), np.asarray(ref_embd),
                               rtol=2e-2, atol=2e-2)
    np.testing.assert_allclose(np.asarray(logits), np.asarray(ref_logits),
                               rtol=2e-2, atol=2e-2)

    assert logits.shape == (B, num_classes)
    assert embd.shape == (B, 64 * (H // 4) * (W // 4))
    print("KERNEL_OK")
</pallas_src>

<mosaic_0001>
module attributes {stable_mosaic.version = 11 : i64} {
  func.func @_fused_cnn_kernel(%arg0: i32, %arg1: memref<2x16x16x1xf32, #tpu.memory_space<vmem>>, %arg2: memref<9x32xf32, #tpu.memory_space<vmem>>, %arg3: memref<1x32xf32, #tpu.memory_space<vmem>>, %arg4: memref<288x64xf32, #tpu.memory_space<vmem>>, %arg5: memref<1x64xf32, #tpu.memory_space<vmem>>, %arg6: memref<1024x128xf32, #tpu.memory_space<vmem>>, %arg7: memref<1x128xf32, #tpu.memory_space<vmem>>, %arg8: memref<128x128xf32, #tpu.memory_space<vmem>>, %arg9: memref<1x128xf32, #tpu.memory_space<vmem>>, %arg10: memref<2x128xf32, #tpu.memory_space<vmem>>, %arg11: memref<2x16x64xf32, #tpu.memory_space<vmem>>, %arg12: memref<2x18x18x1xf32, #tpu.memory_space<vmem>>, %arg13: memref<512x9xf32, #tpu.memory_space<vmem>>, %arg14: memref<2x10x10x32xf32, #tpu.memory_space<vmem>>, %arg15: memref<128x288xf32, #tpu.memory_space<vmem>>, %arg16: memref<2x4x4x64xf32, #tpu.memory_space<vmem>>, %arg17: memref<2x1024xf32, #tpu.memory_space<vmem>>) attributes {dimension_semantics = [#tpu.dimension_semantics<parallel>], iteration_bounds = array<i64: 1>, scalar_prefetch = 0 : i64, scratch_operands = 6 : i64, tpu.core_type = #tpu.core_type<tc>, window_params = [{transform_indices = @transform_0, window_bounds = array<i64: 2, 16, 16, 1>}, {pipeline_mode = #tpu.pipeline_mode<synchronous>, transform_indices = @transform_1, window_bounds = array<i64: 9, 32>}, {pipeline_mode = #tpu.pipeline_mode<synchronous>, transform_indices = @transform_2, window_bounds = array<i64: 1, 32>}, {pipeline_mode = #tpu.pipeline_mode<synchronous>, transform_indices = @transform_3, window_bounds = array<i64: 288, 64>}, {pipeline_mode = #tpu.pipeline_mode<synchronous>, transform_indices = @transform_4, window_bounds = array<i64: 1, 64>}, {pipeline_mode = #tpu.pipeline_mode<synchronous>, transform_indices = @transform_5, window_bounds = array<i64: 1024, 128>}, {pipeline_mode = #tpu.pipeline_mode<synchronous>, transform_indices = @transform_6, window_bounds = array<i64: 1, 128>}, {pipeline_mode = #tpu.pipeline_mode<synchronous>, transform_indices = @transform_7, window_bounds = array<i64: 128, 128>}, {pipeline_mode = #tpu.pipeline_mode<synchronous>, transform_indices = @transform_8, window_bounds = array<i64: 1, 128>}, {transform_indices = @transform_9, window_bounds = array<i64: 2, 128>}, {transform_indices = @transform_10, window_bounds = array<i64: 2, 16, 64>}]} {
    %cst = arith.constant 0.000000e+00 : f32
    %0 = vector.broadcast %cst : f32 to vector<2x18x18x1xf32>
    %c0 = arith.constant 0 : index
    %c0_0 = arith.constant 0 : index
    %c0_1 = arith.constant 0 : index
    %c0_2 = arith.constant 0 : index
    %1 = vector.load %arg12[%c0, %c0_0, %c0_1, %c0_2] : memref<2x18x18x1xf32, #tpu.memory_space<vmem>>, vector<2x18x18x1xf32>
    tpu.vector_store %arg12[%c0, %c0_0, %c0_1, %c0_2], %0 {strides = array<i32>} : memref<2x18x18x1xf32, #tpu.memory_space<vmem>>, vector<2x18x18x1xf32>,
    %c0_3 = arith.constant 0 : index
    %c0_4 = arith.constant 0 : index
    %c0_5 = arith.constant 0 : index
    %c0_6 = arith.constant 0 : index
    %2 = vector.load %arg1[%c0_3, %c0_4, %c0_5, %c0_6] : memref<2x16x16x1xf32, #tpu.memory_space<vmem>>, vector<2x16x16x1xf32>
    %c0_7 = arith.constant 0 : index
    %c1 = arith.constant 1 : index
    %c1_8 = arith.constant 1 : index
    %c0_9 = arith.constant 0 : index
    %3 = vector.load %arg12[%c0_7, %c1, %c1_8, %c0_9] : memref<2x18x18x1xf32, #tpu.memory_space<vmem>>, vector<2x16x16x1xf32>
    tpu.vector_store %arg12[%c0_7, %c1, %c1_8, %c0_9], %2 {strides = array<i32>} : memref<2x18x18x1xf32, #tpu.memory_space<vmem>>, vector<2x16x16x1xf32>,
    %c0_10 = arith.constant 0 : index
    %c0_11 = arith.constant 0 : index
    %c0_12 = arith.constant 0 : index
    %c0_13 = arith.constant 0 : index
    %4 = vector.load %arg12[%c0_10, %c0_11, %c0_12, %c0_13] : memref<2x18x18x1xf32, #tpu.memory_space<vmem>>, vector<2x16x16x1xf32>
    %5 = vector.shape_cast %4 : vector<2x16x16x1xf32> to vector<512x1xf32>
    %c0_14 = arith.constant 0 : index
    %c0_15 = arith.constant 0 : index
    %6 = vector.load %arg13[%c0_14, %c0_15] : memref<512x9xf32, #tpu.memory_space<vmem>>, vector<512x1xf32>
    tpu.vector_store %arg13[%c0_14, %c0_15], %5 {strides = array<i32>} : memref<512x9xf32, #tpu.memory_space<vmem>>, vector<512x1xf32>,
    %c0_16 = arith.constant 0 : index
    %c0_17 = arith.constant 0 : index
    %c1_18 = arith.constant 1 : index
    %c0_19 = arith.constant 0 : index
    %7 = vector.load %arg12[%c0_16, %c0_17, %c1_18, %c0_19] : memref<2x18x18x1xf32, #tpu.memory_space<vmem>>, vector<2x16x16x1xf32>
    %8 = vector.shape_cast %7 : vector<2x16x16x1xf32> to vector<512x1xf32>
    %c0_20 = arith.constant 0 : index
    %c1_21 = arith.constant 1 : index
    %9 = vector.load %arg13[%c0_20, %c1_21] : memref<512x9xf32, #tpu.memory_space<vmem>>, vector<512x1xf32>
    tpu.vector_store %arg13[%c0_20, %c1_21], %8 {strides = array<i32>} : memref<512x9xf32, #tpu.memory_space<vmem>>, vector<512x1xf32>,
    %c0_22 = arith.constant 0 : index
    %c0_23 = arith.constant 0 : index
    %c2 = arith.constant 2 : index
    %c0_24 = arith.constant 0 : index
    %10 = vector.load %arg12[%c0_22, %c0_23, %c2, %c0_24] : memref<2x18x18x1xf32, #tpu.memory_space<vmem>>, vector<2x16x16x1xf32>
    %11 = vector.shape_cast %10 : vector<2x16x16x1xf32> to vector<512x1xf32>
    %c0_25 = arith.constant 0 : index
    %c2_26 = arith.constant 2 : index
    %12 = vector.load %arg13[%c0_25, %c2_26] : memref<512x9xf32, #tpu.memory_space<vmem>>, vector<512x1xf32>
    tpu.vector_store %arg13[%c0_25, %c2_26], %11 {strides = array<i32>} : memref<512x9xf32, #tpu.memory_space<vmem>>, vector<512x1xf32>,
    %c0_27 = arith.constant 0 : index
    %c1_28 = arith.constant 1 : index
    %c0_29 = arith.constant 0 : index
    %c0_30 = arith.constant 0 : index
    %13 = vector.load %arg12[%c0_27, %c1_28, %c0_29, %c0_30] : memref<2x18x18x1xf32, #tpu.memory_space<vmem>>, vector<2x16x16x1xf32>
    %14 = vector.shape_cast %13 : vector<2x16x16x1xf32> to vector<512x1xf32>
    %c0_31 = arith.constant 0 : index
    %c3 = arith.constant 3 : index
    %15 = vector.load %arg13[%c0_31, %c3] : memref<512x9xf32, #tpu.memory_space<vmem>>, vector<512x1xf32>
    tpu.vector_store %arg13[%c0_31, %c3], %14 {strides = array<i32>} : memref<512x9xf32, #tpu.memory_space<vmem>>, vector<512x1xf32>,
    %c0_32 = arith.constant 0 : index
    %c1_33 = arith.constant 1 : index
    %c1_34 = arith.constant 1 : index
    %c0_35 = arith.constant 0 : index
    %16 = vector.load %arg12[%c0_32, %c1_33, %c1_34, %c0_35] : memref<2x18x18x1xf32, #tpu.memory_space<vmem>>, vector<2x16x16x1xf32>
    %17 = vector.shape_cast %16 : vector<2x16x16x1xf32> to vector<512x1xf32>
    %c0_36 = arith.constant 0 : index
    %c4 = arith.constant 4 : index
    %18 = vector.load %arg13[%c0_36, %c4] : memref<512x9xf32, #tpu.memory_space<vmem>>, vector<512x1xf32>
    tpu.vector_store %arg13[%c0_36, %c4], %17 {strides = array<i32>} : memref<512x9xf32, #tpu.memory_space<vmem>>, vector<512x1xf32>,
    %c0_37 = arith.constant 0 : index
    %c1_38 = arith.constant 1 : index
    %c2_39 = arith.constant 2 : index
    %c0_40 = arith.constant 0 : index
    %19 = vector.load %arg12[%c0_37, %c1_38, %c2_39, %c0_40] : memref<2x18x18x1xf32, #tpu.memory_space<vmem>>, vector<2x16x16x1xf32>
    %20 = vector.shape_cast %19 : vector<2x16x16x1xf32> to vector<512x1xf32>
    %c0_41 = arith.constant 0 : index
    %c5 = arith.constant 5 : index
    %21 = vector.load %arg13[%c0_41, %c5] : memref<512x9xf32, #tpu.memory_space<vmem>>, vector<512x1xf32>
    tpu.vector_store %arg13[%c0_41, %c5], %20 {strides = array<i32>} : memref<512x9xf32, #tpu.memory_space<vmem>>, vector<512x1xf32>,
    %c0_42 = arith.constant 0 : index
    %c2_43 = arith.constant 2 : index
    %c0_44 = arith.constant 0 : index
    %c0_45 = arith.constant 0 : index
    %22 = vector.load %arg12[%c0_42, %c2_43, %c0_44, %c0_45] : memref<2x18x18x1xf32, #tpu.memory_space<vmem>>, vector<2x16x16x1xf32>
    %23 = vector.shape_cast %22 : vector<2x16x16x1xf32> to vector<512x1xf32>
    %c0_46 = arith.constant 0 : index
    %c6 = arith.constant 6 : index
    %24 = vector.load %arg13[%c0_46, %c6] : memref<512x9xf32, #tpu.memory_space<vmem>>, vector<512x1xf32>
    tpu.vector_store %arg13[%c0_46, %c6], %23 {strides = array<i32>} : memref<512x9xf32, #tpu.memory_space<vmem>>, vector<512x1xf32>,
    %c0_47 = arith.constant 0 : index
    %c2_48 = arith.constant 2 : index
    %c1_49 = arith.constant 1 : index
    %c0_50 = arith.constant 0 : index
    %25 = vector.load %arg12[%c0_47, %c2_48, %c1_49, %c0_50] : memref<2x18x18x1xf32, #tpu.memory_space<vmem>>, vector<2x16x16x1xf32>
    %26 = vector.shape_cast %25 : vector<2x16x16x1xf32> to vector<512x1xf32>
    %c0_51 = arith.constant 0 : index
    %c7 = arith.constant 7 : index
    %27 = vector.load %arg13[%c0_51, %c7] : memref<512x9xf32, #tpu.memory_space<vmem>>, vector<512x1xf32>
    tpu.vector_store %arg13[%c0_51, %c7], %26 {strides = array<i32>} : memref<512x9xf32, #tpu.memory_space<vmem>>, vector<512x1xf32>,
    %c0_52 = arith.constant 0 : index
    %c2_53 = arith.constant 2 : index
    %c2_54 = arith.constant 2 : index
    %c0_55 = arith.constant 0 : index
    %28 = vector.load %arg12[%c0_52, %c2_53, %c2_54, %c0_55] : memref<2x18x18x1xf32, #tpu.memory_space<vmem>>, vector<2x16x16x1xf32>
    %29 = vector.shape_cast %28 : vector<2x16x16x1xf32> to vector<512x1xf32>
    %c0_56 = arith.constant 0 : index
    %c8 = arith.constant 8 : index
    %30 = vector.load %arg13[%c0_56, %c8] : memref<512x9xf32, #tpu.memory_space<vmem>>, vector<512x1xf32>
    tpu.vector_store %arg13[%c0_56, %c8], %29 {strides = array<i32>} : memref<512x9xf32, #tpu.memory_space<vmem>>, vector<512x1xf32>,
    %c0_57 = arith.constant 0 : index
    %c0_58 = arith.constant 0 : index
    %31 = vector.load %arg13[%c0_57, %c0_58] : memref<512x9xf32, #tpu.memory_space<vmem>>, vector<512x9xf32>
    %c0_59 = arith.constant 0 : index
    %c0_60 = arith.constant 0 : index
    %32 = vector.load %arg2[%c0_59, %c0_60] : memref<9x32xf32, #tpu.memory_space<vmem>>, vector<9x32xf32>
    %cst_61 = arith.constant dense<0.000000e+00> : vector<512x32xf32>
    %33 = tpu.matmul %31, %32, %cst_61 {dimension_numbers = #tpu.dot_dimension_numbers<[1], [0], [0], [1], [0, 0, 1, 1], [], []>} : vector<512x9xf32>, vector<9x32xf32>, vector<512x32xf32> -> vector<512x32xf32>
    %c0_62 = arith.constant 0 : index
    %c0_63 = arith.constant 0 : index
    %34 = vector.load %arg3[%c0_62, %c0_63] : memref<1x32xf32, #tpu.memory_space<vmem>>, vector<1x32xf32>
    %35 = vector.broadcast %34 : vector<1x32xf32> to vector<512x32xf32>
    %36 = arith.addf %33, %35 : vector<512x32xf32>
    %cst_64 = arith.constant 0.000000e+00 : f32
    %37 = vector.broadcast %cst_64 : f32 to vector<512x32xf32>
    %38 = arith.maximumf %36, %37 : vector<512x32xf32>
    %39 = vector.shape_cast %38 : vector<512x32xf32> to vector<2x16x16x32xf32>
    %cst_65 = arith.constant 0.000000e+00 : f32
    %40 = vector.broadcast %cst_65 : f32 to vector<2x10x10x32xf32>
    %c0_66 = arith.constant 0 : index
    %c0_67 = arith.constant 0 : index
    %c0_68 = arith.constant 0 : index
    %c0_69 = arith.constant 0 : index
    %41 = vector.load %arg14[%c0_66, %c0_67, %c0_68, %c0_69] : memref<2x10x10x32xf32, #tpu.memory_space<vmem>>, vector<2x10x10x32xf32>
    tpu.vector_store %arg14[%c0_66, %c0_67, %c0_68, %c0_69], %40 {strides = array<i32>} : memref<2x10x10x32xf32, #tpu.memory_space<vmem>>, vector<2x10x10x32xf32>,
    %42 = vector.extract_strided_slice %39 {offsets = [0, 0, 0, 0], sizes = [2, 1, 16, 32], strides = [1, 1, 1, 1]} : vector<2x16x16x32xf32> to vector<2x1x16x32xf32>
    %43 = vector.extract_strided_slice %39 {offsets = [0, 1, 0, 0], sizes = [2, 1, 16, 32], strides = [1, 1, 1, 1]} : vector<2x16x16x32xf32> to vector<2x1x16x32xf32>
    %44 = arith.maximumf %42, %43 : vector<2x1x16x32xf32>
    %45 = vector.extract_strided_slice %39 {offsets = [0, 2, 0, 0], sizes = [2, 1, 16, 32], strides = [1, 1, 1, 1]} : vector<2x16x16x32xf32> to vector<2x1x16x32xf32>
    %46 = vector.extract_strided_slice %39 {offsets = [0, 3, 0, 0], sizes = [2, 1, 16, 32], strides = [1, 1, 1, 1]} : vector<2x16x16x32xf32> to vector<2x1x16x32xf32>
    %47 = arith.maximumf %45, %46 : vector<2x1x16x32xf32>
    %48 = vector.extract_strided_slice %39 {offsets = [0, 4, 0, 0], sizes = [2, 1, 16, 32], strides = [1, 1, 1, 1]} : vector<2x16x16x32xf32> to vector<2x1x16x32xf32>
    %49 = vector.extract_strided_slice %39 {offsets = [0, 5, 0, 0], sizes = [2, 1, 16, 32], strides = [1, 1, 1, 1]} : vector<2x16x16x32xf32> to vector<2x1x16x32xf32>
    %50 = arith.maximumf %48, %49 : vector<2x1x16x32xf32>
    %51 = vector.extract_strided_slice %39 {offsets = [0, 6, 0, 0], sizes = [2, 1, 16, 32], strides = [1, 1, 1, 1]} : vector<2x16x16x32xf32> to vector<2x1x16x32xf32>
    %52 = vector.extract_strided_slice %39 {offsets = [0, 7, 0, 0], sizes = [2, 1, 16, 32], strides = [1, 1, 1, 1]} : vector<2x16x16x32xf32> to vector<2x1x16x32xf32>
    %53 = arith.maximumf %51, %52 : vector<2x1x16x32xf32>
    %54 = vector.extract_strided_slice %39 {offsets = [0, 8, 0, 0], sizes = [2, 1, 16, 32], strides = [1, 1, 1, 1]} : vector<2x16x16x32xf32> to vector<2x1x16x32xf32>
    %55 = vector.extract_strided_slice %39 {offsets = [0, 9, 0, 0], sizes = [2, 1, 16, 32], strides = [1, 1, 1, 1]} : vector<2x16x16x32xf32> to vector<2x1x16x32xf32>
    %56 = arith.maximumf %54, %55 : vector<2x1x16x32xf32>
    %57 = vector.extract_strided_slice %39 {offsets = [0, 10, 0, 0], sizes = [2, 1, 16, 32], strides = [1, 1, 1, 1]} : vector<2x16x16x32xf32> to vector<2x1x16x32xf32>
    %58 = vector.extract_strided_slice %39 {offsets = [0, 11, 0, 0], sizes = [2, 1, 16, 32], strides = [1, 1, 1, 1]} : vector<2x16x16x32xf32> to vector<2x1x16x32xf32>
    %59 = arith.maximumf %57, %58 : vector<2x1x16x32xf32>
    %60 = vector.extract_strided_slice %39 {offsets = [0, 12, 0, 0], sizes = [2, 1, 16, 32], strides = [1, 1, 1, 1]} : vector<2x16x16x32xf32> to vector<2x1x16x32xf32>
    %61 = vector.extract_strided_slice %39 {offsets = [0, 13, 0, 0], sizes = [2, 1, 16, 32], strides = [1, 1, 1, 1]} : vector<2x16x16x32xf32> to vector<2x1x16x32xf32>
    %62 = arith.maximumf %60, %61 : vector<2x1x16x32xf32>
    %63 = vector.extract_strided_slice %39 {offsets = [0, 14, 0, 0], sizes = [2, 1, 16, 32], strides = [1, 1, 1, 1]} : vector<2x16x16x32xf32> to vector<2x1x16x32xf32>
    %64 = vector.extract_strided_slice %39 {offsets = [0, 15, 0, 0], sizes = [2, 1, 16, 32], strides = [1, 1, 1, 1]} : vector<2x16x16x32xf32> to vector<2x1x16x32xf32>
    %65 = arith.maximumf %63, %64 : vector<2x1x16x32xf32>
    %66 = tpu.concatenate %44, %47, %50, %53, %56, %59, %62, %65 in 1 : vector<2x1x16x32xf32>, vector<2x1x16x32xf32>, vector<2x1x16x32xf32>, vector<2x1x16x32xf32>, vector<2x1x16x32xf32>, vector<2x1x16x32xf32>, vector<2x1x16x32xf32>, vector<2x1x16x32xf32> -> vector<2x8x16x32xf32>
    %67 = vector.extract_strided_slice %66 {offsets = [0, 0, 0, 0], sizes = [2, 8, 1, 32], strides = [1, 1, 1, 1]} : vector<2x8x16x32xf32> to vector<2x8x1x32xf32>
    %68 = vector.extract_strided_slice %66 {offsets = [0, 0, 1, 0], sizes = [2, 8, 1, 32], strides = [1, 1, 1, 1]} : vector<2x8x16x32xf32> to vector<2x8x1x32xf32>
    %69 = arith.maximumf %67, %68 : vector<2x8x1x32xf32>
    %c0_70 = arith.constant 0 : index
    %c1_71 = arith.constant 1 : index
    %c1_72 = arith.constant 1 : index
    %c0_73 = arith.constant 0 : index
    %70 = vector.load %arg14[%c0_70, %c1_71, %c1_72, %c0_73] : memref<2x10x10x32xf32, #tpu.memory_space<vmem>>, vector<2x8x1x32xf32>
    tpu.vector_store %arg14[%c0_70, %c1_71, %c1_72, %c0_73], %69 {strides = array<i32>} : memref<2x10x10x32xf32, #tpu.memory_space<vmem>>, vector<2x8x1x32xf32>,
    %71 = vector.extract_strided_slice %66 {offsets = [0, 0, 2, 0], sizes = [2, 8, 1, 32], strides = [1, 1, 1, 1]} : vector<2x8x16x32xf32> to vector<2x8x1x32xf32>
    %72 = vector.extract_strided_slice %66 {offsets = [0, 0, 3, 0], sizes = [2, 8, 1, 32], strides = [1, 1, 1, 1]} : vector<2x8x16x32xf32> to vector<2x8x1x32xf32>
    %73 = arith.maximumf %71, %72 : vector<2x8x1x32xf32>
    %c0_74 = arith.constant 0 : index
    %c1_75 = arith.constant 1 : index
    %c2_76 = arith.constant 2 : index
    %c0_77 = arith.constant 0 : index
    %74 = vector.load %arg14[%c0_74, %c1_75, %c2_76, %c0_77] : memref<2x10x10x32xf32, #tpu.memory_space<vmem>>, vector<2x8x1x32xf32>
    tpu.vector_store %arg14[%c0_74, %c1_75, %c2_76, %c0_77], %73 {strides = array<i32>} : memref<2x10x10x32xf32, #tpu.memory_space<vmem>>, vector<2x8x1x32xf32>,
    %75 = vector.extract_strided_slice %66 {offsets = [0, 0, 4, 0], sizes = [2, 8, 1, 32], strides = [1, 1, 1, 1]} : vector<2x8x16x32xf32> to vector<2x8x1x32xf32>
    %76 = vector.extract_strided_slice %66 {offsets = [0, 0, 5, 0], sizes = [2, 8, 1, 32], strides = [1, 1, 1, 1]} : vector<2x8x16x32xf32> to vector<2x8x1x32xf32>
    %77 = arith.maximumf %75, %76 : vector<2x8x1x32xf32>
    %c0_78 = arith.constant 0 : index
    %c1_79 = arith.constant 1 : index
    %c3_80 = arith.constant 3 : index
    %c0_81 = arith.constant 0 : index
    %78 = vector.load %arg14[%c0_78, %c1_79, %c3_80, %c0_81] : memref<2x10x10x32xf32, #tpu.memory_space<vmem>>, vector<2x8x1x32xf32>
    tpu.vector_store %arg14[%c0_78, %c1_79, %c3_80, %c0_81], %77 {strides = array<i32>} : memref<2x10x10x32xf32, #tpu.memory_space<vmem>>, vector<2x8x1x32xf32>,
    %79 = vector.extract_strided_slice %66 {offsets = [0, 0, 6, 0], sizes = [2, 8, 1, 32], strides = [1, 1, 1, 1]} : vector<2x8x16x32xf32> to vector<2x8x1x32xf32>
    %80 = vector.extract_strided_slice %66 {offsets = [0, 0, 7, 0], sizes = [2, 8, 1, 32], strides = [1, 1, 1, 1]} : vector<2x8x16x32xf32> to vector<2x8x1x32xf32>
    %81 = arith.maximumf %79, %80 : vector<2x8x1x32xf32>
    %c0_82 = arith.constant 0 : index
    %c1_83 = arith.constant 1 : index
    %c4_84 = arith.constant 4 : index
    %c0_85 = arith.constant 0 : index
    %82 = vector.load %arg14[%c0_82, %c1_83, %c4_84, %c0_85] : memref<2x10x10x32xf32, #tpu.memory_space<vmem>>, vector<2x8x1x32xf32>
    tpu.vector_store %arg14[%c0_82, %c1_83, %c4_84, %c0_85], %81 {strides = array<i32>} : memref<2x10x10x32xf32, #tpu.memory_space<vmem>>, vector<2x8x1x32xf32>,
    %83 = vector.extract_strided_slice %66 {offsets = [0, 0, 8, 0], sizes = [2, 8, 1, 32], strides = [1, 1, 1, 1]} : vector<2x8x16x32xf32> to vector<2x8x1x32xf32>
    %84 = vector.extract_strided_slice %66 {offsets = [0, 0, 9, 0], sizes = [2, 8, 1, 32], strides = [1, 1, 1, 1]} : vector<2x8x16x32xf32> to vector<2x8x1x32xf32>
    %85 = arith.maximumf %83, %84 : vector<2x8x1x32xf32>
    %c0_86 = arith.constant 0 : index
    %c1_87 = arith.constant 1 : index
    %c5_88 = arith.constant 5 : index
    %c0_89 = arith.constant 0 : index
    %86 = vector.load %arg14[%c0_86, %c1_87, %c5_88, %c0_89] : memref<2x10x10x32xf32, #tpu.memory_space<vmem>>, vector<2x8x1x32xf32>
    tpu.vector_store %arg14[%c0_86, %c1_87, %c5_88, %c0_89], %85 {strides = array<i32>} : memref<2x10x10x32xf32, #tpu.memory_space<vmem>>, vector<2x8x1x32xf32>,
    %87 = vector.extract_strided_slice %66 {offsets = [0, 0, 10, 0], sizes = [2, 8, 1, 32], strides = [1, 1, 1, 1]} : vector<2x8x16x32xf32> to vector<2x8x1x32xf32>
    %88 = vector.extract_strided_slice %66 {offsets = [0, 0, 11, 0], sizes = [2, 8, 1, 32], strides = [1, 1, 1, 1]} : vector<2x8x16x32xf32> to vector<2x8x1x32xf32>
    %89 = arith.maximumf %87, %88 : vector<2x8x1x32xf32>
    %c0_90 = arith.constant 0 : index
    %c1_91 = arith.constant 1 : index
    %c6_92 = arith.constant 6 : index
    %c0_93 = arith.constant 0 : index
    %90 = vector.load %arg14[%c0_90, %c1_91, %c6_92, %c0_93] : memref<2x10x10x32xf32, #tpu.memory_space<vmem>>, vector<2x8x1x32xf32>
    tpu.vector_store %arg14[%c0_90, %c1_91, %c6_92, %c0_93], %89 {strides = array<i32>} : memref<2x10x10x32xf32, #tpu.memory_space<vmem>>, vector<2x8x1x32xf32>,
    %91 = vector.extract_strided_slice %66 {offsets = [0, 0, 12, 0], sizes = [2, 8, 1, 32], strides = [1, 1, 1, 1]} : vector<2x8x16x32xf32> to vector<2x8x1x32xf32>
    %92 = vector.extract_strided_slice %66 {offsets = [0, 0, 13, 0], sizes = [2, 8, 1, 32], strides = [1, 1, 1, 1]} : vector<2x8x16x32xf32> to vector<2x8x1x32xf32>
    %93 = arith.maximumf %91, %92 : vector<2x8x1x32xf32>
    %c0_94 = arith.constant 0 : index
    %c1_95 = arith.constant 1 : index
    %c7_96 = arith.constant 7 : index
    %c0_97 = arith.constant 0 : index
    %94 = vector.load %arg14[%c0_94, %c1_95, %c7_96, %c0_97] : memref<2x10x10x32xf32, #tpu.memory_space<vmem>>, vector<2x8x1x32xf32>
    tpu.vector_store %arg14[%c0_94, %c1_95, %c7_96, %c0_97], %93 {strides = array<i32>} : memref<2x10x10x32xf32, #tpu.memory_space<vmem>>, vector<2x8x1x32xf32>,
    %95 = vector.extract_strided_slice %66 {offsets = [0, 0, 14, 0], sizes = [2, 8, 1, 32], strides = [1, 1, 1, 1]} : vector<2x8x16x32xf32> to vector<2x8x1x32xf32>
    %96 = vector.extract_strided_slice %66 {offsets = [0, 0, 15, 0], sizes = [2, 8, 1, 32], strides = [1, 1, 1, 1]} : vector<2x8x16x32xf32> to vector<2x8x1x32xf32>
    %97 = arith.maximumf %95, %96 : vector<2x8x1x32xf32>
    %c0_98 = arith.constant 0 : index
    %c1_99 = arith.constant 1 : index
    %c8_100 = arith.constant 8 : index
    %c0_101 = arith.constant 0 : index
    %98 = vector.load %arg14[%c0_98, %c1_99, %c8_100, %c0_101] : memref<2x10x10x32xf32, #tpu.memory_space<vmem>>, vector<2x8x1x32xf32>
    tpu.vector_store %arg14[%c0_98, %c1_99, %c8_100, %c0_101], %97 {strides = array<i32>} : memref<2x10x10x32xf32, #tpu.memory_space<vmem>>, vector<2x8x1x32xf32>,
    %c0_102 = arith.constant 0 : index
    %c0_103 = arith.constant 0 : index
    %c0_104 = arith.constant 0 : index
    %c0_105 = arith.constant 0 : index
    %99 = vector.load %arg14[%c0_102, %c0_103, %c0_104, %c0_105] : memref<2x10x10x32xf32, #tpu.memory_space<vmem>>, vector<2x8x8x32xf32>
    %100 = vector.shape_cast %99 : vector<2x8x8x32xf32> to vector<128x32xf32>
    %c0_106 = arith.constant 0 : index
    %c0_107 = arith.constant 0 : index
    %101 = vector.load %arg15[%c0_106, %c0_107] : memref<128x288xf32, #tpu.memory_space<vmem>>, vector<128x32xf32>
    tpu.vector_store %arg15[%c0_106, %c0_107], %100 {strides = array<i32>} : memref<128x288xf32, #tpu.memory_space<vmem>>, vector<128x32xf32>,
    %c0_108 = arith.constant 0 : index
    %c0_109 = arith.constant 0 : index
    %c1_110 = arith.constant 1 : index
    %c0_111 = arith.constant 0 : index
    %102 = vector.load %arg14[%c0_108, %c0_109, %c1_110, %c0_111] : memref<2x10x10x32xf32, #tpu.memory_space<vmem>>, vector<2x8x8x32xf32>
    %103 = vector.shape_cast %102 : vector<2x8x8x32xf32> to vector<128x32xf32>
    %c0_112 = arith.constant 0 : index
    %c32 = arith.constant 32 : index
    %104 = vector.load %arg15[%c0_112, %c32] : memref<128x288xf32, #tpu.memory_space<vmem>>, vector<128x32xf32>
    tpu.vector_store %arg15[%c0_112, %c32], %103 {strides = array<i32>} : memref<128x288xf32, #tpu.memory_space<vmem>>, vector<128x32xf32>,
    %c0_113 = arith.constant 0 : index
    %c0_114 = arith.constant 0 : index
    %c2_115 = arith.constant 2 : index
    %c0_116 = arith.constant 0 : index
    %105 = vector.load %arg14[%c0_113, %c0_114, %c2_115, %c0_116] : memref<2x10x10x32xf32, #tpu.memory_space<vmem>>, vector<2x8x8x32xf32>
    %106 = vector.shape_cast %105 : vector<2x8x8x32xf32> to vector<128x32xf32>
    %c0_117 = arith.constant 0 : index
    %c64 = arith.constant 64 : index
    %107 = vector.load %arg15[%c0_117, %c64] : memref<128x288xf32, #tpu.memory_space<vmem>>, vector<128x32xf32>
    tpu.vector_store %arg15[%c0_117, %c64], %106 {strides = array<i32>} : memref<128x288xf32, #tpu.memory_space<vmem>>, vector<128x32xf32>,
    %c0_118 = arith.constant 0 : index
    %c1_119 = arith.constant 1 : index
    %c0_120 = arith.constant 0 : index
    %c0_121 = arith.constant 0 : index
    %108 = vector.load %arg14[%c0_118, %c1_119, %c0_120, %c0_121] : memref<2x10x10x32xf32, #tpu.memory_space<vmem>>, vector<2x8x8x32xf32>
    %109 = vector.shape_cast %108 : vector<2x8x8x32xf32> to vector<128x32xf32>
    %c0_122 = arith.constant 0 : index
    %c96 = arith.constant 96 : index
    %110 = vector.load %arg15[%c0_122, %c96] : memref<128x288xf32, #tpu.memory_space<vmem>>, vector<128x32xf32>
    tpu.vector_store %arg15[%c0_122, %c96], %109 {strides = array<i32>} : memref<128x288xf32, #tpu.memory_space<vmem>>, vector<128x32xf32>,
    %c0_123 = arith.constant 0 : index
    %c1_124 = arith.constant 1 : index
    %c1_125 = arith.constant 1 : index
    %c0_126 = arith.constant 0 : index
    %111 = vector.load %arg14[%c0_123, %c1_124, %c1_125, %c0_126] : memref<2x10x10x32xf32, #tpu.memory_space<vmem>>, vector<2x8x8x32xf32>
    %112 = vector.shape_cast %111 : vector<2x8x8x32xf32> to vector<128x32xf32>
    %c0_127 = arith.constant 0 : index
    %c128 = arith.constant 128 : index
    %113 = vector.load %arg15[%c0_127, %c128] : memref<128x288xf32, #tpu.memory_space<vmem>>, vector<128x32xf32>
    tpu.vector_store %arg15[%c0_127, %c128], %112 {strides = array<i32>} : memref<128x288xf32, #tpu.memory_space<vmem>>, vector<128x32xf32>,
    %c0_128 = arith.constant 0 : index
    %c1_129 = arith.constant 1 : index
    %c2_130 = arith.constant 2 : index
    %c0_131 = arith.constant 0 : index
    %114 = vector.load %arg14[%c0_128, %c1_129, %c2_130, %c0_131] : memref<2x10x10x32xf32, #tpu.memory_space<vmem>>, vector<2x8x8x32xf32>
    %115 = vector.shape_cast %114 : vector<2x8x8x32xf32> to vector<128x32xf32>
    %c0_132 = arith.constant 0 : index
    %c160 = arith.constant 160 : index
    %116 = vector.load %arg15[%c0_132, %c160] : memref<128x288xf32, #tpu.memory_space<vmem>>, vector<128x32xf32>
    tpu.vector_store %arg15[%c0_132, %c160], %115 {strides = array<i32>} : memref<128x288xf32, #tpu.memory_space<vmem>>, vector<128x32xf32>,
    %c0_133 = arith.constant 0 : index
    %c2_134 = arith.constant 2 : index
    %c0_135 = arith.constant 0 : index
    %c0_136 = arith.constant 0 : index
    %117 = vector.load %arg14[%c0_133, %c2_134, %c0_135, %c0_136] : memref<2x10x10x32xf32, #tpu.memory_space<vmem>>, vector<2x8x8x32xf32>
    %118 = vector.shape_cast %117 : vector<2x8x8x32xf32> to vector<128x32xf32>
    %c0_137 = arith.constant 0 : index
    %c192 = arith.constant 192 : index
    %119 = vector.load %arg15[%c0_137, %c192] : memref<128x288xf32, #tpu.memory_space<vmem>>, vector<128x32xf32>
    tpu.vector_store %arg15[%c0_137, %c192], %118 {strides = array<i32>} : memref<128x288xf32, #tpu.memory_space<vmem>>, vector<128x32xf32>,
    %c0_138 = arith.constant 0 : index
    %c2_139 = arith.constant 2 : index
    %c1_140 = arith.constant 1 : index
    %c0_141 = arith.constant 0 : index
    %120 = vector.load %arg14[%c0_138, %c2_139, %c1_140, %c0_141] : memref<2x10x10x32xf32, #tpu.memory_space<vmem>>, vector<2x8x8x32xf32>
    %121 = vector.shape_cast %120 : vector<2x8x8x32xf32> to vector<128x32xf32>
    %c0_142 = arith.constant 0 : index
    %c224 = arith.constant 224 : index
    %122 = vector.load %arg15[%c0_142, %c224] : memref<128x288xf32, #tpu.memory_space<vmem>>, vector<128x32xf32>
    tpu.vector_store %arg15[%c0_142, %c224], %121 {strides = array<i32>} : memref<128x288xf32, #tpu.memory_space<vmem>>, vector<128x32xf32>,
    %c0_143 = arith.constant 0 : index
    %c2_144 = arith.constant 2 : index
    %c2_145 = arith.constant 2 : index
    %c0_146 = arith.constant 0 : index
    %123 = vector.load %arg14[%c0_143, %c2_144, %c2_145, %c0_146] : memref<2x10x10x32xf32, #tpu.memory_space<vmem>>, vector<2x8x8x32xf32>
    %124 = vector.shape_cast %123 : vector<2x8x8x32xf32> to vector<128x32xf32>
    %c0_147 = arith.constant 0 : index
    %c256 = arith.constant 256 : index
    %125 = vector.load %arg15[%c0_147, %c256] : memref<128x288xf32, #tpu.memory_space<vmem>>, vector<128x32xf32>
    tpu.vector_store %arg15[%c0_147, %c256], %124 {strides = array<i32>} : memref<128x288xf32, #tpu.memory_space<vmem>>, vector<128x32xf32>,
    %c0_148 = arith.constant 0 : index
    %c0_149 = arith.constant 0 : index
    %126 = vector.load %arg15[%c0_148, %c0_149] : memref<128x288xf32, #tpu.memory_space<vmem>>, vector<128x288xf32>
    %c0_150 = arith.constant 0 : index
    %c0_151 = arith.constant 0 : index
    %127 = vector.load %arg4[%c0_150, %c0_151] : memref<288x64xf32, #tpu.memory_space<vmem>>, vector<288x64xf32>
    %cst_152 = arith.constant dense<0.000000e+00> : vector<128x64xf32>
    %128 = tpu.matmul %126, %127, %cst_152 {dimension_numbers = #tpu.dot_dimension_numbers<[1], [0], [0], [1], [0, 0, 1, 1], [], []>} : vector<128x288xf32>, vector<288x64xf32>, vector<128x64xf32> -> vector<128x64xf32>
    %c0_153 = arith.constant 0 : index
    %c0_154 = arith.constant 0 : index
    %129 = vector.load %arg5[%c0_153, %c0_154] : memref<1x64xf32, #tpu.memory_space<vmem>>, vector<1x64xf32>
    %130 = vector.broadcast %129 : vector<1x64xf32> to vector<128x64xf32>
    %131 = arith.addf %128, %130 : vector<128x64xf32>
    %cst_155 = arith.constant 0.000000e+00 : f32
    %132 = vector.broadcast %cst_155 : f32 to vector<128x64xf32>
    %133 = arith.maximumf %131, %132 : vector<128x64xf32>
    %134 = vector.shape_cast %133 : vector<128x64xf32> to vector<2x8x8x64xf32>
    %135 = vector.extract_strided_slice %134 {offsets = [0, 0, 0, 0], sizes = [2, 1, 8, 64], strides = [1, 1, 1, 1]} : vector<2x8x8x64xf32> to vector<2x1x8x64xf32>
    %136 = vector.extract_strided_slice %134 {offsets = [0, 1, 0, 0], sizes = [2, 1, 8, 64], strides = [1, 1, 1, 1]} : vector<2x8x8x64xf32> to vector<2x1x8x64xf32>
    %137 = arith.maximumf %135, %136 : vector<2x1x8x64xf32>
    %138 = vector.extract_strided_slice %134 {offsets = [0, 2, 0, 0], sizes = [2, 1, 8, 64], strides = [1, 1, 1, 1]} : vector<2x8x8x64xf32> to vector<2x1x8x64xf32>
    %139 = vector.extract_strided_slice %134 {offsets = [0, 3, 0, 0], sizes = [2, 1, 8, 64], strides = [1, 1, 1, 1]} : vector<2x8x8x64xf32> to vector<2x1x8x64xf32>
    %140 = arith.maximumf %138, %139 : vector<2x1x8x64xf32>
    %141 = vector.extract_strided_slice %134 {offsets = [0, 4, 0, 0], sizes = [2, 1, 8, 64], strides = [1, 1, 1, 1]} : vector<2x8x8x64xf32> to vector<2x1x8x64xf32>
    %142 = vector.extract_strided_slice %134 {offsets = [0, 5, 0, 0], sizes = [2, 1, 8, 64], strides = [1, 1, 1, 1]} : vector<2x8x8x64xf32> to vector<2x1x8x64xf32>
    %143 = arith.maximumf %141, %142 : vector<2x1x8x64xf32>
    %144 = vector.extract_strided_slice %134 {offsets = [0, 6, 0, 0], sizes = [2, 1, 8, 64], strides = [1, 1, 1, 1]} : vector<2x8x8x64xf32> to vector<2x1x8x64xf32>
    %145 = vector.extract_strided_slice %134 {offsets = [0, 7, 0, 0], sizes = [2, 1, 8, 64], strides = [1, 1, 1, 1]} : vector<2x8x8x64xf32> to vector<2x1x8x64xf32>
    %146 = arith.maximumf %144, %145 : vector<2x1x8x64xf32>
    %147 = tpu.concatenate %137, %140, %143, %146 in 1 : vector<2x1x8x64xf32>, vector<2x1x8x64xf32>, vector<2x1x8x64xf32>, vector<2x1x8x64xf32> -> vector<2x4x8x64xf32>
    %148 = vector.extract_strided_slice %147 {offsets = [0, 0, 0, 0], sizes = [2, 4, 1, 64], strides = [1, 1, 1, 1]} : vector<2x4x8x64xf32> to vector<2x4x1x64xf32>
    %149 = vector.extract_strided_slice %147 {offsets = [0, 0, 1, 0], sizes = [2, 4, 1, 64], strides = [1, 1, 1, 1]} : vector<2x4x8x64xf32> to vector<2x4x1x64xf32>
    %150 = arith.maximumf %148, %149 : vector<2x4x1x64xf32>
    %c0_156 = arith.constant 0 : index
    %c0_157 = arith.constant 0 : index
    %c0_158 = arith.constant 0 : index
    %c0_159 = arith.constant 0 : index
    %151 = vector.load %arg16[%c0_156, %c0_157, %c0_158, %c0_159] : memref<2x4x4x64xf32, #tpu.memory_space<vmem>>, vector<2x4x1x64xf32>
    tpu.vector_store %arg16[%c0_156, %c0_157, %c0_158, %c0_159], %150 {strides = array<i32>} : memref<2x4x4x64xf32, #tpu.memory_space<vmem>>, vector<2x4x1x64xf32>,
    %152 = vector.extract_strided_slice %147 {offsets = [0, 0, 2, 0], sizes = [2, 4, 1, 64], strides = [1, 1, 1, 1]} : vector<2x4x8x64xf32> to vector<2x4x1x64xf32>
    %153 = vector.extract_strided_slice %147 {offsets = [0, 0, 3, 0], sizes = [2, 4, 1, 64], strides = [1, 1, 1, 1]} : vector<2x4x8x64xf32> to vector<2x4x1x64xf32>
    %154 = arith.maximumf %152, %153 : vector<2x4x1x64xf32>
    %c0_160 = arith.constant 0 : index
    %c0_161 = arith.constant 0 : index
    %c1_162 = arith.constant 1 : index
    %c0_163 = arith.constant 0 : index
    %155 = vector.load %arg16[%c0_160, %c0_161, %c1_162, %c0_163] : memref<2x4x4x64xf32, #tpu.memory_space<vmem>>, vector<2x4x1x64xf32>
    tpu.vector_store %arg16[%c0_160, %c0_161, %c1_162, %c0_163], %154 {strides = array<i32>} : memref<2x4x4x64xf32, #tpu.memory_space<vmem>>, vector<2x4x1x64xf32>,
    %156 = vector.extract_strided_slice %147 {offsets = [0, 0, 4, 0], sizes = [2, 4, 1, 64], strides = [1, 1, 1, 1]} : vector<2x4x8x64xf32> to vector<2x4x1x64xf32>
    %157 = vector.extract_strided_slice %147 {offsets = [0, 0, 5, 0], sizes = [2, 4, 1, 64], strides = [1, 1, 1, 1]} : vector<2x4x8x64xf32> to vector<2x4x1x64xf32>
    %158 = arith.maximumf %156, %157 : vector<2x4x1x64xf32>
    %c0_164 = arith.constant 0 : index
    %c0_165 = arith.constant 0 : index
    %c2_166 = arith.constant 2 : index
    %c0_167 = arith.constant 0 : index
    %159 = vector.load %arg16[%c0_164, %c0_165, %c2_166, %c0_167] : memref<2x4x4x64xf32, #tpu.memory_space<vmem>>, vector<2x4x1x64xf32>
    tpu.vector_store %arg16[%c0_164, %c0_165, %c2_166, %c0_167], %158 {strides = array<i32>} : memref<2x4x4x64xf32, #tpu.memory_space<vmem>>, vector<2x4x1x64xf32>,
    %160 = vector.extract_strided_slice %147 {offsets = [0, 0, 6, 0], sizes = [2, 4, 1, 64], strides = [1, 1, 1, 1]} : vector<2x4x8x64xf32> to vector<2x4x1x64xf32>
    %161 = vector.extract_strided_slice %147 {offsets = [0, 0, 7, 0], sizes = [2, 4, 1, 64], strides = [1, 1, 1, 1]} : vector<2x4x8x64xf32> to vector<2x4x1x64xf32>
    %162 = arith.maximumf %160, %161 : vector<2x4x1x64xf32>
    %c0_168 = arith.constant 0 : index
    %c0_169 = arith.constant 0 : index
    %c3_170 = arith.constant 3 : index
    %c0_171 = arith.constant 0 : index
    %163 = vector.load %arg16[%c0_168, %c0_169, %c3_170, %c0_171] : memref<2x4x4x64xf32, #tpu.memory_space<vmem>>, vector<2x4x1x64xf32>
    tpu.vector_store %arg16[%c0_168, %c0_169, %c3_170, %c0_171], %162 {strides = array<i32>} : memref<2x4x4x64xf32, #tpu.memory_space<vmem>>, vector<2x4x1x64xf32>,
    %c0_172 = arith.constant 0 : index
    %c0_173 = arith.constant 0 : index
    %c0_174 = arith.constant 0 : index
    %c0_175 = arith.constant 0 : index
    %164 = vector.load %arg16[%c0_172, %c0_173, %c0_174, %c0_175] : memref<2x4x4x64xf32, #tpu.memory_space<vmem>>, vector<2x4x4x64xf32>
    %165 = vector.shape_cast %164 : vector<2x4x4x64xf32> to vector<2x16x64xf32>
    %c0_176 = arith.constant 0 : index
    %c0_177 = arith.constant 0 : index
    %c0_178 = arith.constant 0 : index
    %166 = vector.load %arg11[%c0_176, %c0_177, %c0_178] : memref<2x16x64xf32, #tpu.memory_space<vmem>>, vector<2x16x64xf32>
    tpu.vector_store %arg11[%c0_176, %c0_177, %c0_178], %165 {strides = array<i32>} : memref<2x16x64xf32, #tpu.memory_space<vmem>>, vector<2x16x64xf32>,
    %167 = vector.extract_strided_slice %165 {offsets = [0, 0, 0], sizes = [2, 1, 64], strides = [1, 1, 1]} : vector<2x16x64xf32> to vector<2x1x64xf32>
    %168 = vector.shape_cast %167 : vector<2x1x64xf32> to vector<2x64xf32>
    %c0_179 = arith.constant 0 : index
    %c0_180 = arith.constant 0 : index
    %169 = vector.load %arg17[%c0_179, %c0_180] : memref<2x1024xf32, #tpu.memory_space<vmem>>, vector<2x64xf32>
    tpu.vector_store %arg17[%c0_179, %c0_180], %168 {strides = array<i32>} : memref<2x1024xf32, #tpu.memory_space<vmem>>, vector<2x64xf32>,
    %170 = vector.extract_strided_slice %165 {offsets = [0, 1, 0], sizes = [2, 1, 64], strides = [1, 1, 1]} : vector<2x16x64xf32> to vector<2x1x64xf32>
    %171 = vector.shape_cast %170 : vector<2x1x64xf32> to vector<2x64xf32>
    %c0_181 = arith.constant 0 : index
    %c64_182 = arith.constant 64 : index
    %172 = vector.load %arg17[%c0_181, %c64_182] : memref<2x1024xf32, #tpu.memory_space<vmem>>, vector<2x64xf32>
    tpu.vector_store %arg17[%c0_181, %c64_182], %171 {strides = array<i32>} : memref<2x1024xf32, #tpu.memory_space<vmem>>, vector<2x64xf32>,
    %173 = vector.extract_strided_slice %165 {offsets = [0, 2, 0], sizes = [2, 1, 64], strides = [1, 1, 1]} : vector<2x16x64xf32> to vector<2x1x64xf32>
    %174 = vector.shape_cast %173 : vector<2x1x64xf32> to vector<2x64xf32>
    %c0_183 = arith.constant 0 : index
    %c128_184 = arith.constant 128 : index
    %175 = vector.load %arg17[%c0_183, %c128_184] : memref<2x1024xf32, #tpu.memory_space<vmem>>, vector<2x64xf32>
    tpu.vector_store %arg17[%c0_183, %c128_184], %174 {strides = array<i32>} : memref<2x1024xf32, #tpu.memory_space<vmem>>, vector<2x64xf32>,
    %176 = vector.extract_strided_slice %165 {offsets = [0, 3, 0], sizes = [2, 1, 64], strides = [1, 1, 1]} : vector<2x16x64xf32> to vector<2x1x64xf32>
    %177 = vector.shape_cast %176 : vector<2x1x64xf32> to vector<2x64xf32>
    %c0_185 = arith.constant 0 : index
    %c192_186 = arith.constant 192 : index
    %178 = vector.load %arg17[%c0_185, %c192_186] : memref<2x1024xf32, #tpu.memory_space<vmem>>, vector<2x64xf32>
    tpu.vector_store %arg17[%c0_185, %c192_186], %177 {strides = array<i32>} : memref<2x1024xf32, #tpu.memory_space<vmem>>, vector<2x64xf32>,
    %179 = vector.extract_strided_slice %165 {offsets = [0, 4, 0], sizes = [2, 1, 64], strides = [1, 1, 1]} : vector<2x16x64xf32> to vector<2x1x64xf32>
    %180 = vector.shape_cast %179 : vector<2x1x64xf32> to vector<2x64xf32>
    %c0_187 = arith.constant 0 : index
    %c256_188 = arith.constant 256 : index
    %181 = vector.load %arg17[%c0_187, %c256_188] : memref<2x1024xf32, #tpu.memory_space<vmem>>, vector<2x64xf32>
    tpu.vector_store %arg17[%c0_187, %c256_188], %180 {strides = array<i32>} : memref<2x1024xf32, #tpu.memory_space<vmem>>, vector<2x64xf32>,
    %182 = vector.extract_strided_slice %165 {offsets = [0, 5, 0], sizes = [2, 1, 64], strides = [1, 1, 1]} : vector<2x16x64xf32> to vector<2x1x64xf32>
    %183 = vector.shape_cast %182 : vector<2x1x64xf32> to vector<2x64xf32>
    %c0_189 = arith.constant 0 : index
    %c320 = arith.constant 320 : index
    %184 = vector.load %arg17[%c0_189, %c320] : memref<2x1024xf32, #tpu.memory_space<vmem>>, vector<2x64xf32>
    tpu.vector_store %arg17[%c0_189, %c320], %183 {strides = array<i32>} : memref<2x1024xf32, #tpu.memory_space<vmem>>, vector<2x64xf32>,
    %185 = vector.extract_strided_slice %165 {offsets = [0, 6, 0], sizes = [2, 1, 64], strides = [1, 1, 1]} : vector<2x16x64xf32> to vector<2x1x64xf32>
    %186 = vector.shape_cast %185 : vector<2x1x64xf32> to vector<2x64xf32>
    %c0_190 = arith.constant 0 : index
    %c384 = arith.constant 384 : index
    %187 = vector.load %arg17[%c0_190, %c384] : memref<2x1024xf32, #tpu.memory_space<vmem>>, vector<2x64xf32>
    tpu.vector_store %arg17[%c0_190, %c384], %186 {strides = array<i32>} : memref<2x1024xf32, #tpu.memory_space<vmem>>, vector<2x64xf32>,
    %188 = vector.extract_strided_slice %165 {offsets = [0, 7, 0], sizes = [2, 1, 64], strides = [1, 1, 1]} : vector<2x16x64xf32> to vector<2x1x64xf32>
    %189 = vector.shape_cast %188 : vector<2x1x64xf32> to vector<2x64xf32>
    %c0_191 = arith.constant 0 : index
    %c448 = arith.constant 448 : index
    %190 = vector.load %arg17[%c0_191, %c448] : memref<2x1024xf32, #tpu.memory_space<vmem>>, vector<2x64xf32>
    tpu.vector_store %arg17[%c0_191, %c448], %189 {strides = array<i32>} : memref<2x1024xf32, #tpu.memory_space<vmem>>, vector<2x64xf32>,
    %191 = vector.extract_strided_slice %165 {offsets = [0, 8, 0], sizes = [2, 1, 64], strides = [1, 1, 1]} : vector<2x16x64xf32> to vector<2x1x64xf32>
    %192 = vector.shape_cast %191 : vector<2x1x64xf32> to vector<2x64xf32>
    %c0_192 = arith.constant 0 : index
    %c512 = arith.constant 512 : index
    %193 = vector.load %arg17[%c0_192, %c512] : memref<2x1024xf32, #tpu.memory_space<vmem>>, vector<2x64xf32>
    tpu.vector_store %arg17[%c0_192, %c512], %192 {strides = array<i32>} : memref<2x1024xf32, #tpu.memory_space<vmem>>, vector<2x64xf32>,
    %194 = vector.extract_strided_slice %165 {offsets = [0, 9, 0], sizes = [2, 1, 64], strides = [1, 1, 1]} : vector<2x16x64xf32> to vector<2x1x64xf32>
    %195 = vector.shape_cast %194 : vector<2x1x64xf32> to vector<2x64xf32>
    %c0_193 = arith.constant 0 : index
    %c576 = arith.constant 576 : index
    %196 = vector.load %arg17[%c0_193, %c576] : memref<2x1024xf32, #tpu.memory_space<vmem>>, vector<2x64xf32>
    tpu.vector_store %arg17[%c0_193, %c576], %195 {strides = array<i32>} : memref<2x1024xf32, #tpu.memory_space<vmem>>, vector<2x64xf32>,
    %197 = vector.extract_strided_slice %165 {offsets = [0, 10, 0], sizes = [2, 1, 64], strides = [1, 1, 1]} : vector<2x16x64xf32> to vector<2x1x64xf32>
    %198 = vector.shape_cast %197 : vector<2x1x64xf32> to vector<2x64xf32>
    %c0_194 = arith.constant 0 : index
    %c640 = arith.constant 640 : index
    %199 = vector.load %arg17[%c0_194, %c640] : memref<2x1024xf32, #tpu.memory_space<vmem>>, vector<2x64xf32>
    tpu.vector_store %arg17[%c0_194, %c640], %198 {strides = array<i32>} : memref<2x1024xf32, #tpu.memory_space<vmem>>, vector<2x64xf32>,
    %200 = vector.extract_strided_slice %165 {offsets = [0, 11, 0], sizes = [2, 1, 64], strides = [1, 1, 1]} : vector<2x16x64xf32> to vector<2x1x64xf32>
    %201 = vector.shape_cast %200 : vector<2x1x64xf32> to vector<2x64xf32>
    %c0_195 = arith.constant 0 : index
    %c704 = arith.constant 704 : index
    %202 = vector.load %arg17[%c0_195, %c704] : memref<2x1024xf32, #tpu.memory_space<vmem>>, vector<2x64xf32>
    tpu.vector_store %arg17[%c0_195, %c704], %201 {strides = array<i32>} : memref<2x1024xf32, #tpu.memory_space<vmem>>, vector<2x64xf32>,
    %203 = vector.extract_strided_slice %165 {offsets = [0, 12, 0], sizes = [2, 1, 64], strides = [1, 1, 1]} : vector<2x16x64xf32> to vector<2x1x64xf32>
    %204 = vector.shape_cast %203 : vector<2x1x64xf32> to vector<2x64xf32>
    %c0_196 = arith.constant 0 : index
    %c768 = arith.constant 768 : index
    %205 = vector.load %arg17[%c0_196, %c768] : memref<2x1024xf32, #tpu.memory_space<vmem>>, vector<2x64xf32>
    tpu.vector_store %arg17[%c0_196, %c768], %204 {strides = array<i32>} : memref<2x1024xf32, #tpu.memory_space<vmem>>, vector<2x64xf32>,
    %206 = vector.extract_strided_slice %165 {offsets = [0, 13, 0], sizes = [2, 1, 64], strides = [1, 1, 1]} : vector<2x16x64xf32> to vector<2x1x64xf32>
    %207 = vector.shape_cast %206 : vector<2x1x64xf32> to vector<2x64xf32>
    %c0_197 = arith.constant 0 : index
    %c832 = arith.constant 832 : index
    %208 = vector.load %arg17[%c0_197, %c832] : memref<2x1024xf32, #tpu.memory_space<vmem>>, vector<2x64xf32>
    tpu.vector_store %arg17[%c0_197, %c832], %207 {strides = array<i32>} : memref<2x1024xf32, #tpu.memory_space<vmem>>, vector<2x64xf32>,
    %209 = vector.extract_strided_slice %165 {offsets = [0, 14, 0], sizes = [2, 1, 64], strides = [1, 1, 1]} : vector<2x16x64xf32> to vector<2x1x64xf32>
    %210 = vector.shape_cast %209 : vector<2x1x64xf32> to vector<2x64xf32>
    %c0_198 = arith.constant 0 : index
    %c896 = arith.constant 896 : index
    %211 = vector.load %arg17[%c0_198, %c896] : memref<2x1024xf32, #tpu.memory_space<vmem>>, vector<2x64xf32>
    tpu.vector_store %arg17[%c0_198, %c896], %210 {strides = array<i32>} : memref<2x1024xf32, #tpu.memory_space<vmem>>, vector<2x64xf32>,
    %212 = vector.extract_strided_slice %165 {offsets = [0, 15, 0], sizes = [2, 1, 64], strides = [1, 1, 1]} : vector<2x16x64xf32> to vector<2x1x64xf32>
    %213 = vector.shape_cast %212 : vector<2x1x64xf32> to vector<2x64xf32>
    %c0_199 = arith.constant 0 : index
    %c960 = arith.constant 960 : index
    %214 = vector.load %arg17[%c0_199, %c960] : memref<2x1024xf32, #tpu.memory_space<vmem>>, vector<2x64xf32>
    tpu.vector_store %arg17[%c0_199, %c960], %213 {strides = array<i32>} : memref<2x1024xf32, #tpu.memory_space<vmem>>, vector<2x64xf32>,
    %c0_200 = arith.constant 0 : index
    %c0_201 = arith.constant 0 : index
    %215 = vector.load %arg17[%c0_200, %c0_201] : memref<2x1024xf32, #tpu.memory_space<vmem>>, vector<2x1024xf32>
    %c0_202 = arith.constant 0 : index
    %c0_203 = arith.constant 0 : index
    %216 = vector.load %arg6[%c0_202, %c0_203] : memref<1024x128xf32, #tpu.memory_space<vmem>>, vector<1024x128xf32>
    %cst_204 = arith.constant dense<0.000000e+00> : vector<2x128xf32>
    %217 = tpu.matmul %215, %216, %cst_204 {dimension_numbers = #tpu.dot_dimension_numbers<[1], [0], [0], [1], [0, 0, 1, 1], [], []>} : vector<2x1024xf32>, vector<1024x128xf32>, vector<2x128xf32> -> vector<2x128xf32>
    %c0_205 = arith.constant 0 : index
    %c0_206 = arith.constant 0 : index
    %218 = vector.load %arg7[%c0_205, %c0_206] : memref<1x128xf32, #tpu.memory_space<vmem>>, vector<1x128xf32>
    %219 = vector.broadcast %218 : vector<1x128xf32> to vector<2x128xf32>
    %220 = arith.addf %217, %219 : vector<2x128xf32>
    %cst_207 = arith.constant 0.000000e+00 : f32
    %221 = vector.broadcast %cst_207 : f32 to vector<2x128xf32>
    %222 = arith.maximumf %220, %221 : vector<2x128xf32>
    %c0_208 = arith.constant 0 : index
    %c0_209 = arith.constant 0 : index
    %223 = vector.load %arg8[%c0_208, %c0_209] : memref<128x128xf32, #tpu.memory_space<vmem>>, vector<128x128xf32>
    %cst_210 = arith.constant dense<0.000000e+00> : vector<2x128xf32>
    %224 = tpu.matmul %222, %223, %cst_210 {dimension_numbers = #tpu.dot_dimension_numbers<[1], [0], [0], [1], [0, 0, 1, 1], [], []>} : vector<2x128xf32>, vector<128x128xf32>, vector<2x128xf32> -> vector<2x128xf32>
    %c0_211 = arith.constant 0 : index
    %c0_212 = arith.constant 0 : index
    %225 = vector.load %arg9[%c0_211, %c0_212] : memref<1x128xf32, #tpu.memory_space<vmem>>, vector<1x128xf32>
    %226 = vector.broadcast %225 : vector<1x128xf32> to vector<2x128xf32>
    %227 = arith.addf %224, %226 : vector<2x128xf32>
    %c0_213 = arith.constant 0 : index
    %c0_214 = arith.constant 0 : index
    %228 = vector.load %arg10[%c0_213, %c0_214] : memref<2x128xf32, #tpu.memory_space<vmem>>, vector<2x128xf32>
    tpu.vector_store %arg10[%c0_213, %c0_214], %227 {strides = array<i32>} : memref<2x128xf32, #tpu.memory_space<vmem>>, vector<2x128xf32>,
    return
  }
  func.func @transform_0(%arg0: i32) -> (i32, i32, i32, i32) {
    %c0_i32 = arith.constant 0 : i32
    %c0_i32_0 = arith.constant 0 : i32
    %c0_i32_1 = arith.constant 0 : i32
    %c0_i32_2 = arith.constant 0 : i32
    return %arg0, %c0_i32, %c0_i32_0, %c0_i32_1 : i32, i32, i32, i32
  }
  func.func @transform_1(%arg0: i32) -> (i32, i32) {
    %c0_i32 = arith.constant 0 : i32
    %c0_i32_0 = arith.constant 0 : i32
    %c0_i32_1 = arith.constant 0 : i32
    return %c0_i32, %c0_i32_0 : i32, i32
  }
  func.func @transform_2(%arg0: i32) -> (i32, i32) {
    %c0_i32 = arith.constant 0 : i32
    %c0_i32_0 = arith.constant 0 : i32
    %c0_i32_1 = arith.constant 0 : i32
    return %c0_i32, %c0_i32_0 : i32, i32
  }
  func.func @transform_3(%arg0: i32) -> (i32, i32) {
    %c0_i32 = arith.constant 0 : i32
    %c0_i32_0 = arith.constant 0 : i32
    %c0_i32_1 = arith.constant 0 : i32
    return %c0_i32, %c0_i32_0 : i32, i32
  }
  func.func @transform_4(%arg0: i32) -> (i32, i32) {
    %c0_i32 = arith.constant 0 : i32
    %c0_i32_0 = arith.constant 0 : i32
    %c0_i32_1 = arith.constant 0 : i32
    return %c0_i32, %c0_i32_0 : i32, i32
  }
  func.func @transform_5(%arg0: i32) -> (i32, i32) {
    %c0_i32 = arith.constant 0 : i32
    %c0_i32_0 = arith.constant 0 : i32
    %c0_i32_1 = arith.constant 0 : i32
    return %c0_i32, %c0_i32_0 : i32, i32
  }
  func.func @transform_6(%arg0: i32) -> (i32, i32) {
    %c0_i32 = arith.constant 0 : i32
    %c0_i32_0 = arith.constant 0 : i32
    %c0_i32_1 = arith.constant 0 : i32
    return %c0_i32, %c0_i32_0 : i32, i32
  }
  func.func @transform_7(%arg0: i32) -> (i32, i32) {
    %c0_i32 = arith.constant 0 : i32
    %c0_i32_0 = arith.constant 0 : i32
    %c0_i32_1 = arith.constant 0 : i32
    return %c0_i32, %c0_i32_0 : i32, i32
  }
  func.func @transform_8(%arg0: i32) -> (i32, i32) {
    %c0_i32 = arith.constant 0 : i32
    %c0_i32_0 = arith.constant 0 : i32
    %c0_i32_1 = arith.constant 0 : i32
    return %c0_i32, %c0_i32_0 : i32, i32
  }
  func.func @transform_9(%arg0: i32) -> (i32, i32) {
    %c0_i32 = arith.constant 0 : i32
    %c0_i32_0 = arith.constant 0 : i32
    return %arg0, %c0_i32 : i32, i32
  }
  func.func @transform_10(%arg0: i32) -> (i32, i32, i32) {
    %c0_i32 = arith.constant 0 : i32
    %c0_i32_0 = arith.constant 0 : i32
    %c0_i32_1 = arith.constant 0 : i32
    return %arg0, %c0_i32, %c0_i32_0 : i32, i32, i32
  }
}

</mosaic_0001>

<bundles_post_ra>
// kernel: simple_cnn_forward.1
= control target key start
LH: loop header
LB: loop body
LE: loop exit
PB: predicated region body
PF: predicated region fallthrough
CT: control target
= control target key end

     0   :  { %vm35_vm0 = vcmask 7168   ;;  %v10140_v0 = vmov 0.0   ;;  %s10129_s0 = inlined_call_operand.vmem [shape: f32[2,16,16,1], index: 0, kind: input, shape index: {}]   ;;  %s10130_s1 = inlined_call_operand.vmem [shape: f32[9,32], index: 1, kind: input, shape index: {}]   ;;  %s10131_s2 = inlined_call_operand.vmem [shape: f32[1,32], index: 2, kind: input, shape index: {}]   ;;  %s10132_s3 = inlined_call_operand.vmem [shape: f32[288,64], index: 3, kind: input, shape index: {}]   ;;  %s10133_s4 = inlined_call_operand.vmem [shape: f32[1,64], index: 4, kind: input, shape index: {}]   ;;  %s10134_s5 = inlined_call_operand.vmem [shape: f32[1024,128], index: 5, kind: input, shape index: {}]   ;;  %s10135_s6 = inlined_call_operand.vmem [shape: f32[1,128], index: 6, kind: input, shape index: {}]   ;;  %s10136_s7 = inlined_call_operand.vmem [shape: f32[128,128], index: 7, kind: input, shape index: {}]   ;;  %s10137_s8 = inlined_call_operand.vmem [shape: f32[1,128], index: 8, kind: input, shape index: {}]   ;;  %s10138_s9 = inlined_call_operand.hbm [shape: f32[2,128], index: 9, kind: output, shape index: {0}]   ;;  %s10139_s10 = inlined_call_operand.vmem [shape: f32[2,16,64], index: 10, kind: output, shape index: {1}]  }
   0x1   :  { %36 = vst.msk [vmem:[#allocation2] sm:$0xff] %vm35_vm0, %v10140_v0 }
   0x2   :  { %37 = vst.msk [vmem:[#allocation2 + $0x8] sm:$0xff] %vm35_vm0, %v10140_v0 }
   0x3   :  { %16 = vsyncpa [#allocation9], 0  ;;  %40 = vst.msk [vmem:[#allocation2 + $0x18] sm:$0xff] %vm35_vm0, %v10140_v0  ;;  %s6262_s13 = smov 1   ;;  %v147_v2 = vld [vmem:[%s10129_s0 + $0x10] sm:$0xff]  ;;  %v145_v3 = vld [vmem:[%s10129_s0] sm:$0xff] }
   0x4   :  { %41 = vst.msk [vmem:[#allocation2 + $0x20] sm:$0xff] %vm35_vm0, %v10140_v0  ;;  %vm38_vm1 = vcmask 1024   ;;  %v148_v7 = vld [vmem:[%s10129_s0 + $0x18] sm:$0xff]  ;;  %v146_v8 = vld [vmem:[%s10129_s0 + $0x8] sm:$0xff]  ;;  %v149_v9 = vld [vmem:[%s10129_s0 + $0x20] sm:$0xff]  ;;  %vm722_vm2 = vcmask 15368  }
   0x5   :  { %43 = vst.msk [vmem:[#allocation2 + $0x30] sm:$0xff] %vm35_vm0, %v10140_v0  ;;  %v151_v10 = vld [vmem:[%s10129_s0 + $0x30] sm:$0xff]  ;;  %v150_v11 = vld [vmem:[%s10129_s0 + $0x28] sm:$0xff]  ;;  %v152_v12 = vld [vmem:[%s10129_s0 + $0x38] sm:$0xff]  ;;  %vm1107_vm3 = vcmask 23568   ;;  %s6264_s20 = smov 3  }
   0x6   :  { %44 = vst.msk [vmem:[#allocation2 + $0x38] sm:$0xff] %vm35_vm0, %v10140_v0  ;;  %v154_v13 = vld [vmem:[%s10129_s0 + $0x48] sm:$0xff]  ;;  %v153_v14 = vld [vmem:[%s10129_s0 + $0x40] sm:$0xff]  ;;  %v155_v15 = vld [vmem:[%s10129_s0 + $0x50] sm:$0xff]  ;;  %vm1492_vm4 = vcmask 31768   ;;  %s6266_s29 = smov 5  }
   0x7   :  { %46 = vst.msk [vmem:[#allocation2 + $0x48] sm:$0xff] %vm35_vm0, %v10140_v0  ;;  %v157_v16 = vld [vmem:[%s10129_s0 + $0x60] sm:$0xff]  ;;  %v156_v18 = vld [vmem:[%s10129_s0 + $0x58] sm:$0xff]  ;;  %v158_v20 = vld [vmem:[%s10129_s0 + $0x68] sm:$0xff]  ;;  %vm1877_vm5 = vcmask 39968   ;;  %s6267_s30 = smov 6  }
   0x8   :  { %47 = vst.msk [vmem:[#allocation2 + $0x50] sm:$0xff] %vm35_vm0, %v10140_v0  ;;  %v160_v22 = vld [vmem:[%s10129_s0 + $0x78] sm:$0xff]  ;;  %v159_v23 = vld [vmem:[%s10129_s0 + $0x70] sm:$0xff]  ;;  %v161_v24 = vld [vmem:[%s10129_s0 + $0x80] sm:$0xff]  ;;  %s6268_s11 = smov 8   ;;  %s6269_s12 = smov 7  }
   0x9   :  { %v402_v1 = vld [vmem:[#allocation2 + $0x1] sm:$0xff]  ;;  %49 = vst.msk [vmem:[#allocation2 + $0x60] sm:$0xff] %vm35_vm0, %v10140_v0  ;;  %v164_v30 = vld [vmem:[%s10129_s0 + $0x98] sm:$0xff]  ;;  %v165_v32 = vld [vmem:[%s10129_s0 + $0xa0] sm:$0xff]  ;;  %vm2262_vm6 = vcmask 48168   ;;  %vm3746_vm7 = vcmask 1040384  }
   0xa   :  { %530 = vrot.lane.b32.xlu0 %v402_v1, %s6262_s13  ;;  %50 = vst.msk [vmem:[#allocation2 + $0x68] sm:$0xff] %vm35_vm0, %v10140_v0  ;;  %v163_v25 = vld [vmem:[%s10129_s0 + $0x90] sm:$0xff]  ;;  %v162_v27 = vld [vmem:[%s10129_s0 + $0x88] sm:$0xff]  ;;  %v169_v37 = vld [vmem:[%s10129_s0 + $0xc0] sm:$0xff]  ;;  %vm2648_vm8 = vcmask 56368   ;;  %vm3033_vm9 = vcmask 64568  }
   0xb   :  { %52 = vst.msk [vmem:[#allocation2 + $0x78] sm:$0xff] %vm35_vm0, %v10140_v0  ;;  %v166_v31 = vld [vmem:[%s10129_s0 + $0xa8] sm:$0xff]  ;;  %v167_v36 = vld [vmem:[%s10129_s0 + $0xb0] sm:$0xff]  ;;  %v168_v38 = vld [vmem:[%s10129_s0 + $0xb8] sm:$0xff]  ;;  %vm3418_vm10 = vcmask 72768   ;;  %vm3553_vm11 = vcmask 72704  }
   0xc   :  { %53 = vst.msk [vmem:[#allocation2 + $0x80] sm:$0xff] %vm35_vm0, %v10140_v0  ;;  %v170_v42 = vld [vmem:[%s10129_s0 + $0xc8] sm:$0xff]  ;;  %v172_v43 = vld [vmem:[%s10129_s0 + $0xd8] sm:$0xff]  ;;  %v171_v44 = vld [vmem:[%s10129_s0 + $0xd0] sm:$0xff]  ;;  %vm4023_vm12 = vcmask 261120   ;;  %vm4025_vm13 = vcmask 254976  }
   0xd   :  { %55 = vst.msk [vmem:[#allocation2 + $0x90] sm:$0xff] %vm35_vm0, %v10140_v0  ;;  %v173_v48 = vld [vmem:[%s10129_s0 + $0xe0] sm:$0xff]  ;;  %v174_v49 = vld [vmem:[%s10129_s0 + $0xe8] sm:$0xff]  ;;  %v179_v58 = vld [vmem:[%s10129_s0 + $0x110] sm:$0xff]  ;;  %vm4162_vm14 = vcmask 253952   ;;  %vm4179_vm15 = vcmask 256002  }
   0xe   :  { %56 = vst.msk [vmem:[#allocation2 + $0x98] sm:$0xff] %vm35_vm0, %v10140_v0  ;;  %v178_v53 = vld [vmem:[%s10129_s0 + $0x108] sm:$0xff]  ;;  %v177_v54 = vld [vmem:[%s10129_s0 + $0x100] sm:$0xff]  ;;  %v180_v60 = vld [vmem:[%s10129_s0 + $0x118] sm:$0xff]  ;;  %s6271_s21 = smov 64   ;;  %s6273_s25 = smov [#allocation8]  }
   0xf   :  { %58 = vst.msk [vmem:[#allocation2 + $0xa8] sm:$0xff] %vm35_vm0, %v10140_v0  ;;  %v181_v59 = vld [vmem:[%s10129_s0 + $0x120] sm:$0xff]  ;;  %s6096_s26 = sshll.u32 %s6273_s25, 4  ;;  %s6097_s26 = int_to_ptr.vmem [resolvable:$true] %s6096_s26 }
  0x10   :  { %59 = vst.msk [vmem:[#allocation2 + $0xb0] sm:$0xff] %vm35_vm0, %v10140_v0 }
  0x11   :  { %61 = vst.msk [vmem:[#allocation2 + $0xc0] sm:$0xff] %vm35_vm0, %v10140_v0 }
  0x12   :  { %62 = vst.msk [vmem:[#allocation2 + $0xc8] sm:$0xff] %vm35_vm0, %v10140_v0 }
  0x13   :  { %64 = vst.msk [vmem:[#allocation2 + $0xd8] sm:$0xff] %vm35_vm0, %v10140_v0 }
  0x14   :  { %65 = vst.msk [vmem:[#allocation2 + $0xe0] sm:$0xff] %vm35_vm0, %v10140_v0 }
  0x15   :  { %67 = vst.msk [vmem:[#allocation2 + $0xf0] sm:$0xff] %vm35_vm0, %v10140_v0 }
  0x16   :  { %68 = vst.msk [vmem:[#allocation2 + $0xf8] sm:$0xff] %vm35_vm0, %v10140_v0 }
  0x17   :  { %70 = vst.msk [vmem:[#allocation2 + $0x108] sm:$0xff] %vm35_vm0, %v10140_v0 }
  0x18   :  { %71 = vst.msk [vmem:[#allocation2 + $0x110] sm:$0xff] %vm35_vm0, %v10140_v0 }
  0x19   :  { %73 = vst.msk [vmem:[#allocation2 + $0x120] sm:$0xff] %vm35_vm0, %v10140_v0 }
  0x1a   :  { %74 = vst.msk [vmem:[#allocation2 + $0x128] sm:$0xff] %vm35_vm0, %v10140_v0 }
  0x1b   :  { %76 = vst.msk [vmem:[#allocation2 + $0x138] sm:$0xff] %vm35_vm0, %v10140_v0 }
  0x1c   :  { %77 = vst.msk [vmem:[#allocation2 + $0x140] sm:$0xff] %vm35_vm0, %v10140_v0 }
  0x1d   :  { %79 = vst.msk [vmem:[#allocation2 + $0x150] sm:$0xff] %vm35_vm0, %v10140_v0 }
  0x1e   :  { %80 = vst.msk [vmem:[#allocation2 + $0x158] sm:$0xff] %vm35_vm0, %v10140_v0 }
  0x1f   :  { %82 = vst.msk [vmem:[#allocation2 + $0x168] sm:$0xff] %vm35_vm0, %v10140_v0 }
  0x20   :  { %83 = vst.msk [vmem:[#allocation2 + $0x170] sm:$0xff] %vm35_vm0, %v10140_v0 }
  0x21   :  { %85 = vst.msk [vmem:[#allocation2 + $0x180] sm:$0xff] %vm35_vm0, %v10140_v0 }
  0x22   :  { %86 = vst.msk [vmem:[#allocation2 + $0x188] sm:$0xff] %vm35_vm0, %v10140_v0 }
  0x23   :  { %88 = vst.msk [vmem:[#allocation2 + $0x198] sm:$0xff] %vm35_vm0, %v10140_v0 }
  0x24   :  { %89 = vst.msk [vmem:[#allocation2 + $0x1a0] sm:$0xff] %vm35_vm0, %v10140_v0 }
  0x25   :  { %91 = vst.msk [vmem:[#allocation2 + $0x1b0] sm:$0xff] %vm35_vm0, %v10140_v0 }
  0x26   :  { %92 = vst.msk [vmem:[#allocation2 + $0x1b8] sm:$0xff] %vm35_vm0, %v10140_v0 }
  0x27   :  { %94 = vst.msk [vmem:[#allocation2 + $0x1c8] sm:$0xff] %vm35_vm0, %v10140_v0 }
  0x28   :  { %95 = vst.msk [vmem:[#allocation2 + $0x1d0] sm:$0xff] %vm35_vm0, %v10140_v0 }
  0x29   :  { %97 = vst.msk [vmem:[#allocation2 + $0x1e0] sm:$0xff] %vm35_vm0, %v10140_v0 }
  0x2a   :  { %98 = vst.msk [vmem:[#allocation2 + $0x1e8] sm:$0xff] %vm35_vm0, %v10140_v0 }
  0x2b   :  { %100 = vst.msk [vmem:[#allocation2 + $0x1f8] sm:$0xff] %vm35_vm0, %v10140_v0 }
  0x2c   :  { %101 = vst.msk [vmem:[#allocation2 + $0x200] sm:$0xff] %vm35_vm0, %v10140_v0 }
  0x2d   :  { %103 = vst.msk [vmem:[#allocation2 + $0x210] sm:$0xff] %vm35_vm0, %v10140_v0 }
  0x2e   :  { %104 = vst.msk [vmem:[#allocation2 + $0x218] sm:$0xff] %vm35_vm0, %v10140_v0 }
  0x2f   :  { %106 = vst.msk [vmem:[#allocation2 + $0x228] sm:$0xff] %vm35_vm0, %v10140_v0 }
  0x30   :  { %107 = vst.msk [vmem:[#allocation2 + $0x230] sm:$0xff] %vm35_vm0, %v10140_v0 }
  0x31   :  { %109 = vst.msk [vmem:[#allocation2 + $0x240] sm:$0xff] %vm35_vm0, %v10140_v0 }
  0x32   :  { %110 = vst.msk [vmem:[#allocation2 + $0x248] sm:$0xff] %vm35_vm0, %v10140_v0 }
  0x33   :  { %112 = vst.msk [vmem:[#allocation2 + $0x258] sm:$0xff] %vm35_vm0, %v10140_v0 }
  0x34   :  { %113 = vst.msk [vmem:[#allocation2 + $0x260] sm:$0xff] %vm35_vm0, %v10140_v0 }
  0x35   :  { %115 = vst.msk [vmem:[#allocation2 + $0x270] sm:$0xff] %vm35_vm0, %v10140_v0 }
  0x36   :  { %116 = vst.msk [vmem:[#allocation2 + $0x278] sm:$0xff] %vm35_vm0, %v10140_v0 }
  0x37   :  { %118 = vst.msk [vmem:[#allocation2 + $0x288] sm:$0xff] %vm35_vm0, %v10140_v0 }
  0x38   :  { %119 = vst.msk [vmem:[#allocation2 + $0x290] sm:$0xff] %vm35_vm0, %v10140_v0 }
  0x39   :  { %121 = vst.msk [vmem:[#allocation2 + $0x2a0] sm:$0xff] %vm35_vm0, %v10140_v0 }
  0x3a   :  { %122 = vst.msk [vmem:[#allocation2 + $0x2a8] sm:$0xff] %vm35_vm0, %v10140_v0 }
  0x3b   :  { %124 = vst.msk [vmem:[#allocation2 + $0x2b8] sm:$0xff] %vm35_vm0, %v10140_v0 }
  0x3c   :  { %125 = vst.msk [vmem:[#allocation2 + $0x2c0] sm:$0xff] %vm35_vm0, %v10140_v0 }
  0x3d   :  { %127 = vst.msk [vmem:[#allocation2 + $0x2d0] sm:$0xff] %vm35_vm0, %v10140_v0 }
  0x3e   :  { %128 = vst.msk [vmem:[#allocation2 + $0x2d8] sm:$0xff] %vm35_vm0, %v10140_v0 }
  0x3f   :  { %130 = vst.msk [vmem:[#allocation2 + $0x2e8] sm:$0xff] %vm35_vm0, %v10140_v0 }
  0x40   :  { %131 = vst.msk [vmem:[#allocation2 + $0x2f0] sm:$0xff] %vm35_vm0, %v10140_v0 }
  0x41   :  { %133 = vst.msk [vmem:[#allocation2 + $0x300] sm:$0xff] %vm35_vm0, %v10140_v0 }
  0x42   :  { %134 = vst.msk [vmem:[#allocation2 + $0x308] sm:$0xff] %vm35_vm0, %v10140_v0 }
  0x43   :  { %136 = vst.msk [vmem:[#allocation2 + $0x318] sm:$0xff] %vm35_vm0, %v10140_v0 }
  0x44   :  { %137 = vst.msk [vmem:[#allocation2 + $0x320] sm:$0xff] %vm35_vm0, %v10140_v0 }
  0x45   :  { %139 = vst.msk [vmem:[#allocation2 + $0x330] sm:$0xff] %vm35_vm0, %v10140_v0 }
  0x46   :  { %140 = vst.msk [vmem:[#allocation2 + $0x338] sm:$0xff] %vm35_vm0, %v10140_v0 }
  0x47   :  { %142 = vst.msk [vmem:[#allocation2 + $0x348] sm:$0xff] %vm35_vm0, %v10140_v0 }
  0x48   :  { %143 = vst.msk [vmem:[#allocation2 + $0x350] sm:$0xff] %vm35_vm0, %v10140_v0 }
  0x49   :  { %212 = vst.msk [vmem:[#allocation2 + $0x31] sm:$0xff] %vm35_vm0, %v147_v2 }
  0x4a   :  { %210 = vst.msk [vmem:[#allocation2 + $0x19] sm:$0xff] %vm35_vm0, %v145_v3  ;;  %v182_v3 = vld [vmem:[%s10129_s0 + $0x128] sm:$0xff] }
  0x4b   :  { %39 = vst.msk [vmem:[#allocation2 + $0x10] sm:$0x3] %vm38_vm1, %v10140_v0 }
  0x4c   :  { %42 = vst.msk [vmem:[#allocation2 + $0x28] sm:$0x3] %vm38_vm1, %v10140_v0 }
  0x4d   :  { %45 = vst.msk [vmem:[#allocation2 + $0x40] sm:$0x3] %vm38_vm1, %v10140_v0 }
  0x4e   :  { %48 = vst.msk [vmem:[#allocation2 + $0x58] sm:$0x3] %vm38_vm1, %v10140_v0 }
  0x4f   :  { %51 = vst.msk [vmem:[#allocation2 + $0x70] sm:$0x3] %vm38_vm1, %v10140_v0 }
  0x50   :  { %v406_v4 = vld [vmem:[#allocation2 + $0x31] sm:$0xff]  ;;  %54 = vst.msk [vmem:[#allocation2 + $0x88] sm:$0x3] %vm38_vm1, %v10140_v0 }
  0x51   :  { %538 = vrot.lane.b32.xlu2 %v406_v4, %s6262_s13  ;;  %v404_v5 = vld [vmem:[#allocation2 + $0x19] sm:$0xff]  ;;  %57 = vst.msk [vmem:[#allocation2 + $0xa0] sm:$0x3] %vm38_vm1, %v10140_v0  ;;  %v278_v61 = vld [vmem:[#allocation2 + $0x30] sm:$0xff] }
  0x52   :  { %534 = vrot.lane.b32.xlu1 %v404_v5, %s6262_s13  ;;  %v403_v6 = vld [vmem:[#allocation2 + $0x9] sm:$0xff]  ;;  %60 = vst.msk [vmem:[#allocation2 + $0xb8] sm:$0x3] %vm38_vm1, %v10140_v0 }
  0x53   :  { %532 = vrot.lane.b32.xlu0 %v403_v6, %s6262_s13  ;;  %63 = vst.msk [vmem:[#allocation2 + $0xd0] sm:$0x3] %vm38_vm1, %v10140_v0  ;;  %v184_v4 = vld [vmem:[%s10129_s0 + $0x138] sm:$0xff]  ;;  %v183_v5 = vld [vmem:[%s10129_s0 + $0x130] sm:$0xff] }
  0x54   :  { %66 = vst.msk [vmem:[#allocation2 + $0xe8] sm:$0x3] %vm38_vm1, %v10140_v0 }
  0x55   :  { %69 = vst.msk [vmem:[#allocation2 + $0x100] sm:$0x3] %vm38_vm1, %v10140_v0 }
  0x56   :  { %72 = vst.msk [vmem:[#allocation2 + $0x118] sm:$0x3] %vm38_vm1, %v10140_v0 }
  0x57   :  { %75 = vst.msk [vmem:[#allocation2 + $0x130] sm:$0x3] %vm38_vm1, %v10140_v0 }
  0x58   :  { %78 = vst.msk [vmem:[#allocation2 + $0x148] sm:$0x3] %vm38_vm1, %v10140_v0 }
  0x59   :  { %81 = vst.msk [vmem:[#allocation2 + $0x160] sm:$0x3] %vm38_vm1, %v10140_v0 }
  0x5a   :  { %84 = vst.msk [vmem:[#allocation2 + $0x178] sm:$0x3] %vm38_vm1, %v10140_v0 }
  0x5b   :  { %87 = vst.msk [vmem:[#allocation2 + $0x190] sm:$0x3] %vm38_vm1, %v10140_v0 }
  0x5c   :  { %90 = vst.msk [vmem:[#allocation2 + $0x1a8] sm:$0x3] %vm38_vm1, %v10140_v0 }
  0x5d   :  { %93 = vst.msk [vmem:[#allocation2 + $0x1c0] sm:$0x3] %vm38_vm1, %v10140_v0 }
  0x5e   :  { %96 = vst.msk [vmem:[#allocation2 + $0x1d8] sm:$0x3] %vm38_vm1, %v10140_v0 }
  0x5f   :  { %99 = vst.msk [vmem:[#allocation2 + $0x1f0] sm:$0x3] %vm38_vm1, %v10140_v0 }
  0x60   :  { %102 = vst.msk [vmem:[#allocation2 + $0x208] sm:$0x3] %vm38_vm1, %v10140_v0 }
  0x61   :  { %105 = vst.msk [vmem:[#allocation2 + $0x220] sm:$0x3] %vm38_vm1, %v10140_v0 }
  0x62   :  { %108 = vst.msk [vmem:[#allocation2 + $0x238] sm:$0x3] %vm38_vm1, %v10140_v0 }
  0x63   :  { %111 = vst.msk [vmem:[#allocation2 + $0x250] sm:$0x3] %vm38_vm1, %v10140_v0 }
  0x64   :  { %114 = vst.msk [vmem:[#allocation2 + $0x268] sm:$0x3] %vm38_vm1, %v10140_v0 }
  0x65   :  { %117 = vst.msk [vmem:[#allocation2 + $0x280] sm:$0x3] %vm38_vm1, %v10140_v0 }
  0x66   :  { %120 = vst.msk [vmem:[#allocation2 + $0x298] sm:$0x3] %vm38_vm1, %v10140_v0 }
  0x67   :  { %123 = vst.msk [vmem:[#allocation2 + $0x2b0] sm:$0x3] %vm38_vm1, %v10140_v0 }
  0x68   :  { %126 = vst.msk [vmem:[#allocation2 + $0x2c8] sm:$0x3] %vm38_vm1, %v10140_v0 }
  0x69   :  { %129 = vst.msk [vmem:[#allocation2 + $0x2e0] sm:$0x3] %vm38_vm1, %v10140_v0 }
  0x6a   :  { %132 = vst.msk [vmem:[#allocation2 + $0x2f8] sm:$0x3] %vm38_vm1, %v10140_v0 }
  0x6b   :  { %135 = vst.msk [vmem:[#allocation2 + $0x310] sm:$0x3] %vm38_vm1, %v10140_v0 }
  0x6c   :  { %138 = vst.msk [vmem:[#allocation2 + $0x328] sm:$0x3] %vm38_vm1, %v10140_v0 }
  0x6d   :  { %141 = vst.msk [vmem:[#allocation2 + $0x340] sm:$0x3] %vm38_vm1, %v10140_v0 }
  0x6e   :  { %144 = vst.msk [vmem:[#allocation2 + $0x358] sm:$0x3] %vm38_vm1, %v10140_v0  ;;  %vm4213_vm1 = vcmask 260102  }
  0x6f   :  { %213 = vst.msk [vmem:[#allocation2 + $0x39] sm:$0xff] %vm35_vm0, %v148_v7 }
  0x70   :  { %211 = vst.msk [vmem:[#allocation2 + $0x21] sm:$0xff] %vm35_vm0, %v146_v8 }
  0x71   :  { %214 = vst.msk [vmem:[#allocation2 + $0x49] sm:$0xff] %vm35_vm0, %v149_v9 }
  0x72   :  { %216 = vst.msk [vmem:[#allocation2 + $0x61] sm:$0xff] %vm35_vm0, %v151_v10  ;;  %v185_v10 = vld [vmem:[%s10129_s0 + $0x140] sm:$0xff] }
  0x73   :  { %215 = vst.msk [vmem:[#allocation2 + $0x51] sm:$0xff] %vm35_vm0, %v150_v11  ;;  %v187_v11 = vld [vmem:[%s10129_s0 + $0x150] sm:$0xff] }
  0x74   :  { %217 = vst.msk [vmem:[#allocation2 + $0x69] sm:$0xff] %vm35_vm0, %v152_v12  ;;  %v186_v12 = vld [vmem:[%s10129_s0 + $0x148] sm:$0xff] }
  0x75   :  { %219 = vst.msk [vmem:[#allocation2 + $0x81] sm:$0xff] %vm35_vm0, %v154_v13 }
  0x76   :  { %v407_v17 = vld [vmem:[#allocation2 + $0x39] sm:$0xff]  ;;  %218 = vst.msk [vmem:[#allocation2 + $0x79] sm:$0xff] %vm35_vm0, %v153_v14  ;;  %v434_v14 = vld [vmem:[#allocation2 + $0x1b1] sm:$0xff] }
  0x77   :  { %540 = vrot.lane.b32.xlu2 %v407_v17, %s6262_s13  ;;  %v405_v19 = vld [vmem:[#allocation2 + $0x21] sm:$0xff]  ;;  %220 = vst.msk [vmem:[#allocation2 + $0x91] sm:$0xff] %vm35_vm0, %v155_v15  ;;  %v279_v6 = vld [vmem:[#allocation2 + $0x38] sm:$0xff]  ;;  %v188_v17 = vld [vmem:[%s10129_s0 + $0x158] sm:$0xff] }
  0x78   :  { %536 = vrot.lane.b32.xlu1 %v405_v19, %s6262_s13  ;;  %v408_v21 = vld [vmem:[#allocation2 + $0x49] sm:$0xff]  ;;  %222 = vst.msk [vmem:[#allocation2 + $0xa9] sm:$0xff] %vm35_vm0, %v157_v16  ;;  %v435_v16 = vld [vmem:[#allocation2 + $0x1b9] sm:$0xff] }
  0x79   :  { %542 = vrot.lane.b32.xlu0 %v408_v21, %s6262_s13  ;;  %221 = vst.msk [vmem:[#allocation2 + $0x99] sm:$0xff] %vm35_vm0, %v156_v18  ;;  %v410_v26 = vld [vmem:[#allocation2 + $0x61] sm:$0xff] }
  0x7a   :  { %223 = vst.msk [vmem:[#allocation2 + $0xb1] sm:$0xff] %vm35_vm0, %v158_v20  ;;  %v409_v28 = vld [vmem:[#allocation2 + $0x51] sm:$0xff]  ;;  %v282_v13 = vld [vmem:[#allocation2 + $0x60] sm:$0xff] }
  0x7b   :  { %225 = vst.msk [vmem:[#allocation2 + $0xc9] sm:$0xff] %vm35_vm0, %v160_v22  ;;  %v411_v29 = vld [vmem:[#allocation2 + $0x69] sm:$0xff]  ;;  %v190_v18 = vld [vmem:[%s10129_s0 + $0x168] sm:$0xff]  ;;  %v6757_v22 = vld [vmem:[#allocation2 + $0x18] sm:$0xff] }
  0x7c   :  { %224 = vst.msk [vmem:[#allocation2 + $0xc1] sm:$0xff] %vm35_vm0, %v159_v23  ;;  %v413_v33 = vld [vmem:[#allocation2 + $0x81] sm:$0xff]  ;;  %v531_v19 = vpop.permute.xlu0 %530  ;;  %v189_v23 = vld [vmem:[%s10129_s0 + $0x160] sm:$0xff] }
  0x7d   :  { %226 = vst.msk [vmem:[#allocation2 + $0xd9] sm:$0xff] %vm35_vm0, %v161_v24  ;;  %v412_v34 = vld [vmem:[#allocation2 + $0x79] sm:$0xff] }
  0x7e   :  { %228 = vst.msk [vmem:[#allocation2 + $0xf1] sm:$0xff] %vm35_vm0, %v163_v25  ;;  %v414_v35 = vld [vmem:[#allocation2 + $0x91] sm:$0xff]  ;;  %v274_v20 = vld [vmem:[#allocation2] sm:$0xff] }
  0x7f   :  { %546 = vrot.lane.b32.xlu2 %v410_v26, %s6262_s13  ;;  %227 = vst.msk [vmem:[#allocation2 + $0xe1] sm:$0xff] %vm35_vm0, %v162_v27  ;;  %v416_v39 = vld [vmem:[#allocation2 + $0xa9] sm:$0xff]  ;;  %v285_v21 = vld [vmem:[#allocation2 + $0x80] sm:$0xff] }
  0x80   :  { %544 = vrot.lane.b32.xlu1 %v409_v28, %s6262_s13  ;;  %229 = vst.msk [vmem:[#allocation2 + $0xf9] sm:$0xff] %vm35_vm0, %v164_v30  ;;  %v415_v40 = vld [vmem:[#allocation2 + $0x99] sm:$0xff]  ;;  %v191_v28 = vld [vmem:[%s10129_s0 + $0x170] sm:$0xff] }
  0x81   :  { %548 = vrot.lane.b32.xlu0 %v411_v29, %s6262_s13  ;;  %231 = vst.msk [vmem:[#allocation2 + $0x111] sm:$0xff] %vm35_vm0, %v166_v31  ;;  %v417_v41 = vld [vmem:[#allocation2 + $0xb1] sm:$0xff]  ;;  %v275_v30 = vld [vmem:[#allocation2 + $0x8] sm:$0xff] }
  0x82   :  { %230 = vst.msk [vmem:[#allocation2 + $0x109] sm:$0xff] %vm35_vm0, %v165_v32  ;;  %v419_v45 = vld [vmem:[#allocation2 + $0xc9] sm:$0xff]  ;;  %v193_v29 = vld [vmem:[%s10129_s0 + $0x180] sm:$0xff] }
  0x83   :  { %232 = vst.msk [vmem:[#allocation2 + $0x121] sm:$0xff] %vm35_vm0, %v167_v36  ;;  %v418_v46 = vld [vmem:[#allocation2 + $0xc1] sm:$0xff] }
  0x84   :  { %234 = vst.msk [vmem:[#allocation2 + $0x139] sm:$0xff] %vm35_vm0, %v169_v37  ;;  %v420_v47 = vld [vmem:[#allocation2 + $0xd9] sm:$0xff]  ;;  %v288_v32 = vld [vmem:[#allocation2 + $0xa8] sm:$0xff] }
  0x85   :  { %233 = vst.msk [vmem:[#allocation2 + $0x129] sm:$0xff] %vm35_vm0, %v168_v38  ;;  %v422_v50 = vld [vmem:[#allocation2 + $0xf1] sm:$0xff]  ;;  %v194_v38 = vld [vmem:[%s10129_s0 + $0x188] sm:$0xff] }
  0x86   :  { %235 = vst.msk [vmem:[#allocation2 + $0x141] sm:$0xff] %vm35_vm0, %v170_v42  ;;  %v421_v51 = vld [vmem:[#allocation2 + $0xe1] sm:$0xff] }
  0x87   :  { %552 = vrot.lane.b32.xlu2 %v413_v33, %s6262_s13  ;;  %237 = vst.msk [vmem:[#allocation2 + $0x159] sm:$0xff] %vm35_vm0, %v172_v43  ;;  %v423_v52 = vld [vmem:[#allocation2 + $0xf9] sm:$0xff]  ;;  %v6807_v43 = vld [vmem:[#allocation2 + $0x50] sm:$0xff] }
  0x88   :  { %550 = vrot.lane.b32.xlu1 %v412_v34, %s6262_s13  ;;  %236 = vst.msk [vmem:[#allocation2 + $0x151] sm:$0xff] %vm35_vm0, %v171_v44  ;;  %v425_v55 = vld [vmem:[#allocation2 + $0x111] sm:$0xff]  ;;  %v6780_v33 = vld [vmem:[#allocation2 + $0x20] sm:$0xff]  ;;  %v195_v44 = vld [vmem:[%s10129_s0 + $0x190] sm:$0xff] }
  0x89   :  { %554 = vrot.lane.b32.xlu0 %v414_v35, %s6262_s13  ;;  %238 = vst.msk [vmem:[#allocation2 + $0x169] sm:$0xff] %vm35_vm0, %v173_v48  ;;  %v424_v56 = vld [vmem:[#allocation2 + $0x109] sm:$0xff]  ;;  %v197_v48 = vld [vmem:[%s10129_s0 + $0x1a0] sm:$0xff] }
  0x8a   :  { %239 = vst.msk [vmem:[#allocation2 + $0x171] sm:$0xff] %vm35_vm0, %v174_v49  ;;  %v426_v57 = vld [vmem:[#allocation2 + $0x121] sm:$0xff]  ;;  %v192_v34 = vld [vmem:[%s10129_s0 + $0x178] sm:$0xff] }
  0x8b   :  { %243 = vst.msk [vmem:[#allocation2 + $0x1d1] sm:$0xff] %vm35_vm0, %v178_v53  ;;  %v428_v63 = vld [vmem:[#allocation2 + $0x139] sm:$0xff]  ;;  %v199_v49 = vld [vmem:[%s10129_s0 + $0x1b0] sm:$0xff] }
  0x8c   :  { %242 = vst.msk [vmem:[#allocation2 + $0x1c9] sm:$0xff] %vm35_vm0, %v177_v54  ;;  %v427_v1 = vld [vmem:[#allocation2 + $0x129] sm:$0xff]  ;;  %v6835_v53 = vld [vmem:[#allocation2 + $0x78] sm:$0xff]  ;;  %v198_v54 = vld [vmem:[%s10129_s0 + $0x1a8] sm:$0xff] }
  0x8d   :  { %244 = vst.msk [vmem:[#allocation2 + $0x1e1] sm:$0xff] %vm35_vm0, %v179_v58  ;;  %v429_v2 = vld [vmem:[#allocation2 + $0x141] sm:$0xff]  ;;  %v200_v58 = vld [vmem:[%s10129_s0 + $0x1b8] sm:$0xff] }
  0x8e   :  { %246 = vst.msk [vmem:[#allocation2 + $0x1f9] sm:$0xff] %vm35_vm0, %v181_v59  ;;  %v431_v7 = vld [vmem:[#allocation2 + $0x159] sm:$0xff] }
  0x8f   :  { %558 = vrot.lane.b32.xlu2 %v416_v39, %s6262_s13  ;;  %342 = vst.msk [vmem:[#allocation3 + $0x20] sm:$0xff] %vm35_vm0, %v278_v61  ;;  %v430_v8 = vld [vmem:[#allocation2 + $0x151] sm:$0xff]  ;;  %v202_v59 = vld [vmem:[%s10129_s0 + $0x1c8] sm:$0xff] }
  0x90   :  { %556 = vrot.lane.b32.xlu1 %v415_v40, %s6262_s13  ;;  %245 = vst.msk [vmem:[#allocation2 + $0x1e9] sm:$0xff] %vm35_vm0, %v180_v60  ;;  %v432_v9 = vld [vmem:[#allocation2 + $0x169] sm:$0xff] }
  0x91   :  { %560 = vrot.lane.b32.xlu0 %v417_v41, %s6262_s13  ;;  %247 = vst.msk [vmem:[#allocation2 + $0x201] sm:$0xff] %vm35_vm0, %v182_v3  ;;  %v433_v15 = vld [vmem:[#allocation2 + $0x171] sm:$0xff]  ;;  %v6798_v40 = vld [vmem:[#allocation2 + $0x48] sm:$0xff] }
  0x92   :  { %249 = vst.msk [vmem:[#allocation2 + $0x219] sm:$0xff] %vm35_vm0, %v184_v4  ;;  %v437_v24 = vld [vmem:[#allocation2 + $0x1d1] sm:$0xff]  ;;  %v6800_v41 = vld [vmem:[#allocation2 + $0xc8] sm:$0xff] }
  0x93   :  { %248 = vst.msk [vmem:[#allocation2 + $0x211] sm:$0xff] %vm35_vm0, %v183_v5  ;;  %v436_v26 = vld [vmem:[#allocation2 + $0x1c9] sm:$0xff] }
  0x94   :  { %343 = vst.msk [vmem:[#allocation3 + $0x28] sm:$0xff] %vm35_vm0, %v279_v6  ;;  %v438_v27 = vld [vmem:[#allocation2 + $0x1e1] sm:$0xff]  ;;  %v196_v39 = vld [vmem:[%s10129_s0 + $0x198] sm:$0xff]  ;;  %v205_v6 = vld [vmem:[%s10129_s0 + $0x1e0] sm:$0xff] }
  0x95   :  { %250 = vst.msk [vmem:[#allocation2 + $0x229] sm:$0xff] %vm35_vm0, %v185_v10  ;;  %v440_v35 = vld [vmem:[#allocation2 + $0x1f9] sm:$0xff]  ;;  %v6854_v60 = vld [vmem:[#allocation2 + $0x90] sm:$0xff]  ;;  %v203_v5 = vld [vmem:[%s10129_s0 + $0x1d0] sm:$0xff] }
  0x96   :  { %252 = vst.msk [vmem:[#allocation2 + $0x241] sm:$0xff] %vm35_vm0, %v187_v11  ;;  %v6856_v61 = vld [vmem:[#allocation2 + $0x110] sm:$0xff]  ;;  %v6889_v10 = vld [vmem:[#allocation2 + $0x138] sm:$0xff] }
  0x97   :  { %564 = vrot.lane.b32.xlu2 %v419_v45, %s6262_s13  ;;  %346 = vst.msk [vmem:[#allocation3 + $0x40] sm:$0xff] %vm35_vm0, %v282_v13  ;;  %v439_v36 = vld [vmem:[#allocation2 + $0x1e9] sm:$0xff] }
  0x98   :  { %562 = vrot.lane.b32.xlu1 %v418_v46, %s6262_s13  ;;  %251 = vst.msk [vmem:[#allocation2 + $0x231] sm:$0xff] %vm35_vm0, %v186_v12  ;;  %v441_v37 = vld [vmem:[#allocation2 + $0x201] sm:$0xff] }
  0x99   :  { %566 = vrot.lane.b32.xlu0 %v420_v47, %s6262_s13  ;;  %253 = vst.msk [vmem:[#allocation2 + $0x249] sm:$0xff] %vm35_vm0, %v188_v17  ;;  %v443_v45 = vld [vmem:[#allocation2 + $0x219] sm:$0xff] }
  0x9a   :  { %255 = vst.msk [vmem:[#allocation2 + $0x261] sm:$0xff] %vm35_vm0, %v190_v18  ;;  %v442_v46 = vld [vmem:[#allocation2 + $0x211] sm:$0xff]  ;;  %v6892_v12 = vld [vmem:[#allocation2 + $0xc0] sm:$0xff] }
  0x9b   :  { %338 = vst.msk [vmem:[#allocation3] sm:$0xff] %vm35_vm0, %v274_v20  ;;  %v206_v17 = vld [vmem:[%s10129_s0 + $0x1e8] sm:$0xff]  ;;  %v6908_v18 = vld [vmem:[#allocation2 + $0xd8] sm:$0xff] }
  0x9c   :  { %723 = vst.msk [vmem:[#allocation3] sm:$0xff] %vm722_vm2, %v531_v19  ;;  %v444_v47 = vld [vmem:[#allocation2 + $0x229] sm:$0xff]  ;;  %v825_v0 = vld [vmem:[#allocation2 + $0x1fa] sm:$0xff] }
  0x9d   :  { %349 = vst.msk [vmem:[#allocation3 + $0x58] sm:$0xff] %vm35_vm0, %v285_v21  ;;  %v6915_v21 = vld [vmem:[#allocation2 + $0x158] sm:$0xff] }
  0x9e   :  { %340 = vst.msk [vmem:[#allocation3 + $0x10] sm:$0xff] %vm35_vm0, %v6757_v22 }
  0x9f   :  { %570 = vrot.lane.b32.xlu2 %v422_v50, %s6262_s13  ;;  %254 = vst.msk [vmem:[#allocation2 + $0x259] sm:$0xff] %vm35_vm0, %v189_v23  ;;  %v6826_v50 = vld [vmem:[#allocation2 + $0x68] sm:$0xff] }
  0xa0   :  { %568 = vrot.lane.b32.xlu1 %v421_v51, %s6262_s13  ;;  %256 = vst.msk [vmem:[#allocation2 + $0x271] sm:$0xff] %vm35_vm0, %v191_v28  ;;  %v6828_v51 = vld [vmem:[#allocation2 + $0xf0] sm:$0xff]  ;;  %v6927_v28 = vld [vmem:[#allocation2 + $0xf8] sm:$0xff] }
  0xa1   :  { %572 = vrot.lane.b32.xlu0 %v423_v52, %s6262_s13  ;;  %258 = vst.msk [vmem:[#allocation2 + $0x289] sm:$0xff] %vm35_vm0, %v193_v29 }
  0xa2   :  { %339 = vst.msk [vmem:[#allocation3 + $0x8] sm:$0xff] %vm35_vm0, %v275_v30 }
  0xa3   :  { %352 = vst.msk [vmem:[#allocation3 + $0x70] sm:$0xff] %vm35_vm0, %v288_v32 }
  0xa4   :  { %341 = vst.msk [vmem:[#allocation3 + $0x18] sm:$0xff] %vm35_vm0, %v6780_v33 }
  0xa5   :  { %257 = vst.msk [vmem:[#allocation2 + $0x279] sm:$0xff] %vm35_vm0, %v192_v34  ;;  %v6934_v34 = vld [vmem:[#allocation2 + $0x108] sm:$0xff] }
  0xa6   :  { %259 = vst.msk [vmem:[#allocation2 + $0x291] sm:$0xff] %vm35_vm0, %v194_v38  ;;  %v448_v3 = vld [vmem:[#allocation2 + $0x259] sm:$0xff] }
  0xa7   :  { %576 = vrot.lane.b32.xlu2 %v425_v55, %s6262_s13  ;;  %261 = vst.msk [vmem:[#allocation2 + $0x2a9] sm:$0xff] %vm35_vm0, %v196_v39  ;;  %v446_v55 = vld [vmem:[#allocation2 + $0x241] sm:$0xff]  ;;  %v450_v4 = vld [vmem:[#allocation2 + $0x271] sm:$0xff] }
  0xa8   :  { %574 = vrot.lane.b32.xlu1 %v424_v56, %s6262_s13  ;;  %344 = vst.msk [vmem:[#allocation3 + $0x30] sm:$0xff] %vm35_vm0, %v6798_v40  ;;  %v445_v56 = vld [vmem:[#allocation2 + $0x231] sm:$0xff]  ;;  %v452_v13 = vld [vmem:[#allocation2 + $0x289] sm:$0xff]  ;;  %v6942_v38 = vld [vmem:[#allocation2 + $0x120] sm:$0xff] }
  0xa9   :  { %578 = vrot.lane.b32.xlu0 %v426_v57, %s6262_s13  ;;  %355 = vst.msk [vmem:[#allocation3 + $0x88] sm:$0xff] %vm35_vm0, %v6800_v41  ;;  %v447_v57 = vld [vmem:[#allocation2 + $0x249] sm:$0xff] }
  0xaa   :  { %345 = vst.msk [vmem:[#allocation3 + $0x38] sm:$0xff] %vm35_vm0, %v6807_v43 }
  0xab   :  { %v539_v62 = vpop.permute.xlu2 %538  ;;  %260 = vst.msk [vmem:[#allocation2 + $0x2a1] sm:$0xff] %vm35_vm0, %v195_v44  ;;  %v6948_v44 = vld [vmem:[#allocation2 + $0x1d0] sm:$0xff] }
  0xac   :  { %727 = vst.msk [vmem:[#allocation3 + $0x20] sm:$0xff] %vm722_vm2, %v539_v62 }
  0xad   :  { %262 = vst.msk [vmem:[#allocation2 + $0x2b9] sm:$0xff] %vm35_vm0, %v197_v48 }
  0xae   :  { %264 = vst.msk [vmem:[#allocation2 + $0x2d1] sm:$0xff] %vm35_vm0, %v199_v49 }
  0xaf   :  { %582 = vrot.lane.b32.xlu2 %v428_v63, %s6262_s13  ;;  %347 = vst.msk [vmem:[#allocation3 + $0x48] sm:$0xff] %vm35_vm0, %v6826_v50  ;;  %v6863_v63 = vld [vmem:[#allocation2 + $0x98] sm:$0xff] }
  0xb0   :  { %580 = vrot.lane.b32.xlu1 %v427_v1, %s6262_s13  ;;  %358 = vst.msk [vmem:[#allocation3 + $0xa0] sm:$0xff] %vm35_vm0, %v6828_v51  ;;  %v201_v1 = vld [vmem:[%s10129_s0 + $0x1c0] sm:$0xff] }
  0xb1   :  { %584 = vrot.lane.b32.xlu0 %v429_v2, %s6262_s13  ;;  %348 = vst.msk [vmem:[#allocation3 + $0x50] sm:$0xff] %vm35_vm0, %v6835_v53  ;;  %v449_v2 = vld [vmem:[#allocation2 + $0x261] sm:$0xff] }
  0xb2   :  { %263 = vst.msk [vmem:[#allocation2 + $0x2c1] sm:$0xff] %vm35_vm0, %v198_v54 }
  0xb3   :  { %265 = vst.msk [vmem:[#allocation2 + $0x2d9] sm:$0xff] %vm35_vm0, %v200_v58  ;;  %v6969_v58 = vld [vmem:[#allocation2 + $0x150] sm:$0xff] }
  0xb4   :  { %267 = vst.msk [vmem:[#allocation2 + $0x2f1] sm:$0xff] %vm35_vm0, %v202_v59 }
  0xb5   :  { %350 = vst.msk [vmem:[#allocation3 + $0x60] sm:$0xff] %vm35_vm0, %v6854_v60 }
  0xb6   :  { %361 = vst.msk [vmem:[#allocation3 + $0xb8] sm:$0xff] %vm35_vm0, %v6856_v61 }
  0xb7   :  { %588 = vrot.lane.b32.xlu2 %v431_v7, %s6262_s13  ;;  %351 = vst.msk [vmem:[#allocation3 + $0x68] sm:$0xff] %vm35_vm0, %v6863_v63  ;;  %v6882_v7 = vld [vmem:[#allocation2 + $0xb0] sm:$0xff] }
  0xb8   :  { %586 = vrot.lane.b32.xlu1 %v430_v8, %s6262_s13  ;;  %266 = vst.msk [vmem:[#allocation2 + $0x2e9] sm:$0xff] %vm35_vm0, %v201_v1 }
  0xb9   :  { %590 = vrot.lane.b32.xlu0 %v432_v9, %s6262_s13  ;;  %268 = vst.msk [vmem:[#allocation2 + $0x301] sm:$0xff] %vm35_vm0, %v203_v5  ;;  %v6984_v5 = vld [vmem:[#allocation2 + $0x218] sm:$0xff] }
  0xba   :  { %270 = vst.msk [vmem:[#allocation2 + $0x319] sm:$0xff] %vm35_vm0, %v205_v6 }
  0xbb   :  { %353 = vst.msk [vmem:[#allocation3 + $0x78] sm:$0xff] %vm35_vm0, %v6882_v7 }
  0xbc   :  { %364 = vst.msk [vmem:[#allocation3 + $0xd0] sm:$0xff] %vm35_vm0, %v6889_v10 }
  0xbd   :  { %354 = vst.msk [vmem:[#allocation3 + $0x80] sm:$0xff] %vm35_vm0, %v6892_v12 }
  0xbe   :  { %271 = vst.msk [vmem:[#allocation2 + $0x321] sm:$0xff] %vm35_vm0, %v206_v17  ;;  %v6999_v17 = vld [vmem:[#allocation2 + $0x240] sm:$0xff] }
  0xbf   :  { %594 = vrot.lane.b32.xlu2 %v434_v14, %s6262_s13  ;;  %v204_v14 = vld [vmem:[%s10129_s0 + $0x1d8] sm:$0xff]  ;;  %356 = vst.msk [vmem:[#allocation3 + $0x90] sm:$0xff] %vm35_vm0, %v6908_v18 }
  0xc0   :  { %592 = vrot.lane.b32.xlu1 %v433_v15, %s6262_s13  ;;  %v451_v15 = vld [vmem:[#allocation2 + $0x279] sm:$0xff]  ;;  %269 = vst.msk [vmem:[#allocation2 + $0x309] sm:$0xff] %vm35_vm0, %v204_v14  ;;  %v460_v48 = vld [vmem:[#allocation2 + $0x2e9] sm:$0xff]  ;;  %v462_v49 = vld [vmem:[#allocation2 + $0x301] sm:$0xff] }
  0xc1   :  { %596 = vrot.lane.b32.xlu0 %v435_v16, %s6262_s13  ;;  %v453_v16 = vld [vmem:[#allocation2 + $0x291] sm:$0xff]  ;;  %367 = vst.msk [vmem:[#allocation3 + $0xe8] sm:$0xff] %vm35_vm0, %v6915_v21  ;;  %v464_v59 = vld [vmem:[#allocation2 + $0x319] sm:$0xff] }
  0xc2   :  { %359 = vst.msk [vmem:[#allocation3 + $0xa8] sm:$0xff] %vm35_vm0, %v6927_v28  ;;  %v307_v14 = vld [vmem:[#allocation2 + $0x1b8] sm:$0xff] }
  0xc3   :  { %360 = vst.msk [vmem:[#allocation3 + $0xb0] sm:$0xff] %vm35_vm0, %v6934_v34 }
  0xc4   :  { %v535_v25 = vpop.permute.xlu1 %534  ;;  %362 = vst.msk [vmem:[#allocation3 + $0xc0] sm:$0xff] %vm35_vm0, %v6942_v38 }
  0xc5   :  { %725 = vst.msk [vmem:[#allocation3 + $0x10] sm:$0xff] %vm722_vm2, %v535_v25  ;;  %v533_v31 = vpop.permute.xlu0 %532  ;;  %v455_v25 = vld [vmem:[#allocation2 + $0x2a9] sm:$0xff]  ;;  %v465_v1 = vld [vmem:[#allocation2 + $0x321] sm:$0xff] }
  0xc6   :  { %724 = vst.msk [vmem:[#allocation3 + $0x8] sm:$0xff] %vm722_vm2, %v533_v31  ;;  %v306_v31 = vld [vmem:[#allocation2 + $0x1b0] sm:$0xff] }
  0xc7   :  { %600 = vrot.lane.b32.xlu2 %v437_v24, %s6262_s13  ;;  %v6918_v24 = vld [vmem:[#allocation2 + $0xe0] sm:$0xff]  ;;  %370 = vst.msk [vmem:[#allocation3 + $0x100] sm:$0xff] %vm35_vm0, %v306_v31 }
  0xc8   :  { %598 = vrot.lane.b32.xlu1 %v436_v26, %s6262_s13  ;;  %v454_v26 = vld [vmem:[#allocation2 + $0x2a1] sm:$0xff]  ;;  %357 = vst.msk [vmem:[#allocation3 + $0x98] sm:$0xff] %vm35_vm0, %v6918_v24 }
  0xc9   :  { %602 = vrot.lane.b32.xlu0 %v438_v27, %s6262_s13  ;;  %v456_v27 = vld [vmem:[#allocation2 + $0x2b9] sm:$0xff]  ;;  %373 = vst.msk [vmem:[#allocation3 + $0x118] sm:$0xff] %vm35_vm0, %v6948_v44 }
  0xca   :  { %366 = vst.msk [vmem:[#allocation3 + $0xe0] sm:$0xff] %vm35_vm0, %v6969_v58  ;;  %v7017_v31 = vld [vmem:[#allocation2 + $0x260] sm:$0xff] }
  0xcb   :  { %379 = vst.msk [vmem:[#allocation3 + $0x148] sm:$0xff] %vm35_vm0, %v6984_v5 }
  0xcc   :  { %371 = vst.msk [vmem:[#allocation3 + $0x108] sm:$0xff] %vm35_vm0, %v307_v14  ;;  %v801_v14 = vld [vmem:[#allocation2 + $0xaa] sm:$0xff] }
  0xcd   :  { %382 = vst.msk [vmem:[#allocation3 + $0x160] sm:$0xff] %vm35_vm0, %v6999_v17 }
  0xce   :  { %385 = vst.msk [vmem:[#allocation3 + $0x178] sm:$0xff] %vm35_vm0, %v7017_v31 }
  0xcf   :  { %606 = vrot.lane.b32.xlu2 %v440_v35, %s6262_s13  ;;  %v458_v35 = vld [vmem:[#allocation2 + $0x2d1] sm:$0xff] }
  0xd0   :  { %604 = vrot.lane.b32.xlu1 %v439_v36, %s6262_s13  ;;  %v457_v36 = vld [vmem:[#allocation2 + $0x2c1] sm:$0xff] }
  0xd1   :  { %v541_v42 = vpop.permute.xlu2 %540  ;;  %608 = vrot.lane.b32.xlu0 %v441_v37, %s6262_s13  ;;  %v459_v37 = vld [vmem:[#allocation2 + $0x2d9] sm:$0xff] }
  0xd2   :  { %728 = vst.msk [vmem:[#allocation3 + $0x28] sm:$0xff] %vm722_vm2, %v541_v42 }
  0xd7   :  { %612 = vrot.lane.b32.xlu2 %v443_v45, %s6262_s13 }
  0xd8   :  { %610 = vrot.lane.b32.xlu1 %v442_v46, %s6262_s13  ;;  %v6951_v46 = vld [vmem:[#allocation2 + $0x128] sm:$0xff] }
  0xd9   :  { %v547_v52 = vpop.permute.xlu2 %546  ;;  %614 = vrot.lane.b32.xlu0 %v444_v47, %s6262_s13  ;;  %v461_v47 = vld [vmem:[#allocation2 + $0x2f1] sm:$0xff]  ;;  %363 = vst.msk [vmem:[#allocation3 + $0xc8] sm:$0xff] %vm35_vm0, %v6951_v46 }
  0xda   :  { %731 = vst.msk [vmem:[#allocation3 + $0x40] sm:$0xff] %vm722_vm2, %v547_v52  ;;  %v6960_v52 = vld [vmem:[#allocation2 + $0x140] sm:$0xff] }
  0xdb   :  { %365 = vst.msk [vmem:[#allocation3 + $0xd8] sm:$0xff] %vm35_vm0, %v6960_v52 }
  0xdf   :  { %618 = vrot.lane.b32.xlu2 %v446_v55, %s6262_s13 }
  0xe0   :  { %616 = vrot.lane.b32.xlu1 %v445_v56, %s6262_s13  ;;  %v6966_v56 = vld [vmem:[#allocation2 + $0x1f8] sm:$0xff] }
  0xe1   :  { %v553_v62 = vpop.permute.xlu2 %552  ;;  %620 = vrot.lane.b32.xlu0 %v447_v57, %s6262_s13  ;;  %376 = vst.msk [vmem:[#allocation3 + $0x130] sm:$0xff] %vm35_vm0, %v6966_v56 }
  0xe2   :  { %734 = vst.msk [vmem:[#allocation3 + $0x58] sm:$0xff] %vm722_vm2, %v553_v62  ;;  %v463_v62 = vld [vmem:[#allocation2 + $0x309] sm:$0xff] }
  0xe7   :  { %624 = vrot.lane.b32.xlu2 %v449_v2, %s6262_s13  ;;  %v6978_v2 = vld [vmem:[#allocation2 + $0x168] sm:$0xff] }
  0xe8   :  { %622 = vrot.lane.b32.xlu1 %v448_v3, %s6262_s13  ;;  %368 = vst.msk [vmem:[#allocation3 + $0xf0] sm:$0xff] %vm35_vm0, %v6978_v2 }
  0xe9   :  { %v559_v8 = vpop.permute.xlu2 %558  ;;  %626 = vrot.lane.b32.xlu0 %v450_v4, %s6262_s13 }
  0xea   :  { %737 = vst.msk [vmem:[#allocation3 + $0x70] sm:$0xff] %vm722_vm2, %v559_v8  ;;  %v537_v9 = vpop.permute.xlu1 %536  ;;  %v6987_v8 = vld [vmem:[#allocation2 + $0x170] sm:$0xff] }
  0xeb   :  { %726 = vst.msk [vmem:[#allocation3 + $0x18] sm:$0xff] %vm722_vm2, %v537_v9  ;;  %v543_v11 = vpop.permute.xlu0 %542  ;;  %v788_v9 = vld [vmem:[#allocation2 + $0xa] sm:$0xff] }
  0xec   :  { %729 = vst.msk [vmem:[#allocation3 + $0x30] sm:$0xff] %vm722_vm2, %v543_v11  ;;  %v787_v11 = vld [vmem:[#allocation2 + $0x2] sm:$0xff] }
  0xed   :  { %369 = vst.msk [vmem:[#allocation3 + $0xf8] sm:$0xff] %vm35_vm0, %v6987_v8 }
  0xef   :  { %630 = vrot.lane.b32.xlu2 %v452_v13, %s6262_s13  ;;  %v789_v13 = vld [vmem:[#allocation2 + $0x1a] sm:$0xff] }
  0xf0   :  { %628 = vrot.lane.b32.xlu1 %v451_v15, %s6262_s13 }
  0xf1   :  { %v565_v19 = vpop.permute.xlu2 %564  ;;  %632 = vrot.lane.b32.xlu0 %v453_v16, %s6262_s13 }
  0xf2   :  { %740 = vst.msk [vmem:[#allocation3 + $0x88] sm:$0xff] %vm722_vm2, %v565_v19  ;;  %v545_v20 = vpop.permute.xlu1 %544 }
  0xf3   :  { %730 = vst.msk [vmem:[#allocation3 + $0x38] sm:$0xff] %vm722_vm2, %v545_v20  ;;  %v549_v23 = vpop.permute.xlu0 %548  ;;  %v7002_v20 = vld [vmem:[#allocation2 + $0x1c8] sm:$0xff] }
  0xf4   :  { %732 = vst.msk [vmem:[#allocation3 + $0x48] sm:$0xff] %vm722_vm2, %v549_v23  ;;  %v791_v23 = vld [vmem:[#allocation2 + $0x32] sm:$0xff] }
  0xf5   :  { %372 = vst.msk [vmem:[#allocation3 + $0x110] sm:$0xff] %vm35_vm0, %v7002_v20 }
  0xf7   :  { %636 = vrot.lane.b32.xlu2 %v455_v25, %s6262_s13  ;;  %v790_v25 = vld [vmem:[#allocation2 + $0x22] sm:$0xff] }
  0xf8   :  { %634 = vrot.lane.b32.xlu1 %v454_v26, %s6262_s13  ;;  %v792_v26 = vld [vmem:[#allocation2 + $0x3a] sm:$0xff] }
  0xf9   :  { %v571_v29 = vpop.permute.xlu2 %570  ;;  %638 = vrot.lane.b32.xlu0 %v456_v27, %s6262_s13  ;;  %v7011_v27 = vld [vmem:[#allocation2 + $0x1e0] sm:$0xff] }
  0xfa   :  { %743 = vst.msk [vmem:[#allocation3 + $0xa0] sm:$0xff] %vm722_vm2, %v571_v29  ;;  %v551_v30 = vpop.permute.xlu1 %550 }
  0xfb   :  { %733 = vst.msk [vmem:[#allocation3 + $0x50] sm:$0xff] %vm722_vm2, %v551_v30  ;;  %v555_v32 = vpop.permute.xlu0 %554 }
  0xfc   :  { %735 = vst.msk [vmem:[#allocation3 + $0x60] sm:$0xff] %vm722_vm2, %v555_v32 }
  0xfd   :  { %374 = vst.msk [vmem:[#allocation3 + $0x120] sm:$0xff] %vm35_vm0, %v7011_v27 }
  0xff   :  { %642 = vrot.lane.b32.xlu2 %v458_v35, %s6262_s13  ;;  %v7020_v35 = vld [vmem:[#allocation2 + $0x1e8] sm:$0xff] }
 0x100   :  { %640 = vrot.lane.b32.xlu1 %v457_v36, %s6262_s13  ;;  %v794_v36 = vld [vmem:[#allocation2 + $0x52] sm:$0xff]  ;;  %375 = vst.msk [vmem:[#allocation3 + $0x128] sm:$0xff] %vm35_vm0, %v7020_v35 }
 0x101   :  { %v577_v39 = vpop.permute.xlu2 %576  ;;  %644 = vrot.lane.b32.xlu0 %v459_v37, %s6262_s13  ;;  %v793_v37 = vld [vmem:[#allocation2 + $0x4a] sm:$0xff] }
 0x102   :  { %746 = vst.msk [vmem:[#allocation3 + $0xb8] sm:$0xff] %vm722_vm2, %v577_v39  ;;  %v557_v42 = vpop.permute.xlu1 %556  ;;  %v795_v39 = vld [vmem:[#allocation2 + $0x62] sm:$0xff] }
 0x103   :  { %736 = vst.msk [vmem:[#allocation3 + $0x68] sm:$0xff] %vm722_vm2, %v557_v42  ;;  %v561_v45 = vpop.permute.xlu0 %560  ;;  %v7029_v42 = vld [vmem:[#allocation2 + $0x200] sm:$0xff] }
 0x104   :  { %738 = vst.msk [vmem:[#allocation3 + $0x78] sm:$0xff] %vm722_vm2, %v561_v45 }
 0x105   :  { %377 = vst.msk [vmem:[#allocation3 + $0x138] sm:$0xff] %vm35_vm0, %v7029_v42 }
 0x107   :  { %648 = vrot.lane.b32.xlu2 %v461_v47, %s6262_s13 }
 0x108   :  { %646 = vrot.lane.b32.xlu1 %v460_v48, %s6262_s13  ;;  %v7035_v48 = vld [vmem:[#allocation2 + $0x288] sm:$0xff] }
 0x109   :  { %v583_v54 = vpop.permute.xlu2 %582  ;;  %650 = vrot.lane.b32.xlu0 %v462_v49, %s6262_s13  ;;  %388 = vst.msk [vmem:[#allocation3 + $0x190] sm:$0xff] %vm35_vm0, %v7035_v48 }
 0x10a   :  { %749 = vst.msk [vmem:[#allocation3 + $0xd0] sm:$0xff] %vm722_vm2, %v583_v54  ;;  %v563_v55 = vpop.permute.xlu1 %562  ;;  %v7038_v54 = vld [vmem:[#allocation2 + $0x210] sm:$0xff] }
 0x10b   :  { %739 = vst.msk [vmem:[#allocation3 + $0x80] sm:$0xff] %vm722_vm2, %v563_v55  ;;  %v567_v57 = vpop.permute.xlu0 %566  ;;  %v797_v55 = vld [vmem:[#allocation2 + $0x7a] sm:$0xff] }
 0x10c   :  { %741 = vst.msk [vmem:[#allocation3 + $0x90] sm:$0xff] %vm722_vm2, %v567_v57  ;;  %v796_v57 = vld [vmem:[#allocation2 + $0x6a] sm:$0xff] }
 0x10d   :  { %378 = vst.msk [vmem:[#allocation3 + $0x140] sm:$0xff] %vm35_vm0, %v7038_v54 }
 0x10f   :  { %654 = vrot.lane.b32.xlu2 %v464_v59, %s6262_s13  ;;  %v798_v59 = vld [vmem:[#allocation2 + $0x82] sm:$0xff] }
 0x110   :  { %652 = vrot.lane.b32.xlu1 %v463_v62, %s6262_s13  ;;  %v7047_v62 = vld [vmem:[#allocation2 + $0x228] sm:$0xff] }
 0x111   :  { %v589_v3 = vpop.permute.xlu2 %588  ;;  %656 = vrot.lane.b32.xlu0 %v465_v1, %s6262_s13  ;;  %s6263_s13 = smov 2   ;;  %380 = vst.msk [vmem:[#allocation3 + $0x150] sm:$0xff] %vm35_vm0, %v7047_v62 }
 0x112   :  { %752 = vst.msk [vmem:[#allocation3 + $0xe8] sm:$0xff] %vm722_vm2, %v589_v3  ;;  %v569_v4 = vpop.permute.xlu1 %568 }
 0x113   :  { %742 = vst.msk [vmem:[#allocation3 + $0x98] sm:$0xff] %vm722_vm2, %v569_v4  ;;  %v573_v6 = vpop.permute.xlu0 %572  ;;  %v7053_v4 = vld [vmem:[#allocation2 + $0x2a8] sm:$0xff] }
 0x114   :  { %744 = vst.msk [vmem:[#allocation3 + $0xa8] sm:$0xff] %vm722_vm2, %v573_v6 }
 0x115   :  { %391 = vst.msk [vmem:[#allocation3 + $0x1a8] sm:$0xff] %vm35_vm0, %v7053_v4 }
 0x117   :  { %917 = vrot.lane.b32.xlu2 %v788_v9, %s6263_s13  ;;  %v7056_v9 = vld [vmem:[#allocation2 + $0x230] sm:$0xff] }
 0x118   :  { %915 = vrot.lane.b32.xlu1 %v787_v11, %s6263_s13  ;;  %v800_v11 = vld [vmem:[#allocation2 + $0x9a] sm:$0xff]  ;;  %381 = vst.msk [vmem:[#allocation3 + $0x158] sm:$0xff] %vm35_vm0, %v7056_v9 }
 0x119   :  { %v595_v15 = vpop.permute.xlu2 %594  ;;  %919 = vrot.lane.b32.xlu0 %v789_v13, %s6263_s13  ;;  %v799_v13 = vld [vmem:[#allocation2 + $0x92] sm:$0xff] }
 0x11a   :  { %755 = vst.msk [vmem:[#allocation3 + $0x100] sm:$0xff] %vm722_vm2, %v595_v15  ;;  %v575_v16 = vpop.permute.xlu1 %574  ;;  %v7065_v15 = vld [vmem:[#allocation2 + $0x248] sm:$0xff] }
 0x11b   :  { %745 = vst.msk [vmem:[#allocation3 + $0xb0] sm:$0xff] %vm722_vm2, %v575_v16  ;;  %v579_v19 = vpop.permute.xlu0 %578 }
 0x11c   :  { %747 = vst.msk [vmem:[#allocation3 + $0xc0] sm:$0xff] %vm722_vm2, %v579_v19 }
 0x11d   :  { %383 = vst.msk [vmem:[#allocation3 + $0x168] sm:$0xff] %vm35_vm0, %v7065_v15 }
 0x11f   :  { %923 = vrot.lane.b32.xlu2 %v791_v23, %s6263_s13  ;;  %v7071_v23 = vld [vmem:[#allocation2 + $0x2d0] sm:$0xff] }
 0x120   :  { %921 = vrot.lane.b32.xlu1 %v790_v25, %s6263_s13  ;;  %394 = vst.msk [vmem:[#allocation3 + $0x1c0] sm:$0xff] %vm35_vm0, %v7071_v23 }
 0x121   :  { %v601_v29 = vpop.permute.xlu2 %600  ;;  %925 = vrot.lane.b32.xlu0 %v792_v26, %s6263_s13  ;;  %v7074_v26 = vld [vmem:[#allocation2 + $0x258] sm:$0xff] }
 0x122   :  { %758 = vst.msk [vmem:[#allocation3 + $0x118] sm:$0xff] %vm722_vm2, %v601_v29  ;;  %v581_v30 = vpop.permute.xlu1 %580  ;;  %v803_v29 = vld [vmem:[#allocation2 + $0xc2] sm:$0xff] }
 0x123   :  { %748 = vst.msk [vmem:[#allocation3 + $0xc8] sm:$0xff] %vm722_vm2, %v581_v30  ;;  %v585_v32 = vpop.permute.xlu0 %584  ;;  %v802_v30 = vld [vmem:[#allocation2 + $0xb2] sm:$0xff] }
 0x124   :  { %750 = vst.msk [vmem:[#allocation3 + $0xd8] sm:$0xff] %vm722_vm2, %v585_v32  ;;  %v804_v32 = vld [vmem:[#allocation2 + $0xca] sm:$0xff] }
 0x125   :  { %384 = vst.msk [vmem:[#allocation3 + $0x170] sm:$0xff] %vm35_vm0, %v7074_v26 }
 0x127   :  { %929 = vrot.lane.b32.xlu2 %v794_v36, %s6263_s13  ;;  %v7083_v36 = vld [vmem:[#allocation2 + $0x270] sm:$0xff] }
 0x128   :  { %927 = vrot.lane.b32.xlu1 %v793_v37, %s6263_s13  ;;  %386 = vst.msk [vmem:[#allocation3 + $0x180] sm:$0xff] %vm35_vm0, %v7083_v36 }
 0x129   :  { %v607_v45 = vpop.permute.xlu2 %606  ;;  %931 = vrot.lane.b32.xlu0 %v795_v39, %s6263_s13 }
 0x12a   :  { %761 = vst.msk [vmem:[#allocation3 + $0x130] sm:$0xff] %vm722_vm2, %v607_v45  ;;  %v587_v47 = vpop.permute.xlu1 %586  ;;  %v7089_v45 = vld [vmem:[#allocation2 + $0x2f0] sm:$0xff] }
 0x12b   :  { %751 = vst.msk [vmem:[#allocation3 + $0xe0] sm:$0xff] %vm722_vm2, %v587_v47  ;;  %v591_v49 = vpop.permute.xlu0 %590 }
 0x12c   :  { %753 = vst.msk [vmem:[#allocation3 + $0xf0] sm:$0xff] %vm722_vm2, %v591_v49  ;;  %v7092_v49 = vld [vmem:[#allocation2 + $0x278] sm:$0xff] }
 0x12d   :  { %397 = vst.msk [vmem:[#allocation3 + $0x1d8] sm:$0xff] %vm35_vm0, %v7089_v45 }
 0x12e   :  { %387 = vst.msk [vmem:[#allocation3 + $0x188] sm:$0xff] %vm35_vm0, %v7092_v49 }
 0x12f   :  { %935 = vrot.lane.b32.xlu2 %v797_v55, %s6263_s13  ;;  %v806_v55 = vld [vmem:[#allocation2 + $0xe2] sm:$0xff] }
 0x130   :  { %933 = vrot.lane.b32.xlu1 %v796_v57, %s6263_s13  ;;  %v805_v57 = vld [vmem:[#allocation2 + $0xda] sm:$0xff] }
 0x131   :  { %v613_v1 = vpop.permute.xlu2 %612  ;;  %937 = vrot.lane.b32.xlu0 %v798_v59, %s6263_s13  ;;  %v807_v59 = vld [vmem:[#allocation2 + $0xf2] sm:$0xff] }
 0x132   :  { %764 = vst.msk [vmem:[#allocation3 + $0x148] sm:$0xff] %vm722_vm2, %v613_v1  ;;  %v593_v3 = vpop.permute.xlu1 %592  ;;  %v7101_v1 = vld [vmem:[#allocation2 + $0x290] sm:$0xff] }
 0x133   :  { %754 = vst.msk [vmem:[#allocation3 + $0xf8] sm:$0xff] %vm722_vm2, %v593_v3  ;;  %v597_v6 = vpop.permute.xlu0 %596 }
 0x134   :  { %756 = vst.msk [vmem:[#allocation3 + $0x108] sm:$0xff] %vm722_vm2, %v597_v6 }
 0x135   :  { %389 = vst.msk [vmem:[#allocation3 + $0x198] sm:$0xff] %vm35_vm0, %v7101_v1 }
 0x137   :  { %941 = vrot.lane.b32.xlu2 %v800_v11, %s6263_s13  ;;  %v7107_v11 = vld [vmem:[#allocation2 + $0x318] sm:$0xff] }
 0x138   :  { %939 = vrot.lane.b32.xlu1 %v799_v13, %s6263_s13  ;;  %400 = vst.msk [vmem:[#allocation3 + $0x1f0] sm:$0xff] %vm35_vm0, %v7107_v11 }
 0x139   :  { %v619_v16 = vpop.permute.xlu2 %618  ;;  %943 = vrot.lane.b32.xlu0 %v801_v14, %s6263_s13  ;;  %v7110_v14 = vld [vmem:[#allocation2 + $0x2a0] sm:$0xff] }
 0x13a   :  { %767 = vst.msk [vmem:[#allocation3 + $0x160] sm:$0xff] %vm722_vm2, %v619_v16  ;;  %v599_v19 = vpop.permute.xlu1 %598  ;;  %v809_v16 = vld [vmem:[#allocation2 + $0x10a] sm:$0xff] }
 0x13b   :  { %757 = vst.msk [vmem:[#allocation3 + $0x110] sm:$0xff] %vm722_vm2, %v599_v19  ;;  %v603_v25 = vpop.permute.xlu0 %602  ;;  %v808_v19 = vld [vmem:[#allocation2 + $0xfa] sm:$0xff] }
 0x13c   :  { %759 = vst.msk [vmem:[#allocation3 + $0x120] sm:$0xff] %vm722_vm2, %v603_v25  ;;  %v810_v25 = vld [vmem:[#allocation2 + $0x112] sm:$0xff] }
 0x13d   :  { %390 = vst.msk [vmem:[#allocation3 + $0x1a0] sm:$0xff] %vm35_vm0, %v7110_v14 }
 0x13f   :  { %947 = vrot.lane.b32.xlu2 %v803_v29, %s6263_s13  ;;  %v7119_v29 = vld [vmem:[#allocation2 + $0x2b8] sm:$0xff] }
 0x140   :  { %945 = vrot.lane.b32.xlu1 %v802_v30, %s6263_s13  ;;  %392 = vst.msk [vmem:[#allocation3 + $0x1b0] sm:$0xff] %vm35_vm0, %v7119_v29 }
 0x141   :  { %v625_v37 = vpop.permute.xlu2 %624  ;;  %949 = vrot.lane.b32.xlu0 %v804_v32, %s6263_s13 }
 0x142   :  { %770 = vst.msk [vmem:[#allocation3 + $0x178] sm:$0xff] %vm722_vm2, %v625_v37  ;;  %v605_v39 = vpop.permute.xlu1 %604  ;;  %v7125_v37 = vld [vmem:[#allocation2 + $0x2c0] sm:$0xff] }
 0x143   :  { %760 = vst.msk [vmem:[#allocation3 + $0x128] sm:$0xff] %vm722_vm2, %v605_v39  ;;  %v609_v47 = vpop.permute.xlu0 %608 }
 0x144   :  { %762 = vst.msk [vmem:[#allocation3 + $0x138] sm:$0xff] %vm722_vm2, %v609_v47  ;;  %v812_v47 = vld [vmem:[#allocation2 + $0x12a] sm:$0xff] }
 0x145   :  { %393 = vst.msk [vmem:[#allocation3 + $0x1b8] sm:$0xff] %vm35_vm0, %v7125_v37 }
 0x147   :  { %953 = vrot.lane.b32.xlu2 %v806_v55, %s6263_s13  ;;  %v811_v55 = vld [vmem:[#allocation2 + $0x122] sm:$0xff] }
 0x148   :  { %951 = vrot.lane.b32.xlu1 %v805_v57, %s6263_s13  ;;  %v813_v57 = vld [vmem:[#allocation2 + $0x13a] sm:$0xff] }
 0x149   :  { %v631_v3 = vpop.permute.xlu2 %630  ;;  %955 = vrot.lane.b32.xlu0 %v807_v59, %s6263_s13  ;;  %v7133_v59 = vld [vmem:[#allocation2 + $0x2d8] sm:$0xff] }
 0x14a   :  { %773 = vst.msk [vmem:[#allocation3 + $0x190] sm:$0xff] %vm722_vm2, %v631_v3  ;;  %v611_v6 = vpop.permute.xlu1 %610 }
 0x14b   :  { %763 = vst.msk [vmem:[#allocation3 + $0x140] sm:$0xff] %vm722_vm2, %v611_v6  ;;  %v615_v13 = vpop.permute.xlu0 %614 }
 0x14c   :  { %765 = vst.msk [vmem:[#allocation3 + $0x150] sm:$0xff] %vm722_vm2, %v615_v13  ;;  %v7139_v13 = vld [vmem:[#allocation2 + $0x2e8] sm:$0xff] }
 0x14d   :  { %395 = vst.msk [vmem:[#allocation3 + $0x1c8] sm:$0xff] %vm35_vm0, %v7133_v59 }
 0x14e   :  { %396 = vst.msk [vmem:[#allocation3 + $0x1d0] sm:$0xff] %vm35_vm0, %v7139_v13 }
 0x14f   :  { %959 = vrot.lane.b32.xlu2 %v809_v16, %s6263_s13 }
 0x150   :  { %957 = vrot.lane.b32.xlu1 %v808_v19, %s6263_s13  ;;  %v815_v19 = vld [vmem:[#allocation2 + $0x152] sm:$0xff] }
 0x151   :  { %v637_v30 = vpop.permute.xlu2 %636  ;;  %961 = vrot.lane.b32.xlu0 %v810_v25, %s6263_s13  ;;  %v814_v25 = vld [vmem:[#allocation2 + $0x142] sm:$0xff] }
 0x152   :  { %776 = vst.msk [vmem:[#allocation3 + $0x1a8] sm:$0xff] %vm722_vm2, %v637_v30  ;;  %v617_v32 = vpop.permute.xlu1 %616  ;;  %v816_v30 = vld [vmem:[#allocation2 + $0x15a] sm:$0xff] }
 0x153   :  { %766 = vst.msk [vmem:[#allocation3 + $0x158] sm:$0xff] %vm722_vm2, %v617_v32  ;;  %v621_v39 = vpop.permute.xlu0 %620  ;;  %v7147_v32 = vld [vmem:[#allocation2 + $0x300] sm:$0xff] }
 0x154   :  { %768 = vst.msk [vmem:[#allocation3 + $0x168] sm:$0xff] %vm722_vm2, %v621_v39 }
 0x155   :  { %398 = vst.msk [vmem:[#allocation3 + $0x1e0] sm:$0xff] %vm35_vm0, %v7147_v32 }
 0x157   :  { %965 = vrot.lane.b32.xlu2 %v812_v47, %s6263_s13 }
 0x158   :  { %963 = vrot.lane.b32.xlu1 %v811_v55, %s6263_s13  ;;  %v7153_v55 = vld [vmem:[#allocation2 + $0x308] sm:$0xff] }
 0x159   :  { %v643_v3 = vpop.permute.xlu2 %642  ;;  %967 = vrot.lane.b32.xlu0 %v813_v57, %s6263_s13  ;;  %399 = vst.msk [vmem:[#allocation3 + $0x1e8] sm:$0xff] %vm35_vm0, %v7153_v55 }
 0x15a   :  { %779 = vst.msk [vmem:[#allocation3 + $0x1c0] sm:$0xff] %vm722_vm2, %v643_v3  ;;  %v623_v6 = vpop.permute.xlu1 %622  ;;  %v818_v3 = vld [vmem:[#allocation2 + $0x172] sm:$0xff] }
 0x15b   :  { %769 = vst.msk [vmem:[#allocation3 + $0x170] sm:$0xff] %vm722_vm2, %v623_v6  ;;  %v627_v16 = vpop.permute.xlu0 %626  ;;  %v817_v6 = vld [vmem:[#allocation2 + $0x16a] sm:$0xff] }
 0x15c   :  { %771 = vst.msk [vmem:[#allocation3 + $0x180] sm:$0xff] %vm722_vm2, %v627_v16  ;;  %v819_v16 = vld [vmem:[#allocation2 + $0x1b2] sm:$0xff] }
 0x15f   :  { %971 = vrot.lane.b32.xlu2 %v815_v19, %s6263_s13  ;;  %v7161_v19 = vld [vmem:[#allocation2 + $0x320] sm:$0xff] }
 0x160   :  { %969 = vrot.lane.b32.xlu1 %v814_v25, %s6263_s13  ;;  %401 = vst.msk [vmem:[#allocation3 + $0x1f8] sm:$0xff] %vm35_vm0, %v7161_v19 }
 0x161   :  { %v649_v39 = vpop.permute.xlu2 %648  ;;  %973 = vrot.lane.b32.xlu0 %v816_v30, %s6263_s13 }
 0x162   :  { %782 = vst.msk [vmem:[#allocation3 + $0x1d8] sm:$0xff] %vm722_vm2, %v649_v39  ;;  %v629_v47 = vpop.permute.xlu1 %628 }
 0x163   :  { %772 = vst.msk [vmem:[#allocation3 + $0x188] sm:$0xff] %vm722_vm2, %v629_v47  ;;  %v633_v57 = vpop.permute.xlu0 %632  ;;  %v821_v47 = vld [vmem:[#allocation2 + $0x1ca] sm:$0xff] }
 0x164   :  { %774 = vst.msk [vmem:[#allocation3 + $0x198] sm:$0xff] %vm722_vm2, %v633_v57  ;;  %v820_v57 = vld [vmem:[#allocation2 + $0x1ba] sm:$0xff] }
 0x167   :  { %977 = vrot.lane.b32.xlu2 %v818_v3, %s6263_s13  ;;  %v822_v3 = vld [vmem:[#allocation2 + $0x1d2] sm:$0xff] }
 0x168   :  { %975 = vrot.lane.b32.xlu1 %v817_v6, %s6263_s13 }
 0x169   :  { %v655_v25 = vpop.permute.xlu2 %654  ;;  %979 = vrot.lane.b32.xlu0 %v819_v16, %s6263_s13 }
 0x16a   :  { %785 = vst.msk [vmem:[#allocation3 + $0x1f0] sm:$0xff] %vm722_vm2, %v655_v25  ;;  %v635_v30 = vpop.permute.xlu1 %634 }
 0x16b   :  { %775 = vst.msk [vmem:[#allocation3 + $0x1a0] sm:$0xff] %vm722_vm2, %v635_v30  ;;  %v639_v39 = vpop.permute.xlu0 %638  ;;  %v824_v30 = vld [vmem:[#allocation2 + $0x1ea] sm:$0xff] }
 0x16c   :  { %777 = vst.msk [vmem:[#allocation3 + $0x1b0] sm:$0xff] %vm722_vm2, %v639_v39  ;;  %v823_v39 = vld [vmem:[#allocation2 + $0x1e2] sm:$0xff] }
 0x16f   :  { %983 = vrot.lane.b32.xlu2 %v821_v47, %s6263_s13 }
 0x170   :  { %981 = vrot.lane.b32.xlu1 %v820_v57, %s6263_s13 }
 0x171   :  { %v918_v6 = vpop.permute.xlu2 %917  ;;  %985 = vrot.lane.b32.xlu0 %v822_v3, %s6263_s13 }
 0x172   :  { %v641_v16 = vpop.permute.xlu1 %640  ;;  %1109 = vst.msk [vmem:[#allocation3 + $0x8] sm:$0xff] %vm1107_vm3, %v918_v6  ;;  %v827_v6 = vld [vmem:[#allocation2 + $0x212] sm:$0xff] }
 0x173   :  { %778 = vst.msk [vmem:[#allocation3 + $0x1b8] sm:$0xff] %vm722_vm2, %v641_v16  ;;  %v645_v25 = vpop.permute.xlu0 %644  ;;  %v826_v16 = vld [vmem:[#allocation2 + $0x202] sm:$0xff] }
 0x174   :  { %780 = vst.msk [vmem:[#allocation3 + $0x1c8] sm:$0xff] %vm722_vm2, %v645_v25  ;;  %v828_v25 = vld [vmem:[#allocation2 + $0x21a] sm:$0xff] }
 0x177   :  { %989 = vrot.lane.b32.xlu2 %v824_v30, %s6263_s13 }
 0x178   :  { %987 = vrot.lane.b32.xlu1 %v823_v39, %s6263_s13 }
 0x179   :  { %v924_v47 = vpop.permute.xlu2 %923  ;;  %991 = vrot.lane.b32.xlu0 %v825_v0, %s6263_s13 }
 0x17a   :  { %v647_v57 = vpop.permute.xlu1 %646  ;;  %1112 = vst.msk [vmem:[#allocation3 + $0x20] sm:$0xff] %vm1107_vm3, %v924_v47  ;;  %v830_v47 = vld [vmem:[#allocation2 + $0x232] sm:$0xff] }
 0x17b   :  { %781 = vst.msk [vmem:[#allocation3 + $0x1d0] sm:$0xff] %vm722_vm2, %v647_v57  ;;  %v651_v3 = vpop.permute.xlu0 %650  ;;  %v829_v57 = vld [vmem:[#allocation2 + $0x22a] sm:$0xff] }
 0x17c   :  { %783 = vst.msk [vmem:[#allocation3 + $0x1e0] sm:$0xff] %vm722_vm2, %v651_v3  ;;  %v831_v3 = vld [vmem:[#allocation2 + $0x242] sm:$0xff] }
 0x17f   :  { %995 = vrot.lane.b32.xlu2 %v827_v6, %s6263_s13 }
 0x180   :  { %993 = vrot.lane.b32.xlu1 %v826_v16, %s6263_s13 }
 0x181   :  { %v930_v30 = vpop.permute.xlu2 %929  ;;  %997 = vrot.lane.b32.xlu0 %v828_v25, %s6263_s13 }
 0x182   :  { %v653_v39 = vpop.permute.xlu1 %652  ;;  %1115 = vst.msk [vmem:[#allocation3 + $0x38] sm:$0xff] %vm1107_vm3, %v930_v30  ;;  %v833_v30 = vld [vmem:[#allocation2 + $0x25a] sm:$0xff] }
 0x183   :  { %784 = vst.msk [vmem:[#allocation3 + $0x1e8] sm:$0xff] %vm722_vm2, %v653_v39  ;;  %v657_v0 = vpop.permute.xlu0 %656  ;;  %v832_v39 = vld [vmem:[#allocation2 + $0x24a] sm:$0xff] }
 0x184   :  { %786 = vst.msk [vmem:[#allocation3 + $0x1f8] sm:$0xff] %vm722_vm2, %v657_v0  ;;  %v834_v0 = vld [vmem:[#allocation2 + $0x262] sm:$0xff]  ;;  %vm4470_vm2 = vcmask 523520  }
 0x187   :  { %1001 = vrot.lane.b32.xlu2 %v830_v47, %s6263_s13 }
 0x188   :  { %999 = vrot.lane.b32.xlu1 %v829_v57, %s6263_s13 }
 0x189   :  { %v936_v6 = vpop.permute.xlu2 %935  ;;  %1003 = vrot.lane.b32.xlu0 %v831_v3, %s6263_s13 }
 0x18a   :  { %1118 = vst.msk [vmem:[#allocation3 + $0x50] sm:$0xff] %vm1107_vm3, %v936_v6  ;;  %v916_v16 = vpop.permute.xlu1 %915  ;;  %v836_v6 = vld [vmem:[#allocation2 + $0x27a] sm:$0xff] }
 0x18b   :  { %1108 = vst.msk [vmem:[#allocation3] sm:$0xff] %vm1107_vm3, %v916_v16  ;;  %v920_v25 = vpop.permute.xlu0 %919  ;;  %v835_v16 = vld [vmem:[#allocation2 + $0x272] sm:$0xff] }
 0x18c   :  { %1110 = vst.msk [vmem:[#allocation3 + $0x10] sm:$0xff] %vm1107_vm3, %v920_v25  ;;  %v837_v25 = vld [vmem:[#allocation2 + $0x28a] sm:$0xff] }
 0x18f   :  { %1007 = vrot.lane.b32.xlu2 %v833_v30, %s6263_s13 }
 0x190   :  { %1005 = vrot.lane.b32.xlu1 %v832_v39, %s6263_s13 }
 0x191   :  { %v942_v47 = vpop.permute.xlu2 %941  ;;  %1009 = vrot.lane.b32.xlu0 %v834_v0, %s6263_s13 }
 0x192   :  { %1121 = vst.msk [vmem:[#allocation3 + $0x68] sm:$0xff] %vm1107_vm3, %v942_v47  ;;  %v922_v57 = vpop.permute.xlu1 %921  ;;  %v839_v47 = vld [vmem:[#allocation2 + $0x2a2] sm:$0xff] }
 0x193   :  { %1111 = vst.msk [vmem:[#allocation3 + $0x18] sm:$0xff] %vm1107_vm3, %v922_v57  ;;  %v926_v3 = vpop.permute.xlu0 %925  ;;  %v838_v57 = vld [vmem:[#allocation2 + $0x292] sm:$0xff] }
 0x194   :  { %1113 = vst.msk [vmem:[#allocation3 + $0x28] sm:$0xff] %vm1107_vm3, %v926_v3  ;;  %v840_v3 = vld [vmem:[#allocation2 + $0x2aa] sm:$0xff] }
 0x197   :  { %1013 = vrot.lane.b32.xlu2 %v836_v6, %s6263_s13 }
 0x198   :  { %1011 = vrot.lane.b32.xlu1 %v835_v16, %s6263_s13 }
 0x199   :  { %v948_v30 = vpop.permute.xlu2 %947  ;;  %1015 = vrot.lane.b32.xlu0 %v837_v25, %s6263_s13 }
 0x19a   :  { %1124 = vst.msk [vmem:[#allocation3 + $0x80] sm:$0xff] %vm1107_vm3, %v948_v30  ;;  %v928_v39 = vpop.permute.xlu1 %927  ;;  %v842_v30 = vld [vmem:[#allocation2 + $0x2c2] sm:$0xff] }
 0x19b   :  { %1114 = vst.msk [vmem:[#allocation3 + $0x30] sm:$0xff] %vm1107_vm3, %v928_v39  ;;  %v932_v0 = vpop.permute.xlu0 %931  ;;  %v841_v39 = vld [vmem:[#allocation2 + $0x2ba] sm:$0xff] }
 0x19c   :  { %1116 = vst.msk [vmem:[#allocation3 + $0x40] sm:$0xff] %vm1107_vm3, %v932_v0  ;;  %v843_v0 = vld [vmem:[#allocation2 + $0x2d2] sm:$0xff] }
 0x19f   :  { %1019 = vrot.lane.b32.xlu2 %v839_v47, %s6263_s13 }
 0x1a0   :  { %1017 = vrot.lane.b32.xlu1 %v838_v57, %s6263_s13 }
 0x1a1   :  { %v954_v6 = vpop.permute.xlu2 %953  ;;  %1021 = vrot.lane.b32.xlu0 %v840_v3, %s6263_s13 }
 0x1a2   :  { %1127 = vst.msk [vmem:[#allocation3 + $0x98] sm:$0xff] %vm1107_vm3, %v954_v6  ;;  %v934_v16 = vpop.permute.xlu1 %933  ;;  %v845_v6 = vld [vmem:[#allocation2 + $0x2ea] sm:$0xff] }
 0x1a3   :  { %1117 = vst.msk [vmem:[#allocation3 + $0x48] sm:$0xff] %vm1107_vm3, %v934_v16  ;;  %v938_v25 = vpop.permute.xlu0 %937  ;;  %v844_v16 = vld [vmem:[#allocation2 + $0x2da] sm:$0xff] }
 0x1a4   :  { %1119 = vst.msk [vmem:[#allocation3 + $0x58] sm:$0xff] %vm1107_vm3, %v938_v25  ;;  %v846_v25 = vld [vmem:[#allocation2 + $0x2f2] sm:$0xff] }
 0x1a7   :  { %1025 = vrot.lane.b32.xlu2 %v842_v30, %s6263_s13 }
 0x1a8   :  { %1023 = vrot.lane.b32.xlu1 %v841_v39, %s6263_s13 }
 0x1a9   :  { %v960_v47 = vpop.permute.xlu2 %959  ;;  %1027 = vrot.lane.b32.xlu0 %v843_v0, %s6263_s13 }
 0x1aa   :  { %1130 = vst.msk [vmem:[#allocation3 + $0xb0] sm:$0xff] %vm1107_vm3, %v960_v47  ;;  %v940_v57 = vpop.permute.xlu1 %939  ;;  %v848_v47 = vld [vmem:[#allocation2 + $0x30a] sm:$0xff] }
 0x1ab   :  { %1120 = vst.msk [vmem:[#allocation3 + $0x60] sm:$0xff] %vm1107_vm3, %v940_v57  ;;  %v944_v3 = vpop.permute.xlu0 %943  ;;  %v847_v57 = vld [vmem:[#allocation2 + $0x302] sm:$0xff] }
 0x1ac   :  { %1122 = vst.msk [vmem:[#allocation3 + $0x70] sm:$0xff] %vm1107_vm3, %v944_v3  ;;  %v849_v3 = vld [vmem:[#allocation2 + $0x31a] sm:$0xff] }
 0x1af   :  { %1031 = vrot.lane.b32.xlu2 %v845_v6, %s6263_s13 }
 0x1b0   :  { %1029 = vrot.lane.b32.xlu1 %v844_v16, %s6263_s13 }
 0x1b1   :  { %v966_v30 = vpop.permute.xlu2 %965  ;;  %1033 = vrot.lane.b32.xlu0 %v846_v25, %s6263_s13 }
 0x1b2   :  { %1133 = vst.msk [vmem:[#allocation3 + $0xc8] sm:$0xff] %vm1107_vm3, %v966_v30  ;;  %v946_v39 = vpop.permute.xlu1 %945  ;;  %v850_v30 = vld [vmem:[#allocation2 + $0x322] sm:$0xff] }
 0x1b3   :  { %1123 = vst.msk [vmem:[#allocation3 + $0x78] sm:$0xff] %vm1107_vm3, %v946_v39  ;;  %v950_v0 = vpop.permute.xlu0 %949 }
 0x1b4   :  { %1125 = vst.msk [vmem:[#allocation3 + $0x88] sm:$0xff] %vm1107_vm3, %v950_v0 }
 0x1b7   :  { %1037 = vrot.lane.b32.xlu2 %v848_v47, %s6263_s13 }
 0x1b8   :  { %1035 = vrot.lane.b32.xlu1 %v847_v57, %s6263_s13  ;;  %v7236_v57 = vld [vmem:[#allocation2 + $0x38] sm:$0xff] }
 0x1b9   :  { %v972_v6 = vpop.permute.xlu2 %971  ;;  %1039 = vrot.lane.b32.xlu0 %v849_v3, %s6263_s13  ;;  %v7239_v3 = vld [vmem:[#allocation2 + $0x30] sm:$0xff] }
 0x1ba   :  { %1136 = vst.msk [vmem:[#allocation3 + $0xe0] sm:$0xff] %vm1107_vm3, %v972_v6  ;;  %v952_v16 = vpop.permute.xlu1 %951 }
 0x1bb   :  { %1126 = vst.msk [vmem:[#allocation3 + $0x90] sm:$0xff] %vm1107_vm3, %v952_v16  ;;  %v956_v25 = vpop.permute.xlu0 %955  ;;  %v7249_v16 = vld [vmem:[#allocation2 + $0x60] sm:$0xff] }
 0x1bc   :  { %1128 = vst.msk [vmem:[#allocation3 + $0xa0] sm:$0xff] %vm1107_vm3, %v956_v25 }
 0x1bf   :  { %1300 = vrot.lane.b32.xlu2 %v6757_v22, %s6264_s20 }
 0x1c0   :  { %1041 = vrot.lane.b32.xlu1 %v850_v30, %s6263_s13 }
 0x1c1   :  { %v978_v39 = vpop.permute.xlu2 %977  ;;  %1302 = vrot.lane.b32.xlu0 %v6780_v33, %s6264_s20 }
 0x1c2   :  { %1139 = vst.msk [vmem:[#allocation3 + $0xf8] sm:$0xff] %vm1107_vm3, %v978_v39  ;;  %v958_v0 = vpop.permute.xlu1 %957  ;;  %v7260_v39 = vld [vmem:[#allocation2 + $0x80] sm:$0xff] }
 0x1c3   :  { %1129 = vst.msk [vmem:[#allocation3 + $0xa8] sm:$0xff] %vm1107_vm3, %v958_v0  ;;  %v962_v47 = vpop.permute.xlu0 %961 }
 0x1c4   :  { %1131 = vst.msk [vmem:[#allocation3 + $0xb8] sm:$0xff] %vm1107_vm3, %v962_v47  ;;  %v1184_v47 = vld [vmem:[#allocation2 + $0xa8] sm:$0xff] }
 0x1c7   :  { %1306 = vrot.lane.b32.xlu2 %v7236_v57, %s6264_s20 }
 0x1c8   :  { %1304 = vrot.lane.b32.xlu1 %v7239_v3, %s6264_s20 }
 0x1c9   :  { %v984_v22 = vpop.permute.xlu2 %983  ;;  %1308 = vrot.lane.b32.xlu0 %v6798_v40, %s6264_s20 }
 0x1ca   :  { %1142 = vst.msk [vmem:[#allocation3 + $0x110] sm:$0xff] %vm1107_vm3, %v984_v22  ;;  %v964_v33 = vpop.permute.xlu1 %963 }
 0x1cb   :  { %1132 = vst.msk [vmem:[#allocation3 + $0xc0] sm:$0xff] %vm1107_vm3, %v964_v33  ;;  %v968_v6 = vpop.permute.xlu0 %967  ;;  %v175_v33 = vld [vmem:[%s10129_s0 + $0xf0] sm:$0xff] }
 0x1cc   :  { %1134 = vst.msk [vmem:[#allocation3 + $0xd0] sm:$0xff] %vm1107_vm3, %v968_v6 }
 0x1cd   :  { %240 = vst.msk [vmem:[#allocation2 + $0x181] sm:$0xff] %vm35_vm0, %v175_v33  ;;  %v7443_v33 = vld [vmem:[#allocation2 + $0x31] sm:$0xff] }
 0x1cf   :  { %1312 = vrot.lane.b32.xlu2 %v7249_v16, %s6264_s20 }
 0x1d0   :  { %1310 = vrot.lane.b32.xlu1 %v6807_v43, %s6264_s20 }
 0x1d1   :  { %v990_v25 = vpop.permute.xlu2 %989  ;;  %1314 = vrot.lane.b32.xlu0 %v6826_v50, %s6264_s20 }
 0x1d2   :  { %1145 = vst.msk [vmem:[#allocation3 + $0x128] sm:$0xff] %vm1107_vm3, %v990_v25  ;;  %v970_v40 = vpop.permute.xlu1 %969 }
 0x1d3   :  { %1135 = vst.msk [vmem:[#allocation3 + $0xd8] sm:$0xff] %vm1107_vm3, %v970_v40  ;;  %v974_v30 = vpop.permute.xlu0 %973 }
 0x1d4   :  { %1137 = vst.msk [vmem:[#allocation3 + $0xe8] sm:$0xff] %vm1107_vm3, %v974_v30  ;;  %v1202_v40 = vld [vmem:[#allocation2 + $0x180] sm:$0xff] }
 0x1d7   :  { %1318 = vrot.lane.b32.xlu2 %v7260_v39, %s6264_s20 }
 0x1d8   :  { %1316 = vrot.lane.b32.xlu1 %v6835_v53, %s6264_s20 }
 0x1d9   :  { %v996_v43 = vpop.permute.xlu2 %995  ;;  %1320 = vrot.lane.b32.xlu0 %v6854_v60, %s6264_s20 }
 0x1da   :  { %1148 = vst.msk [vmem:[#allocation3 + $0x140] sm:$0xff] %vm1107_vm3, %v996_v43  ;;  %v976_v50 = vpop.permute.xlu1 %975 }
 0x1db   :  { %1138 = vst.msk [vmem:[#allocation3 + $0xf0] sm:$0xff] %vm1107_vm3, %v976_v50  ;;  %v980_v0 = vpop.permute.xlu0 %979 }
 0x1dc   :  { %1140 = vst.msk [vmem:[#allocation3 + $0x100] sm:$0xff] %vm1107_vm3, %v980_v0 }
 0x1df   :  { %1324 = vrot.lane.b32.xlu2 %v1184_v47, %s6264_s20 }
 0x1e0   :  { %1322 = vrot.lane.b32.xlu1 %v6863_v63, %s6264_s20 }
 0x1e1   :  { %v1002_v22 = vpop.permute.xlu2 %1001  ;;  %1326 = vrot.lane.b32.xlu0 %v6882_v7, %s6264_s20 }
 0x1e2   :  { %1151 = vst.msk [vmem:[#allocation3 + $0x158] sm:$0xff] %vm1107_vm3, %v1002_v22  ;;  %v982_v53 = vpop.permute.xlu1 %981 }
 0x1e3   :  { %1141 = vst.msk [vmem:[#allocation3 + $0x108] sm:$0xff] %vm1107_vm3, %v982_v53  ;;  %v986_v60 = vpop.permute.xlu0 %985 }
 0x1e4   :  { %1143 = vst.msk [vmem:[#allocation3 + $0x118] sm:$0xff] %vm1107_vm3, %v986_v60  ;;  %v1557_v60 = vld [vmem:[#allocation2 + $0x19] sm:$0xff] }
 0x1e7   :  { %1330 = vrot.lane.b32.xlu2 %v6800_v41, %s6264_s20  ;;  %v176_v41 = vld [vmem:[%s10129_s0 + $0xf8] sm:$0xff] }
 0x1e8   :  { %1328 = vrot.lane.b32.xlu1 %v6892_v12, %s6264_s20  ;;  %241 = vst.msk [vmem:[#allocation2 + $0x189] sm:$0xff] %vm35_vm0, %v176_v41 }
 0x1e9   :  { %v1008_v63 = vpop.permute.xlu2 %1007  ;;  %1332 = vrot.lane.b32.xlu0 %v6908_v18, %s6264_s20 }
 0x1ea   :  { %1154 = vst.msk [vmem:[#allocation3 + $0x170] sm:$0xff] %vm1107_vm3, %v1008_v63  ;;  %v988_v7 = vpop.permute.xlu1 %987  ;;  %v1558_v63 = vld [vmem:[#allocation2 + $0x21] sm:$0xff] }
 0x1eb   :  { %1144 = vst.msk [vmem:[#allocation3 + $0x120] sm:$0xff] %vm1107_vm3, %v988_v7  ;;  %v992_v6 = vpop.permute.xlu0 %991  ;;  %v7446_v7 = vld [vmem:[#allocation2 + $0x39] sm:$0xff] }
 0x1ec   :  { %1146 = vst.msk [vmem:[#allocation3 + $0x130] sm:$0xff] %vm1107_vm3, %v992_v6 }
 0x1ef   :  { %1336 = vrot.lane.b32.xlu2 %v6828_v51, %s6264_s20  ;;  %v1203_v30 = vld [vmem:[#allocation2 + $0x188] sm:$0xff] }
 0x1f0   :  { %1334 = vrot.lane.b32.xlu1 %v6918_v24, %s6264_s20 }
 0x1f1   :  { %v1014_v12 = vpop.permute.xlu2 %1013  ;;  %1338 = vrot.lane.b32.xlu0 %v6927_v28, %s6264_s20 }
 0x1f2   :  { %1157 = vst.msk [vmem:[#allocation3 + $0x188] sm:$0xff] %vm1107_vm3, %v1014_v12  ;;  %v994_v18 = vpop.permute.xlu1 %993 }
 0x1f3   :  { %1147 = vst.msk [vmem:[#allocation3 + $0x138] sm:$0xff] %vm1107_vm3, %v994_v18  ;;  %v998_v25 = vpop.permute.xlu0 %997  ;;  %v7455_v18 = vld [vmem:[#allocation2 + $0x51] sm:$0xff] }
 0x1f4   :  { %1149 = vst.msk [vmem:[#allocation3 + $0x148] sm:$0xff] %vm1107_vm3, %v998_v25  ;;  %v7458_v25 = vld [vmem:[#allocation2 + $0x49] sm:$0xff] }
 0x1f7   :  { %1342 = vrot.lane.b32.xlu2 %v6856_v61, %s6264_s20 }
 0x1f8   :  { %1340 = vrot.lane.b32.xlu1 %v6934_v34, %s6264_s20 }
 0x1f9   :  { %v1020_v51 = vpop.permute.xlu2 %1019  ;;  %1344 = vrot.lane.b32.xlu0 %v6942_v38, %s6264_s20 }
 0x1fa   :  { %1160 = vst.msk [vmem:[#allocation3 + $0x1a0] sm:$0xff] %vm1107_vm3, %v1020_v51  ;;  %v1000_v24 = vpop.permute.xlu1 %999  ;;  %v7460_v51 = vld [vmem:[#allocation2 + $0x61] sm:$0xff] }
 0x1fb   :  { %1150 = vst.msk [vmem:[#allocation3 + $0x150] sm:$0xff] %vm1107_vm3, %v1000_v24  ;;  %v1004_v28 = vpop.permute.xlu0 %1003 }
 0x1fc   :  { %1152 = vst.msk [vmem:[#allocation3 + $0x160] sm:$0xff] %vm1107_vm3, %v1004_v28 }
 0x1ff   :  { %1348 = vrot.lane.b32.xlu2 %v6889_v10, %s6264_s20 }
 0x200   :  { %1346 = vrot.lane.b32.xlu1 %v6951_v46, %s6264_s20 }
 0x201   :  { %v1026_v61 = vpop.permute.xlu2 %1025  ;;  %1350 = vrot.lane.b32.xlu0 %v6960_v52, %s6264_s20 }
 0x202   :  { %1163 = vst.msk [vmem:[#allocation3 + $0x1b8] sm:$0xff] %vm1107_vm3, %v1026_v61  ;;  %v1006_v34 = vpop.permute.xlu1 %1005 }
 0x203   :  { %1153 = vst.msk [vmem:[#allocation3 + $0x168] sm:$0xff] %vm1107_vm3, %v1006_v34  ;;  %v1010_v38 = vpop.permute.xlu0 %1009  ;;  %v7470_v34 = vld [vmem:[#allocation2 + $0x79] sm:$0xff] }
 0x204   :  { %1155 = vst.msk [vmem:[#allocation3 + $0x178] sm:$0xff] %vm1107_vm3, %v1010_v38  ;;  %v7473_v38 = vld [vmem:[#allocation2 + $0x69] sm:$0xff] }
 0x207   :  { %1354 = vrot.lane.b32.xlu2 %v6915_v21, %s6264_s20 }
 0x208   :  { %1352 = vrot.lane.b32.xlu1 %v6969_v58, %s6264_s20 }
 0x209   :  { %v1032_v10 = vpop.permute.xlu2 %1031  ;;  %1356 = vrot.lane.b32.xlu0 %v6978_v2, %s6264_s20 }
 0x20a   :  { %1166 = vst.msk [vmem:[#allocation3 + $0x1d0] sm:$0xff] %vm1107_vm3, %v1032_v10  ;;  %v1012_v46 = vpop.permute.xlu1 %1011  ;;  %v7475_v10 = vld [vmem:[#allocation2 + $0x81] sm:$0xff] }
 0x20b   :  { %1156 = vst.msk [vmem:[#allocation3 + $0x180] sm:$0xff] %vm1107_vm3, %v1012_v46  ;;  %v1016_v52 = vpop.permute.xlu0 %1015 }
 0x20c   :  { %1158 = vst.msk [vmem:[#allocation3 + $0x190] sm:$0xff] %vm1107_vm3, %v1016_v52 }
 0x20f   :  { %1360 = vrot.lane.b32.xlu2 %v1202_v40, %s6264_s20 }
 0x210   :  { %1358 = vrot.lane.b32.xlu1 %v6987_v8, %s6264_s20 }
 0x211   :  { %v1038_v21 = vpop.permute.xlu2 %1037  ;;  %1362 = vrot.lane.b32.xlu0 %v1203_v30, %s6264_s20  ;;  %v7485_v30 = vld [vmem:[#allocation2 + $0x99] sm:$0xff] }
 0x212   :  { %1169 = vst.msk [vmem:[#allocation3 + $0x1e8] sm:$0xff] %vm1107_vm3, %v1038_v21  ;;  %v1018_v58 = vpop.permute.xlu1 %1017  ;;  %v7488_v21 = vld [vmem:[#allocation2 + $0x91] sm:$0xff] }
 0x213   :  { %1159 = vst.msk [vmem:[#allocation3 + $0x198] sm:$0xff] %vm1107_vm3, %v1018_v58  ;;  %v1022_v2 = vpop.permute.xlu0 %1021  ;;  %v7490_v58 = vld [vmem:[#allocation2 + $0xa9] sm:$0xff] }
 0x214   :  { %1161 = vst.msk [vmem:[#allocation3 + $0x1a8] sm:$0xff] %vm1107_vm3, %v1022_v2 }
 0x217   :  { %1366 = vrot.lane.b32.xlu2 %v6948_v44, %s6264_s20 }
 0x218   :  { %1364 = vrot.lane.b32.xlu1 %v7002_v20, %s6264_s20 }
 0x219   :  { %v1301_v43 = vpop.permute.xlu2 %1300  ;;  %1368 = vrot.lane.b32.xlu0 %v7011_v27, %s6264_s20 }
 0x21a   :  { %1493 = vst.msk [vmem:[#allocation3] sm:$0xff] %vm1492_vm4, %v1301_v43  ;;  %v1024_v8 = vpop.permute.xlu1 %1023 }
 0x21b   :  { %1162 = vst.msk [vmem:[#allocation3 + $0x1b0] sm:$0xff] %vm1107_vm3, %v1024_v8  ;;  %v1028_v50 = vpop.permute.xlu0 %1027 }
 0x21c   :  { %1164 = vst.msk [vmem:[#allocation3 + $0x1c0] sm:$0xff] %vm1107_vm3, %v1028_v50  ;;  %v7500_v50 = vld [vmem:[#allocation2 + $0xc1] sm:$0xff] }
 0x21f   :  { %1372 = vrot.lane.b32.xlu2 %v6966_v56, %s6264_s20 }
 0x220   :  { %1370 = vrot.lane.b32.xlu1 %v7020_v35, %s6264_s20 }
 0x221   :  { %v1307_v44 = vpop.permute.xlu2 %1306  ;;  %1374 = vrot.lane.b32.xlu0 %v7029_v42, %s6264_s20 }
 0x222   :  { %1496 = vst.msk [vmem:[#allocation3 + $0x18] sm:$0xff] %vm1492_vm4, %v1307_v44  ;;  %v1030_v20 = vpop.permute.xlu1 %1029  ;;  %v7503_v44 = vld [vmem:[#allocation2 + $0xb1] sm:$0xff] }
 0x223   :  { %1165 = vst.msk [vmem:[#allocation3 + $0x1c8] sm:$0xff] %vm1107_vm3, %v1030_v20  ;;  %v1034_v27 = vpop.permute.xlu0 %1033  ;;  %v7505_v20 = vld [vmem:[#allocation2 + $0xc9] sm:$0xff] }
 0x224   :  { %1167 = vst.msk [vmem:[#allocation3 + $0x1d8] sm:$0xff] %vm1107_vm3, %v1034_v27 }
 0x227   :  { %1378 = vrot.lane.b32.xlu2 %v6984_v5, %s6264_s20 }
 0x228   :  { %1376 = vrot.lane.b32.xlu1 %v7038_v54, %s6264_s20 }
 0x229   :  { %v1313_v56 = vpop.permute.xlu2 %1312  ;;  %1380 = vrot.lane.b32.xlu0 %v7047_v62, %s6264_s20 }
 0x22a   :  { %1499 = vst.msk [vmem:[#allocation3 + $0x30] sm:$0xff] %vm1492_vm4, %v1313_v56  ;;  %v1036_v35 = vpop.permute.xlu1 %1035 }
 0x22b   :  { %1168 = vst.msk [vmem:[#allocation3 + $0x1e0] sm:$0xff] %vm1107_vm3, %v1036_v35  ;;  %v1040_v42 = vpop.permute.xlu0 %1039 }
 0x22c   :  { %1170 = vst.msk [vmem:[#allocation3 + $0x1f0] sm:$0xff] %vm1107_vm3, %v1040_v42  ;;  %v7515_v42 = vld [vmem:[#allocation2 + $0xe1] sm:$0xff] }
 0x22f   :  { %1384 = vrot.lane.b32.xlu2 %v6999_v17, %s6264_s20 }
 0x230   :  { %1382 = vrot.lane.b32.xlu1 %v7056_v9, %s6264_s20 }
 0x231   :  { %v1319_v5 = vpop.permute.xlu2 %1318  ;;  %1386 = vrot.lane.b32.xlu0 %v7065_v15, %s6264_s20 }
 0x232   :  { %1502 = vst.msk [vmem:[#allocation3 + $0x48] sm:$0xff] %vm1492_vm4, %v1319_v5  ;;  %v1042_v54 = vpop.permute.xlu1 %1041  ;;  %v7518_v5 = vld [vmem:[#allocation2 + $0xd9] sm:$0xff] }
 0x233   :  { %1171 = vst.msk [vmem:[#allocation3 + $0x1f8] sm:$0xff] %vm1107_vm3, %v1042_v54  ;;  %v1303_v62 = vpop.permute.xlu0 %1302  ;;  %v7520_v54 = vld [vmem:[#allocation2 + $0xf1] sm:$0xff]  ;;  %vm4567_vm3 = vcmask 785920  }
 0x234   :  { %1494 = vst.msk [vmem:[#allocation3 + $0x8] sm:$0xff] %vm1492_vm4, %v1303_v62 }
 0x237   :  { %1390 = vrot.lane.b32.xlu2 %v7017_v31, %s6264_s20  ;;  %v207_v31 = vld [vmem:[%s10129_s0 + $0x1f0] sm:$0xff] }
 0x238   :  { %1388 = vrot.lane.b32.xlu1 %v7074_v26, %s6264_s20  ;;  %v208_v26 = vld [vmem:[%s10129_s0 + $0x1f8] sm:$0xff]  ;;  %272 = vst.msk [vmem:[#allocation2 + $0x331] sm:$0xff] %vm35_vm0, %v207_v31  ;;  %s6265_s0 = smov 4   ;;  %v7533_v31 = vld [vmem:[#allocation2 + $0xf9] sm:$0xff] }
 0x239   :  { %v1325_v17 = vpop.permute.xlu2 %1324  ;;  %1392 = vrot.lane.b32.xlu0 %v7083_v36, %s6264_s20  ;;  %273 = vst.msk [vmem:[#allocation2 + $0x339] sm:$0xff] %vm35_vm0, %v208_v26  ;;  %v1578_v26 = vld [vmem:[#allocation2 + $0x111] sm:$0xff]  ;;  %vm4196_vm0 = vcmask 258052  }
 0x23a   :  { %1505 = vst.msk [vmem:[#allocation3 + $0x60] sm:$0xff] %vm1492_vm4, %v1325_v17  ;;  %v1305_v9 = vpop.permute.xlu1 %1304 }
 0x23b   :  { %1495 = vst.msk [vmem:[#allocation3 + $0x10] sm:$0xff] %vm1492_vm4, %v1305_v9  ;;  %v1309_v15 = vpop.permute.xlu0 %1308 }
 0x23c   :  { %1497 = vst.msk [vmem:[#allocation3 + $0x20] sm:$0xff] %vm1492_vm4, %v1309_v15  ;;  %v7530_v15 = vld [vmem:[#allocation2 + $0x109] sm:$0xff] }
 0x23f   :  { %1396 = vrot.lane.b32.xlu2 %v7035_v48, %s6264_s20  ;;  %v1234_v53 = vld [vmem:[#allocation2 + $0x330] sm:$0xff] }
 0x240   :  { %1394 = vrot.lane.b32.xlu1 %v7092_v49, %s6264_s20  ;;  %v1235_v22 = vld [vmem:[#allocation2 + $0x338] sm:$0xff] }
 0x241   :  { %v1331_v36 = vpop.permute.xlu2 %1330  ;;  %1398 = vrot.lane.b32.xlu0 %v7101_v1, %s6264_s20 }
 0x242   :  { %1508 = vst.msk [vmem:[#allocation3 + $0x78] sm:$0xff] %vm1492_vm4, %v1331_v36  ;;  %v1311_v48 = vpop.permute.xlu1 %1310 }
 0x243   :  { %1498 = vst.msk [vmem:[#allocation3 + $0x28] sm:$0xff] %vm1492_vm4, %v1311_v48  ;;  %v1315_v0 = vpop.permute.xlu0 %1314 }
 0x244   :  { %1500 = vst.msk [vmem:[#allocation3 + $0x38] sm:$0xff] %vm1492_vm4, %v1315_v0 }
 0x247   :  { %1402 = vrot.lane.b32.xlu2 %v7053_v4, %s6264_s20 }
 0x248   :  { %1400 = vrot.lane.b32.xlu1 %v7110_v14, %s6264_s20 }
 0x249   :  { %v1337_v49 = vpop.permute.xlu2 %1336  ;;  %1404 = vrot.lane.b32.xlu0 %v7119_v29, %s6264_s20 }
 0x24a   :  { %1511 = vst.msk [vmem:[#allocation3 + $0x90] sm:$0xff] %vm1492_vm4, %v1337_v49  ;;  %v1317_v1 = vpop.permute.xlu1 %1316  ;;  %v1580_v49 = vld [vmem:[#allocation2 + $0x129] sm:$0xff] }
 0x24b   :  { %1501 = vst.msk [vmem:[#allocation3 + $0x40] sm:$0xff] %vm1492_vm4, %v1317_v1  ;;  %v1321_v47 = vpop.permute.xlu0 %1320  ;;  %v1579_v1 = vld [vmem:[#allocation2 + $0x121] sm:$0xff] }
 0x24c   :  { %1503 = vst.msk [vmem:[#allocation3 + $0x50] sm:$0xff] %vm1492_vm4, %v1321_v47  ;;  %v1581_v47 = vld [vmem:[#allocation2 + $0x139] sm:$0xff] }
 0x24f   :  { %1408 = vrot.lane.b32.xlu2 %v7071_v23, %s6264_s20 }
 0x250   :  { %1406 = vrot.lane.b32.xlu1 %v7125_v37, %s6264_s20 }
 0x251   :  { %v1343_v4 = vpop.permute.xlu2 %1342  ;;  %1410 = vrot.lane.b32.xlu0 %v7133_v59, %s6264_s20 }
 0x252   :  { %1514 = vst.msk [vmem:[#allocation3 + $0xa8] sm:$0xff] %vm1492_vm4, %v1343_v4  ;;  %v1323_v14 = vpop.permute.xlu1 %1322 }
 0x253   :  { %1504 = vst.msk [vmem:[#allocation3 + $0x58] sm:$0xff] %vm1492_vm4, %v1323_v14  ;;  %v1327_v29 = vpop.permute.xlu0 %1326 }
 0x254   :  { %1506 = vst.msk [vmem:[#allocation3 + $0x68] sm:$0xff] %vm1492_vm4, %v1327_v29 }
 0x257   :  { %1414 = vrot.lane.b32.xlu2 %v7089_v45, %s6264_s20 }
 0x258   :  { %1412 = vrot.lane.b32.xlu1 %v7139_v13, %s6264_s20 }
 0x259   :  { %v1349_v23 = vpop.permute.xlu2 %1348  ;;  %1416 = vrot.lane.b32.xlu0 %v7147_v32, %s6264_s20 }
 0x25a   :  { %1517 = vst.msk [vmem:[#allocation3 + $0xc0] sm:$0xff] %vm1492_vm4, %v1349_v23  ;;  %v1329_v37 = vpop.permute.xlu1 %1328  ;;  %v1583_v23 = vld [vmem:[#allocation2 + $0x151] sm:$0xff] }
 0x25b   :  { %1507 = vst.msk [vmem:[#allocation3 + $0x70] sm:$0xff] %vm1492_vm4, %v1329_v37  ;;  %v1333_v59 = vpop.permute.xlu0 %1332  ;;  %v1582_v37 = vld [vmem:[#allocation2 + $0x141] sm:$0xff] }
 0x25c   :  { %1509 = vst.msk [vmem:[#allocation3 + $0x80] sm:$0xff] %vm1492_vm4, %v1333_v59  ;;  %v1584_v59 = vld [vmem:[#allocation2 + $0x159] sm:$0xff] }
 0x25f   :  { %1420 = vrot.lane.b32.xlu2 %v7107_v11, %s6264_s20 }
 0x260   :  { %1418 = vrot.lane.b32.xlu1 %v7153_v55, %s6264_s20 }
 0x261   :  { %v1355_v45 = vpop.permute.xlu2 %1354  ;;  %1422 = vrot.lane.b32.xlu0 %v7161_v19, %s6264_s20 }
 0x262   :  { %1520 = vst.msk [vmem:[#allocation3 + $0xd8] sm:$0xff] %vm1492_vm4, %v1355_v45  ;;  %v1335_v13 = vpop.permute.xlu1 %1334 }
 0x263   :  { %1510 = vst.msk [vmem:[#allocation3 + $0x88] sm:$0xff] %vm1492_vm4, %v1335_v13  ;;  %v1339_v32 = vpop.permute.xlu0 %1338 }
 0x264   :  { %1512 = vst.msk [vmem:[#allocation3 + $0x98] sm:$0xff] %vm1492_vm4, %v1339_v32 }
 0x267   :  { %1426 = vrot.lane.b32.xlu2 %v1235_v22, %s6264_s20  ;;  %v1586_v22 = vld [vmem:[#allocation2 + $0x171] sm:$0xff] }
 0x268   :  { %1424 = vrot.lane.b32.xlu1 %v1234_v53, %s6264_s20  ;;  %v1585_v53 = vld [vmem:[#allocation2 + $0x169] sm:$0xff]  ;;  %s6270_s20 = smov 32  }
 0x269   :  { %v1361_v11 = vpop.permute.xlu2 %1360  ;;  %1685 = vrot.lane.b32.xlu0 %v1557_v60, %s6265_s0  ;;  %v1587_v60 = vld [vmem:[#allocation2 + $0x181] sm:$0xff] }
 0x26a   :  { %1523 = vst.msk [vmem:[#allocation3 + $0xf0] sm:$0xff] %vm1492_vm4, %v1361_v11  ;;  %v1341_v55 = vpop.permute.xlu1 %1340 }
 0x26b   :  { %1513 = vst.msk [vmem:[#allocation3 + $0xa0] sm:$0xff] %vm1492_vm4, %v1341_v55  ;;  %v1345_v19 = vpop.permute.xlu0 %1344 }
 0x26c   :  { %1515 = vst.msk [vmem:[#allocation3 + $0xb0] sm:$0xff] %vm1492_vm4, %v1345_v19 }
 0x26f   :  { %1689 = vrot.lane.b32.xlu2 %v7443_v33, %s6265_s0 }
 0x270   :  { %1687 = vrot.lane.b32.xlu1 %v1558_v63, %s6265_s0  ;;  %v1589_v63 = vld [vmem:[#allocation2 + $0x1c9] sm:$0xff] }
 0x271   :  { %v1367_v6 = vpop.permute.xlu2 %1366  ;;  %1691 = vrot.lane.b32.xlu0 %v7446_v7, %s6265_s0 }
 0x272   :  { %1526 = vst.msk [vmem:[#allocation3 + $0x108] sm:$0xff] %vm1492_vm4, %v1367_v6  ;;  %v1347_v41 = vpop.permute.xlu1 %1346  ;;  %v1588_v6 = vld [vmem:[#allocation2 + $0x189] sm:$0xff] }
 0x273   :  { %1516 = vst.msk [vmem:[#allocation3 + $0xb8] sm:$0xff] %vm1492_vm4, %v1347_v41  ;;  %v1351_v12 = vpop.permute.xlu0 %1350  ;;  %v1590_v41 = vld [vmem:[#allocation2 + $0x1d1] sm:$0xff] }
 0x274   :  { %1518 = vst.msk [vmem:[#allocation3 + $0xc8] sm:$0xff] %vm1492_vm4, %v1351_v12 }
 0x277   :  { %1695 = vrot.lane.b32.xlu2 %v7455_v18, %s6265_s0 }
 0x278   :  { %1693 = vrot.lane.b32.xlu1 %v7458_v25, %s6265_s0 }
 0x279   :  { %v1373_v24 = vpop.permute.xlu2 %1372  ;;  %1697 = vrot.lane.b32.xlu0 %v7460_v51, %s6265_s0 }
 0x27a   :  { %1529 = vst.msk [vmem:[#allocation3 + $0x120] sm:$0xff] %vm1492_vm4, %v1373_v24  ;;  %v1353_v28 = vpop.permute.xlu1 %1352 }
 0x27b   :  { %1519 = vst.msk [vmem:[#allocation3 + $0xd0] sm:$0xff] %vm1492_vm4, %v1353_v28  ;;  %v1357_v61 = vpop.permute.xlu0 %1356 }
 0x27c   :  { %1521 = vst.msk [vmem:[#allocation3 + $0xe0] sm:$0xff] %vm1492_vm4, %v1357_v61  ;;  %v1942_v61 = vld [vmem:[#allocation2 + $0x1a] sm:$0xff] }
 0x27f   :  { %1701 = vrot.lane.b32.xlu2 %v7470_v34, %s6265_s0 }
 0x280   :  { %1699 = vrot.lane.b32.xlu1 %v7473_v38, %s6265_s0 }
 0x281   :  { %v1379_v46 = vpop.permute.xlu2 %1378  ;;  %1703 = vrot.lane.b32.xlu0 %v7475_v10, %s6265_s0 }
 0x282   :  { %1532 = vst.msk [vmem:[#allocation3 + $0x138] sm:$0xff] %vm1492_vm4, %v1379_v46  ;;  %v1359_v52 = vpop.permute.xlu1 %1358  ;;  %v1591_v46 = vld [vmem:[#allocation2 + $0x1e1] sm:$0xff] }
 0x283   :  { %1522 = vst.msk [vmem:[#allocation3 + $0xe8] sm:$0xff] %vm1492_vm4, %v1359_v52  ;;  %v1363_v40 = vpop.permute.xlu0 %1362 }
 0x284   :  { %1524 = vst.msk [vmem:[#allocation3 + $0xf8] sm:$0xff] %vm1492_vm4, %v1363_v40 }
 0x287   :  { %1707 = vrot.lane.b32.xlu2 %v7485_v30, %s6265_s0 }
 0x288   :  { %1705 = vrot.lane.b32.xlu1 %v7488_v21, %s6265_s0 }
 0x289   :  { %v1385_v2 = vpop.permute.xlu2 %1384  ;;  %1709 = vrot.lane.b32.xlu0 %v7490_v58, %s6265_s0 }
 0x28a   :  { %1535 = vst.msk [vmem:[#allocation3 + $0x150] sm:$0xff] %vm1492_vm4, %v1385_v2  ;;  %v1365_v43 = vpop.permute.xlu1 %1364 }
 0x28b   :  { %1525 = vst.msk [vmem:[#allocation3 + $0x100] sm:$0xff] %vm1492_vm4, %v1365_v43  ;;  %v1369_v8 = vpop.permute.xlu0 %1368  ;;  %v3098_v43 = vld [vmem:[#allocation2 + $0x32] sm:$0xff] }
 0x28c   :  { %1527 = vst.msk [vmem:[#allocation3 + $0x110] sm:$0xff] %vm1492_vm4, %v1369_v8  ;;  %v1943_v8 = vld [vmem:[#allocation2 + $0x22] sm:$0xff] }
 0x28f   :  { %1713 = vrot.lane.b32.xlu2 %v7500_v50, %s6265_s0 }
 0x290   :  { %1711 = vrot.lane.b32.xlu1 %v7503_v44, %s6265_s0 }
 0x291   :  { %v1391_v27 = vpop.permute.xlu2 %1390  ;;  %1715 = vrot.lane.b32.xlu0 %v7505_v20, %s6265_s0 }
 0x292   :  { %1538 = vst.msk [vmem:[#allocation3 + $0x168] sm:$0xff] %vm1492_vm4, %v1391_v27  ;;  %v1371_v56 = vpop.permute.xlu1 %1370 }
 0x293   :  { %1528 = vst.msk [vmem:[#allocation3 + $0x118] sm:$0xff] %vm1492_vm4, %v1371_v56  ;;  %v1375_v35 = vpop.permute.xlu0 %1374 }
 0x294   :  { %1530 = vst.msk [vmem:[#allocation3 + $0x128] sm:$0xff] %vm1492_vm4, %v1375_v35  ;;  %v3099_v35 = vld [vmem:[#allocation2 + $0x3a] sm:$0xff] }
 0x297   :  { %1719 = vrot.lane.b32.xlu2 %v7515_v42, %s6265_s0 }
 0x298   :  { %1717 = vrot.lane.b32.xlu1 %v7518_v5, %s6265_s0 }
 0x299   :  { %v1397_v62 = vpop.permute.xlu2 %1396  ;;  %1721 = vrot.lane.b32.xlu0 %v7520_v54, %s6265_s0 }
 0x29a   :  { %1541 = vst.msk [vmem:[#allocation3 + $0x180] sm:$0xff] %vm1492_vm4, %v1397_v62  ;;  %v1377_v17 = vpop.permute.xlu1 %1376 }
 0x29b   :  { %1531 = vst.msk [vmem:[#allocation3 + $0x130] sm:$0xff] %vm1492_vm4, %v1377_v17  ;;  %v1381_v9 = vpop.permute.xlu0 %1380 }
 0x29c   :  { %1533 = vst.msk [vmem:[#allocation3 + $0x140] sm:$0xff] %vm1492_vm4, %v1381_v9  ;;  %v2330_v9 = vld [vmem:[#allocation2 + $0x48] sm:$0xff] }
 0x29f   :  { %1725 = vrot.lane.b32.xlu2 %v7530_v15, %s6265_s0 }
 0x2a0   :  { %1723 = vrot.lane.b32.xlu1 %v7533_v31, %s6265_s0 }
 0x2a1   :  { %v1403_v36 = vpop.permute.xlu2 %1402  ;;  %1727 = vrot.lane.b32.xlu0 %v1578_v26, %s6265_s0 }
 0x2a2   :  { %1544 = vst.msk [vmem:[#allocation3 + $0x198] sm:$0xff] %vm1492_vm4, %v1403_v36  ;;  %v1383_v48 = vpop.permute.xlu1 %1382  ;;  %v3100_v36 = vld [vmem:[#allocation2 + $0x4a] sm:$0xff] }
 0x2a3   :  { %1534 = vst.msk [vmem:[#allocation3 + $0x148] sm:$0xff] %vm1492_vm4, %v1383_v48  ;;  %v1387_v0 = vpop.permute.xlu0 %1386  ;;  %v2331_v48 = vld [vmem:[#allocation2 + $0x50] sm:$0xff] }
 0x2a4   :  { %1536 = vst.msk [vmem:[#allocation3 + $0x158] sm:$0xff] %vm1492_vm4, %v1387_v0 }
 0x2a7   :  { %1731 = vrot.lane.b32.xlu2 %v1580_v49, %s6265_s0 }
 0x2a8   :  { %1729 = vrot.lane.b32.xlu1 %v1579_v1, %s6265_s0  ;;  %v3101_v1 = vld [vmem:[#allocation2 + $0x52] sm:$0xff] }
 0x2a9   :  { %v1409_v4 = vpop.permute.xlu2 %1408  ;;  %1733 = vrot.lane.b32.xlu0 %v1581_v47, %s6265_s0 }
 0x2aa   :  { %1547 = vst.msk [vmem:[#allocation3 + $0x1b0] sm:$0xff] %vm1492_vm4, %v1409_v4  ;;  %v1389_v14 = vpop.permute.xlu1 %1388 }
 0x2ab   :  { %1537 = vst.msk [vmem:[#allocation3 + $0x160] sm:$0xff] %vm1492_vm4, %v1389_v14  ;;  %v1393_v29 = vpop.permute.xlu0 %1392 }
 0x2ac   :  { %1539 = vst.msk [vmem:[#allocation3 + $0x170] sm:$0xff] %vm1492_vm4, %v1393_v29  ;;  %v3102_v29 = vld [vmem:[#allocation2 + $0x62] sm:$0xff] }
 0x2af   :  { %1737 = vrot.lane.b32.xlu2 %v1583_v23, %s6265_s0 }
 0x2b0   :  { %1735 = vrot.lane.b32.xlu1 %v1582_v37, %s6265_s0 }
 0x2b1   :  { %v1415_v45 = vpop.permute.xlu2 %1414  ;;  %1739 = vrot.lane.b32.xlu0 %v1584_v59, %s6265_s0  ;;  %v2333_v59 = vld [vmem:[#allocation2 + $0x68] sm:$0xff] }
 0x2b2   :  { %1550 = vst.msk [vmem:[#allocation3 + $0x1c8] sm:$0xff] %vm1492_vm4, %v1415_v45  ;;  %v1395_v13 = vpop.permute.xlu1 %1394 }
 0x2b3   :  { %1540 = vst.msk [vmem:[#allocation3 + $0x178] sm:$0xff] %vm1492_vm4, %v1395_v13  ;;  %v1399_v32 = vpop.permute.xlu0 %1398  ;;  %v3103_v13 = vld [vmem:[#allocation2 + $0x6a] sm:$0xff] }
 0x2b4   :  { %1542 = vst.msk [vmem:[#allocation3 + $0x188] sm:$0xff] %vm1492_vm4, %v1399_v32  ;;  %v2334_v32 = vld [vmem:[#allocation2 + $0x78] sm:$0xff] }
 0x2b7   :  { %1743 = vrot.lane.b32.xlu2 %v1586_v22, %s6265_s0 }
 0x2b8   :  { %1741 = vrot.lane.b32.xlu1 %v1585_v53, %s6265_s0 }
 0x2b9   :  { %v1421_v11 = vpop.permute.xlu2 %1420  ;;  %1745 = vrot.lane.b32.xlu0 %v1587_v60, %s6265_s0  ;;  %v3104_v60 = vld [vmem:[#allocation2 + $0x7a] sm:$0xff] }
 0x2ba   :  { %1553 = vst.msk [vmem:[#allocation3 + $0x1e0] sm:$0xff] %vm1492_vm4, %v1421_v11  ;;  %v1401_v55 = vpop.permute.xlu1 %1400 }
 0x2bb   :  { %1543 = vst.msk [vmem:[#allocation3 + $0x190] sm:$0xff] %vm1492_vm4, %v1401_v55  ;;  %v1405_v19 = vpop.permute.xlu0 %1404 }
 0x2bc   :  { %1545 = vst.msk [vmem:[#allocation3 + $0x1a0] sm:$0xff] %vm1492_vm4, %v1405_v19 }
 0x2bf   :  { %1749 = vrot.lane.b32.xlu2 %v1589_v63, %s6265_s0  ;;  %v3105_v63 = vld [vmem:[#allocation2 + $0x82] sm:$0xff] }
 0x2c0   :  { %1747 = vrot.lane.b32.xlu1 %v1588_v6, %s6265_s0 }
 0x2c1   :  { %v1427_v12 = vpop.permute.xlu2 %1426  ;;  %1751 = vrot.lane.b32.xlu0 %v1590_v41, %s6265_s0 }
 0x2c2   :  { %1556 = vst.msk [vmem:[#allocation3 + $0x1f8] sm:$0xff] %vm1492_vm4, %v1427_v12  ;;  %v1407_v24 = vpop.permute.xlu1 %1406  ;;  %v2336_v12 = vld [vmem:[#allocation2 + $0x90] sm:$0xff] }
 0x2c3   :  { %1546 = vst.msk [vmem:[#allocation3 + $0x1a8] sm:$0xff] %vm1492_vm4, %v1407_v24  ;;  %v1411_v28 = vpop.permute.xlu0 %1410 }
 0x2c4   :  { %1548 = vst.msk [vmem:[#allocation3 + $0x1b8] sm:$0xff] %vm1492_vm4, %v1411_v28  ;;  %v3106_v28 = vld [vmem:[#allocation2 + $0x92] sm:$0xff] }
 0x2c7   :  { %2070 = vrot.lane.b32.xlu2 %v1942_v61, %s6266_s29  ;;  %v2337_v61 = vld [vmem:[#allocation2 + $0x98] sm:$0xff] }
 0x2c8   :  { %1753 = vrot.lane.b32.xlu1 %v1591_v46, %s6265_s0 }
 0x2c9   :  { %v1690_v52 = vpop.permute.xlu2 %1689  ;;  %2456 = vrot.lane.b32.xlu0 %v7239_v3, %s6267_s30 }
 0x2ca   :  { %1880 = vst.msk [vmem:[#allocation3 + $0x10] sm:$0xff] %vm1877_vm5, %v1690_v52  ;;  %v1413_v40 = vpop.permute.xlu1 %1412 }
 0x2cb   :  { %1549 = vst.msk [vmem:[#allocation3 + $0x1c0] sm:$0xff] %vm1492_vm4, %v1413_v40  ;;  %v1417_v2 = vpop.permute.xlu0 %1416  ;;  %v3107_v40 = vld [vmem:[#allocation2 + $0x9a] sm:$0xff] }
 0x2cc   :  { %1551 = vst.msk [vmem:[#allocation3 + $0x1d0] sm:$0xff] %vm1492_vm4, %v1417_v2  ;;  %v3548_v2 = vld [vmem:[%s10130_s1 + $0x8] sm:$0x1] }
 0x2cd   :  { %6111 = vmatpush.msk.msra.mxu0 %vm3746_vm7, %v3548_v2  ;;  %6193 = vmatpush.msk.msra.mxu3 %vm3746_vm7, %v3548_v2 }
 0x2ce   :  { %6192 = vmatpush.msk.msra.mxu2 %vm3746_vm7, %v3548_v2  ;;  %v2755_v2 = vld [vmem:[#allocation2 + $0x259] sm:$0xff]  ;;  %vm5439_vm7 = vcmask 520196  }
 0x2cf   :  { %3226 = vrot.lane.b32.xlu2 %v3098_v43, %s6268_s11 }
 0x2d0   :  { %2841 = vrot.lane.b32.xlu1 %v7443_v33, %s6269_s12 }
 0x2d1   :  { %v1696_v27 = vpop.permute.xlu2 %1695  ;;  %2072 = vrot.lane.b32.xlu0 %v1943_v8, %s6266_s29 }
 0x2d2   :  { %1883 = vst.msk [vmem:[#allocation3 + $0x28] sm:$0xff] %vm1877_vm5, %v1696_v27  ;;  %v1419_v3 = vpop.permute.xlu1 %1418 }
 0x2d3   :  { %1552 = vst.msk [vmem:[#allocation3 + $0x1d8] sm:$0xff] %vm1492_vm4, %v1419_v3  ;;  %v1423_v56 = vpop.permute.xlu0 %1422 }
 0x2d4   :  { %1554 = vst.msk [vmem:[#allocation3 + $0x1e8] sm:$0xff] %vm1492_vm4, %v1423_v56  ;;  %v2338_v56 = vld [vmem:[#allocation2 + $0xa8] sm:$0xff] }
 0x2d7   :  { %2843 = vrot.lane.b32.xlu2 %v7446_v7, %s6269_s12 }
 0x2d8   :  { %2458 = vrot.lane.b32.xlu1 %v7236_v57, %s6267_s30 }
 0x2d9   :  { %v1702_v62 = vpop.permute.xlu2 %1701  ;;  %3228 = vrot.lane.b32.xlu0 %v3099_v35, %s6268_s11 }
 0x2da   :  { %1886 = vst.msk [vmem:[#allocation3 + $0x40] sm:$0xff] %vm1877_vm5, %v1702_v62  ;;  %v1425_v33 = vpop.permute.xlu1 %1424 }
 0x2db   :  { %1555 = vst.msk [vmem:[#allocation3 + $0x1f0] sm:$0xff] %vm1492_vm4, %v1425_v33  ;;  %v1686_v17 = vpop.permute.xlu0 %1685  ;;  %vm4664_vm4 = vcmask 1048320  }
 0x2dc   :  { %1878 = vst.msk [vmem:[#allocation3] sm:$0xff] %vm1877_vm5, %v1686_v17  ;;  %v2339_v17 = vld [vmem:[#allocation2 + $0xb0] sm:$0xff] }
 0x2df   :  { %2460 = vrot.lane.b32.xlu2 %v2330_v9, %s6267_s30 }
 0x2e0   :  { %2074 = vrot.lane.b32.xlu1 %v3098_v43, %s6266_s29  ;;  %v3547_v43 = vld [vmem:[%s10130_s1] sm:$0xff] }
 0x2e1   :  { %v1708_v7 = vpop.permute.xlu2 %1707  ;;  %2845 = vrot.lane.b32.xlu0 %v7458_v25, %s6269_s12  ;;  %3765 = vmatpush.msra.mxu0 %v3547_v43 }
 0x2e2   :  { %1889 = vst.msk [vmem:[#allocation3 + $0x58] sm:$0xff] %vm1877_vm5, %v1708_v7  ;;  %v1688_v57 = vpop.permute.xlu1 %1687  ;;  %6195 = vmatpush.msra.mxu3 %v3547_v43  ;;  %6194 = vmatpush.msra.mxu2 %v3547_v43  ;;  %v3113_v43 = vld [vmem:[#allocation2 + $0xe2] sm:$0xff] }
 0x2e3   :  { %1879 = vst.msk [vmem:[#allocation3 + $0x8] sm:$0xff] %vm1877_vm5, %v1688_v57  ;;  %v1692_v26 = vpop.permute.xlu0 %1691  ;;  %v3109_v57 = vld [vmem:[#allocation2 + $0xb2] sm:$0xff] }
 0x2e4   :  { %1881 = vst.msk [vmem:[#allocation3 + $0x18] sm:$0xff] %vm1877_vm5, %v1692_v26  ;;  %v2340_v26 = vld [vmem:[#allocation2 + $0xc0] sm:$0xff] }
 0x2e7   :  { %2076 = vrot.lane.b32.xlu2 %v3099_v35, %s6266_s29  ;;  %v3108_v35 = vld [vmem:[#allocation2 + $0xaa] sm:$0xff] }
 0x2e8   :  { %3230 = vrot.lane.b32.xlu1 %v3100_v36, %s6268_s11 }
 0x2e9   :  { %v1714_v0 = vpop.permute.xlu2 %1713  ;;  %2462 = vrot.lane.b32.xlu0 %v2331_v48, %s6267_s30 }
 0x2ea   :  { %1892 = vst.msk [vmem:[#allocation3 + $0x70] sm:$0xff] %vm1877_vm5, %v1714_v0  ;;  %v1694_v25 = vpop.permute.xlu1 %1693 }
 0x2eb   :  { %1882 = vst.msk [vmem:[#allocation3 + $0x20] sm:$0xff] %vm1877_vm5, %v1694_v25  ;;  %v1698_v49 = vpop.permute.xlu0 %1697  ;;  %v3110_v25 = vld [vmem:[#allocation2 + $0xc2] sm:$0xff] }
 0x2ec   :  { %1884 = vst.msk [vmem:[#allocation3 + $0x30] sm:$0xff] %vm1877_vm5, %v1698_v49 }
 0x2ef   :  { %3232 = vrot.lane.b32.xlu2 %v3101_v1, %s6268_s11 }
 0x2f0   :  { %2847 = vrot.lane.b32.xlu1 %v7455_v18, %s6269_s12 }
 0x2f1   :  { %v1720_v47 = vpop.permute.xlu2 %1719  ;;  %2078 = vrot.lane.b32.xlu0 %v3100_v36, %s6266_s29 }
 0x2f2   :  { %1895 = vst.msk [vmem:[#allocation3 + $0x88] sm:$0xff] %vm1877_vm5, %v1720_v47  ;;  %v1700_v4 = vpop.permute.xlu1 %1699 }
 0x2f3   :  { %1885 = vst.msk [vmem:[#allocation3 + $0x38] sm:$0xff] %vm1877_vm5, %v1700_v4  ;;  %v1704_v14 = vpop.permute.xlu0 %1703 }
 0x2f4   :  { %1887 = vst.msk [vmem:[#allocation3 + $0x48] sm:$0xff] %vm1877_vm5, %v1704_v14  ;;  %v2341_v14 = vld [vmem:[#allocation2 + $0xc8] sm:$0xff] }
 0x2f7   :  { %2849 = vrot.lane.b32.xlu2 %v7460_v51, %s6269_s12 }
 0x2f8   :  { %2464 = vrot.lane.b32.xlu1 %v7249_v16, %s6267_s30 }
 0x2f9   :  { %v1726_v23 = vpop.permute.xlu2 %1725  ;;  %3234 = vrot.lane.b32.xlu0 %v3102_v29, %s6268_s11 }
 0x2fa   :  { %1898 = vst.msk [vmem:[#allocation3 + $0xa0] sm:$0xff] %vm1877_vm5, %v1726_v23  ;;  %v1706_v18 = vpop.permute.xlu1 %1705 }
 0x2fb   :  { %1888 = vst.msk [vmem:[#allocation3 + $0x50] sm:$0xff] %vm1877_vm5, %v1706_v18  ;;  %v1710_v37 = vpop.permute.xlu0 %1709 }
 0x2fc   :  { %1890 = vst.msk [vmem:[#allocation3 + $0x60] sm:$0xff] %vm1877_vm5, %v1710_v37  ;;  %v1598_v37 = vld [vmem:[#allocation2 + $0x231] sm:$0xff] }
 0x2ff   :  { %2466 = vrot.lane.b32.xlu2 %v2333_v59, %s6267_s30  ;;  %v2342_v59 = vld [vmem:[#allocation2 + $0xd8] sm:$0xff] }
 0x300   :  { %2080 = vrot.lane.b32.xlu1 %v3101_v1, %s6266_s29 }
 0x301   :  { %v1732_v51 = vpop.permute.xlu2 %1731  ;;  %2851 = vrot.lane.b32.xlu0 %v7473_v38, %s6269_s12 }
 0x302   :  { %1901 = vst.msk [vmem:[#allocation3 + $0xb8] sm:$0xff] %vm1877_vm5, %v1732_v51  ;;  %v1712_v16 = vpop.permute.xlu1 %1711 }
 0x303   :  { %1891 = vst.msk [vmem:[#allocation3 + $0x68] sm:$0xff] %vm1877_vm5, %v1712_v16  ;;  %v1716_v45 = vpop.permute.xlu0 %1715 }
 0x304   :  { %1893 = vst.msk [vmem:[#allocation3 + $0x78] sm:$0xff] %vm1877_vm5, %v1716_v45 }
 0x307   :  { %2082 = vrot.lane.b32.xlu2 %v3102_v29, %s6266_s29  ;;  %v3111_v29 = vld [vmem:[#allocation2 + $0xca] sm:$0xff] }
 0x308   :  { %3236 = vrot.lane.b32.xlu1 %v3103_v13, %s6268_s11 }
 0x309   :  { %v1738_v22 = vpop.permute.xlu2 %1737  ;;  %2468 = vrot.lane.b32.xlu0 %v2334_v32, %s6267_s30  ;;  %v2369_v32 = vld [vmem:[#allocation2 + $0x248] sm:$0xff] }
 0x30a   :  { %1904 = vst.msk [vmem:[#allocation3 + $0xd0] sm:$0xff] %vm1877_vm5, %v1738_v22  ;;  %v1718_v38 = vpop.permute.xlu1 %1717 }
 0x30b   :  { %1894 = vst.msk [vmem:[#allocation3 + $0x80] sm:$0xff] %vm1877_vm5, %v1718_v38  ;;  %v1722_v53 = vpop.permute.xlu0 %1721 }
 0x30c   :  { %1896 = vst.msk [vmem:[#allocation3 + $0x90] sm:$0xff] %vm1877_vm5, %v1722_v53 }
 0x30f   :  { %3238 = vrot.lane.b32.xlu2 %v3104_v60, %s6268_s11 }
 0x310   :  { %2853 = vrot.lane.b32.xlu1 %v7470_v34, %s6269_s12 }
 0x311   :  { %v1744_v11 = vpop.permute.xlu2 %1743  ;;  %2084 = vrot.lane.b32.xlu0 %v3103_v13, %s6266_s29  ;;  %v1983_v13 = vld [vmem:[#allocation2 + $0x232] sm:$0xff] }
 0x312   :  { %1907 = vst.msk [vmem:[#allocation3 + $0xe8] sm:$0xff] %vm1877_vm5, %v1744_v11  ;;  %v1724_v55 = vpop.permute.xlu1 %1723  ;;  %v2754_v11 = vld [vmem:[#allocation2 + $0x249] sm:$0xff] }
 0x313   :  { %1897 = vst.msk [vmem:[#allocation3 + $0x98] sm:$0xff] %vm1877_vm5, %v1724_v55  ;;  %v1728_v19 = vpop.permute.xlu0 %1727  ;;  %v3112_v55 = vld [vmem:[#allocation2 + $0xda] sm:$0xff] }
 0x314   :  { %1899 = vst.msk [vmem:[#allocation3 + $0xa8] sm:$0xff] %vm1877_vm5, %v1728_v19  ;;  %v7720_v19 = vld [vmem:[#allocation2 + $0x24a] sm:$0xff] }
 0x317   :  { %2855 = vrot.lane.b32.xlu2 %v7475_v10, %s6269_s12 }
 0x318   :  { %2470 = vrot.lane.b32.xlu1 %v7260_v39, %s6267_s30 }
 0x319   :  { %v1750_v6 = vpop.permute.xlu2 %1749  ;;  %3240 = vrot.lane.b32.xlu0 %v3105_v63, %s6268_s11 }
 0x31a   :  { %1910 = vst.msk [vmem:[#allocation3 + $0x100] sm:$0xff] %vm1877_vm5, %v1750_v6  ;;  %v1730_v34 = vpop.permute.xlu1 %1729 }
 0x31b   :  { %1900 = vst.msk [vmem:[#allocation3 + $0xb0] sm:$0xff] %vm1877_vm5, %v1730_v34  ;;  %v1734_v41 = vpop.permute.xlu0 %1733  ;;  %v1599_v34 = vld [vmem:[#allocation2 + $0x241] sm:$0xff] }
 0x31c   :  { %1902 = vst.msk [vmem:[#allocation3 + $0xc0] sm:$0xff] %vm1877_vm5, %v1734_v41 }
 0x31f   :  { %2472 = vrot.lane.b32.xlu2 %v2336_v12, %s6267_s30  ;;  %v2343_v12 = vld [vmem:[#allocation2 + $0xe0] sm:$0xff] }
 0x320   :  { %2086 = vrot.lane.b32.xlu1 %v3104_v60, %s6266_s29 }
 0x321   :  { %v2071_v10 = vpop.permute.xlu2 %2070  ;;  %2857 = vrot.lane.b32.xlu0 %v7488_v21, %s6269_s12 }
 0x322   :  { %2263 = vst.msk [vmem:[#allocation3] sm:$0xff] %vm2262_vm6, %v2071_v10  ;;  %v1736_v39 = vpop.permute.xlu1 %1735 }
 0x323   :  { %1903 = vst.msk [vmem:[#allocation3 + $0xc8] sm:$0xff] %vm1877_vm5, %v1736_v39  ;;  %v1740_v24 = vpop.permute.xlu0 %1739 }
 0x324   :  { %1905 = vst.msk [vmem:[#allocation3 + $0xd8] sm:$0xff] %vm1877_vm5, %v1740_v24 }
 0x327   :  { %2088 = vrot.lane.b32.xlu2 %v3105_v63, %s6266_s29 }
 0x328   :  { %3242 = vrot.lane.b32.xlu1 %v3106_v28, %s6268_s11 }
 0x329   :  { %v3227_v46 = vpop.permute.xlu2 %3226  ;;  %2474 = vrot.lane.b32.xlu0 %v2337_v61, %s6267_s30  ;;  %v2370_v61 = vld [vmem:[#allocation2 + $0x258] sm:$0xff] }
 0x32a   :  { %v1742_v52 = vpop.permute.xlu1 %1741 }
 0x32b   :  { %1906 = vst.msk [vmem:[#allocation3 + $0xe0] sm:$0xff] %vm1877_vm5, %v1742_v52  ;;  %v1746_v21 = vpop.permute.xlu0 %1745 }
 0x32c   :  { %1908 = vst.msk [vmem:[#allocation3 + $0xf0] sm:$0xff] %vm1877_vm5, %v1746_v21 }
 0x32f   :  { %3244 = vrot.lane.b32.xlu2 %v3107_v40, %s6268_s11 }
 0x330   :  { %2859 = vrot.lane.b32.xlu1 %v7485_v30, %s6269_s12 }
 0x331   :  { %v2844_v8 = vpop.permute.xlu2 %2843  ;;  %2090 = vrot.lane.b32.xlu0 %v3106_v28, %s6266_s29  ;;  %v1984_v28 = vld [vmem:[#allocation2 + $0x242] sm:$0xff] }
 0x332   :  { %v1748_v27 = vpop.permute.xlu1 %1747 }
 0x333   :  { %1909 = vst.msk [vmem:[#allocation3 + $0xf8] sm:$0xff] %vm1877_vm5, %v1748_v27  ;;  %v1752_v3 = vpop.permute.xlu0 %1751 }
 0x334   :  { %1911 = vst.msk [vmem:[#allocation3 + $0x108] sm:$0xff] %vm1877_vm5, %v1752_v3 }
 0x337   :  { %2861 = vrot.lane.b32.xlu2 %v7490_v58, %s6269_s12 }
 0x338   :  { %2476 = vrot.lane.b32.xlu1 %v2338_v56, %s6267_s30 }
 0x339   :  { %v2461_v30 = vpop.permute.xlu2 %2460  ;;  %3246 = vrot.lane.b32.xlu0 %v3108_v35, %s6268_s11 }
 0x33a   :  { %v1754_v62 = vpop.permute.xlu1 %1753 }
 0x33b   :  { %1912 = vst.msk [vmem:[#allocation3 + $0x110] sm:$0xff] %vm1877_vm5, %v1754_v62  ;;  %v2457_v33 = vpop.permute.xlu0 %2456 }
 0x33c   :  { %2649 = vst.msk [vmem:[#allocation3] sm:$0xff] %vm2648_vm8, %v2457_v33 }
 0x33f   :  { %2478 = vrot.lane.b32.xlu2 %v2339_v17, %s6267_s30 }
 0x340   :  { %2092 = vrot.lane.b32.xlu1 %v3107_v40, %s6266_s29 }
 0x341   :  { %v2077_v9 = vpop.permute.xlu2 %2076  ;;  %2863 = vrot.lane.b32.xlu0 %v7503_v44, %s6269_s12 }
 0x342   :  { %2266 = vst.msk [vmem:[#allocation3 + $0x18] sm:$0xff] %vm2262_vm6, %v2077_v9  ;;  %v2842_v58 = vpop.permute.xlu1 %2841  ;;  %v2371_v9 = vld [vmem:[#allocation2 + $0x260] sm:$0xff] }
 0x343   :  { %3034 = vst.msk [vmem:[#allocation3] sm:$0xff] %vm3033_vm9, %v2842_v58  ;;  %v2073_v7 = vpop.permute.xlu0 %2072 }
 0x344   :  { %3419 = vst.msk [vmem:[#allocation3] sm:$0xff] %vm3418_vm10, %v3227_v46 }
 0x345   :  { %2264 = vst.msk [vmem:[#allocation3 + $0x8] sm:$0xff] %vm2262_vm6, %v2073_v7 }
 0x347   :  { %2094 = vrot.lane.b32.xlu2 %v3108_v35, %s6266_s29  ;;  %v2344_v35 = vld [vmem:[#allocation2 + $0xf0] sm:$0xff] }
 0x348   :  { %3248 = vrot.lane.b32.xlu1 %v3109_v57, %s6268_s11 }
 0x349   :  { %v3233_v36 = vpop.permute.xlu2 %3232  ;;  %2480 = vrot.lane.b32.xlu0 %v2340_v26, %s6267_s30  ;;  %v2756_v26 = vld [vmem:[#allocation2 + $0x261] sm:$0xff] }
 0x34a   :  { %v2459_v44 = vpop.permute.xlu1 %2458 }
 0x34b   :  { %2650 = vst.msk [vmem:[#allocation3 + $0x8] sm:$0xff] %vm2648_vm8, %v2459_v44  ;;  %v3229_v48 = vpop.permute.xlu0 %3228  ;;  %v3483_v0 = vld [vmem:[#allocation3] sm:$0xff] }
 0x34c   :  { %3035 = vst.msk [vmem:[#allocation3 + $0x8] sm:$0xff] %vm3033_vm9, %v2844_v8  ;;  %6112 = vmatmul.msk.f32.vlgmr.msra.gmra.mxu0 %vm3553_vm11, %v3483_v0  ;;  %v7765_v44 = vld [vmem:[#allocation2 + $0x262] sm:$0xff] }
 0x34d   :  { %3420 = vst.msk [vmem:[#allocation3 + $0x8] sm:$0xff] %vm3418_vm10, %v3229_v48 }
 0x34f   :  { %3250 = vrot.lane.b32.xlu2 %v3110_v25, %s6268_s11 }
 0x350   :  { %2865 = vrot.lane.b32.xlu1 %v7500_v50, %s6269_s12 }
 0x351   :  { %v2850_v49 = vpop.permute.xlu2 %2849  ;;  %2096 = vrot.lane.b32.xlu0 %v3109_v57, %s6266_s29 }
 0x352   :  { %v2075_v1 = vpop.permute.xlu1 %2074 }
 0x353   :  { %2265 = vst.msk [vmem:[#allocation3 + $0x10] sm:$0xff] %vm2262_vm6, %v2075_v1  ;;  %v2846_v47 = vpop.permute.xlu0 %2845 }
 0x354   :  { %2651 = vst.msk [vmem:[#allocation3 + $0x10] sm:$0xff] %vm2648_vm8, %v2461_v30  ;;  %v3484_v4 = vld [vmem:[#allocation3 + $0x8] sm:$0xff] }
 0x355   :  { %3036 = vst.msk [vmem:[#allocation3 + $0x10] sm:$0xff] %vm3033_vm9, %v2846_v47  ;;  %6113 = vmatmul.msk.f32.gmra.mxu0 %vm3553_vm11, %v3484_v4 }
 0x357   :  { %2867 = vrot.lane.b32.xlu2 %v7505_v20, %s6269_s12 }
 0x358   :  { %2482 = vrot.lane.b32.xlu1 %v2341_v14, %s6267_s30 }
 0x359   :  { %v2467_v50 = vpop.permute.xlu2 %2466  ;;  %3252 = vrot.lane.b32.xlu0 %v3111_v29, %s6268_s11 }
 0x35a   :  { %v3231_v23 = vpop.permute.xlu1 %3230 }
 0x35b   :  { %3421 = vst.msk [vmem:[#allocation3 + $0x10] sm:$0xff] %vm3418_vm10, %v3231_v23  ;;  %v2463_v18 = vpop.permute.xlu0 %2462 }
 0x35c   :  { %2652 = vst.msk [vmem:[#allocation3 + $0x18] sm:$0xff] %vm2648_vm8, %v2463_v18 }
 0x35f   :  { %1767 = vrot.lane.b32.xlu2 %v1598_v37, %s6265_s0  ;;  %v7789_v37 = vld [vmem:[#allocation2 + $0x271] sm:$0xff] }
 0x360   :  { %2098 = vrot.lane.b32.xlu1 %v3110_v25, %s6266_s29 }
 0x361   :  { %v2083_v51 = vpop.permute.xlu2 %2082  ;;  %2484 = vrot.lane.b32.xlu0 %v2342_v59, %s6267_s30 }
 0x362   :  { %2269 = vst.msk [vmem:[#allocation3 + $0x30] sm:$0xff] %vm2262_vm6, %v2083_v51  ;;  %v2848_v20 = vpop.permute.xlu1 %2847  ;;  %v3485_v16 = vld [vmem:[#allocation3 + $0x10] sm:$0xff]  ;;  %v7791_v51 = vld [vmem:[#allocation2 + $0xfa] sm:$0xff] }
 0x363   :  { %3037 = vst.msk [vmem:[#allocation3 + $0x18] sm:$0xff] %vm3033_vm9, %v2848_v20  ;;  %6114 = vmatmul.msk.f32.gmra.mxu0 %vm3553_vm11, %v3485_v16  ;;  %v2079_v45 = vpop.permute.xlu0 %2078 }
 0x364   :  { %3422 = vst.msk [vmem:[#allocation3 + $0x18] sm:$0xff] %vm3418_vm10, %v3233_v36  ;;  %v3114_v36 = vld [vmem:[#allocation2 + $0xf2] sm:$0xff] }
 0x365   :  { %2267 = vst.msk [vmem:[#allocation3 + $0x20] sm:$0xff] %vm2262_vm6, %v2079_v45 }
 0x367   :  { %2869 = vrot.lane.b32.xlu2 %v7518_v5, %s6269_s12 }
 0x368   :  { %2152 = vrot.lane.b32.xlu1 %v1983_v13, %s6266_s29  ;;  %v2346_v13 = vld [vmem:[#allocation2 + $0x108] sm:$0xff] }
 0x369   :  { %v3239_v22 = vpop.permute.xlu2 %3238  ;;  %2538 = vrot.lane.b32.xlu0 %v2369_v32, %s6267_s30 }
 0x36a   :  { %v2465_v38 = vpop.permute.xlu1 %2464 }
 0x36b   :  { %2653 = vst.msk [vmem:[#allocation3 + $0x20] sm:$0xff] %vm2648_vm8, %v2465_v38  ;;  %v3486_v53 = vld [vmem:[#allocation3 + $0x18] sm:$0xff]  ;;  %v3235_v60 = vpop.permute.xlu0 %3234 }
 0x36c   :  { %3038 = vst.msk [vmem:[#allocation3 + $0x20] sm:$0xff] %vm3033_vm9, %v2850_v49  ;;  %6115 = vmatmul.msk.f32.gmra.mxu0 %vm3553_vm11, %v3486_v53  ;;  %v2345_v49 = vld [vmem:[#allocation2 + $0xf8] sm:$0xff] }
 0x36d   :  { %3423 = vst.msk [vmem:[#allocation3 + $0x20] sm:$0xff] %vm3418_vm10, %v3235_v60  ;;  %v2373_v60 = vld [vmem:[#allocation2 + $0x278] sm:$0xff] }
 0x36f   :  { %2923 = vrot.lane.b32.xlu2 %v2754_v11, %s6269_s12 }
 0x370   :  { %3254 = vrot.lane.b32.xlu1 %v3112_v55, %s6268_s11 }
 0x371   :  { %v2856_v5 = vpop.permute.xlu2 %2855  ;;  %3308 = vrot.lane.b32.xlu0 %v7720_v19, %s6268_s11 }
 0x372   :  { %v2081_v63 = vpop.permute.xlu1 %2080 }
 0x373   :  { %2268 = vst.msk [vmem:[#allocation3 + $0x28] sm:$0xff] %vm2262_vm6, %v2081_v63  ;;  %v2852_v6 = vpop.permute.xlu0 %2851 }
 0x374   :  { %2654 = vst.msk [vmem:[#allocation3 + $0x28] sm:$0xff] %vm2648_vm8, %v2467_v50  ;;  %v3487_v41 = vld [vmem:[#allocation3 + $0x20] sm:$0xff] }
 0x375   :  { %3039 = vst.msk [vmem:[#allocation3 + $0x28] sm:$0xff] %vm3033_vm9, %v2852_v6  ;;  %6116 = vmatmul.msk.f32.gmra.mxu0 %vm3553_vm11, %v3487_v41  ;;  %v7832_v6 = vld [vmem:[#allocation2 + $0x279] sm:$0xff] }
 0x376   :  { %v7838_v41 = vld [vmem:[#allocation2 + $0x27a] sm:$0xff] }
 0x377   :  { %1769 = vrot.lane.b32.xlu2 %v1599_v34, %s6265_s0  ;;  %v7835_v34 = vld [vmem:[#allocation2 + $0x10a] sm:$0xff] }
 0x378   :  { %2100 = vrot.lane.b32.xlu1 %v3111_v29, %s6266_s29  ;;  %v2372_v29 = vld [vmem:[#allocation2 + $0x270] sm:$0xff] }
 0x379   :  { %v2473_v10 = vpop.permute.xlu2 %2472  ;;  %2486 = vrot.lane.b32.xlu0 %v2343_v12, %s6267_s30 }
 0x37a   :  { %v3237_v39 = vpop.permute.xlu1 %3236 }
 0x37b   :  { %3424 = vst.msk [vmem:[#allocation3 + $0x28] sm:$0xff] %vm3418_vm10, %v3237_v39  ;;  %v2469_v24 = vpop.permute.xlu0 %2468 }
 0x37c   :  { %2655 = vst.msk [vmem:[#allocation3 + $0x30] sm:$0xff] %vm2648_vm8, %v2469_v24 }
 0x37f   :  { %2871 = vrot.lane.b32.xlu2 %v7515_v42, %s6269_s12  ;;  %v3140_v42 = vld [vmem:[#allocation2 + $0x25a] sm:$0xff] }
 0x380   :  { %2154 = vrot.lane.b32.xlu1 %v1984_v28, %s6266_s29 }
 0x381   :  { %v2089_v46 = vpop.permute.xlu2 %2088  ;;  %2540 = vrot.lane.b32.xlu0 %v2370_v61, %s6267_s30  ;;  %v2347_v61 = vld [vmem:[#allocation2 + $0x110] sm:$0xff] }
 0x382   :  { %2272 = vst.msk [vmem:[#allocation3 + $0x48] sm:$0xff] %vm2262_vm6, %v2089_v46  ;;  %v2854_v52 = vpop.permute.xlu1 %2853  ;;  %v3488_v21 = vld [vmem:[#allocation3 + $0x28] sm:$0xff] }
 0x383   :  { %3040 = vst.msk [vmem:[#allocation3 + $0x30] sm:$0xff] %vm3033_vm9, %v2854_v52  ;;  %6117 = vmatmul.msk.f32.gmra.mxu0 %vm3553_vm11, %v3488_v21  ;;  %v2085_v40 = vpop.permute.xlu0 %2084  ;;  %v7879_v21 = vld [vmem:[%s10131_s2] ss:$0 sm:$0xff] }
 0x384   :  { %3425 = vst.msk [vmem:[#allocation3 + $0x30] sm:$0xff] %vm3418_vm10, %v3239_v22 }
 0x385   :  { %2270 = vst.msk [vmem:[#allocation3 + $0x38] sm:$0xff] %vm2262_vm6, %v2085_v40 }
 0x387   :  { %2925 = vrot.lane.b32.xlu2 %v2755_v2, %s6269_s12 }
 0x388   :  { %3256 = vrot.lane.b32.xlu1 %v3113_v43, %s6268_s11 }
 0x389   :  { %v3245_v8 = vpop.permute.xlu2 %3244  ;;  %3310 = vrot.lane.b32.xlu0 %v3140_v42, %s6268_s11 }
 0x38a   :  { %v2471_v27 = vpop.permute.xlu1 %2470 }
 0x38b   :  { %2656 = vst.msk [vmem:[#allocation3 + $0x38] sm:$0xff] %vm2648_vm8, %v2471_v27  ;;  %v3489_v3 = vld [vmem:[#allocation3 + $0x30] sm:$0xff]  ;;  %v3241_v56 = vpop.permute.xlu0 %3240 }
 0x38c   :  { %3041 = vst.msk [vmem:[#allocation3 + $0x38] sm:$0xff] %vm3033_vm9, %v2856_v5  ;;  %6118 = vmatmul.msk.f32.gmra.mxu0 %vm3553_vm11, %v3489_v3 }
 0x38d   :  { %3426 = vst.msk [vmem:[#allocation3 + $0x38] sm:$0xff] %vm3418_vm10, %v3241_v56 }
 0x38f   :  { %1771 = vrot.lane.b32.xlu2 %v2754_v11, %s6265_s0  ;;  %v10142_v11 = vmov 0.0  }
 0x390   :  { %2102 = vrot.lane.b32.xlu1 %v3112_v55, %s6266_s29  ;;  %4027 = vst.msk [vmem:[#allocation4 + $0x10] sm:$0xff] %vm4023_vm12, %v10142_v11 }
 0x391   :  { %v2862_v30 = vpop.permute.xlu2 %2861  ;;  %2488 = vrot.lane.b32.xlu0 %v2344_v35, %s6267_s30  ;;  %4024 = vst.msk [vmem:[#allocation4] sm:$0xff] %vm4023_vm12, %v10142_v11 }
 0x392   :  { %v2087_v62 = vpop.permute.xlu1 %2086  ;;  %4029 = vst.msk [vmem:[#allocation4 + $0x20] sm:$0xff] %vm4023_vm12, %v10142_v11 }
 0x393   :  { %2271 = vst.msk [vmem:[#allocation3 + $0x40] sm:$0xff] %vm2262_vm6, %v2087_v62  ;;  %v2858_v33 = vpop.permute.xlu0 %2857 }
 0x394   :  { %2657 = vst.msk [vmem:[#allocation3 + $0x40] sm:$0xff] %vm2648_vm8, %v2473_v10  ;;  %v3490_v17 = vld [vmem:[#allocation3 + $0x38] sm:$0xff] }
 0x395   :  { %3042 = vst.msk [vmem:[#allocation3 + $0x40] sm:$0xff] %vm3033_vm9, %v2858_v33  ;;  %6119 = vmatmul.msk.f32.gmra.mxu0 %vm3553_vm11, %v3490_v17  ;;  %v7906_v33 = vld [vmem:[#allocation2 + $0x289] sm:$0xff] }
 0x396   :  { %4031 = vst.msk [vmem:[#allocation4 + $0x30] sm:$0xff] %vm4023_vm12, %v10142_v11 }
 0x397   :  { %2873 = vrot.lane.b32.xlu2 %v7520_v54, %s6269_s12  ;;  %4033 = vst.msk [vmem:[#allocation4 + $0x40] sm:$0xff] %vm4023_vm12, %v10142_v11 }
 0x398   :  { %2156 = vrot.lane.b32.xlu1 %v7720_v19, %s6266_s29  ;;  %4035 = vst.msk [vmem:[#allocation4 + $0x50] sm:$0xff] %vm4023_vm12, %v10142_v11 }
 0x399   :  { %v2479_v58 = vpop.permute.xlu2 %2478  ;;  %2542 = vrot.lane.b32.xlu0 %v2371_v9, %s6267_s30  ;;  %4037 = vst.msk [vmem:[#allocation4 + $0x60] sm:$0xff] %vm4023_vm12, %v10142_v11  ;;  %v7908_v9 = vld [vmem:[#allocation2 + $0x112] sm:$0xff] }
 0x39a   :  { %v3243_v7 = vpop.permute.xlu1 %3242  ;;  %4039 = vst.msk [vmem:[#allocation4 + $0x70] sm:$0xff] %vm4023_vm12, %v10142_v11 }
 0x39b   :  { %3427 = vst.msk [vmem:[#allocation3 + $0x40] sm:$0xff] %vm3418_vm10, %v3243_v7  ;;  %v2475_v57 = vpop.permute.xlu0 %2474 }
 0x39c   :  { %2658 = vst.msk [vmem:[#allocation3 + $0x48] sm:$0xff] %vm2648_vm8, %v2475_v57 }
 0x39d   :  { %4041 = vst.msk [vmem:[#allocation4 + $0x80] sm:$0xff] %vm4023_vm12, %v10142_v11 }
 0x39e   :  { %4043 = vst.msk [vmem:[#allocation4 + $0x90] sm:$0xff] %vm4023_vm12, %v10142_v11 }
 0x39f   :  { %2927 = vrot.lane.b32.xlu2 %v2756_v26, %s6269_s12  ;;  %4045 = vst.msk [vmem:[#allocation4 + $0xa0] sm:$0xff] %vm4023_vm12, %v10142_v11 }
 0x3a0   :  { %3258 = vrot.lane.b32.xlu1 %v3114_v36, %s6268_s11  ;;  %4047 = vst.msk [vmem:[#allocation4 + $0xb0] sm:$0xff] %vm4023_vm12, %v10142_v11 }
 0x3a1   :  { %v2095_v54 = vpop.permute.xlu2 %2094  ;;  %3312 = vrot.lane.b32.xlu0 %v7765_v44, %s6268_s11  ;;  %4049 = vst.msk [vmem:[#allocation4 + $0xc0] sm:$0xff] %vm4023_vm12, %v10142_v11 }
 0x3a2   :  { %2275 = vst.msk [vmem:[#allocation3 + $0x60] sm:$0xff] %vm2262_vm6, %v2095_v54  ;;  %v2860_v48 = vpop.permute.xlu1 %2859  ;;  %v3491_v0 = vld [vmem:[#allocation3 + $0x40] sm:$0xff] }
 0x3a3   :  { %3043 = vst.msk [vmem:[#allocation3 + $0x48] sm:$0xff] %vm3033_vm9, %v2860_v48  ;;  %6120 = vmatmul.msk.f32.gmra.mxu0 %vm3553_vm11, %v3491_v0  ;;  %v2091_v25 = vpop.permute.xlu0 %2090 }
 0x3a4   :  { %3428 = vst.msk [vmem:[#allocation3 + $0x48] sm:$0xff] %vm3418_vm10, %v3245_v8 }
 0x3a5   :  { %2273 = vst.msk [vmem:[#allocation3 + $0x50] sm:$0xff] %vm2262_vm6, %v2091_v25 }
 0x3a6   :  { %4051 = vst.msk [vmem:[#allocation4 + $0xd0] sm:$0xff] %vm4023_vm12, %v10142_v11 }
 0x3a7   :  { %1773 = vrot.lane.b32.xlu2 %v2755_v2, %s6265_s0  ;;  %v2732_v2 = vld [vmem:[#allocation2 + $0x111] sm:$0xff]  ;;  %4053 = vst.msk [vmem:[#allocation4 + $0xe0] sm:$0xff] %vm4023_vm12, %v10142_v11 }
 0x3a8   :  { %2104 = vrot.lane.b32.xlu1 %v3113_v43, %s6266_s29  ;;  %4055 = vst.msk [vmem:[#allocation4 + $0xf0] sm:$0xff] %vm4023_vm12, %v10142_v11  ;;  %v2374_v43 = vld [vmem:[#allocation2 + $0x288] sm:$0xff] }
 0x3a9   :  { %v3251_v1 = vpop.permute.xlu2 %3250  ;;  %2490 = vrot.lane.b32.xlu0 %v2345_v49, %s6267_s30  ;;  %4057 = vst.msk [vmem:[#allocation4 + $0x100] sm:$0xff] %vm4023_vm12, %v10142_v11 }
 0x3aa   :  { %v2477_v47 = vpop.permute.xlu1 %2476  ;;  %4059 = vst.msk [vmem:[#allocation4 + $0x110] sm:$0xff] %vm4023_vm12, %v10142_v11 }
 0x3ab   :  { %2659 = vst.msk [vmem:[#allocation3 + $0x50] sm:$0xff] %vm2648_vm8, %v2477_v47  ;;  %v3247_v4 = vpop.permute.xlu0 %3246  ;;  %v3492_v14 = vld [vmem:[#allocation3 + $0x48] sm:$0xff] }
 0x3ac   :  { %3044 = vst.msk [vmem:[#allocation3 + $0x50] sm:$0xff] %vm3033_vm9, %v2862_v30  ;;  %6121 = vmatmul.msk.f32.gmra.mxu0 %vm3553_vm11, %v3492_v14  ;;  %v2348_v14 = vld [vmem:[#allocation2 + $0x120] sm:$0xff] }
 0x3ad   :  { %3429 = vst.msk [vmem:[#allocation3 + $0x50] sm:$0xff] %vm3418_vm10, %v3247_v4 }
 0x3ae   :  { %4061 = vst.msk [vmem:[#allocation4 + $0x120] sm:$0xff] %vm4023_vm12, %v10142_v11 }
 0x3af   :  { %2875 = vrot.lane.b32.xlu2 %v7533_v31, %s6269_s12  ;;  %v7795_v31 = vld [vmem:[#allocation2 + $0x272] sm:$0xff]  ;;  %4063 = vst.msk [vmem:[#allocation4 + $0x130] sm:$0xff] %vm4023_vm12, %v10142_v11 }
 0x3b0   :  { %2158 = vrot.lane.b32.xlu1 %v3140_v42, %s6266_s29  ;;  %4028 = vst.msk [vmem:[#allocation4 + $0x18] sm:$0x3] %vm4025_vm13, %v10142_v11 }
 0x3b1   :  { %v2868_v50 = vpop.permute.xlu2 %2867  ;;  %2544 = vrot.lane.b32.xlu0 %v2372_v29, %s6267_s30  ;;  %4026 = vst.msk [vmem:[#allocation4 + $0x8] sm:$0x3] %vm4025_vm13, %v10142_v11 }
 0x3b2   :  { %v2093_v23 = vpop.permute.xlu1 %2092  ;;  %4030 = vst.msk [vmem:[#allocation4 + $0x28] sm:$0x3] %vm4025_vm13, %v10142_v11 }
 0x3b3   :  { %2274 = vst.msk [vmem:[#allocation3 + $0x58] sm:$0xff] %vm2262_vm6, %v2093_v23  ;;  %v2864_v18 = vpop.permute.xlu0 %2863 }
 0x3b4   :  { %2660 = vst.msk [vmem:[#allocation3 + $0x58] sm:$0xff] %vm2648_vm8, %v2479_v58  ;;  %v3493_v59 = vld [vmem:[#allocation3 + $0x50] sm:$0xff] }
 0x3b5   :  { %3045 = vst.msk [vmem:[#allocation3 + $0x58] sm:$0xff] %vm3033_vm9, %v2864_v18  ;;  %6122 = vmatmul.msk.f32.gmra.mxu0 %vm3553_vm11, %v3493_v59  ;;  %v7913_v58 = vld [vmem:[#allocation2 + $0x28a] sm:$0xff]  ;;  %v2733_v59 = vld [vmem:[#allocation2 + $0x121] sm:$0xff] }
 0x3b6   :  { %4032 = vst.msk [vmem:[#allocation4 + $0x38] sm:$0x3] %vm4025_vm13, %v10142_v11 }
 0x3b7   :  { %2929 = vrot.lane.b32.xlu2 %v7789_v37, %s6269_s12  ;;  %4034 = vst.msk [vmem:[#allocation4 + $0x48] sm:$0x3] %vm4025_vm13, %v10142_v11 }
 0x3b8   :  { %3260 = vrot.lane.b32.xlu1 %v7791_v51, %s6268_s11  ;;  %4036 = vst.msk [vmem:[#allocation4 + $0x58] sm:$0x3] %vm4025_vm13, %v10142_v11 }
 0x3b9   :  { %v1768_v20 = vpop.permute.xlu2 %1767  ;;  %3314 = vrot.lane.b32.xlu0 %v7795_v31, %s6268_s11  ;;  %4038 = vst.msk [vmem:[#allocation4 + $0x68] sm:$0x3] %vm4025_vm13, %v10142_v11 }
 0x3ba   :  { %1919 = vst.msk [vmem:[#allocation3 + $0x148] sm:$0xff] %vm1877_vm5, %v1768_v20  ;;  %v3249_v16 = vpop.permute.xlu1 %3248 }
 0x3bb   :  { %3430 = vst.msk [vmem:[#allocation3 + $0x58] sm:$0xff] %vm3418_vm10, %v3249_v16  ;;  %v2481_v45 = vpop.permute.xlu0 %2480 }
 0x3bc   :  { %2661 = vst.msk [vmem:[#allocation3 + $0x60] sm:$0xff] %vm2648_vm8, %v2481_v45 }
 0x3bd   :  { %4040 = vst.msk [vmem:[#allocation4 + $0x78] sm:$0x3] %vm4025_vm13, %v10142_v11 }
 0x3be   :  { %4042 = vst.msk [vmem:[#allocation4 + $0x88] sm:$0x3] %vm4025_vm13, %v10142_v11 }
 0x3bf   :  { %1775 = vrot.lane.b32.xlu2 %v2756_v26, %s6265_s0  ;;  %4044 = vst.msk [vmem:[#allocation4 + $0x98] sm:$0x3] %vm4025_vm13, %v10142_v11 }
 0x3c0   :  { %2106 = vrot.lane.b32.xlu1 %v3114_v36, %s6266_s29  ;;  %4046 = vst.msk [vmem:[#allocation4 + $0xa8] sm:$0x3] %vm4025_vm13, %v10142_v11 }
 0x3c1   :  { %v2870_v32 = vpop.permute.xlu2 %2869  ;;  %2492 = vrot.lane.b32.xlu0 %v2346_v13, %s6267_s30  ;;  %4048 = vst.msk [vmem:[#allocation4 + $0xb8] sm:$0x3] %vm4025_vm13, %v10142_v11  ;;  %v7974_v13 = vld [vmem:[#allocation2 + $0x291] sm:$0xff] }
 0x3c2   :  { %v2866_v22 = vpop.permute.xlu1 %2865  ;;  %v3494_v38 = vld [vmem:[#allocation3 + $0x58] sm:$0xff]  ;;  %4050 = vst.msk [vmem:[#allocation4 + $0xc8] sm:$0x3] %vm4025_vm13, %v10142_v11 }
 0x3c3   :  { %3046 = vst.msk [vmem:[#allocation3 + $0x60] sm:$0xff] %vm3033_vm9, %v2866_v22  ;;  %6123 = vmatmul.msk.f32.gmra.mxu0 %vm3553_vm11, %v3494_v38  ;;  %v2097_v53 = vpop.permute.xlu0 %2096  ;;  %v7982_v22 = vld [vmem:[#allocation2 + $0x292] sm:$0xff] }
 0x3c4   :  { %3431 = vst.msk [vmem:[#allocation3 + $0x60] sm:$0xff] %vm3418_vm10, %v3251_v1 }
 0x3c5   :  { %2276 = vst.msk [vmem:[#allocation3 + $0x68] sm:$0xff] %vm2262_vm6, %v2097_v53 }
 0x3c6   :  { %4052 = vst.msk [vmem:[#allocation4 + $0xd8] sm:$0x3] %vm4025_vm13, %v10142_v11 }
 0x3c7   :  { %2877 = vrot.lane.b32.xlu2 %v7530_v15, %s6269_s12  ;;  %4054 = vst.msk [vmem:[#allocation4 + $0xe8] sm:$0x3] %vm4025_vm13, %v10142_v11 }
 0x3c8   :  { %2160 = vrot.lane.b32.xlu1 %v7765_v44, %s6266_s29  ;;  %4056 = vst.msk [vmem:[#allocation4 + $0xf8] sm:$0x3] %vm4025_vm13, %v10142_v11 }
 0x3c9   :  { %v7823_v55 = vpop.permute.xlu2 %2923  ;;  %2546 = vrot.lane.b32.xlu0 %v2373_v60, %s6267_s30  ;;  %v3767_v63 = vpop.f32.mrf.mxu0  ;;  %4058 = vst.msk [vmem:[#allocation4 + $0x108] sm:$0x3] %vm4025_vm13, %v10142_v11 }
 0x3ca   :  { %v2483_v19 = vpop.permute.xlu1 %2482  ;;  %v3768_v42 = vadd.f32 %v7879_v21, %v3767_v63  ;;  %4060 = vst.msk [vmem:[#allocation4 + $0x118] sm:$0x3] %vm4025_vm13, %v10142_v11 }
 0x3cb   :  { %2662 = vst.msk [vmem:[#allocation3 + $0x68] sm:$0xff] %vm2648_vm8, %v2483_v19  ;;  %v3253_v15 = vpop.permute.xlu0 %3252  ;;  %v3495_v5 = vld [vmem:[#allocation3 + $0x60] sm:$0xff]  ;;  %v2349_v19 = vld [vmem:[#allocation2 + $0x128] sm:$0xff] }
 0x3cc   :  { %3047 = vst.msk [vmem:[#allocation3 + $0x68] sm:$0xff] %vm3033_vm9, %v2868_v50  ;;  %6124 = vmatmul.msk.f32.gmra.mxu0 %vm3553_vm11, %v3495_v5  ;;  %v3959_v35 = vmax.f32 %v3768_v42, 0.0 }
 0x3cd   :  { %3432 = vst.msk [vmem:[#allocation3 + $0x68] sm:$0xff] %vm3418_vm10, %v3253_v15 }
 0x3ce   :  { %4062 = vst.msk [vmem:[#allocation4 + $0x128] sm:$0x3] %vm4025_vm13, %v10142_v11 }
 0x3cf   :  { %2931 = vrot.lane.b32.xlu2 %v7832_v6, %s6269_s12  ;;  %4064 = vst.msk [vmem:[#allocation4 + $0x138] sm:$0x3] %vm4025_vm13, %v10142_v11  ;;  %vm5515_vm13 = vcmask 1045509  }
 0x3d0   :  { %3262 = vrot.lane.b32.xlu1 %v7835_v34, %s6268_s11 }
 0x3d1   :  { %v1770_v12 = vpop.permute.xlu2 %1769  ;;  %3316 = vrot.lane.b32.xlu0 %v7838_v41, %s6268_s11 }
 0x3d2   :  { %1920 = vst.msk [vmem:[#allocation3 + $0x150] sm:$0xff] %vm1877_vm5, %v1770_v12  ;;  %v2099_v10 = vpop.permute.xlu1 %2098  ;;  %v3770_v28 = vpop.f32.mrf.mxu0 }
 0x3d3   :  { %2277 = vst.msk [vmem:[#allocation3 + $0x70] sm:$0xff] %vm2262_vm6, %v2099_v10  ;;  %v2485_v39 = vpop.permute.xlu0 %2484  ;;  %v3771_v57 = vadd.f32 %v7879_v21, %v3770_v28  ;;  %v2734_v10 = vld [vmem:[#allocation2 + $0x129] sm:$0xff] }
 0x3d4   :  { %2663 = vst.msk [vmem:[#allocation3 + $0x70] sm:$0xff] %vm2648_vm8, %v2485_v39  ;;  %v3496_v24 = vld [vmem:[#allocation3 + $0x68] sm:$0xff] }
 0x3d5   :  { %3048 = vst.msk [vmem:[#allocation3 + $0x70] sm:$0xff] %vm3033_vm9, %v2870_v32  ;;  %6125 = vmatmul.msk.f32.gmra.mxu0 %vm3553_vm11, %v3496_v24  ;;  %v3960_v49 = vmax.f32 %v3771_v57, 0.0  ;;  %v7978_v32 = vld [vmem:[#allocation2 + $0x122] sm:$0xff] }
 0x3d6   :  { %v2376_v24 = vld [vmem:[#allocation2 + $0x2a0] sm:$0xff] }
 0x3d7   :  { %1777 = vrot.lane.b32.xlu2 %v7789_v37, %s6265_s0 }
 0x3d8   :  { %2108 = vrot.lane.b32.xlu1 %v7791_v51, %s6266_s29  ;;  %v2375_v51 = vld [vmem:[#allocation2 + $0x290] sm:$0xff] }
 0x3d9   :  { %v7869_v46 = vpop.permute.xlu2 %2871  ;;  %2494 = vrot.lane.b32.xlu0 %v2347_v61, %s6267_s30 }
 0x3da   :  { %v2153_v52 = vpop.permute.xlu1 %2152 }
 0x3db   :  { %2304 = vst.msk [vmem:[#allocation3 + $0x148] sm:$0xff] %vm2262_vm6, %v2153_v52  ;;  %v2539_v40 = vpop.permute.xlu0 %2538 }
 0x3dc   :  { %2690 = vst.msk [vmem:[#allocation3 + $0x148] sm:$0xff] %vm2648_vm8, %v2539_v40 }
 0x3dd   :  { %3075 = vst.msk [vmem:[#allocation3 + $0x148] sm:$0xff] %vm3033_vm9, %v7823_v55 }
 0x3df   :  { %2879 = vrot.lane.b32.xlu2 %v2732_v2, %s6269_s12 }
 0x3e0   :  { %2162 = vrot.lane.b32.xlu1 %v7795_v31, %s6266_s29  ;;  %v3773_v8 = vpop.f32.mrf.mxu0 }
 0x3e1   :  { %v3774_v27 = vadd.f32 %v7879_v21, %v3773_v8  ;;  %v7899_v3 = vpop.permute.xlu2 %2925  ;;  %2548 = vrot.lane.b32.xlu0 %v2374_v43, %s6267_s30 }
 0x3e2   :  { %v3255_v56 = vpop.permute.xlu1 %3254 }
 0x3e3   :  { %v3961_v30 = vmax.f32 %v3774_v27, 0.0  ;;  %v3309_v62 = vpop.permute.xlu0 %3308  ;;  %3433 = vst.msk [vmem:[#allocation3 + $0x70] sm:$0xff] %vm3418_vm10, %v3255_v56  ;;  %v8039_v56 = vld [vmem:[#allocation2 + $0x2a1] sm:$0xff] }
 0x3e4   :  { %3460 = vst.msk [vmem:[#allocation3 + $0x148] sm:$0xff] %vm3418_vm10, %v3309_v62  ;;  %v8042_v62 = vld [vmem:[#allocation2 + $0x12a] sm:$0xff] }
 0x3e5   :  { %v4065_v17 = vmax.f32 %v3959_v35, %v3961_v30 }
 0x3e7   :  { %v4113_v7 = vrot.slane %v4065_v17, 1  ;;  %2933 = vrot.lane.b32.xlu2 %v7906_v33, %s6269_s12 }
 0x3e8   :  { %3264 = vrot.lane.b32.xlu1 %v7908_v9, %s6268_s11 }
 0x3e9   :  { %v4145_v26 = vmax.f32 %v4065_v17, %v4113_v7  ;;  %v3776_v36 = vpop.f32.mrf.mxu0  ;;  %v7926_v44 = vpop.permute.xlu2 %1771  ;;  %3318 = vrot.lane.b32.xlu0 %v7913_v58, %s6268_s11 }
 0x3ea   :  { %v3777_v54 = vadd.f32 %v7879_v21, %v3776_v36  ;;  %v2101_v48 = vpop.permute.xlu1 %2100  ;;  %v3497_v0 = vld [vmem:[#allocation3 + $0x70] sm:$0xff]  ;;  %1921 = vst.msk [vmem:[#allocation3 + $0x158] sm:$0xff] %vm1877_vm5, %v7926_v44 }
 0x3eb   :  { %4163 = vst.msk [vmem:[#allocation4 + $0x11] sm:$0x1] %vm4162_vm14, %v4145_v26  ;;  %v2487_v25 = vpop.permute.xlu0 %2486  ;;  %6126 = vmatmul.msk.f32.gmra.mxu0 %vm3553_vm11, %v3497_v0  ;;  %v3524_v47 = vld [vmem:[#allocation3 + $0x148] sm:$0xff] }
 0x3ec   :  { %4180 = vst.msk [vmem:[#allocation4 + $0x10] sm:$0x4] %vm4179_vm15, %v4145_v26  ;;  %v3962_v1 = vmax.f32 %v3777_v54, 0.0  ;;  %6153 = vmatmul.msk.f32.vlgmr.msra.gmra.mxu3 %vm3553_vm11, %v3524_v47  ;;  %v2350_v54 = vld [vmem:[#allocation2 + $0x138] sm:$0xff] }
 0x3ed   :  { %4197 = vst.msk [vmem:[#allocation4 + $0xf] sm:$0x10] %vm4196_vm0, %v4145_v26  ;;  %v2735_v47 = vld [vmem:[#allocation2 + $0x139] sm:$0xff] }
 0x3ee   :  { %4214 = vst.msk [vmem:[#allocation4 + $0xe] sm:$0x40] %vm4213_vm1, %v4145_v26  ;;  %v4066_v4 = vmax.f32 %v3960_v49, %v3962_v1 }
 0x3ef   :  { %1779 = vrot.lane.b32.xlu2 %v7832_v6, %s6265_s0  ;;  %2278 = vst.msk [vmem:[#allocation3 + $0x78] sm:$0xff] %vm2262_vm6, %v2101_v48 }
 0x3f0   :  { %v4246_v29 = vrot.slane %v4066_v4, 1  ;;  %2110 = vrot.lane.b32.xlu1 %v7835_v34, %s6266_s29  ;;  %2664 = vst.msk [vmem:[#allocation3 + $0x78] sm:$0xff] %vm2648_vm8, %v2487_v25 }
 0x3f1   :  { %v7949_v50 = vpop.permute.xlu2 %2873  ;;  %2496 = vrot.lane.b32.xlu0 %v2348_v14, %s6267_s30  ;;  %3049 = vst.msk [vmem:[#allocation3 + $0x78] sm:$0xff] %vm3033_vm9, %v7869_v46 }
 0x3f2   :  { %v4278_v23 = vmax.f32 %v4066_v4, %v4246_v29  ;;  %v2155_v18 = vpop.permute.xlu1 %2154  ;;  %v3779_v31 = vpop.f32.mrf.mxu0  ;;  %v2377_v4 = vld [vmem:[#allocation2 + $0x2a8] sm:$0xff] }
 0x3f3   :  { %v2541_v37 = vpop.permute.xlu0 %2540  ;;  %2305 = vst.msk [vmem:[#allocation3 + $0x150] sm:$0xff] %vm2262_vm6, %v2155_v18  ;;  %v3780_v11 = vadd.f32 %v7879_v21, %v3779_v31  ;;  %v8089_v31 = vld [vmem:[#allocation2 + $0x13a] sm:$0xff] }
 0x3f4   :  { %4294 = vst.msk [vmem:[#allocation4 + $0x15] sm:$0x1] %vm4162_vm14, %v4278_v23 }
 0x3f5   :  { %4310 = vst.msk [vmem:[#allocation4 + $0x14] sm:$0x4] %vm4179_vm15, %v4278_v23 }
 0x3f6   :  { %4326 = vst.msk [vmem:[#allocation4 + $0x13] sm:$0x10] %vm4196_vm0, %v4278_v23 }
 0x3f7   :  { %4342 = vst.msk [vmem:[#allocation4 + $0x12] sm:$0x40] %vm4213_vm1, %v4278_v23  ;;  %2881 = vrot.lane.b32.xlu2 %v2733_v59, %s6269_s12 }
 0x3f8   :  { %2164 = vrot.lane.b32.xlu1 %v7838_v41, %s6266_s29  ;;  %2691 = vst.msk [vmem:[#allocation3 + $0x150] sm:$0xff] %vm2648_vm8, %v2541_v37  ;;  %v3963_v41 = vmax.f32 %v3780_v11, 0.0  ;;  %v2351_v11 = vld [vmem:[#allocation2 + $0x140] sm:$0xff] }
 0x3f9   :  { %v2928_v20 = vpop.permute.xlu2 %2927  ;;  %2550 = vrot.lane.b32.xlu0 %v2375_v51, %s6267_s30  ;;  %3076 = vst.msk [vmem:[#allocation3 + $0x150] sm:$0xff] %vm3033_vm9, %v7899_v3  ;;  %v8086_v51 = vld [vmem:[#allocation2 + $0x2a9] sm:$0xff] }
 0x3fa   :  { %v3257_v16 = vpop.permute.xlu1 %3256 }
 0x3fb   :  { %v3311_v45 = vpop.permute.xlu0 %3310  ;;  %3434 = vst.msk [vmem:[#allocation3 + $0x78] sm:$0xff] %vm3418_vm10, %v3257_v16 }
 0x3fc   :  { %3461 = vst.msk [vmem:[#allocation3 + $0x150] sm:$0xff] %vm3418_vm10, %v3311_v45 }
 0x3fd   :  { %v8024_v28 = vld [vmem:[#allocation4 + $0x10] sm:$0xff] }
 0x3fe   :  { %4375 = vst.msk [vmem:[#allocation5 + $0x18] sm:$0xff] %vm4023_vm12, %v8024_v28  ;;  %v4681_v17 = vld [vmem:[#allocation4 + $0x11] sm:$0xff] }
 0x3ff   :  { %2935 = vrot.lane.b32.xlu2 %v7974_v13, %s6269_s12  ;;  %4697 = vst.msk [vmem:[#allocation5 + $0x8] sm:$0xff] %vm4023_vm12, %v4681_v17 }
 0x400   :  { %3266 = vrot.lane.b32.xlu1 %v7978_v32, %s6268_s11  ;;  %v3782_v38 = vpop.f32.mrf.mxu0 }
 0x401   :  { %v1774_v53 = vpop.permute.xlu2 %1773  ;;  %3320 = vrot.lane.b32.xlu0 %v7982_v22, %s6268_s11  ;;  %v3783_v52 = vadd.f32 %v7879_v21, %v3782_v38 }
 0x402   :  { %v2103_v60 = vpop.permute.xlu1 %2102  ;;  %1922 = vst.msk [vmem:[#allocation3 + $0x160] sm:$0xff] %vm1877_vm5, %v1774_v53  ;;  %v3498_v61 = vld [vmem:[#allocation3 + $0x78] sm:$0xff] }
 0x403   :  { %v2489_v55 = vpop.permute.xlu0 %2488  ;;  %2279 = vst.msk [vmem:[#allocation3 + $0x80] sm:$0xff] %vm2262_vm6, %v2103_v60  ;;  %6127 = vmatmul.msk.f32.gmra.mxu0 %vm3553_vm11, %v3498_v61  ;;  %v3525_v40 = vld [vmem:[#allocation3 + $0x150] sm:$0xff]  ;;  %v3964_v35 = vmax.f32 %v3783_v52, 0.0 }
 0x404   :  { %2665 = vst.msk [vmem:[#allocation3 + $0x80] sm:$0xff] %vm2648_vm8, %v2489_v55  ;;  %6154 = vmatmul.msk.f32.gmra.mxu3 %vm3553_vm11, %v3525_v40 }
 0x405   :  { %3050 = vst.msk [vmem:[#allocation3 + $0x80] sm:$0xff] %vm3033_vm9, %v7949_v50 }
 0x407   :  { %1781 = vrot.lane.b32.xlu2 %v7906_v33, %s6265_s0  ;;  %v8045_v33 = vld [vmem:[#allocation2 + $0x2a2] sm:$0xff] }
 0x408   :  { %2112 = vrot.lane.b32.xlu1 %v7908_v9, %s6266_s29 }
 0x409   :  { %v3785_v15 = vpop.f32.mrf.mxu0  ;;  %v8012_v5 = vpop.permute.xlu2 %2875  ;;  %2498 = vrot.lane.b32.xlu0 %v2349_v19, %s6267_s30 }
 0x40a   :  { %v3786_v63 = vadd.f32 %v7879_v21, %v3785_v15  ;;  %v2157_v6 = vpop.permute.xlu1 %2156 }
 0x40b   :  { %v2543_v34 = vpop.permute.xlu0 %2542  ;;  %2306 = vst.msk [vmem:[#allocation3 + $0x158] sm:$0xff] %vm2262_vm6, %v2157_v6 }
 0x40c   :  { %v3965_v12 = vmax.f32 %v3786_v63, 0.0  ;;  %2692 = vst.msk [vmem:[#allocation3 + $0x158] sm:$0xff] %vm2648_vm8, %v2543_v34 }
 0x40d   :  { %3077 = vst.msk [vmem:[#allocation3 + $0x158] sm:$0xff] %vm3033_vm9, %v2928_v20  ;;  %v8091_v20 = vld [vmem:[#allocation2 + $0x2aa] sm:$0xff] }
 0x40e   :  { %v4069_v39 = vmax.f32 %v3963_v41, %v3965_v12  ;;  %v2736_v12 = vld [vmem:[#allocation2 + $0x141] sm:$0xff] }
 0x40f   :  { %2883 = vrot.lane.b32.xlu2 %v2734_v10, %s6269_s12  ;;  %v2378_v10 = vld [vmem:[#allocation2 + $0x2b8] sm:$0xff] }
 0x410   :  { %v4114_v46 = vrot.slane %v4069_v39, 1  ;;  %2166 = vrot.lane.b32.xlu1 %v7913_v58, %s6266_s29 }
 0x411   :  { %v2930_v2 = vpop.permute.xlu2 %2929  ;;  %2552 = vrot.lane.b32.xlu0 %v2376_v24, %s6267_s30 }
 0x412   :  { %v4146_v43 = vmax.f32 %v4069_v39, %v4114_v46  ;;  %v3259_v42 = vpop.permute.xlu1 %3258  ;;  %v3788_v8 = vpop.f32.mrf.mxu0 }
 0x413   :  { %3435 = vst.msk [vmem:[#allocation3 + $0x80] sm:$0xff] %vm3418_vm10, %v3259_v42  ;;  %v3789_v27 = vadd.f32 %v7879_v21, %v3788_v8  ;;  %v3313_v3 = vpop.permute.xlu0 %3312  ;;  %v8126_v42 = vld [vmem:[#allocation2 + $0x2b9] sm:$0xff] }
 0x414   :  { %4164 = vst.msk [vmem:[#allocation4 + $0x21] sm:$0x1] %vm4162_vm14, %v4146_v43 }
 0x415   :  { %4181 = vst.msk [vmem:[#allocation4 + $0x20] sm:$0x4] %vm4179_vm15, %v4146_v43  ;;  %v3966_v30 = vmax.f32 %v3789_v27, 0.0  ;;  %v8129_v27 = vld [vmem:[#allocation2 + $0x142] sm:$0xff] }
 0x416   :  { %4198 = vst.msk [vmem:[#allocation4 + $0x1f] sm:$0x10] %vm4196_vm0, %v4146_v43 }
 0x417   :  { %4215 = vst.msk [vmem:[#allocation4 + $0x1e] sm:$0x40] %vm4213_vm1, %v4146_v43  ;;  %v4070_v9 = vmax.f32 %v3964_v35, %v3966_v30  ;;  %2937 = vrot.lane.b32.xlu2 %v8039_v56, %s6269_s12 }
 0x418   :  { %3268 = vrot.lane.b32.xlu1 %v8042_v62, %s6268_s11  ;;  %3462 = vst.msk [vmem:[#allocation3 + $0x158] sm:$0xff] %vm3418_vm10, %v3313_v3  ;;  %v8131_v3 = vld [vmem:[#allocation2 + $0x2ba] sm:$0xff] }
 0x419   :  { %v4247_v58 = vrot.slane %v4070_v9, 1  ;;  %v1776_v7 = vpop.permute.xlu2 %1775  ;;  %3322 = vrot.lane.b32.xlu0 %v8045_v33, %s6268_s11 }
 0x41a   :  { %1923 = vst.msk [vmem:[#allocation3 + $0x168] sm:$0xff] %vm1877_vm5, %v1776_v7  ;;  %v2105_v57 = vpop.permute.xlu1 %2104  ;;  %v3499_v26 = vld [vmem:[#allocation3 + $0x80] sm:$0xff] }
 0x41b   :  { %v4279_v36 = vmax.f32 %v4070_v9, %v4247_v58  ;;  %2280 = vst.msk [vmem:[#allocation3 + $0x88] sm:$0xff] %vm2262_vm6, %v2105_v57  ;;  %6128 = vmatmul.msk.f32.gmra.mxu0 %vm3553_vm11, %v3499_v26  ;;  %v2491_v44 = vpop.permute.xlu0 %2490  ;;  %v2352_v58 = vld [vmem:[#allocation2 + $0x150] sm:$0xff] }
 0x41c   :  { %2666 = vst.msk [vmem:[#allocation3 + $0x88] sm:$0xff] %vm2648_vm8, %v2491_v44 }
 0x41d   :  { %4295 = vst.msk [vmem:[#allocation4 + $0x25] sm:$0x1] %vm4162_vm14, %v4279_v36 }
 0x41e   :  { %4311 = vst.msk [vmem:[#allocation4 + $0x24] sm:$0x4] %vm4179_vm15, %v4279_v36 }
 0x41f   :  { %4327 = vst.msk [vmem:[#allocation4 + $0x23] sm:$0x10] %vm4196_vm0, %v4279_v36  ;;  %1783 = vrot.lane.b32.xlu2 %v7974_v13, %s6265_s0  ;;  %v3526_v48 = vld [vmem:[#allocation3 + $0x158] sm:$0xff] }
 0x420   :  { %4343 = vst.msk [vmem:[#allocation4 + $0x22] sm:$0x40] %vm4213_vm1, %v4279_v36  ;;  %2114 = vrot.lane.b32.xlu1 %v7978_v32, %s6266_s29  ;;  %6155 = vmatmul.msk.f32.gmra.mxu3 %vm3553_vm11, %v3526_v48  ;;  %v3791_v25 = vpop.f32.mrf.mxu0  ;;  %v2737_v36 = vld [vmem:[#allocation2 + $0x151] sm:$0xff]  ;;  %v2379_v48 = vld [vmem:[#allocation2 + $0x2c0] sm:$0xff] }
 0x421   :  { %3051 = vst.msk [vmem:[#allocation3 + $0x88] sm:$0xff] %vm3033_vm9, %v8012_v5  ;;  %v2878_v0 = vpop.permute.xlu2 %2877  ;;  %2500 = vrot.lane.b32.xlu0 %v2350_v54, %s6267_s30  ;;  %v3792_v16 = vadd.f32 %v7879_v21, %v3791_v25 }
 0x422   :  { %v2159_v49 = vpop.permute.xlu1 %2158 }
 0x423   :  { %2307 = vst.msk [vmem:[#allocation3 + $0x160] sm:$0xff] %vm2262_vm6, %v2159_v49  ;;  %v2545_v1 = vpop.permute.xlu0 %2544  ;;  %v3967_v55 = vmax.f32 %v3792_v16, 0.0 }
 0x424   :  { %2693 = vst.msk [vmem:[#allocation3 + $0x160] sm:$0xff] %vm2648_vm8, %v2545_v1 }
 0x425   :  { %3078 = vst.msk [vmem:[#allocation3 + $0x160] sm:$0xff] %vm3033_vm9, %v2930_v2 }
 0x426   :  { %v8075_v14 = vld [vmem:[#allocation4 + $0x20] sm:$0xff] }
 0x427   :  { %2885 = vrot.lane.b32.xlu2 %v2735_v47, %s6269_s12  ;;  %4376 = vst.msk [vmem:[#allocation5 + $0x30] sm:$0xff] %vm4023_vm12, %v8075_v14  ;;  %v4682_v29 = vld [vmem:[#allocation4 + $0x21] sm:$0xff] }
 0x428   :  { %2168 = vrot.lane.b32.xlu1 %v7982_v22, %s6266_s29  ;;  %4698 = vst.msk [vmem:[#allocation5 + $0x20] sm:$0xff] %vm4023_vm12, %v4682_v29  ;;  %v5002_v50 = vld [vmem:[#allocation4 + $0x22] sm:$0xff]  ;;  %v8171_v29 = vld [vmem:[#allocation2 + $0x152] sm:$0xff] }
 0x429   :  { %v2932_v23 = vpop.permute.xlu2 %2931  ;;  %2554 = vrot.lane.b32.xlu0 %v2377_v4, %s6267_s30  ;;  %v3794_v18 = vpop.f32.mrf.mxu0  ;;  %5018 = vst.msk [vmem:[#allocation5 + $0x10] sm:$0xff] %vm4023_vm12, %v5002_v50  ;;  %v8168_v4 = vld [vmem:[#allocation2 + $0x2c1] sm:$0xff] }
 0x42a   :  { %v3261_v37 = vpop.permute.xlu1 %3260  ;;  %v3795_v39 = vadd.f32 %v7879_v21, %v3794_v18  ;;  %v8173_v50 = vld [vmem:[#allocation2 + $0x2c2] sm:$0xff] }
 0x42b   :  { %3436 = vst.msk [vmem:[#allocation3 + $0x88] sm:$0xff] %vm3418_vm10, %v3261_v37  ;;  %v3315_v59 = vpop.permute.xlu0 %3314 }
 0x42c   :  { %3463 = vst.msk [vmem:[#allocation3 + $0x160] sm:$0xff] %vm3418_vm10, %v3315_v59  ;;  %v3968_v40 = vmax.f32 %v3795_v39, 0.0 }
 0x42f   :  { %2939 = vrot.lane.b32.xlu2 %v8086_v51, %s6269_s12 }
 0x430   :  { %3270 = vrot.lane.b32.xlu1 %v8089_v31, %s6268_s11 }
 0x431   :  { %v1778_v45 = vpop.permute.xlu2 %1777  ;;  %3324 = vrot.lane.b32.xlu0 %v8091_v20, %s6268_s11 }
 0x432   :  { %1924 = vst.msk [vmem:[#allocation3 + $0x170] sm:$0xff] %vm1877_vm5, %v1778_v45  ;;  %v2107_v13 = vpop.permute.xlu1 %2106  ;;  %v3500_v32 = vld [vmem:[#allocation3 + $0x88] sm:$0xff]  ;;  %v3797_v22 = vpop.f32.mrf.mxu0 }
 0x433   :  { %2281 = vst.msk [vmem:[#allocation3 + $0x90] sm:$0xff] %vm2262_vm6, %v2107_v13  ;;  %6129 = vmatmul.msk.f32.gmra.mxu0 %vm3553_vm11, %v3500_v32  ;;  %v3798_v38 = vadd.f32 %v7879_v21, %v3797_v22  ;;  %v2493_v53 = vpop.permute.xlu0 %2492  ;;  %v3527_v60 = vld [vmem:[#allocation3 + $0x160] sm:$0xff] }
 0x434   :  { %2667 = vst.msk [vmem:[#allocation3 + $0x90] sm:$0xff] %vm2648_vm8, %v2493_v53  ;;  %6156 = vmatmul.msk.f32.gmra.mxu3 %vm3553_vm11, %v3527_v60 }
 0x435   :  { %v3969_v19 = vmax.f32 %v3798_v38, 0.0  ;;  %3052 = vst.msk [vmem:[#allocation3 + $0x90] sm:$0xff] %vm3033_vm9, %v2878_v0 }
 0x437   :  { %v4073_v15 = vmax.f32 %v3967_v55, %v3969_v19  ;;  %1785 = vrot.lane.b32.xlu2 %v8039_v56, %s6265_s0  ;;  %v2738_v55 = vld [vmem:[#allocation2 + $0x159] sm:$0xff] }
 0x438   :  { %2116 = vrot.lane.b32.xlu1 %v8042_v62, %s6266_s29 }
 0x439   :  { %v4115_v5 = vrot.slane %v4073_v15, 1  ;;  %v2880_v63 = vpop.permute.xlu2 %2879  ;;  %2502 = vrot.lane.b32.xlu0 %v2351_v11, %s6267_s30  ;;  %v2380_v11 = vld [vmem:[#allocation2 + $0x2d0] sm:$0xff] }
 0x43a   :  { %v2161_v6 = vpop.permute.xlu1 %2160 }
 0x43b   :  { %v4147_v34 = vmax.f32 %v4073_v15, %v4115_v5  ;;  %2308 = vst.msk [vmem:[#allocation3 + $0x168] sm:$0xff] %vm2262_vm6, %v2161_v6  ;;  %v2547_v41 = vpop.permute.xlu0 %2546 }
 0x43c   :  { %2694 = vst.msk [vmem:[#allocation3 + $0x168] sm:$0xff] %vm2648_vm8, %v2547_v41  ;;  %v8205_v41 = vld [vmem:[#allocation2 + $0x2d1] sm:$0xff] }
 0x43d   :  { %4165 = vst.msk [vmem:[#allocation4 + $0x31] sm:$0x1] %vm4162_vm14, %v4147_v34 }
 0x43e   :  { %4182 = vst.msk [vmem:[#allocation4 + $0x30] sm:$0x4] %vm4179_vm15, %v4147_v34 }
 0x43f   :  { %4199 = vst.msk [vmem:[#allocation4 + $0x2f] sm:$0x10] %vm4196_vm0, %v4147_v34  ;;  %2887 = vrot.lane.b32.xlu2 %v2736_v12, %s6269_s12  ;;  %v8208_v12 = vld [vmem:[#allocation2 + $0x15a] sm:$0xff] }
 0x440   :  { %4216 = vst.msk [vmem:[#allocation4 + $0x2e] sm:$0x40] %vm4213_vm1, %v4147_v34  ;;  %2170 = vrot.lane.b32.xlu1 %v8045_v33, %s6266_s29  ;;  %v3800_v24 = vpop.f32.mrf.mxu0 }
 0x441   :  { %v3801_v61 = vadd.f32 %v7879_v21, %v3800_v24  ;;  %3079 = vst.msk [vmem:[#allocation3 + $0x168] sm:$0xff] %vm3033_vm9, %v2932_v23  ;;  %v2934_v46 = vpop.permute.xlu2 %2933  ;;  %2556 = vrot.lane.b32.xlu0 %v2378_v10, %s6267_s30  ;;  %v8211_v10 = vld [vmem:[#allocation2 + $0x2d2] sm:$0xff] }
 0x442   :  { %v3263_v52 = vpop.permute.xlu1 %3262 }
 0x443   :  { %v3970_v2 = vmax.f32 %v3801_v61, 0.0  ;;  %3437 = vst.msk [vmem:[#allocation3 + $0x90] sm:$0xff] %vm3418_vm10, %v3263_v52  ;;  %v3317_v43 = vpop.permute.xlu0 %3316  ;;  %v2354_v52 = vld [vmem:[#allocation2 + $0x168] sm:$0xff] }
 0x444   :  { %3464 = vst.msk [vmem:[#allocation3 + $0x168] sm:$0xff] %vm3418_vm10, %v3317_v43 }
 0x445   :  { %v4074_v8 = vmax.f32 %v3968_v40, %v3970_v2 }
 0x447   :  { %v4248_v56 = vrot.slane %v4074_v8, 1  ;;  %2941 = vrot.lane.b32.xlu2 %v8126_v42, %s6269_s12 }
 0x448   :  { %3272 = vrot.lane.b32.xlu1 %v8129_v27, %s6268_s11 }
 0x449   :  { %v4280_v35 = vmax.f32 %v4074_v8, %v4248_v56  ;;  %v1780_v30 = vpop.permute.xlu2 %1779  ;;  %3326 = vrot.lane.b32.xlu0 %v8131_v3, %s6268_s11  ;;  %v3803_v25 = vpop.f32.mrf.mxu0  ;;  %v2739_v8 = vld [vmem:[#allocation2 + $0x169] sm:$0xff] }
 0x44a   :  { %1925 = vst.msk [vmem:[#allocation3 + $0x178] sm:$0xff] %vm1877_vm5, %v1780_v30  ;;  %v2109_v62 = vpop.permute.xlu1 %2108  ;;  %v3501_v33 = vld [vmem:[#allocation3 + $0x90] sm:$0xff]  ;;  %v3804_v16 = vadd.f32 %v7879_v21, %v3803_v25  ;;  %v8240_v30 = vld [vmem:[#allocation2 + $0x2d9] sm:$0xff] }
 0x44b   :  { %4296 = vst.msk [vmem:[#allocation4 + $0x35] sm:$0x1] %vm4162_vm14, %v4280_v35  ;;  %6130 = vmatmul.msk.f32.gmra.mxu0 %vm3553_vm11, %v3501_v33  ;;  %v2495_v17 = vpop.permute.xlu0 %2494  ;;  %v3528_v9 = vld [vmem:[#allocation3 + $0x168] sm:$0xff] }
 0x44c   :  { %4312 = vst.msk [vmem:[#allocation4 + $0x34] sm:$0x4] %vm4179_vm15, %v4280_v35  ;;  %6157 = vmatmul.msk.f32.gmra.mxu3 %vm3553_vm11, %v3528_v9  ;;  %v3971_v53 = vmax.f32 %v3804_v16, 0.0  ;;  %v8245_v33 = vld [vmem:[#allocation2 + $0x16a] sm:$0xff]  ;;  %v8247_v9 = vld [vmem:[#allocation2 + $0x2da] sm:$0xff] }
 0x44d   :  { %4328 = vst.msk [vmem:[#allocation4 + $0x33] sm:$0x10] %vm4196_vm0, %v4280_v35 }
 0x44e   :  { %4344 = vst.msk [vmem:[#allocation4 + $0x32] sm:$0x40] %vm4213_vm1, %v4280_v35 }
 0x44f   :  { %2282 = vst.msk [vmem:[#allocation3 + $0x98] sm:$0xff] %vm2262_vm6, %v2109_v62  ;;  %1787 = vrot.lane.b32.xlu2 %v8086_v51, %s6265_s0 }
 0x450   :  { %2118 = vrot.lane.b32.xlu1 %v8089_v31, %s6266_s29  ;;  %2668 = vst.msk [vmem:[#allocation3 + $0x98] sm:$0xff] %vm2648_vm8, %v2495_v17 }
 0x451   :  { %3053 = vst.msk [vmem:[#allocation3 + $0x98] sm:$0xff] %vm3033_vm9, %v2880_v63  ;;  %v2882_v7 = vpop.permute.xlu2 %2881  ;;  %2504 = vrot.lane.b32.xlu0 %v2352_v58, %s6267_s30 }
 0x452   :  { %v2163_v57 = vpop.permute.xlu1 %2162  ;;  %v8179_v23 = vpop.f32.mrf.mxu0 }
 0x453   :  { %2309 = vst.msk [vmem:[#allocation3 + $0x170] sm:$0xff] %vm2262_vm6, %v2163_v57  ;;  %v2549_v26 = vpop.permute.xlu0 %2548  ;;  %v3807_v62 = vadd.f32 %v7879_v21, %v8179_v23 }
 0x454   :  { %2695 = vst.msk [vmem:[#allocation3 + $0x170] sm:$0xff] %vm2648_vm8, %v2549_v26  ;;  %v8156_v44 = vld [vmem:[#allocation4 + $0x30] sm:$0xff] }
 0x455   :  { %3080 = vst.msk [vmem:[#allocation3 + $0x170] sm:$0xff] %vm3033_vm9, %v2934_v46  ;;  %v4683_v54 = vld [vmem:[#allocation4 + $0x31] sm:$0xff] }
 0x456   :  { %4377 = vst.msk [vmem:[#allocation5 + $0x48] sm:$0xff] %vm4023_vm12, %v8156_v44  ;;  %v5003_v0 = vld [vmem:[#allocation4 + $0x32] sm:$0xff] }
 0x457   :  { %2889 = vrot.lane.b32.xlu2 %v2737_v36, %s6269_s12  ;;  %4699 = vst.msk [vmem:[#allocation5 + $0x38] sm:$0xff] %vm4023_vm12, %v4683_v54 }
 0x458   :  { %2172 = vrot.lane.b32.xlu1 %v8091_v20, %s6266_s29  ;;  %5019 = vst.msk [vmem:[#allocation5 + $0x28] sm:$0xff] %vm4023_vm12, %v5003_v0  ;;  %v2353_v20 = vld [vmem:[#allocation2 + $0x158] sm:$0xff] }
 0x459   :  { %v2936_v49 = vpop.permute.xlu2 %2935  ;;  %2558 = vrot.lane.b32.xlu0 %v2379_v48, %s6267_s30 }
 0x45a   :  { %v3265_v1 = vpop.permute.xlu1 %3264 }
 0x45b   :  { %3438 = vst.msk [vmem:[#allocation3 + $0x98] sm:$0xff] %vm3418_vm10, %v3265_v1  ;;  %v3319_v47 = vpop.permute.xlu0 %3318 }
 0x45c   :  { %3465 = vst.msk [vmem:[#allocation3 + $0x170] sm:$0xff] %vm3418_vm10, %v3319_v47  ;;  %v2355_v47 = vld [vmem:[#allocation2 + $0x170] sm:$0xff] }
 0x45f   :  { %2943 = vrot.lane.b32.xlu2 %v8168_v4, %s6269_s12 }
 0x460   :  { %3274 = vrot.lane.b32.xlu1 %v8171_v29, %s6268_s11 }
 0x461   :  { %v1782_v18 = vpop.permute.xlu2 %1781  ;;  %3328 = vrot.lane.b32.xlu0 %v8173_v50, %s6268_s11 }
 0x462   :  { %1926 = vst.msk [vmem:[#allocation3 + $0x180] sm:$0xff] %vm1877_vm5, %v1782_v18  ;;  %v2111_v37 = vpop.permute.xlu1 %2110  ;;  %v3502_v59 = vld [vmem:[#allocation3 + $0x98] sm:$0xff] }
 0x463   :  { %2283 = vst.msk [vmem:[#allocation3 + $0xa0] sm:$0xff] %vm2262_vm6, %v2111_v37  ;;  %6131 = vmatmul.msk.f32.gmra.mxu0 %vm3553_vm11, %v3502_v59  ;;  %v2497_v51 = vpop.permute.xlu0 %2496  ;;  %v3529_v31 = vld [vmem:[#allocation3 + $0x170] sm:$0xff]  ;;  %v2382_v59 = vld [vmem:[#allocation2 + $0x2e8] sm:$0xff] }
 0x464   :  { %2669 = vst.msk [vmem:[#allocation3 + $0xa0] sm:$0xff] %vm2648_vm8, %v2497_v51  ;;  %6158 = vmatmul.msk.f32.gmra.mxu3 %vm3553_vm11, %v3529_v31  ;;  %v2740_v37 = vld [vmem:[#allocation2 + $0x171] sm:$0xff] }
 0x465   :  { %3054 = vst.msk [vmem:[#allocation3 + $0xa0] sm:$0xff] %vm3033_vm9, %v2882_v7  ;;  %v3972_v7 = vmax.f32 %v3807_v62, 0.0 }
 0x467   :  { %1789 = vrot.lane.b32.xlu2 %v8126_v42, %s6265_s0 }
 0x468   :  { %2120 = vrot.lane.b32.xlu1 %v8129_v27, %s6266_s29  ;;  %v3809_v45 = vpop.f32.mrf.mxu0  ;;  %v2381_v27 = vld [vmem:[#allocation2 + $0x2d8] sm:$0xff] }
 0x469   :  { %v2884_v13 = vpop.permute.xlu2 %2883  ;;  %2506 = vrot.lane.b32.xlu0 %v2353_v20, %s6267_s30  ;;  %v3810_v32 = vadd.f32 %v7879_v21, %v3809_v45 }
 0x46a   :  { %v2165_v22 = vpop.permute.xlu1 %2164 }
 0x46b   :  { %2310 = vst.msk [vmem:[#allocation3 + $0x178] sm:$0xff] %vm2262_vm6, %v2165_v22  ;;  %v2551_v38 = vpop.permute.xlu0 %2550  ;;  %v3973_v60 = vmax.f32 %v3810_v32, 0.0  ;;  %v8285_v22 = vld [vmem:[#allocation2 + $0x2e9] sm:$0xff] }
 0x46c   :  { %2696 = vst.msk [vmem:[#allocation3 + $0x178] sm:$0xff] %vm2648_vm8, %v2551_v38 }
 0x46d   :  { %3081 = vst.msk [vmem:[#allocation3 + $0x178] sm:$0xff] %vm3033_vm9, %v2936_v49  ;;  %v4077_v19 = vmax.f32 %v3971_v53, %v3973_v60  ;;  %v8288_v60 = vld [vmem:[#allocation2 + $0x172] sm:$0xff] }
 0x46f   :  { %2891 = vrot.lane.b32.xlu2 %v2738_v55, %s6269_s12  ;;  %v4116_v15 = vrot.slane %v4077_v19, 1  ;;  %v3890_v48 = vpop.f32.mrf.mxu3 }
 0x470   :  { %2174 = vrot.lane.b32.xlu1 %v8131_v3, %s6266_s29  ;;  %v3891_v31 = vadd.f32 %v7879_v21, %v3890_v48 }
 0x471   :  { %v2938_v5 = vpop.permute.xlu2 %2937  ;;  %2560 = vrot.lane.b32.xlu0 %v2380_v11, %s6267_s30  ;;  %v4148_v63 = vmax.f32 %v4077_v19, %v4116_v15  ;;  %v8292_v11 = vld [vmem:[#allocation2 + $0x2ea] sm:$0xff] }
 0x472   :  { %v3267_v6 = vpop.permute.xlu1 %3266  ;;  %v4000_v55 = vmax.f32 %v3891_v31, 0.0  ;;  %v8373_v31 = vld [vmem:[#allocation2 + $0x302] sm:$0xff] }
 0x473   :  { %3439 = vst.msk [vmem:[#allocation3 + $0xa0] sm:$0xff] %vm3418_vm10, %v3267_v6  ;;  %v3321_v34 = vpop.permute.xlu0 %3320 }
 0x474   :  { %4166 = vst.msk [vmem:[#allocation4 + $0x41] sm:$0x1] %vm4162_vm14, %v4148_v63 }
 0x475   :  { %4183 = vst.msk [vmem:[#allocation4 + $0x40] sm:$0x4] %vm4179_vm15, %v4148_v63 }
 0x476   :  { %4200 = vst.msk [vmem:[#allocation4 + $0x3f] sm:$0x10] %vm4196_vm0, %v4148_v63 }
 0x477   :  { %4217 = vst.msk [vmem:[#allocation4 + $0x3e] sm:$0x40] %vm4213_vm1, %v4148_v63  ;;  %2945 = vrot.lane.b32.xlu2 %v8205_v41, %s6269_s12 }
 0x478   :  { %3276 = vrot.lane.b32.xlu1 %v8208_v12, %s6268_s11  ;;  %3466 = vst.msk [vmem:[#allocation3 + $0x178] sm:$0xff] %vm3418_vm10, %v3321_v34 }
 0x479   :  { %v1784_v39 = vpop.permute.xlu2 %1783  ;;  %3330 = vrot.lane.b32.xlu0 %v8211_v10, %s6268_s11 }
 0x47a   :  { %1927 = vst.msk [vmem:[#allocation3 + $0x188] sm:$0xff] %vm1877_vm5, %v1784_v39  ;;  %v2113_v24 = vpop.permute.xlu1 %2112  ;;  %v3503_v61 = vld [vmem:[#allocation3 + $0xa0] sm:$0xff] }
 0x47b   :  { %2284 = vst.msk [vmem:[#allocation3 + $0xa8] sm:$0xff] %vm2262_vm6, %v2113_v24  ;;  %6132 = vmatmul.msk.f32.gmra.mxu0 %vm3553_vm11, %v3503_v61  ;;  %v2499_v46 = vpop.permute.xlu0 %2498 }
 0x47c   :  { %2670 = vst.msk [vmem:[#allocation3 + $0xa8] sm:$0xff] %vm2648_vm8, %v2499_v46  ;;  %v2741_v46 = vld [vmem:[#allocation2 + $0x181] sm:$0xff] }
 0x47d   :  { %3055 = vst.msk [vmem:[#allocation3 + $0xa8] sm:$0xff] %vm3033_vm9, %v2884_v13 }
 0x47f   :  { %1791 = vrot.lane.b32.xlu2 %v8168_v4, %s6265_s0  ;;  %v3530_v40 = vld [vmem:[#allocation3 + $0x178] sm:$0xff] }
 0x480   :  { %2122 = vrot.lane.b32.xlu1 %v8171_v29, %s6266_s29  ;;  %6159 = vmatmul.msk.f32.gmra.mxu3 %vm3553_vm11, %v3530_v40  ;;  %v3812_v17 = vpop.f32.mrf.mxu0 }
 0x481   :  { %v2886_v2 = vpop.permute.xlu2 %2885  ;;  %2508 = vrot.lane.b32.xlu0 %v2354_v52, %s6267_s30  ;;  %v3813_v58 = vadd.f32 %v7879_v21, %v3812_v17  ;;  %v2383_v52 = vld [vmem:[#allocation2 + $0x2f0] sm:$0xff] }
 0x482   :  { %v2167_v43 = vpop.permute.xlu1 %2166 }
 0x483   :  { %2311 = vst.msk [vmem:[#allocation3 + $0x180] sm:$0xff] %vm2262_vm6, %v2167_v43  ;;  %v2553_v42 = vpop.permute.xlu0 %2552  ;;  %v3974_v57 = vmax.f32 %v3813_v58, 0.0  ;;  %v8349_v58 = vld [vmem:[%s10131_s2] ss:$0 sm:$0xff] }
 0x484   :  { %2697 = vst.msk [vmem:[#allocation3 + $0x180] sm:$0xff] %vm2648_vm8, %v2553_v42 }
 0x485   :  { %3082 = vst.msk [vmem:[#allocation3 + $0x180] sm:$0xff] %vm3033_vm9, %v2938_v5  ;;  %v4078_v0 = vmax.f32 %v3972_v7, %v3974_v57 }
 0x487   :  { %2893 = vrot.lane.b32.xlu2 %v2739_v8, %s6269_s12  ;;  %v4249_v1 = vrot.slane %v4078_v0, 1  ;;  %v8270_v23 = vpop.f32.mrf.mxu3  ;;  %v8325_v8 = vld [vmem:[#allocation2 + $0x2f1] sm:$0xff] }
 0x488   :  { %2176 = vrot.lane.b32.xlu1 %v8173_v50, %s6266_s29 }
 0x489   :  { %v2940_v3 = vpop.permute.xlu2 %2939  ;;  %2562 = vrot.lane.b32.xlu0 %v2381_v27, %s6267_s30  ;;  %v4281_v4 = vmax.f32 %v4078_v0, %v4249_v1  ;;  %v8328_v27 = vld [vmem:[#allocation2 + $0x182] sm:$0xff] }
 0x48a   :  { %v3269_v56 = vpop.permute.xlu1 %3268 }
 0x48b   :  { %3440 = vst.msk [vmem:[#allocation3 + $0xa8] sm:$0xff] %vm3418_vm10, %v3269_v56  ;;  %v3323_v35 = vpop.permute.xlu0 %3322 }
 0x48c   :  { %3467 = vst.msk [vmem:[#allocation3 + $0x180] sm:$0xff] %vm3418_vm10, %v3323_v35 }
 0x48d   :  { %4297 = vst.msk [vmem:[#allocation4 + $0x45] sm:$0x1] %vm4162_vm14, %v4281_v4 }
 0x48e   :  { %4313 = vst.msk [vmem:[#allocation4 + $0x44] sm:$0x4] %vm4179_vm15, %v4281_v4 }
 0x48f   :  { %2947 = vrot.lane.b32.xlu2 %v8240_v30, %s6269_s12  ;;  %4329 = vst.msk [vmem:[#allocation4 + $0x43] sm:$0x10] %vm4196_vm0, %v4281_v4 }
 0x490   :  { %3278 = vrot.lane.b32.xlu1 %v8245_v33, %s6268_s11  ;;  %4345 = vst.msk [vmem:[#allocation4 + $0x42] sm:$0x40] %vm4213_vm1, %v4281_v4 }
 0x491   :  { %v1786_v26 = vpop.permute.xlu2 %1785  ;;  %3332 = vrot.lane.b32.xlu0 %v8247_v9, %s6268_s11 }
 0x492   :  { %1928 = vst.msk [vmem:[#allocation3 + $0x190] sm:$0xff] %vm1877_vm5, %v1786_v26  ;;  %v2115_v36 = vpop.permute.xlu1 %2114  ;;  %v3504_v54 = vld [vmem:[#allocation3 + $0xa8] sm:$0xff] }
 0x493   :  { %2285 = vst.msk [vmem:[#allocation3 + $0xb0] sm:$0xff] %vm2262_vm6, %v2115_v36  ;;  %6133 = vmatmul.msk.f32.gmra.mxu0 %vm3553_vm11, %v3504_v54  ;;  %v2501_v25 = vpop.permute.xlu0 %2500  ;;  %v3531_v49 = vld [vmem:[#allocation3 + $0x180] sm:$0xff] }
 0x494   :  { %2671 = vst.msk [vmem:[#allocation3 + $0xb0] sm:$0xff] %vm2648_vm8, %v2501_v25  ;;  %6160 = vmatmul.msk.f32.gmra.mxu3 %vm3553_vm11, %v3531_v49  ;;  %v2742_v49 = vld [vmem:[#allocation2 + $0x189] sm:$0xff] }
 0x495   :  { %3056 = vst.msk [vmem:[#allocation3 + $0xb0] sm:$0xff] %vm3033_vm9, %v2886_v2 }
 0x496   :  { %v8281_v16 = vld [vmem:[#allocation4 + $0x40] sm:$0xff] }
 0x497   :  { %1793 = vrot.lane.b32.xlu2 %v8205_v41, %s6265_s0  ;;  %v4684_v38 = vld [vmem:[#allocation4 + $0x41] sm:$0xff]  ;;  %4378 = vst.msk [vmem:[#allocation5 + $0x60] sm:$0xff] %vm4023_vm12, %v8281_v16 }
 0x498   :  { %2124 = vrot.lane.b32.xlu1 %v8208_v12, %s6266_s29  ;;  %v5004_v53 = vld [vmem:[#allocation4 + $0x42] sm:$0xff]  ;;  %4700 = vst.msk [vmem:[#allocation5 + $0x50] sm:$0xff] %vm4023_vm12, %v4684_v38  ;;  %v3815_v40 = vpop.f32.mrf.mxu0  ;;  %v2358_v38 = vld [vmem:[#allocation2 + $0x198] sm:$0xff] }
 0x499   :  { %v2888_v29 = vpop.permute.xlu2 %2887  ;;  %2510 = vrot.lane.b32.xlu0 %v2355_v47, %s6267_s30  ;;  %5020 = vst.msk [vmem:[#allocation5 + $0x40] sm:$0xff] %vm4023_vm12, %v5004_v53  ;;  %v3816_v7 = vadd.f32 %v8349_v58, %v3815_v40  ;;  %v2384_v47 = vld [vmem:[#allocation2 + $0x300] sm:$0xff] }
 0x49a   :  { %v2169_v50 = vpop.permute.xlu1 %2168 }
 0x49b   :  { %v2555_v18 = vpop.permute.xlu0 %2554  ;;  %2312 = vst.msk [vmem:[#allocation3 + $0x188] sm:$0xff] %vm2262_vm6, %v2169_v50  ;;  %v3975_v48 = vmax.f32 %v3816_v7, 0.0  ;;  %v2359_v7 = vld [vmem:[#allocation2 + $0x1a0] sm:$0xff] }
 0x49c   :  { %2698 = vst.msk [vmem:[#allocation3 + $0x188] sm:$0xff] %vm2648_vm8, %v2555_v18 }
 0x49d   :  { %3083 = vst.msk [vmem:[#allocation3 + $0x188] sm:$0xff] %vm3033_vm9, %v2940_v3  ;;  %v8330_v3 = vld [vmem:[#allocation2 + $0x2f2] sm:$0xff] }
 0x49f   :  { %2895 = vrot.lane.b32.xlu2 %v2740_v37, %s6269_s12 }
 0x4a0   :  { %2178 = vrot.lane.b32.xlu1 %v8211_v10, %s6266_s29  ;;  %v2356_v10 = vld [vmem:[#allocation2 + $0x180] sm:$0xff] }
 0x4a1   :  { %v2942_v51 = vpop.permute.xlu2 %2941  ;;  %2564 = vrot.lane.b32.xlu0 %v2382_v59, %s6267_s30  ;;  %v8367_v59 = vld [vmem:[#allocation2 + $0x301] sm:$0xff] }
 0x4a2   :  { %v3271_v20 = vpop.permute.xlu1 %3270 }
 0x4a3   :  { %3441 = vst.msk [vmem:[#allocation3 + $0xb0] sm:$0xff] %vm3418_vm10, %v3271_v20  ;;  %v3896_v45 = vpop.f32.mrf.mxu3  ;;  %v3325_v13 = vpop.permute.xlu0 %3324 }
 0x4a4   :  { %v3897_v32 = vadd.f32 %v7879_v21, %v3896_v45  ;;  %3468 = vst.msk [vmem:[#allocation3 + $0x188] sm:$0xff] %vm3418_vm10, %v3325_v13 }
 0x4a6   :  { %v4002_v19 = vmax.f32 %v3897_v32, 0.0 }
 0x4a7   :  { %2949 = vrot.lane.b32.xlu2 %v8285_v22, %s6269_s12 }
 0x4a8   :  { %v4076_v21 = vmax.f32 %v4000_v55, %v4002_v19  ;;  %3280 = vrot.lane.b32.xlu1 %v8288_v60, %s6268_s11 }
 0x4a9   :  { %v1788_v15 = vpop.permute.xlu2 %1787  ;;  %3334 = vrot.lane.b32.xlu0 %v8292_v11, %s6268_s11 }
 0x4aa   :  { %v4256_v5 = vrot.slane %v4076_v21, 1  ;;  %1929 = vst.msk [vmem:[#allocation3 + $0x198] sm:$0xff] %vm1877_vm5, %v1788_v15  ;;  %v2117_v63 = vpop.permute.xlu1 %2116  ;;  %v3505_v6 = vld [vmem:[#allocation3 + $0xb0] sm:$0xff] }
 0x4ab   :  { %2286 = vst.msk [vmem:[#allocation3 + $0xb8] sm:$0xff] %vm2262_vm6, %v2117_v63  ;;  %6134 = vmatmul.msk.f32.gmra.mxu0 %vm3553_vm11, %v3505_v6  ;;  %v2503_v34 = vpop.permute.xlu0 %2502  ;;  %v3532_v41 = vld [vmem:[#allocation3 + $0x188] sm:$0xff] }
 0x4ac   :  { %v4288_v12 = vmax.f32 %v4076_v21, %v4256_v5  ;;  %2672 = vst.msk [vmem:[#allocation3 + $0xb8] sm:$0xff] %vm2648_vm8, %v2503_v34  ;;  %6161 = vmatmul.msk.f32.gmra.mxu3 %vm3553_vm11, %v3532_v41  ;;  %v2743_v34 = vld [vmem:[#allocation2 + $0x199] sm:$0xff] }
 0x4ad   :  { %3057 = vst.msk [vmem:[#allocation3 + $0xb8] sm:$0xff] %vm3033_vm9, %v2888_v29 }
 0x4ae   :  { %4304 = vst.msk [vmem:[#allocation4 + $0xd5] sm:$0x1] %vm4162_vm14, %v4288_v12 }
 0x4af   :  { %4320 = vst.msk [vmem:[#allocation4 + $0xd4] sm:$0x4] %vm4179_vm15, %v4288_v12  ;;  %1795 = vrot.lane.b32.xlu2 %v8240_v30, %s6265_s0 }
 0x4b0   :  { %4336 = vst.msk [vmem:[#allocation4 + $0xd3] sm:$0x10] %vm4196_vm0, %v4288_v12  ;;  %2126 = vrot.lane.b32.xlu1 %v8245_v33, %s6266_s29  ;;  %v8334_v56 = vpop.f32.mrf.mxu0 }
 0x4b1   :  { %4352 = vst.msk [vmem:[#allocation4 + $0xd2] sm:$0x40] %vm4213_vm1, %v4288_v12  ;;  %v2890_v39 = vpop.permute.xlu2 %2889  ;;  %2512 = vrot.lane.b32.xlu0 %v2356_v10, %s6267_s30  ;;  %v3819_v53 = vadd.f32 %v8349_v58, %v8334_v56  ;;  %v2385_v10 = vld [vmem:[#allocation2 + $0x308] sm:$0xff] }
 0x4b2   :  { %v2171_v24 = vpop.permute.xlu1 %2170 }
 0x4b3   :  { %2313 = vst.msk [vmem:[#allocation3 + $0x190] sm:$0xff] %vm2262_vm6, %v2171_v24  ;;  %v2557_v61 = vpop.permute.xlu0 %2556  ;;  %v3976_v5 = vmax.f32 %v3819_v53, 0.0 }
 0x4b4   :  { %2699 = vst.msk [vmem:[#allocation3 + $0x190] sm:$0xff] %vm2648_vm8, %v2557_v61 }
 0x4b5   :  { %3084 = vst.msk [vmem:[#allocation3 + $0x190] sm:$0xff] %vm3033_vm9, %v2942_v51  ;;  %v8370_v51 = vld [vmem:[#allocation2 + $0x18a] sm:$0xff] }
 0x4b7   :  { %2897 = vrot.lane.b32.xlu2 %v2741_v46, %s6269_s12  ;;  %v3899_v20 = vpop.f32.mrf.mxu3 }
 0x4b8   :  { %2180 = vrot.lane.b32.xlu1 %v8247_v9, %s6266_s29  ;;  %v2357_v9 = vld [vmem:[#allocation2 + $0x188] sm:$0xff]  ;;  %v3900_v12 = vadd.f32 %v8349_v58, %v3899_v20 }
 0x4b9   :  { %v2944_v2 = vpop.permute.xlu2 %2943  ;;  %2566 = vrot.lane.b32.xlu0 %v2383_v52, %s6267_s30 }
 0x4ba   :  { %v3273_v43 = vpop.permute.xlu1 %3272  ;;  %v4003_v40 = vmax.f32 %v3900_v12, 0.0 }
 0x4bb   :  { %3442 = vst.msk [vmem:[#allocation3 + $0xb8] sm:$0xff] %vm3418_vm10, %v3273_v43  ;;  %v3327_v42 = vpop.permute.xlu0 %3326 }
 0x4bc   :  { %3469 = vst.msk [vmem:[#allocation3 + $0x190] sm:$0xff] %vm3418_vm10, %v3327_v42 }
 0x4bf   :  { %2951 = vrot.lane.b32.xlu2 %v8325_v8, %s6269_s12 }
 0x4c0   :  { %3282 = vrot.lane.b32.xlu1 %v8328_v27, %s6268_s11 }
 0x4c1   :  { %v1790_v35 = vpop.permute.xlu2 %1789  ;;  %3336 = vrot.lane.b32.xlu0 %v8330_v3, %s6268_s11 }
 0x4c2   :  { %1930 = vst.msk [vmem:[#allocation3 + $0x1a0] sm:$0xff] %vm1877_vm5, %v1790_v35  ;;  %v2119_v30 = vpop.permute.xlu1 %2118  ;;  %v3506_v62 = vld [vmem:[#allocation3 + $0xb8] sm:$0xff]  ;;  %v8414_v35 = vld [vmem:[#allocation2 + $0x30a] sm:$0xff] }
 0x4c3   :  { %2287 = vst.msk [vmem:[#allocation3 + $0xc0] sm:$0xff] %vm2262_vm6, %v2119_v30  ;;  %6135 = vmatmul.msk.f32.gmra.mxu0 %vm3553_vm11, %v3506_v62  ;;  %v2505_v33 = vpop.permute.xlu0 %2504  ;;  %v3533_v17 = vld [vmem:[#allocation3 + $0x190] sm:$0xff] }
 0x4c4   :  { %2673 = vst.msk [vmem:[#allocation3 + $0xc0] sm:$0xff] %vm2648_vm8, %v2505_v33  ;;  %6162 = vmatmul.msk.f32.gmra.mxu3 %vm3553_vm11, %v3533_v17 }
 0x4c5   :  { %3058 = vst.msk [vmem:[#allocation3 + $0xc0] sm:$0xff] %vm3033_vm9, %v2890_v39 }
 0x4c7   :  { %1797 = vrot.lane.b32.xlu2 %v8285_v22, %s6265_s0 }
 0x4c8   :  { %2128 = vrot.lane.b32.xlu1 %v8288_v60, %s6266_s29  ;;  %v3821_v57 = vpop.f32.mrf.mxu0 }
 0x4c9   :  { %v3822_v26 = vadd.f32 %v8349_v58, %v3821_v57  ;;  %v2892_v36 = vpop.permute.xlu2 %2891  ;;  %2514 = vrot.lane.b32.xlu0 %v2357_v9, %s6267_s30 }
 0x4ca   :  { %v2173_v54 = vpop.permute.xlu1 %2172 }
 0x4cb   :  { %v3977_v0 = vmax.f32 %v3822_v26, 0.0  ;;  %2314 = vst.msk [vmem:[#allocation3 + $0x198] sm:$0xff] %vm2262_vm6, %v2173_v54  ;;  %v2559_v25 = vpop.permute.xlu0 %2558 }
 0x4cc   :  { %2700 = vst.msk [vmem:[#allocation3 + $0x198] sm:$0xff] %vm2648_vm8, %v2559_v25  ;;  %v2744_v25 = vld [vmem:[#allocation2 + $0x1a1] sm:$0xff] }
 0x4cd   :  { %v4081_v1 = vmax.f32 %v3975_v48, %v3977_v0  ;;  %3085 = vst.msk [vmem:[#allocation3 + $0x198] sm:$0xff] %vm3033_vm9, %v2944_v2 }
 0x4cf   :  { %v4117_v4 = vrot.slane %v4081_v1, 1  ;;  %2899 = vrot.lane.b32.xlu2 %v2742_v49, %s6269_s12  ;;  %v8389_v60 = vpop.f32.mrf.mxu3 }
 0x4d0   :  { %2182 = vrot.lane.b32.xlu1 %v8292_v11, %s6266_s29 }
 0x4d1   :  { %v4149_v29 = vmax.f32 %v4081_v1, %v4117_v4  ;;  %v2946_v50 = vpop.permute.xlu2 %2945  ;;  %2568 = vrot.lane.b32.xlu0 %v2384_v47, %s6267_s30  ;;  %v2386_v1 = vld [vmem:[#allocation2 + $0x318] sm:$0xff]  ;;  %v3903_v4 = vadd.f32 %v8349_v58, %v8389_v60 }
 0x4d2   :  { %v3275_v18 = vpop.permute.xlu1 %3274 }
 0x4d3   :  { %4167 = vst.msk [vmem:[#allocation4 + $0x51] sm:$0x1] %vm4162_vm14, %v4149_v29  ;;  %v3329_v37 = vpop.permute.xlu0 %3328  ;;  %v4004_v20 = vmax.f32 %v3903_v4, 0.0 }
 0x4d4   :  { %4184 = vst.msk [vmem:[#allocation4 + $0x50] sm:$0x4] %vm4179_vm15, %v4149_v29 }
 0x4d5   :  { %4201 = vst.msk [vmem:[#allocation4 + $0x4f] sm:$0x10] %vm4196_vm0, %v4149_v29 }
 0x4d6   :  { %4218 = vst.msk [vmem:[#allocation4 + $0x4e] sm:$0x40] %vm4213_vm1, %v4149_v29 }
 0x4d7   :  { %3443 = vst.msk [vmem:[#allocation3 + $0xc0] sm:$0xff] %vm3418_vm10, %v3275_v18  ;;  %2953 = vrot.lane.b32.xlu2 %v8367_v59, %s6269_s12 }
 0x4d8   :  { %3284 = vrot.lane.b32.xlu1 %v8370_v51, %s6268_s11  ;;  %3470 = vst.msk [vmem:[#allocation3 + $0x198] sm:$0xff] %vm3418_vm10, %v3329_v37 }
 0x4d9   :  { %v1792_v45 = vpop.permute.xlu2 %1791  ;;  %3338 = vrot.lane.b32.xlu0 %v8373_v31, %s6268_s11 }
 0x4da   :  { %1931 = vst.msk [vmem:[#allocation3 + $0x1a8] sm:$0xff] %vm1877_vm5, %v1792_v45  ;;  %v2121_v13 = vpop.permute.xlu1 %2120  ;;  %v8458_v45 = vld [vmem:[#allocation2 + $0x31a] sm:$0xff] }
 0x4db   :  { %2288 = vst.msk [vmem:[#allocation3 + $0xc8] sm:$0xff] %vm2262_vm6, %v2121_v13  ;;  %v2507_v32 = vpop.permute.xlu0 %2506 }
 0x4dc   :  { %2674 = vst.msk [vmem:[#allocation3 + $0xc8] sm:$0xff] %vm2648_vm8, %v2507_v32 }
 0x4dd   :  { %3059 = vst.msk [vmem:[#allocation3 + $0xc8] sm:$0xff] %vm3033_vm9, %v2892_v36 }
 0x4de   :  { %v3507_v22 = vld [vmem:[#allocation3 + $0xc0] sm:$0xff] }
 0x4df   :  { %6136 = vmatmul.msk.f32.gmra.mxu0 %vm3553_vm11, %v3507_v22  ;;  %1799 = vrot.lane.b32.xlu2 %v8325_v8, %s6265_s0  ;;  %v3534_v55 = vld [vmem:[#allocation3 + $0x198] sm:$0xff] }
 0x4e0   :  { %2130 = vrot.lane.b32.xlu1 %v8328_v27, %s6266_s29  ;;  %v3824_v19 = vpop.f32.mrf.mxu0  ;;  %6163 = vmatmul.msk.f32.gmra.mxu3 %vm3553_vm11, %v3534_v55  ;;  %v8410_v27 = vld [vmem:[#allocation2 + $0x309] sm:$0xff] }
 0x4e1   :  { %v3825_v11 = vadd.f32 %v8349_v58, %v3824_v19  ;;  %v2894_v21 = vpop.permute.xlu2 %2893  ;;  %2516 = vrot.lane.b32.xlu0 %v2358_v38, %s6267_s30 }
 0x4e2   :  { %v2175_v15 = vpop.permute.xlu1 %2174 }
 0x4e3   :  { %v3978_v63 = vmax.f32 %v3825_v11, 0.0  ;;  %2315 = vst.msk [vmem:[#allocation3 + $0x1a0] sm:$0xff] %vm2262_vm6, %v2175_v15  ;;  %v2561_v6 = vpop.permute.xlu0 %2560  ;;  %v1974_v11 = vld [vmem:[#allocation2 + $0x1ca] sm:$0xff] }
 0x4e4   :  { %2701 = vst.msk [vmem:[#allocation3 + $0x1a0] sm:$0xff] %vm2648_vm8, %v2561_v6  ;;  %v2745_v6 = vld [vmem:[#allocation2 + $0x1e1] sm:$0xff] }
 0x4e5   :  { %v4082_v41 = vmax.f32 %v3976_v5, %v3978_v63  ;;  %3086 = vst.msk [vmem:[#allocation3 + $0x1a0] sm:$0xff] %vm3033_vm9, %v2946_v50 }
 0x4e7   :  { %v4250_v39 = vrot.slane %v4082_v41, 1  ;;  %2901 = vrot.lane.b32.xlu2 %v2743_v34, %s6269_s12  ;;  %v3905_v24 = vpop.f32.mrf.mxu3  ;;  %v2387_v34 = vld [vmem:[#allocation2 + $0x320] sm:$0xff] }
 0x4e8   :  { %2184 = vrot.lane.b32.xlu1 %v8330_v3, %s6266_s29  ;;  %v3906_v61 = vadd.f32 %v8349_v58, %v3905_v24  ;;  %v3128_v3 = vld [vmem:[#allocation2 + $0x19a] sm:$0xff] }
 0x4e9   :  { %v4282_v46 = vmax.f32 %v4082_v41, %v4250_v39  ;;  %v2948_v52 = vpop.permute.xlu2 %2947  ;;  %2570 = vrot.lane.b32.xlu0 %v2385_v10, %s6267_s30 }
 0x4ea   :  { %v3277_v2 = vpop.permute.xlu1 %3276  ;;  %v4005_v43 = vmax.f32 %v3906_v61, 0.0 }
 0x4eb   :  { %4298 = vst.msk [vmem:[#allocation4 + $0x55] sm:$0x1] %vm4162_vm14, %v4282_v46  ;;  %v3331_v42 = vpop.permute.xlu0 %3330 }
 0x4ec   :  { %4314 = vst.msk [vmem:[#allocation4 + $0x54] sm:$0x4] %vm4179_vm15, %v4282_v46  ;;  %v4079_v8 = vmax.f32 %v4003_v40, %v4005_v43  ;;  %v8496_v40 = vld [vmem:[#allocation2 + $0x1e2] sm:$0xff] }
 0x4ed   :  { %4330 = vst.msk [vmem:[#allocation4 + $0x53] sm:$0x10] %vm4196_vm0, %v4282_v46 }
 0x4ee   :  { %4346 = vst.msk [vmem:[#allocation4 + $0x52] sm:$0x40] %vm4213_vm1, %v4282_v46  ;;  %v4124_v56 = vrot.slane %v4079_v8, 1 }
 0x4ef   :  { %3444 = vst.msk [vmem:[#allocation3 + $0xc8] sm:$0xff] %vm3418_vm10, %v3277_v2  ;;  %2955 = vrot.lane.b32.xlu2 %v8410_v27, %s6269_s12  ;;  %v8498_v2 = vld [vmem:[#allocation2 + $0x322] sm:$0xff] }
 0x4f0   :  { %v4156_v30 = vmax.f32 %v4079_v8, %v4124_v56  ;;  %3286 = vrot.lane.b32.xlu1 %v3128_v3, %s6268_s11  ;;  %3471 = vst.msk [vmem:[#allocation3 + $0x1a0] sm:$0xff] %vm3418_vm10, %v3331_v42 }
 0x4f1   :  { %v1794_v62 = vpop.permute.xlu2 %1793  ;;  %3340 = vrot.lane.b32.xlu0 %v8414_v35, %s6268_s11 }
 0x4f2   :  { %4174 = vst.msk [vmem:[#allocation4 + $0xe1] sm:$0x1] %vm4162_vm14, %v4156_v30  ;;  %v2123_v33 = vpop.permute.xlu1 %2122 }
 0x4f3   :  { %4191 = vst.msk [vmem:[#allocation4 + $0xe0] sm:$0x4] %vm4179_vm15, %v4156_v30  ;;  %v2509_v17 = vpop.permute.xlu0 %2508 }
 0x4f4   :  { %4208 = vst.msk [vmem:[#allocation4 + $0xdf] sm:$0x10] %vm4196_vm0, %v4156_v30  ;;  %v8432_v26 = vld [vmem:[#allocation4 + $0x50] sm:$0xff] }
 0x4f5   :  { %4225 = vst.msk [vmem:[#allocation4 + $0xde] sm:$0x40] %vm4213_vm1, %v4156_v30  ;;  %v4685_v0 = vld [vmem:[#allocation4 + $0x51] sm:$0xff] }
 0x4f6   :  { %1932 = vst.msk [vmem:[#allocation3 + $0x1b0] sm:$0xff] %vm1877_vm5, %v1794_v62  ;;  %v3508_v9 = vld [vmem:[#allocation3 + $0xc8] sm:$0xff]  ;;  %v5005_v49 = vld [vmem:[#allocation4 + $0x52] sm:$0xff] }
 0x4f7   :  { %2289 = vst.msk [vmem:[#allocation3 + $0xd0] sm:$0xff] %vm2262_vm6, %v2123_v33  ;;  %6137 = vmatmul.msk.f32.gmra.mxu0 %vm3553_vm11, %v3508_v9  ;;  %1801 = vrot.lane.b32.xlu2 %v8367_v59, %s6265_s0  ;;  %v3535_v57 = vld [vmem:[#allocation3 + $0x1a0] sm:$0xff]  ;;  %v1975_v30 = vld [vmem:[#allocation2 + $0x1d2] sm:$0xff] }
 0x4f8   :  { %2132 = vrot.lane.b32.xlu1 %v8370_v51, %s6266_s29  ;;  %2675 = vst.msk [vmem:[#allocation3 + $0xd0] sm:$0xff] %vm2648_vm8, %v2509_v17  ;;  %6164 = vmatmul.msk.f32.gmra.mxu3 %vm3553_vm11, %v3535_v57  ;;  %v8455_v59 = vld [vmem:[#allocation2 + $0x319] sm:$0xff]  ;;  %v3129_v51 = vld [vmem:[#allocation2 + $0x1a2] sm:$0xff]  ;;  %v3827_v12 = vpop.f32.mrf.mxu0 }
 0x4f9   :  { %3060 = vst.msk [vmem:[#allocation3 + $0xd0] sm:$0xff] %vm3033_vm9, %v2894_v21  ;;  %v2896_v36 = vpop.permute.xlu2 %2895  ;;  %2518 = vrot.lane.b32.xlu0 %v2359_v7, %s6267_s30  ;;  %v2360_v21 = vld [vmem:[#allocation2 + $0x1e0] sm:$0xff]  ;;  %v3828_v62 = vadd.f32 %v8349_v58, %v3827_v12 }
 0x4fa   :  { %v2177_v54 = vpop.permute.xlu1 %2176  ;;  %4379 = vst.msk [vmem:[#allocation5 + $0x78] sm:$0xff] %vm4023_vm12, %v8432_v26  ;;  %v8572_v12 = vld [vmem:[#allocation2 + $0x21a] sm:$0xff] }
 0x4fb   :  { %2316 = vst.msk [vmem:[#allocation3 + $0x1a8] sm:$0xff] %vm2262_vm6, %v2177_v54  ;;  %v2563_v48 = vpop.permute.xlu0 %2562  ;;  %v3979_v57 = vmax.f32 %v3828_v62, 0.0 }
 0x4fc   :  { %2702 = vst.msk [vmem:[#allocation3 + $0x1a8] sm:$0xff] %vm2648_vm8, %v2563_v48  ;;  %v8524_v48 = vld [vmem:[#allocation2 + $0x202] sm:$0xff] }
 0x4fd   :  { %3087 = vst.msk [vmem:[#allocation3 + $0x1a8] sm:$0xff] %vm3033_vm9, %v2948_v52  ;;  %v8493_v52 = vld [vmem:[#allocation2 + $0x321] sm:$0xff] }
 0x4fe   :  { %4701 = vst.msk [vmem:[#allocation5 + $0x68] sm:$0xff] %vm4023_vm12, %v4685_v0 }
 0x4ff   :  { %2903 = vrot.lane.b32.xlu2 %v2744_v25, %s6269_s12  ;;  %5021 = vst.msk [vmem:[#allocation5 + $0x58] sm:$0xff] %vm4023_vm12, %v5005_v49  ;;  %v2361_v25 = vld [vmem:[#allocation2 + $0x1e8] sm:$0xff] }
 0x500   :  { %2186 = vrot.lane.b32.xlu1 %v8373_v31, %s6266_s29 }
 0x501   :  { %v2950_v47 = vpop.permute.xlu2 %2949  ;;  %2572 = vrot.lane.b32.xlu0 %v2386_v1, %s6267_s30 }
 0x502   :  { %v3279_v29 = vpop.permute.xlu1 %3278 }
 0x503   :  { %3445 = vst.msk [vmem:[#allocation3 + $0xd0] sm:$0xff] %vm3418_vm10, %v3279_v29  ;;  %v3908_v50 = vpop.f32.mrf.mxu3  ;;  %v3333_v18 = vpop.permute.xlu0 %3332 }
 0x504   :  { %v3909_v37 = vadd.f32 %v8349_v58, %v3908_v50  ;;  %3472 = vst.msk [vmem:[#allocation3 + $0x1a8] sm:$0xff] %vm3418_vm10, %v3333_v18  ;;  %v2365_v50 = vld [vmem:[#allocation2 + $0x218] sm:$0xff]  ;;  %v8536_v18 = vld [vmem:[#allocation2 + $0x1e9] sm:$0xff] }
 0x506   :  { %v4006_v31 = vmax.f32 %v3909_v37, 0.0  ;;  %v2388_v37 = vld [vmem:[#allocation2 + $0x330] sm:$0xff] }
 0x507   :  { %2957 = vrot.lane.b32.xlu2 %v8455_v59, %s6269_s12 }
 0x508   :  { %v4080_v13 = vmax.f32 %v4004_v20, %v4006_v31  ;;  %3288 = vrot.lane.b32.xlu1 %v3129_v51, %s6268_s11 }
 0x509   :  { %v1796_v32 = vpop.permute.xlu2 %1795  ;;  %3342 = vrot.lane.b32.xlu0 %v8458_v45, %s6268_s11 }
 0x50a   :  { %v4257_v22 = vrot.slane %v4080_v13, 1  ;;  %1933 = vst.msk [vmem:[#allocation3 + $0x1b8] sm:$0xff] %vm1877_vm5, %v1796_v32  ;;  %v2125_v38 = vpop.permute.xlu1 %2124  ;;  %v3509_v53 = vld [vmem:[#allocation3 + $0xd0] sm:$0xff] }
 0x50b   :  { %2290 = vst.msk [vmem:[#allocation3 + $0xd8] sm:$0xff] %vm2262_vm6, %v2125_v38  ;;  %6138 = vmatmul.msk.f32.gmra.mxu0 %vm3553_vm11, %v3509_v53  ;;  %v2511_v60 = vpop.permute.xlu0 %2510  ;;  %v3536_v55 = vld [vmem:[#allocation3 + $0x1a8] sm:$0xff] }
 0x50c   :  { %v4289_v19 = vmax.f32 %v4080_v13, %v4257_v22  ;;  %2676 = vst.msk [vmem:[#allocation3 + $0xd8] sm:$0xff] %vm2648_vm8, %v2511_v60  ;;  %6165 = vmatmul.msk.f32.gmra.mxu3 %vm3553_vm11, %v3536_v55  ;;  %v8550_v13 = vld [vmem:[#allocation2 + $0x1ea] sm:$0xff] }
 0x50d   :  { %3061 = vst.msk [vmem:[#allocation3 + $0xd8] sm:$0xff] %vm3033_vm9, %v2896_v36  ;;  %v8553_v22 = vld [vmem:[#allocation2 + $0x331] sm:$0xff] }
 0x50e   :  { %4305 = vst.msk [vmem:[#allocation4 + $0xe5] sm:$0x1] %vm4162_vm14, %v4289_v19 }
 0x50f   :  { %4321 = vst.msk [vmem:[#allocation4 + $0xe4] sm:$0x4] %vm4179_vm15, %v4289_v19  ;;  %1803 = vrot.lane.b32.xlu2 %v8410_v27, %s6265_s0 }
 0x510   :  { %4337 = vst.msk [vmem:[#allocation4 + $0xe3] sm:$0x10] %vm4196_vm0, %v4289_v19  ;;  %2134 = vrot.lane.b32.xlu1 %v1974_v11, %s6266_s29  ;;  %v8502_v43 = vpop.f32.mrf.mxu0 }
 0x511   :  { %4353 = vst.msk [vmem:[#allocation4 + $0xe2] sm:$0x40] %vm4213_vm1, %v4289_v19  ;;  %v2898_v15 = vpop.permute.xlu2 %2897  ;;  %2520 = vrot.lane.b32.xlu0 %v2360_v21, %s6267_s30  ;;  %v3831_v38 = vadd.f32 %v8349_v58, %v8502_v43 }
 0x512   :  { %v2179_v5 = vpop.permute.xlu1 %2178 }
 0x513   :  { %2317 = vst.msk [vmem:[#allocation3 + $0x1b0] sm:$0xff] %vm2262_vm6, %v2179_v5  ;;  %v2565_v63 = vpop.permute.xlu0 %2564 }
 0x514   :  { %2703 = vst.msk [vmem:[#allocation3 + $0x1b0] sm:$0xff] %vm2648_vm8, %v2565_v63 }
 0x515   :  { %3088 = vst.msk [vmem:[#allocation3 + $0x1b0] sm:$0xff] %vm3033_vm9, %v2950_v47 }
 0x517   :  { %2905 = vrot.lane.b32.xlu2 %v2745_v6, %s6269_s12  ;;  %v8483_v41 = vld [vmem:[#allocation4 + $0xe0] sm:$0xff]  ;;  %v8569_v6 = vld [vmem:[#allocation2 + $0x332] sm:$0xff] }
 0x518   :  { %2188 = vrot.lane.b32.xlu1 %v8414_v35, %s6266_s29  ;;  %4386 = vst.msk [vmem:[#allocation5 + $0x120] sm:$0xff] %vm4023_vm12, %v8483_v41  ;;  %v4692_v10 = vld [vmem:[#allocation4 + $0xe1] sm:$0xff] }
 0x519   :  { %v2952_v39 = vpop.permute.xlu2 %2951  ;;  %2574 = vrot.lane.b32.xlu0 %v2387_v34, %s6267_s30  ;;  %4708 = vst.msk [vmem:[#allocation5 + $0x110] sm:$0xff] %vm4023_vm12, %v4692_v10  ;;  %v5012_v24 = vld [vmem:[#allocation4 + $0xe2] sm:$0xff] }
 0x51a   :  { %v3281_v61 = vpop.permute.xlu1 %3280  ;;  %5028 = vst.msk [vmem:[#allocation5 + $0x100] sm:$0xff] %vm4023_vm12, %v5012_v24  ;;  %v8511_v35 = vld [vmem:[#allocation2 + $0x201] sm:$0xff] }
 0x51b   :  { %3446 = vst.msk [vmem:[#allocation3 + $0xd8] sm:$0xff] %vm3418_vm10, %v3281_v61  ;;  %v3335_v46 = vpop.permute.xlu0 %3334 }
 0x51c   :  { %3473 = vst.msk [vmem:[#allocation3 + $0x1b0] sm:$0xff] %vm3418_vm10, %v3335_v46 }
 0x51f   :  { %2959 = vrot.lane.b32.xlu2 %v8493_v52, %s6269_s12 }
 0x520   :  { %3290 = vrot.lane.b32.xlu1 %v8496_v40, %s6268_s11 }
 0x521   :  { %v1798_v42 = vpop.permute.xlu2 %1797  ;;  %3344 = vrot.lane.b32.xlu0 %v8498_v2, %s6268_s11 }
 0x522   :  { %1934 = vst.msk [vmem:[#allocation3 + $0x1c0] sm:$0xff] %vm1877_vm5, %v1798_v42  ;;  %v2127_v8 = vpop.permute.xlu1 %2126  ;;  %v3510_v27 = vld [vmem:[#allocation3 + $0xd8] sm:$0xff] }
 0x523   :  { %2291 = vst.msk [vmem:[#allocation3 + $0xe0] sm:$0xff] %vm2262_vm6, %v2127_v8  ;;  %6139 = vmatmul.msk.f32.gmra.mxu0 %vm3553_vm11, %v3510_v27  ;;  %v2513_v3 = vpop.permute.xlu0 %2512  ;;  %v3537_v56 = vld [vmem:[#allocation3 + $0x1b0] sm:$0xff] }
 0x524   :  { %2677 = vst.msk [vmem:[#allocation3 + $0xe0] sm:$0xff] %vm2648_vm8, %v2513_v3  ;;  %6166 = vmatmul.msk.f32.gmra.mxu3 %vm3553_vm11, %v3537_v56 }
 0x525   :  { %3062 = vst.msk [vmem:[#allocation3 + $0xe0] sm:$0xff] %vm3033_vm9, %v2898_v15  ;;  %v3980_v15 = vmax.f32 %v3831_v38, 0.0  ;;  %v8635_v38 = vld [vmem:[#allocation2 + $0x339] sm:$0xff] }
 0x527   :  { %1759 = vrot.lane.b32.xlu2 %v8511_v35, %s6265_s0 }
 0x528   :  { %2136 = vrot.lane.b32.xlu1 %v1975_v30, %s6266_s29  ;;  %v3833_v33 = vpop.f32.mrf.mxu0  ;;  %v8586_v30 = vld [vmem:[#allocation2 + $0x211] sm:$0xff] }
 0x529   :  { %v3834_v17 = vadd.f32 %v8349_v58, %v3833_v33  ;;  %v2900_v9 = vpop.permute.xlu2 %2899  ;;  %1805 = vrot.lane.b32.xlu0 %v8455_v59, %s6265_s0  ;;  %v3911_v59 = vpop.f32.mrf.mxu3  ;;  %v2362_v33 = vld [vmem:[#allocation2 + $0x1f8] sm:$0xff] }
 0x52a   :  { %v2181_v7 = vpop.permute.xlu1 %2180  ;;  %v3912_v10 = vadd.f32 %v8349_v58, %v3911_v59 }
 0x52b   :  { %v3981_v36 = vmax.f32 %v3834_v17, 0.0  ;;  %2318 = vst.msk [vmem:[#allocation3 + $0x1b8] sm:$0xff] %vm2262_vm6, %v2181_v7  ;;  %v2567_v54 = vpop.permute.xlu0 %2566 }
 0x52c   :  { %2704 = vst.msk [vmem:[#allocation3 + $0x1b8] sm:$0xff] %vm2648_vm8, %v2567_v54  ;;  %v4007_v42 = vmax.f32 %v3912_v10, 0.0 }
 0x52d   :  { %v4085_v0 = vmax.f32 %v3979_v57, %v3981_v36  ;;  %3089 = vst.msk [vmem:[#allocation3 + $0x1b8] sm:$0xff] %vm3033_vm9, %v2952_v39  ;;  %v8603_v36 = vld [vmem:[#allocation2 + $0x1f9] sm:$0xff] }
 0x52f   :  { %v4118_v49 = vrot.slane %v4085_v0, 1  ;;  %2144 = vrot.lane.b32.xlu2 %v8524_v48, %s6266_s29 }
 0x530   :  { %2522 = vrot.lane.b32.xlu1 %v2361_v25, %s6267_s30 }
 0x531   :  { %v4150_v1 = vmax.f32 %v4085_v0, %v4118_v49  ;;  %v2954_v47 = vpop.permute.xlu2 %2953  ;;  %2190 = vrot.lane.b32.xlu0 %v8458_v45, %s6266_s29  ;;  %v8547_v45 = vld [vmem:[#allocation2 + $0x219] sm:$0xff]  ;;  %v8557_v53 = vpop.f32.mrf.mxu3 }
 0x532   :  { %v3283_v4 = vpop.permute.xlu1 %3282  ;;  %v3915_v59 = vadd.f32 %v8349_v58, %v8557_v53 }
 0x533   :  { %4168 = vst.msk [vmem:[#allocation4 + $0x61] sm:$0x1] %vm4162_vm14, %v4150_v1  ;;  %v3337_v29 = vpop.permute.xlu0 %3336 }
 0x534   :  { %4185 = vst.msk [vmem:[#allocation4 + $0x60] sm:$0x4] %vm4179_vm15, %v4150_v1 }
 0x535   :  { %4202 = vst.msk [vmem:[#allocation4 + $0x5f] sm:$0x10] %vm4196_vm0, %v4150_v1 }
 0x536   :  { %4219 = vst.msk [vmem:[#allocation4 + $0x5e] sm:$0x40] %vm4213_vm1, %v4150_v1 }
 0x537   :  { %3447 = vst.msk [vmem:[#allocation3 + $0xe0] sm:$0xff] %vm3418_vm10, %v3283_v4  ;;  %2530 = vrot.lane.b32.xlu2 %v2365_v50, %s6267_s30  ;;  %v8623_v50 = vld [vmem:[#allocation2 + $0x1fa] sm:$0xff] }
 0x538   :  { %2907 = vrot.lane.b32.xlu1 %v8536_v18, %s6269_s12  ;;  %3474 = vst.msk [vmem:[#allocation3 + $0x1b8] sm:$0xff] %vm3418_vm10, %v3337_v29  ;;  %v2366_v29 = vld [vmem:[#allocation2 + $0x228] sm:$0xff] }
 0x539   :  { %v1800_v51 = vpop.permute.xlu2 %1799  ;;  %2576 = vrot.lane.b32.xlu0 %v2388_v37, %s6267_s30 }
 0x53a   :  { %1935 = vst.msk [vmem:[#allocation3 + $0x1c8] sm:$0xff] %vm1877_vm5, %v1800_v51  ;;  %v2129_v20 = vpop.permute.xlu1 %2128 }
 0x53b   :  { %2292 = vst.msk [vmem:[#allocation3 + $0xe8] sm:$0xff] %vm2262_vm6, %v2129_v20  ;;  %v2515_v31 = vpop.permute.xlu0 %2514 }
 0x53c   :  { %2678 = vst.msk [vmem:[#allocation3 + $0xe8] sm:$0xff] %vm2648_vm8, %v2515_v31 }
 0x53d   :  { %3063 = vst.msk [vmem:[#allocation3 + $0xe8] sm:$0xff] %vm3033_vm9, %v2900_v9 }
 0x53e   :  { %v3511_v32 = vld [vmem:[#allocation3 + $0xe0] sm:$0xff] }
 0x53f   :  { %6140 = vmatmul.msk.f32.gmra.mxu0 %vm3553_vm11, %v3511_v32  ;;  %2915 = vrot.lane.b32.xlu2 %v8547_v45, %s6269_s12  ;;  %v3538_v60 = vld [vmem:[#allocation3 + $0x1b8] sm:$0xff] }
 0x540   :  { %3292 = vrot.lane.b32.xlu1 %v8550_v13, %s6268_s11  ;;  %v3836_v55 = vpop.f32.mrf.mxu0  ;;  %6167 = vmatmul.msk.f32.gmra.mxu3 %vm3553_vm11, %v3538_v60  ;;  %v8638_v60 = vld [vmem:[#allocation2 + $0x229] sm:$0xff] }
 0x541   :  { %v3837_v19 = vadd.f32 %v8349_v58, %v3836_v55  ;;  %v2902_v11 = vpop.permute.xlu2 %2901  ;;  %2961 = vrot.lane.b32.xlu0 %v8553_v22, %s6269_s12  ;;  %v4008_v55 = vmax.f32 %v3915_v59, 0.0 }
 0x542   :  { %v2183_v21 = vpop.permute.xlu1 %2182 }
 0x543   :  { %v3982_v5 = vmax.f32 %v3837_v19, 0.0  ;;  %2319 = vst.msk [vmem:[#allocation3 + $0x1c0] sm:$0xff] %vm2262_vm6, %v2183_v21  ;;  %v2569_v63 = vpop.permute.xlu0 %2568 }
 0x544   :  { %2705 = vst.msk [vmem:[#allocation3 + $0x1c0] sm:$0xff] %vm2648_vm8, %v2569_v63 }
 0x545   :  { %v4086_v34 = vmax.f32 %v3980_v15, %v3982_v5  ;;  %3090 = vst.msk [vmem:[#allocation3 + $0x1c0] sm:$0xff] %vm3033_vm9, %v2954_v47  ;;  %v2389_v47 = vld [vmem:[#allocation2 + $0x338] sm:$0xff] }
 0x547   :  { %v4251_v39 = vrot.slane %v4086_v34, 1  ;;  %3346 = vrot.lane.b32.xlu2 %v8569_v6, %s6268_s11  ;;  %v3917_v24 = vpop.f32.mrf.mxu3 }
 0x548   :  { %3300 = vrot.lane.b32.xlu1 %v8572_v12, %s6268_s11  ;;  %v3918_v61 = vadd.f32 %v8349_v58, %v3917_v24  ;;  %v8653_v24 = vld [vmem:[#allocation2 + $0x33a] sm:$0xff] }
 0x549   :  { %v4283_v46 = vmax.f32 %v4086_v34, %v4251_v39  ;;  %v2956_v43 = vpop.permute.xlu2 %2955  ;;  %2138 = vrot.lane.b32.xlu0 %v8496_v40, %s6266_s29 }
 0x54a   :  { %v3285_v8 = vpop.permute.xlu1 %3284  ;;  %v4009_v27 = vmax.f32 %v3918_v61, 0.0 }
 0x54b   :  { %4299 = vst.msk [vmem:[#allocation4 + $0x65] sm:$0x1] %vm4162_vm14, %v4283_v46  ;;  %v3339_v3 = vpop.permute.xlu0 %3338 }
 0x54c   :  { %4315 = vst.msk [vmem:[#allocation4 + $0x64] sm:$0x4] %vm4179_vm15, %v4283_v46  ;;  %v4083_v56 = vmax.f32 %v4007_v42, %v4009_v27 }
 0x54d   :  { %4331 = vst.msk [vmem:[#allocation4 + $0x63] sm:$0x10] %vm4196_vm0, %v4283_v46 }
 0x54e   :  { %4347 = vst.msk [vmem:[#allocation4 + $0x62] sm:$0x40] %vm4213_vm1, %v4283_v46  ;;  %v4125_v62 = vrot.slane %v4083_v56, 1 }
 0x54f   :  { %3448 = vst.msk [vmem:[#allocation3 + $0xe8] sm:$0xff] %vm3418_vm10, %v3285_v8  ;;  %1807 = vrot.lane.b32.xlu2 %v8493_v52, %s6265_s0  ;;  %v8600_v52 = vld [vmem:[#allocation2 + $0x212] sm:$0xff] }
 0x550   :  { %v4157_v40 = vmax.f32 %v4083_v56, %v4125_v62  ;;  %1761 = vrot.lane.b32.xlu1 %v8586_v30, %s6265_s0  ;;  %3475 = vst.msk [vmem:[#allocation3 + $0x1c0] sm:$0xff] %vm3418_vm10, %v3339_v3 }
 0x551   :  { %v1802_v17 = vpop.permute.xlu2 %1801  ;;  %2524 = vrot.lane.b32.xlu0 %v2362_v33, %s6267_s30 }
 0x552   :  { %4175 = vst.msk [vmem:[#allocation4 + $0xf1] sm:$0x1] %vm4162_vm14, %v4157_v40  ;;  %v2131_v9 = vpop.permute.xlu1 %2130 }
 0x553   :  { %4192 = vst.msk [vmem:[#allocation4 + $0xf0] sm:$0x4] %vm4179_vm15, %v4157_v40  ;;  %v2517_v7 = vpop.permute.xlu0 %2516 }
 0x554   :  { %4209 = vst.msk [vmem:[#allocation4 + $0xef] sm:$0x10] %vm4196_vm0, %v4157_v40  ;;  %v8609_v0 = vld [vmem:[#allocation4 + $0x60] sm:$0xff] }
 0x555   :  { %4226 = vst.msk [vmem:[#allocation4 + $0xee] sm:$0x40] %vm4213_vm1, %v4157_v40  ;;  %v4686_v1 = vld [vmem:[#allocation4 + $0x61] sm:$0xff] }
 0x556   :  { %1936 = vst.msk [vmem:[#allocation3 + $0x1d0] sm:$0xff] %vm1877_vm5, %v1802_v17  ;;  %v3512_v57 = vld [vmem:[#allocation3 + $0xe8] sm:$0xff] }
 0x557   :  { %2293 = vst.msk [vmem:[#allocation3 + $0xf0] sm:$0xff] %vm2262_vm6, %v2131_v9  ;;  %6141 = vmatmul.msk.f32.gmra.mxu0 %vm3553_vm11, %v3512_v57  ;;  %2192 = vrot.lane.b32.xlu2 %v8498_v2, %s6266_s29  ;;  %v3539_v54 = vld [vmem:[#allocation3 + $0x1c0] sm:$0xff] }
 0x558   :  { %2146 = vrot.lane.b32.xlu1 %v8600_v52, %s6266_s29  ;;  %2679 = vst.msk [vmem:[#allocation3 + $0xf0] sm:$0xff] %vm2648_vm8, %v2517_v7  ;;  %6168 = vmatmul.msk.f32.gmra.mxu3 %vm3553_vm11, %v3539_v54  ;;  %v5006_v4 = vld [vmem:[#allocation4 + $0x62] sm:$0xff] }
 0x559   :  { %3064 = vst.msk [vmem:[#allocation3 + $0xf0] sm:$0xff] %vm3033_vm9, %v2902_v11  ;;  %v2904_v25 = vpop.permute.xlu2 %2903  ;;  %2909 = vrot.lane.b32.xlu0 %v8603_v36, %s6269_s12  ;;  %v8640_v11 = vld [vmem:[#allocation2 + $0x22a] sm:$0xff] }
 0x55a   :  { %v2185_v49 = vpop.permute.xlu1 %2184  ;;  %4380 = vst.msk [vmem:[#allocation5 + $0x90] sm:$0xff] %vm4023_vm12, %v8609_v0 }
 0x55b   :  { %2320 = vst.msk [vmem:[#allocation3 + $0x1c8] sm:$0xff] %vm2262_vm6, %v2185_v49  ;;  %v2571_v2 = vpop.permute.xlu0 %2570 }
 0x55c   :  { %2706 = vst.msk [vmem:[#allocation3 + $0x1c8] sm:$0xff] %vm2648_vm8, %v2571_v2  ;;  %v3839_v8 = vpop.f32.mrf.mxu0 }
 0x55d   :  { %3091 = vst.msk [vmem:[#allocation3 + $0x1c8] sm:$0xff] %vm3033_vm9, %v2956_v43 }
 0x55e   :  { %4702 = vst.msk [vmem:[#allocation5 + $0x80] sm:$0xff] %vm4023_vm12, %v4686_v1 }
 0x55f   :  { %2578 = vrot.lane.b32.xlu2 %v2389_v47, %s6267_s30  ;;  %5022 = vst.msk [vmem:[#allocation5 + $0x70] sm:$0xff] %vm4023_vm12, %v5006_v4  ;;  %v2775_v47 = vld [vmem:[#allocation2 + $0x349] sm:$0xff] }
 0x560   :  { %2532 = vrot.lane.b32.xlu1 %v2366_v29, %s6267_s30  ;;  %v2752_v29 = vld [vmem:[#allocation2 + $0x231] sm:$0xff] }
 0x561   :  { %v2958_v37 = vpop.permute.xlu2 %2957  ;;  %3294 = vrot.lane.b32.xlu0 %v8623_v50, %s6268_s11 }
 0x562   :  { %v3287_v51 = vpop.permute.xlu1 %3286 }
 0x563   :  { %3449 = vst.msk [vmem:[#allocation3 + $0xf0] sm:$0xff] %vm3418_vm10, %v3287_v51  ;;  %v3920_v20 = vpop.f32.mrf.mxu3  ;;  %v3341_v31 = vpop.permute.xlu0 %3340 }
 0x564   :  { %v3921_v32 = vadd.f32 %v8349_v58, %v3920_v20  ;;  %3476 = vst.msk [vmem:[#allocation3 + $0x1c8] sm:$0xff] %vm3418_vm10, %v3341_v31 }
 0x566   :  { %v4010_v19 = vmax.f32 %v3921_v32, 0.0  ;;  %v3160_v32 = vld [vmem:[#allocation2 + $0x34a] sm:$0xff] }
 0x567   :  { %2963 = vrot.lane.b32.xlu2 %v8635_v38, %s6269_s12 }
 0x568   :  { %v4084_v53 = vmax.f32 %v4008_v55, %v4010_v19  ;;  %2917 = vrot.lane.b32.xlu1 %v8638_v60, %s6269_s12 }
 0x569   :  { %v1804_v21 = vpop.permute.xlu2 %1803  ;;  %3302 = vrot.lane.b32.xlu0 %v8640_v11, %s6268_s11 }
 0x56a   :  { %v4258_v15 = vrot.slane %v4084_v53, 1  ;;  %1937 = vst.msk [vmem:[#allocation3 + $0x1d8] sm:$0xff] %vm1877_vm5, %v1804_v21  ;;  %v2133_v5 = vpop.permute.xlu1 %2132  ;;  %v3513_v63 = vld [vmem:[#allocation3 + $0xf0] sm:$0xff] }
 0x56b   :  { %2294 = vst.msk [vmem:[#allocation3 + $0xf8] sm:$0xff] %vm2262_vm6, %v2133_v5  ;;  %6142 = vmatmul.msk.f32.gmra.mxu0 %vm3553_vm11, %v3513_v63  ;;  %v2519_v34 = vpop.permute.xlu0 %2518  ;;  %v3540_v10 = vld [vmem:[#allocation3 + $0x1c8] sm:$0xff]  ;;  %v2364_v5 = vld [vmem:[#allocation2 + $0x210] sm:$0xff] }
 0x56c   :  { %v4290_v39 = vmax.f32 %v4084_v53, %v4258_v15  ;;  %2680 = vst.msk [vmem:[#allocation3 + $0xf8] sm:$0xff] %vm2648_vm8, %v2519_v34  ;;  %6169 = vmatmul.msk.f32.gmra.mxu3 %vm3553_vm11, %v3540_v10 }
 0x56d   :  { %3065 = vst.msk [vmem:[#allocation3 + $0xf8] sm:$0xff] %vm3033_vm9, %v2904_v25 }
 0x56e   :  { %4306 = vst.msk [vmem:[#allocation4 + $0xf5] sm:$0x1] %vm4162_vm14, %v4290_v39 }
 0x56f   :  { %4322 = vst.msk [vmem:[#allocation4 + $0xf4] sm:$0x4] %vm4179_vm15, %v4290_v39  ;;  %1755 = vrot.lane.b32.xlu2 %v8536_v18, %s6265_s0  ;;  %v2363_v18 = vld [vmem:[#allocation2 + $0x200] sm:$0xff] }
 0x570   :  { %4338 = vst.msk [vmem:[#allocation4 + $0xf3] sm:$0x10] %vm4196_vm0, %v4290_v39  ;;  %3348 = vrot.lane.b32.xlu1 %v8653_v24, %s6268_s11 }
 0x571   :  { %4354 = vst.msk [vmem:[#allocation4 + $0xf2] sm:$0x40] %vm4213_vm1, %v4290_v39  ;;  %v2906_v61 = vpop.permute.xlu2 %2905  ;;  %2140 = vrot.lane.b32.xlu0 %v8550_v13, %s6266_s29 }
 0x572   :  { %v2187_v46 = vpop.permute.xlu1 %2186 }
 0x573   :  { %2321 = vst.msk [vmem:[#allocation3 + $0x1d0] sm:$0xff] %vm2262_vm6, %v2187_v46  ;;  %v2573_v43 = vpop.permute.xlu0 %2572 }
 0x574   :  { %2707 = vst.msk [vmem:[#allocation3 + $0x1d0] sm:$0xff] %vm2648_vm8, %v2573_v43 }
 0x575   :  { %3092 = vst.msk [vmem:[#allocation3 + $0x1d0] sm:$0xff] %vm3033_vm9, %v2958_v37  ;;  %v3137_v37 = vld [vmem:[#allocation2 + $0x232] sm:$0xff] }
 0x577   :  { %1809 = vrot.lane.b32.xlu2 %v8553_v22, %s6265_s0  ;;  %v8671_v42 = vld [vmem:[#allocation4 + $0xf0] sm:$0xff] }
 0x578   :  { %1763 = vrot.lane.b32.xlu1 %v8547_v45, %s6265_s0  ;;  %4387 = vst.msk [vmem:[#allocation5 + $0x138] sm:$0xff] %vm4023_vm12, %v8671_v42  ;;  %v4693_v13 = vld [vmem:[#allocation4 + $0xf1] sm:$0xff]  ;;  %v8684_v45 = vpop.f32.mrf.mxu0 }
 0x579   :  { %v2960_v27 = vpop.permute.xlu2 %2959  ;;  %2526 = vrot.lane.b32.xlu0 %v2363_v18, %s6267_s30  ;;  %4709 = vst.msk [vmem:[#allocation5 + $0x128] sm:$0xff] %vm4023_vm12, %v4693_v13  ;;  %v5013_v3 = vld [vmem:[#allocation4 + $0xf2] sm:$0xff] }
 0x57a   :  { %v3289_v56 = vpop.permute.xlu1 %3288  ;;  %5029 = vst.msk [vmem:[#allocation5 + $0x118] sm:$0xff] %vm4023_vm12, %v5013_v3 }
 0x57b   :  { %3450 = vst.msk [vmem:[#allocation3 + $0xf8] sm:$0xff] %vm3418_vm10, %v3289_v56  ;;  %v3343_v22 = vpop.permute.xlu0 %3342  ;;  %v3923_v55 = vpop.f32.mrf.mxu3 }
 0x57c   :  { %3477 = vst.msk [vmem:[#allocation3 + $0x1d0] sm:$0xff] %vm3418_vm10, %v3343_v22 }
 0x57f   :  { %2194 = vrot.lane.b32.xlu2 %v8569_v6, %s6266_s29  ;;  %v2390_v6 = vld [vmem:[#allocation2 + $0x348] sm:$0xff] }
 0x580   :  { %2148 = vrot.lane.b32.xlu1 %v8572_v12, %s6266_s29  ;;  %v2367_v12 = vld [vmem:[#allocation2 + $0x230] sm:$0xff] }
 0x581   :  { %v1760_v62 = vpop.permute.xlu2 %1759  ;;  %2911 = vrot.lane.b32.xlu0 %v8511_v35, %s6269_s12  ;;  %v3840_v35 = vadd.f32 %v8349_v58, %v3839_v8  ;;  %v3924_v8 = vadd.f32 %v8349_v58, %v3923_v55 }
 0x582   :  { %1915 = vst.msk [vmem:[#allocation3 + $0x128] sm:$0xff] %vm1877_vm5, %v1760_v62  ;;  %v2135_v33 = vpop.permute.xlu1 %2134  ;;  %v3514_v40 = vld [vmem:[#allocation3 + $0xf8] sm:$0xff] }
 0x583   :  { %2295 = vst.msk [vmem:[#allocation3 + $0x100] sm:$0xff] %vm2262_vm6, %v2135_v33  ;;  %6143 = vmatmul.msk.f32.gmra.mxu0 %vm3553_vm11, %v3514_v40  ;;  %v2521_v17 = vpop.permute.xlu0 %2520  ;;  %v3541_v9 = vld [vmem:[#allocation3 + $0x1d0] sm:$0xff]  ;;  %v3983_v49 = vmax.f32 %v3840_v35, 0.0  ;;  %v4011_v22 = vmax.f32 %v3924_v8, 0.0  ;;  %v2753_v35 = vld [vmem:[#allocation2 + $0x241] sm:$0xff] }
 0x584   :  { %2681 = vst.msk [vmem:[#allocation3 + $0x100] sm:$0xff] %vm2648_vm8, %v2521_v17  ;;  %6170 = vmatmul.msk.f32.gmra.mxu3 %vm3553_vm11, %v3541_v9  ;;  %v2391_v40 = vld [vmem:[#allocation2 + $0x350] sm:$0xff] }
 0x585   :  { %3066 = vst.msk [vmem:[#allocation3 + $0x100] sm:$0xff] %vm3033_vm9, %v2906_v61 }
 0x587   :  { %2580 = vrot.lane.b32.xlu2 %v2390_v6, %s6267_s30 }
 0x588   :  { %2534 = vrot.lane.b32.xlu1 %v2367_v12, %s6267_s30  ;;  %v3845_v7 = vpop.f32.mrf.mxu0  ;;  %v2776_v12 = vld [vmem:[#allocation2 + $0x351] sm:$0xff] }
 0x589   :  { %v3846_v57 = vadd.f32 %v8349_v58, %v3845_v7  ;;  %v2145_v54 = vpop.permute.xlu2 %2144  ;;  %3296 = vrot.lane.b32.xlu0 %v8524_v48, %s6268_s11  ;;  %v3138_v7 = vld [vmem:[#allocation2 + $0x242] sm:$0xff] }
 0x58a   :  { %2300 = vst.msk [vmem:[#allocation3 + $0x128] sm:$0xff] %vm2262_vm6, %v2145_v54  ;;  %v2189_v25 = vpop.permute.xlu1 %2188 }
 0x58b   :  { %v3985_v2 = vmax.f32 %v3846_v57, 0.0  ;;  %2322 = vst.msk [vmem:[#allocation3 + $0x1d8] sm:$0xff] %vm2262_vm6, %v2189_v25  ;;  %v2575_v1 = vpop.permute.xlu0 %2574 }
 0x58c   :  { %2708 = vst.msk [vmem:[#allocation3 + $0x1d8] sm:$0xff] %vm2648_vm8, %v2575_v1 }
 0x58d   :  { %v4089_v4 = vmax.f32 %v3983_v49, %v3985_v2  ;;  %3093 = vst.msk [vmem:[#allocation3 + $0x1d8] sm:$0xff] %vm3033_vm9, %v2960_v27  ;;  %v4390_v2 = vld [vmem:[#allocation4 + $0x1] sm:$0xff] }
 0x58f   :  { %v4119_v59 = vrot.slane %v4089_v4, 1  ;;  %2965 = vrot.lane.b32.xlu2 %v2775_v47, %s6269_s12  ;;  %v8726_v63 = vpop.f32.mrf.mxu3  ;;  %v3161_v47 = vld [vmem:[#allocation2 + $0x352] sm:$0xff] }
 0x590   :  { %2919 = vrot.lane.b32.xlu1 %v2752_v29, %s6269_s12  ;;  %v4487_v29 = vld [vmem:[#allocation4 + $0x2] sm:$0xff] }
 0x591   :  { %v4151_v48 = vmax.f32 %v4089_v4, %v4119_v59  ;;  %v2531_v51 = vpop.permute.xlu2 %2530  ;;  %3304 = vrot.lane.b32.xlu0 %v3137_v37, %s6268_s11 }
 0x592   :  { %2686 = vst.msk [vmem:[#allocation3 + $0x128] sm:$0xff] %vm2648_vm8, %v2531_v51  ;;  %v3291_v20 = vpop.permute.xlu1 %3290 }
 0x593   :  { %4169 = vst.msk [vmem:[#allocation4 + $0x71] sm:$0x1] %vm4162_vm14, %v4151_v48  ;;  %v3345_v31 = vpop.permute.xlu0 %3344 }
 0x594   :  { %4186 = vst.msk [vmem:[#allocation4 + $0x70] sm:$0x4] %vm4179_vm15, %v4151_v48 }
 0x595   :  { %4203 = vst.msk [vmem:[#allocation4 + $0x6f] sm:$0x10] %vm4196_vm0, %v4151_v48 }
 0x596   :  { %4220 = vst.msk [vmem:[#allocation4 + $0x6e] sm:$0x40] %vm4213_vm1, %v4151_v48  ;;  %v8785_v48 = vld [vmem:[%s10131_s2] ss:$0 sm:$0xff]  ;;  %s6272_s2 = smov 96  }
 0x597   :  { %3451 = vst.msk [vmem:[#allocation3 + $0x100] sm:$0xff] %vm3418_vm10, %v3291_v20  ;;  %1757 = vrot.lane.b32.xlu2 %v8603_v36, %s6265_s0  ;;  %v3843_v36 = vadd.f32 %v8349_v58, %v8684_v45  ;;  %v3927_v51 = vadd.f32 %v8785_v48, %v8726_v63 }
 0x598   :  { %3350 = vrot.lane.b32.xlu1 %v3160_v32, %s6268_s11  ;;  %3478 = vst.msk [vmem:[#allocation3 + $0x1d8] sm:$0xff] %vm3418_vm10, %v3345_v31 }
 0x599   :  { %v2916_v19 = vpop.permute.xlu2 %2915  ;;  %2142 = vrot.lane.b32.xlu0 %v8623_v50, %s6266_s29  ;;  %v3984_v46 = vmax.f32 %v3843_v36, 0.0  ;;  %v8797_v36 = vld [vmem:[#allocation4 + $0x12] sm:$0xff] }
 0x59a   :  { %3071 = vst.msk [vmem:[#allocation3 + $0x128] sm:$0xff] %vm3033_vm9, %v2916_v19  ;;  %v2137_v53 = vpop.permute.xlu1 %2136 }
 0x59b   :  { %2296 = vst.msk [vmem:[#allocation3 + $0x108] sm:$0xff] %vm2262_vm6, %v2137_v53  ;;  %v1806_v21 = vpop.permute.xlu0 %1805  ;;  %v4012_v53 = vmax.f32 %v3927_v51, 0.0 }
 0x59c   :  { %1938 = vst.msk [vmem:[#allocation3 + $0x1e0] sm:$0xff] %vm1877_vm5, %v1806_v21 }
 0x59e   :  { %v3515_v15 = vld [vmem:[#allocation3 + $0x100] sm:$0xff] }
 0x59f   :  { %6144 = vmatmul.msk.f32.gmra.mxu0 %vm3553_vm11, %v3515_v15  ;;  %1811 = vrot.lane.b32.xlu2 %v8635_v38, %s6265_s0  ;;  %v3542_v50 = vld [vmem:[#allocation3 + $0x1d8] sm:$0xff] }
 0x5a0   :  { %1765 = vrot.lane.b32.xlu1 %v8638_v60, %s6265_s0  ;;  %v3848_v34 = vpop.f32.mrf.mxu0  ;;  %6171 = vmatmul.msk.f32.gmra.mxu3 %vm3553_vm11, %v3542_v50  ;;  %v4391_v15 = vld [vmem:[#allocation4 + $0x11] sm:$0xff]  ;;  %s6098_s0 = sshll.u32 %s10138_s9, 4  ;;  %s6099_s0 = int_to_ptr.hbm [resolvable:$true] %s6098_s0 }
 0x5a1   :  { %v3849_v10 = vadd.f32 %v8349_v58, %v3848_v34  ;;  %v3347_v39 = vpop.permute.xlu2 %3346  ;;  %2528 = vrot.lane.b32.xlu0 %v2364_v5, %s6267_s30 }
 0x5a2   :  { %v2523_v61 = vpop.permute.xlu1 %2522 }
 0x5a3   :  { %v3986_v43 = vmax.f32 %v3849_v10, 0.0  ;;  %2682 = vst.msk [vmem:[#allocation3 + $0x108] sm:$0xff] %vm2648_vm8, %v2523_v61  ;;  %v2191_v18 = vpop.permute.xlu0 %2190  ;;  %v8805_v61 = vld [vmem:[#allocation4 + $0x21] sm:$0xff] }
 0x5a4   :  { %2323 = vst.msk [vmem:[#allocation3 + $0x1e0] sm:$0xff] %vm2262_vm6, %v2191_v18 }
 0x5a5   :  { %v4090_v38 = vmax.f32 %v3984_v46, %v3986_v43 }
 0x5a7   :  { %v4252_v60 = vrot.slane %v4090_v38, 1  ;;  %2196 = vrot.lane.b32.xlu2 %v8653_v24, %s6266_s29  ;;  %v3929_v13 = vpop.f32.mrf.mxu3 }
 0x5a8   :  { %2150 = vrot.lane.b32.xlu1 %v8640_v11, %s6266_s29  ;;  %v3930_v27 = vadd.f32 %v8349_v58, %v3929_v13  ;;  %v2368_v58 = vld [vmem:[#allocation2 + $0x240] sm:$0xff]  ;;  %v8829_v13 = vld [vmem:[#allocation4 + $0x32] sm:$0xff] }
 0x5a9   :  { %v4284_v3 = vmax.f32 %v4090_v38, %v4252_v60  ;;  %v1808_v56 = vpop.permute.xlu2 %1807  ;;  %2913 = vrot.lane.b32.xlu0 %v8586_v30, %s6269_s12  ;;  %v8821_v38 = vld [vmem:[#allocation4 + $0x31] sm:$0xff] }
 0x5aa   :  { %1939 = vst.msk [vmem:[#allocation3 + $0x1e8] sm:$0xff] %vm1877_vm5, %v1808_v56  ;;  %v2908_v45 = vpop.permute.xlu1 %2907  ;;  %v4013_v62 = vmax.f32 %v3930_v27, 0.0 }
 0x5ab   :  { %4300 = vst.msk [vmem:[#allocation4 + $0x75] sm:$0x1] %vm4162_vm14, %v4284_v3  ;;  %v2577_v33 = vpop.permute.xlu0 %2576 }
 0x5ac   :  { %4316 = vst.msk [vmem:[#allocation4 + $0x74] sm:$0x4] %vm4179_vm15, %v4284_v3  ;;  %v4087_v24 = vmax.f32 %v4011_v22, %v4013_v62 }
 0x5ad   :  { %4332 = vst.msk [vmem:[#allocation4 + $0x73] sm:$0x10] %vm4196_vm0, %v4284_v3 }
 0x5ae   :  { %4348 = vst.msk [vmem:[#allocation4 + $0x72] sm:$0x40] %vm4213_vm1, %v4284_v3  ;;  %v4126_v11 = vrot.slane %v4087_v24, 1 }
 0x5af   :  { %3067 = vst.msk [vmem:[#allocation3 + $0x108] sm:$0xff] %vm3033_vm9, %v2908_v45  ;;  %2582 = vrot.lane.b32.xlu2 %v2391_v40, %s6267_s30  ;;  %v8855_v40 = vld [vmem:[#allocation4 + $0x42] sm:$0xff] }
 0x5b0   :  { %v4158_v30 = vmax.f32 %v4087_v24, %v4126_v11  ;;  %2536 = vrot.lane.b32.xlu1 %v2368_v58, %s6267_s30  ;;  %2709 = vst.msk [vmem:[#allocation3 + $0x1e0] sm:$0xff] %vm2648_vm8, %v2577_v33  ;;  %v8847_v33 = vld [vmem:[#allocation4 + $0x41] sm:$0xff] }
 0x5b1   :  { %v2193_v17 = vpop.permute.xlu2 %2192  ;;  %3298 = vrot.lane.b32.xlu0 %v8600_v52, %s6268_s11 }
 0x5b2   :  { %4176 = vst.msk [vmem:[#allocation4 + $0x101] sm:$0x1] %vm4162_vm14, %v4158_v30  ;;  %v3293_v9 = vpop.permute.xlu1 %3292 }
 0x5b3   :  { %4193 = vst.msk [vmem:[#allocation4 + $0x100] sm:$0x4] %vm4179_vm15, %v4158_v30  ;;  %v2962_v6 = vpop.permute.xlu0 %2961 }
 0x5b4   :  { %4210 = vst.msk [vmem:[#allocation4 + $0xff] sm:$0x10] %vm4196_vm0, %v4158_v30  ;;  %v8769_v54 = vld [vmem:[#allocation4 + $0x70] sm:$0xff] }
 0x5b5   :  { %4227 = vst.msk [vmem:[#allocation4 + $0xfe] sm:$0x40] %vm4213_vm1, %v4158_v30  ;;  %v4687_v49 = vld [vmem:[#allocation4 + $0x71] sm:$0xff] }
 0x5b6   :  { %2324 = vst.msk [vmem:[#allocation3 + $0x1e8] sm:$0xff] %vm2262_vm6, %v2193_v17  ;;  %v5007_v1 = vld [vmem:[#allocation4 + $0x72] sm:$0xff] }
 0x5b7   :  { %3452 = vst.msk [vmem:[#allocation3 + $0x108] sm:$0xff] %vm3418_vm10, %v3293_v9  ;;  %2967 = vrot.lane.b32.xlu2 %v2776_v12, %s6269_s12  ;;  %v8863_v9 = vld [vmem:[#allocation4 + $0x51] sm:$0xff] }
 0x5b8   :  { %2921 = vrot.lane.b32.xlu1 %v2753_v35, %s6269_s12  ;;  %3094 = vst.msk [vmem:[#allocation3 + $0x1e0] sm:$0xff] %vm3033_vm9, %v2962_v6  ;;  %v8870_v35 = vld [vmem:[#allocation4 + $0x52] sm:$0xff] }
 0x5b9   :  { %3479 = vst.msk [vmem:[#allocation3 + $0x1e0] sm:$0xff] %vm3418_vm10, %v3347_v39  ;;  %v2579_v52 = vpop.permute.xlu2 %2578  ;;  %3306 = vrot.lane.b32.xlu0 %v3138_v7, %s6268_s11 }
 0x5ba   :  { %2710 = vst.msk [vmem:[#allocation3 + $0x1e8] sm:$0xff] %vm2648_vm8, %v2579_v52  ;;  %v3301_v57 = vpop.permute.xlu1 %3300 }
 0x5bb   :  { %3456 = vst.msk [vmem:[#allocation3 + $0x128] sm:$0xff] %vm3418_vm10, %v3301_v57  ;;  %v2139_v25 = vpop.permute.xlu0 %2138 }
 0x5bc   :  { %2297 = vst.msk [vmem:[#allocation3 + $0x110] sm:$0xff] %vm2262_vm6, %v2139_v25  ;;  %v3851_v60 = vpop.f32.mrf.mxu0 }
 0x5bd   :  { %4381 = vst.msk [vmem:[#allocation5 + $0xa8] sm:$0xff] %vm4023_vm12, %v8769_v54  ;;  %v3852_v6 = vadd.f32 %v8785_v48, %v3851_v60 }
 0x5be   :  { %v3516_v4 = vld [vmem:[#allocation3 + $0x108] sm:$0xff]  ;;  %4703 = vst.msk [vmem:[#allocation5 + $0x98] sm:$0xff] %vm4023_vm12, %v4687_v49 }
 0x5bf   :  { %6145 = vmatmul.msk.f32.gmra.mxu0 %vm3553_vm11, %v3516_v4  ;;  %4422 = vrot.lane.b32.xlu2 %v4390_v2, %s6270_s20  ;;  %5023 = vst.msk [vmem:[#allocation5 + $0x88] sm:$0xff] %vm4023_vm12, %v5007_v1  ;;  %v3987_v49 = vmax.f32 %v3852_v6, 0.0  ;;  %v8879_v4 = vld [vmem:[#allocation4 + $0x61] sm:$0xff] }
 0x5c0   :  { %3352 = vrot.lane.b32.xlu1 %v3161_v47, %s6268_s11  ;;  %v3543_v37 = vld [vmem:[#allocation3 + $0x1e0] sm:$0xff] }
 0x5c1   :  { %v2964_v59 = vpop.permute.xlu2 %2963  ;;  %4519 = vrot.lane.b32.xlu0 %v4487_v29, %s6271_s21  ;;  %6172 = vmatmul.msk.f32.gmra.mxu3 %vm3553_vm11, %v3543_v37  ;;  %v8885_v37 = vld [vmem:[#allocation4 + $0x62] sm:$0xff] }
 0x5c2   :  { %3095 = vst.msk [vmem:[#allocation3 + $0x1e8] sm:$0xff] %vm3033_vm9, %v2964_v59  ;;  %v1762_v20 = vpop.permute.xlu1 %1761  ;;  %v3520_v31 = vld [vmem:[#allocation3 + $0x128] sm:$0xff] }
 0x5c3   :  { %1916 = vst.msk [vmem:[#allocation3 + $0x130] sm:$0xff] %vm1877_vm5, %v1762_v20  ;;  %6149 = vmatmul.msk.f32.vlgmr.msra.gmra.mxu2 %vm3553_vm11, %v3520_v31  ;;  %v3932_v32 = vpop.f32.mrf.mxu3  ;;  %v2525_v55 = vpop.permute.xlu0 %2524 }
 0x5c4   :  { %v3933_v19 = vadd.f32 %v8785_v48, %v3932_v32  ;;  %2683 = vst.msk [vmem:[#allocation3 + $0x110] sm:$0xff] %vm2648_vm8, %v2525_v55  ;;  %v8894_v32 = vld [vmem:[#allocation4 + $0x71] sm:$0xff] }
 0x5c6   :  { %v4014_v21 = vmax.f32 %v3933_v19, 0.0  ;;  %v8902_v19 = vld [vmem:[#allocation4 + $0xe1] sm:$0xff] }
 0x5c7   :  { %4424 = vrot.lane.b32.xlu2 %v4391_v15, %s6270_s20 }
 0x5c8   :  { %v4088_v5 = vmax.f32 %v4012_v53, %v4014_v21  ;;  %4616 = vrot.lane.b32.xlu1 %v8024_v28, %s6272_s2  ;;  %v8813_v28 = vld [vmem:[#allocation4 + $0x22] sm:$0xff] }
 0x5c9   :  { %v1756_v63 = vpop.permute.xlu2 %1755  ;;  %4521 = vrot.lane.b32.xlu0 %v8797_v36, %s6271_s21  ;;  %v4358_v53 = vld [vmem:[#allocation4] sm:$0xff] }
 0x5ca   :  { %v4259_v50 = vrot.slane %v4088_v5, 1  ;;  %1913 = vst.msk [vmem:[#allocation3 + $0x118] sm:$0xff] %vm1877_vm5, %v1756_v63  ;;  %v2147_v34 = vpop.permute.xlu1 %2146  ;;  %v8910_v63 = vld [vmem:[#allocation4 + $0xe2] sm:$0xff] }
 0x5cb   :  { %2301 = vst.msk [vmem:[#allocation3 + $0x130] sm:$0xff] %vm2262_vm6, %v2147_v34  ;;  %v2910_v10 = vpop.permute.xlu0 %2909 }
 0x5cc   :  { %v4291_v39 = vmax.f32 %v4088_v5, %v4259_v50  ;;  %3068 = vst.msk [vmem:[#allocation3 + $0x110] sm:$0xff] %vm3033_vm9, %v2910_v10  ;;  %v8916_v10 = vld [vmem:[#allocation4 + $0x72] sm:$0xff] }
 0x5cd   :  { %4374 = vst.msk [vmem:[#allocation5] sm:$0xff] %vm4023_vm12, %v4358_v53 }
 0x5ce   :  { %4307 = vst.msk [vmem:[#allocation4 + $0x105] sm:$0x1] %vm4162_vm14, %v4291_v39 }
 0x5cf   :  { %4323 = vst.msk [vmem:[#allocation4 + $0x104] sm:$0x4] %vm4179_vm15, %v4291_v39  ;;  %4426 = vrot.lane.b32.xlu2 %v8805_v61, %s6270_s20 }
 0x5d0   :  { %4339 = vst.msk [vmem:[#allocation4 + $0x103] sm:$0x10] %vm4196_vm0, %v4291_v39  ;;  %4618 = vrot.lane.b32.xlu1 %v8075_v14, %s6272_s2 }
 0x5d1   :  { %4355 = vst.msk [vmem:[#allocation4 + $0x102] sm:$0x40] %vm4213_vm1, %v4291_v39  ;;  %v1810_v46 = vpop.permute.xlu2 %1809  ;;  %4523 = vrot.lane.b32.xlu0 %v8813_v28, %s6271_s21 }
 0x5d2   :  { %1940 = vst.msk [vmem:[#allocation3 + $0x1f0] sm:$0xff] %vm1877_vm5, %v1810_v46  ;;  %v2533_v43 = vpop.permute.xlu1 %2532 }
 0x5d3   :  { %2687 = vst.msk [vmem:[#allocation3 + $0x130] sm:$0xff] %vm2648_vm8, %v2533_v43  ;;  %v3295_v18 = vpop.permute.xlu0 %3294 }
 0x5d4   :  { %3453 = vst.msk [vmem:[#allocation3 + $0x110] sm:$0xff] %vm3418_vm10, %v3295_v18  ;;  %v8851_v24 = vpop.f32.mrf.mxu0 }
 0x5d5   :  { %v3855_v50 = vadd.f32 %v8785_v48, %v8851_v24  ;;  %v4398_v24 = vld [vmem:[#allocation4 + $0xa1] sm:$0xff] }
 0x5d7   :  { %4428 = vrot.lane.b32.xlu2 %v8821_v38, %s6270_s20  ;;  %v8825_v8 = vld [vmem:[#allocation4 + $0x100] sm:$0xff]  ;;  %v3988_v60 = vmax.f32 %v3855_v50, 0.0  ;;  %v5093_v50 = vld [vmem:[%s10132_s3 + $0x58] sm:$0xff] }
 0x5d8   :  { %4620 = vrot.lane.b32.xlu1 %v8156_v44, %s6272_s2  ;;  %v8831_v27 = vld [vmem:[#allocation4 + $0x102] sm:$0xff]  ;;  %4388 = vst.msk [vmem:[#allocation5 + $0x150] sm:$0xff] %vm4023_vm12, %v8825_v8 }
 0x5d9   :  { %v2195_v3 = vpop.permute.xlu2 %2194  ;;  %4525 = vrot.lane.b32.xlu0 %v8829_v13, %s6271_s21  ;;  %5030 = vst.msk [vmem:[#allocation5 + $0x130] sm:$0xff] %vm4023_vm12, %v8831_v27  ;;  %v8840_v22 = vld [vmem:[#allocation4 + $0x101] sm:$0xff] }
 0x5da   :  { %2325 = vst.msk [vmem:[#allocation3 + $0x1f0] sm:$0xff] %vm2262_vm6, %v2195_v3  ;;  %v2918_v56 = vpop.permute.xlu1 %2917 }
 0x5db   :  { %3072 = vst.msk [vmem:[#allocation3 + $0x130] sm:$0xff] %vm3033_vm9, %v2918_v56  ;;  %v3303_v45 = vpop.permute.xlu0 %3302  ;;  %v3517_v62 = vld [vmem:[#allocation3 + $0x110] sm:$0xff]  ;;  %v3935_v55 = vpop.f32.mrf.mxu3 }
 0x5dc   :  { %3457 = vst.msk [vmem:[#allocation3 + $0x130] sm:$0xff] %vm3418_vm10, %v3303_v45  ;;  %6146 = vmatmul.msk.f32.gmra.mxu0 %vm3553_vm11, %v3517_v62  ;;  %v5097_v62 = vld [vmem:[%s10132_s3 + $0x78] sm:$0xff] }
 0x5dd   :  { %4710 = vst.msk [vmem:[#allocation5 + $0x140] sm:$0xff] %vm4023_vm12, %v8840_v22  ;;  %5170 = vmatpush.msra.mxu1 %v5097_v62  ;;  %6196 = vmatpush.msrb.mxu2 %v5097_v62  ;;  %v5090_v62 = vld [vmem:[%s10132_s3 + $0x40] sm:$0xff] }
 0x5df   :  { %4430 = vrot.lane.b32.xlu2 %v8847_v33, %s6270_s20 }
 0x5e0   :  { %4622 = vrot.lane.b32.xlu1 %v8281_v16, %s6272_s2 }
 0x5e1   :  { %v2581_v58 = vpop.permute.xlu2 %2580  ;;  %4527 = vrot.lane.b32.xlu0 %v8855_v40, %s6271_s21 }
 0x5e2   :  { %2711 = vst.msk [vmem:[#allocation3 + $0x1f0] sm:$0xff] %vm2648_vm8, %v2581_v58  ;;  %v3349_v11 = vpop.permute.xlu1 %3348 }
 0x5e3   :  { %3480 = vst.msk [vmem:[#allocation3 + $0x1e8] sm:$0xff] %vm3418_vm10, %v3349_v11  ;;  %v2141_v30 = vpop.permute.xlu0 %2140  ;;  %v3521_v17 = vld [vmem:[#allocation3 + $0x130] sm:$0xff]  ;;  %v3936_v11 = vadd.f32 %v8785_v48, %v3935_v55  ;;  %v5095_v55 = vld [vmem:[%s10132_s3 + $0x68] sm:$0xff] }
 0x5e4   :  { %2298 = vst.msk [vmem:[#allocation3 + $0x118] sm:$0xff] %vm2262_vm6, %v2141_v30  ;;  %6150 = vmatmul.msk.f32.gmra.mxu2 %vm3553_vm11, %v3521_v17 }
 0x5e7   :  { %4432 = vrot.lane.b32.xlu2 %v8863_v9, %s6270_s20 }
 0x5e8   :  { %v3857_v12 = vpop.f32.mrf.mxu0  ;;  %4624 = vrot.lane.b32.xlu1 %v8432_v26, %s6272_s2 }
 0x5e9   :  { %v3858_v7 = vadd.f32 %v8785_v48, %v3857_v12  ;;  %v2966_v52 = vpop.permute.xlu2 %2965  ;;  %4529 = vrot.lane.b32.xlu0 %v8870_v35, %s6271_s21 }
 0x5ea   :  { %3096 = vst.msk [vmem:[#allocation3 + $0x1f0] sm:$0xff] %vm3033_vm9, %v2966_v52  ;;  %v1764_v57 = vpop.permute.xlu1 %1763  ;;  %v3544_v25 = vld [vmem:[#allocation3 + $0x1e8] sm:$0xff]  ;;  %v4015_v52 = vmax.f32 %v3936_v11, 0.0 }
 0x5eb   :  { %v3989_v2 = vmax.f32 %v3858_v7, 0.0  ;;  %1917 = vst.msk [vmem:[#allocation3 + $0x138] sm:$0xff] %vm1877_vm5, %v1764_v57  ;;  %6173 = vmatmul.msk.f32.gmra.mxu3 %vm3553_vm11, %v3544_v25  ;;  %v2527_v1 = vpop.permute.xlu0 %2526  ;;  %v5088_v11 = vld [vmem:[%s10132_s3 + $0x30] sm:$0xff] }
 0x5ec   :  { %2684 = vst.msk [vmem:[#allocation3 + $0x118] sm:$0xff] %vm2648_vm8, %v2527_v1 }
 0x5ed   :  { %v4093_v47 = vmax.f32 %v3987_v49, %v3989_v2 }
 0x5ef   :  { %v4120_v29 = vrot.slane %v4093_v47, 1  ;;  %4434 = vrot.lane.b32.xlu2 %v8879_v4, %s6270_s20  ;;  %v8914_v34 = vpop.f32.mrf.mxu3 }
 0x5f0   :  { %4626 = vrot.lane.b32.xlu1 %v8609_v0, %s6272_s2 }
 0x5f1   :  { %v4152_v59 = vmax.f32 %v4093_v47, %v4120_v29  ;;  %v1758_v51 = vpop.permute.xlu2 %1757  ;;  %4531 = vrot.lane.b32.xlu0 %v8885_v37, %s6271_s21  ;;  %v4495_v47 = vld [vmem:[#allocation4 + $0xa2] sm:$0xff] }
 0x5f2   :  { %1914 = vst.msk [vmem:[#allocation3 + $0x120] sm:$0xff] %vm1877_vm5, %v1758_v51  ;;  %v2149_v20 = vpop.permute.xlu1 %2148 }
 0x5f3   :  { %4170 = vst.msk [vmem:[#allocation4 + $0x81] sm:$0x1] %vm4162_vm14, %v4152_v59  ;;  %v2912_v31 = vpop.permute.xlu0 %2911 }
 0x5f4   :  { %4187 = vst.msk [vmem:[#allocation4 + $0x80] sm:$0x4] %vm4179_vm15, %v4152_v59 }
 0x5f5   :  { %4204 = vst.msk [vmem:[#allocation4 + $0x7f] sm:$0x10] %vm4196_vm0, %v4152_v59 }
 0x5f6   :  { %4221 = vst.msk [vmem:[#allocation4 + $0x7e] sm:$0x40] %vm4213_vm1, %v4152_v59  ;;  %v8941_v59 = vld [vmem:[#allocation4 + $0xf2] sm:$0xff] }
 0x5f7   :  { %2302 = vst.msk [vmem:[#allocation3 + $0x138] sm:$0xff] %vm2262_vm6, %v2149_v20  ;;  %4436 = vrot.lane.b32.xlu2 %v8894_v32, %s6270_s20 }
 0x5f8   :  { %4628 = vrot.lane.b32.xlu1 %v8769_v54, %s6272_s2  ;;  %3069 = vst.msk [vmem:[#allocation3 + $0x118] sm:$0xff] %vm3033_vm9, %v2912_v31  ;;  %v5096_v31 = vld [vmem:[%s10132_s3 + $0x70] sm:$0xff] }
 0x5f9   :  { %v1812_v21 = vpop.permute.xlu2 %1811  ;;  %4446 = vrot.lane.b32.xlu0 %v8902_v19, %s6270_s20  ;;  %5171 = vmatpush.msra.mxu1 %v5096_v31 }
 0x5fa   :  { %1941 = vst.msk [vmem:[#allocation3 + $0x1f8] sm:$0xff] %vm1877_vm5, %v1812_v21  ;;  %v2535_v15 = vpop.permute.xlu1 %2534  ;;  %6197 = vmatpush.msrb.mxu2 %v5096_v31 }
 0x5fb   :  { %2688 = vst.msk [vmem:[#allocation3 + $0x138] sm:$0xff] %vm2648_vm8, %v2535_v15  ;;  %v3297_v5 = vpop.permute.xlu0 %3296  ;;  %v5094_v15 = vld [vmem:[%s10132_s3 + $0x60] sm:$0xff]  ;;  %5172 = vmatpush.msra.mxu1 %v5095_v55 }
 0x5fc   :  { %3454 = vst.msk [vmem:[#allocation3 + $0x118] sm:$0xff] %vm3418_vm10, %v3297_v5  ;;  %6198 = vmatpush.msrb.mxu2 %v5095_v55 }
 0x5fd   :  { %5173 = vmatpush.msra.mxu1 %v5094_v15 }
 0x5fe   :  { %6199 = vmatpush.msrb.mxu2 %v5094_v15 }
 0x5ff   :  { %4543 = vrot.lane.b32.xlu2 %v8910_v63, %s6271_s21  ;;  %5174 = vmatpush.msra.mxu1 %v5093_v50 }
 0x600   :  { %v3860_v39 = vpop.f32.mrf.mxu0  ;;  %4533 = vrot.lane.b32.xlu1 %v8916_v10, %s6271_s21  ;;  %6200 = vmatpush.msrb.mxu2 %v5093_v50 }
 0x601   :  { %v3861_v46 = vadd.f32 %v8785_v48, %v3860_v39  ;;  %v2197_v43 = vpop.permute.xlu2 %2196 }
 0x602   :  { %2326 = vst.msk [vmem:[#allocation3 + $0x1f8] sm:$0xff] %vm2262_vm6, %v2197_v43  ;;  %v2920_v18 = vpop.permute.xlu1 %2919  ;;  %v5092_v43 = vld [vmem:[%s10132_s3 + $0x50] sm:$0xff] }
 0x603   :  { %v3990_v3 = vmax.f32 %v3861_v46, 0.0  ;;  %3073 = vst.msk [vmem:[#allocation3 + $0x138] sm:$0xff] %vm3033_vm9, %v2920_v18  ;;  %v3305_v56 = vpop.permute.xlu0 %3304  ;;  %v3518_v45 = vld [vmem:[#allocation3 + $0x118] sm:$0xff]  ;;  %5175 = vmatpush.msra.mxu1 %v5092_v43  ;;  %6201 = vmatpush.msrb.mxu2 %v5092_v43 }
 0x604   :  { %3458 = vst.msk [vmem:[#allocation3 + $0x138] sm:$0xff] %vm3418_vm10, %v3305_v56  ;;  %6147 = vmatmul.msk.f32.gmra.mxu0 %vm3553_vm11, %v3518_v45  ;;  %v5082_v43 = vld [vmem:[%s10132_s3] sm:$0xff] }
 0x605   :  { %v4094_v58 = vmax.f32 %v3988_v60, %v3990_v3  ;;  %v5091_v60 = vld [vmem:[%s10132_s3 + $0x48] sm:$0xff] }
 0x606   :  { %5176 = vmatpush.msra.mxu1 %v5091_v60  ;;  %6202 = vmatpush.msrb.mxu2 %v5091_v60 }
 0x607   :  { %v4253_v30 = vrot.slane %v4094_v58, 1  ;;  %4438 = vrot.lane.b32.xlu2 %v4398_v24, %s6270_s20  ;;  %v3941_v17 = vpop.f32.mrf.mxu3  ;;  %v8991_v24 = vld [vmem:[#allocation4 + $0xf1] sm:$0xff] }
 0x608   :  { %4640 = vrot.lane.b32.xlu1 %v8671_v42, %s6272_s2  ;;  %v3942_v6 = vadd.f32 %v8785_v48, %v3941_v17  ;;  %5177 = vmatpush.msra.mxu1 %v5090_v62  ;;  %v5116_v17 = vld [vmem:[%s10132_s3 + $0x110] sm:$0xff] }
 0x609   :  { %v4285_v12 = vmax.f32 %v4094_v58, %v4253_v30  ;;  %v2583_v7 = vpop.permute.xlu2 %2582  ;;  %v5089_v58 = vld [vmem:[%s10132_s3 + $0x38] sm:$0xff]  ;;  %6203 = vmatpush.msrb.mxu2 %v5090_v62 }
 0x60a   :  { %2712 = vst.msk [vmem:[#allocation3 + $0x1f8] sm:$0xff] %vm2648_vm8, %v2583_v7  ;;  %v3351_v57 = vpop.permute.xlu1 %3350  ;;  %v4017_v25 = vmax.f32 %v3942_v6, 0.0  ;;  %v5117_v30 = vld [vmem:[%s10132_s3 + $0x118] sm:$0xff]  ;;  %5178 = vmatpush.msra.mxu1 %v5089_v58  ;;  %v5115_v7 = vld [vmem:[%s10132_s3 + $0x108] sm:$0xff] }
 0x60b   :  { %4301 = vst.msk [vmem:[#allocation4 + $0x85] sm:$0x1] %vm4162_vm14, %v4285_v12  ;;  %v2143_v49 = vpop.permute.xlu0 %2142  ;;  %v3522_v2 = vld [vmem:[#allocation3 + $0x138] sm:$0xff]  ;;  %6212 = vmatpush.msrb.mxu3 %v5117_v30  ;;  %6204 = vmatpush.msrb.mxu2 %v5089_v58 }
 0x60c   :  { %4317 = vst.msk [vmem:[#allocation4 + $0x84] sm:$0x4] %vm4179_vm15, %v4285_v12  ;;  %v4091_v1 = vmax.f32 %v4015_v52, %v4017_v25  ;;  %6151 = vmatmul.msk.f32.gmra.mxu2 %vm3553_vm11, %v3522_v2  ;;  %v3939_v52 = vadd.f32 %v8785_v48, %v8914_v34  ;;  %5179 = vmatpush.msra.mxu1 %v5088_v11  ;;  %v5086_v2 = vld [vmem:[%s10132_s3 + $0x20] sm:$0xff] }
 0x60d   :  { %4333 = vst.msk [vmem:[#allocation4 + $0x83] sm:$0x10] %vm4196_vm0, %v4285_v12  ;;  %6213 = vmatpush.msrb.mxu3 %v5116_v17  ;;  %6205 = vmatpush.msrb.mxu2 %v5088_v11 }
 0x60e   :  { %4349 = vst.msk [vmem:[#allocation4 + $0x82] sm:$0x40] %vm4213_vm1, %v4285_v12  ;;  %v4127_v29 = vrot.slane %v4091_v1, 1  ;;  %v5087_v12 = vld [vmem:[%s10132_s3 + $0x28] sm:$0xff] }
 0x60f   :  { %3481 = vst.msk [vmem:[#allocation3 + $0x1f0] sm:$0xff] %vm3418_vm10, %v3351_v57  ;;  %4545 = vrot.lane.b32.xlu2 %v8941_v59, %s6271_s21  ;;  %5180 = vmatpush.msra.mxu1 %v5087_v12 }
 0x610   :  { %v4159_v51 = vmax.f32 %v4091_v1, %v4127_v29  ;;  %4535 = vrot.lane.b32.xlu1 %v4495_v47, %s6271_s21  ;;  %2299 = vst.msk [vmem:[#allocation3 + $0x120] sm:$0xff] %vm2262_vm6, %v2143_v49  ;;  %v5114_v1 = vld [vmem:[%s10132_s3 + $0x100] sm:$0xff]  ;;  %6214 = vmatpush.msrb.mxu3 %v5115_v7  ;;  %v5085_v47 = vld [vmem:[%s10132_s3 + $0x18] sm:$0xff]  ;;  %v4016_v29 = vmax.f32 %v3939_v52, 0.0 }
 0x611   :  { %v2968_v20 = vpop.permute.xlu2 %2967  ;;  %6206 = vmatpush.msrb.mxu2 %v5087_v12  ;;  %5181 = vmatpush.msra.mxu1 %v5086_v2 }
 0x612   :  { %4177 = vst.msk [vmem:[#allocation4 + $0x111] sm:$0x1] %vm4162_vm14, %v4159_v51  ;;  %v1766_v53 = vpop.permute.xlu1 %1765  ;;  %6215 = vmatpush.msrb.mxu3 %v5114_v1 }
 0x613   :  { %4194 = vst.msk [vmem:[#allocation4 + $0x110] sm:$0x4] %vm4179_vm15, %v4159_v51  ;;  %v2529_v21 = vpop.permute.xlu0 %2528  ;;  %6207 = vmatpush.msrb.mxu2 %v5086_v2  ;;  %5182 = vmatpush.msra.mxu1 %v5085_v47 }
 0x614   :  { %4211 = vst.msk [vmem:[#allocation4 + $0x10f] sm:$0x10] %vm4196_vm0, %v4159_v51  ;;  %v8960_v5 = vld [vmem:[#allocation4 + $0x80] sm:$0xff] }
 0x615   :  { %4228 = vst.msk [vmem:[#allocation4 + $0x10e] sm:$0x40] %vm4213_vm1, %v4159_v51  ;;  %4630 = vrot.lane.b32.xlu0 %v8960_v5, %s6272_s2  ;;  %v8969_v46 = vld [vmem:[#allocation4 + $0x81] sm:$0xff]  ;;  %6208 = vmatpush.msrb.mxu2 %v5085_v47 }
 0x616   :  { %3097 = vst.msk [vmem:[#allocation3 + $0x1f8] sm:$0xff] %vm3033_vm9, %v2968_v20  ;;  %v3545_v39 = vld [vmem:[#allocation3 + $0x1f0] sm:$0xff]  ;;  %v8985_v56 = vld [vmem:[#allocation4 + $0x82] sm:$0xff] }
 0x617   :  { %1918 = vst.msk [vmem:[#allocation3 + $0x140] sm:$0xff] %vm1877_vm5, %v1766_v53  ;;  %6174 = vmatmul.msk.f32.gmra.mxu3 %vm3553_vm11, %v3545_v39  ;;  %v5084_v20 = vld [vmem:[%s10132_s3 + $0x10] sm:$0xff]  ;;  %v5083_v53 = vld [vmem:[%s10132_s3 + $0x8] sm:$0xff]  ;;  %vm5421_vm5 = vcmask 516096  }
 0x618   :  { %4642 = vrot.lane.b32.xlu1 %v8825_v8, %s6272_s2  ;;  %2685 = vst.msk [vmem:[#allocation3 + $0x120] sm:$0xff] %vm2648_vm8, %v2529_v21  ;;  %5183 = vmatpush.msra.mxu1 %v5084_v20 }
 0x619   :  { %v4423_v18 = vpop.permute.xlu2 %4422  ;;  %4704 = vst.msk [vmem:[#allocation5 + $0xb0] sm:$0xff] %vm4023_vm12, %v8969_v46  ;;  %6209 = vmatpush.msrb.mxu2 %v5084_v20 }
 0x61a   :  { %4471 = vst.msk [vmem:[#allocation5] sm:$0xff] %vm4470_vm2, %v4423_v18  ;;  %v2151_v3 = vpop.permute.xlu1 %2150  ;;  %5184 = vmatpush.msra.mxu1 %v5083_v53 }
 0x61b   :  { %2303 = vst.msk [vmem:[#allocation3 + $0x140] sm:$0xff] %vm2262_vm6, %v2151_v3  ;;  %v2914_v45 = vpop.permute.xlu0 %2913  ;;  %6210 = vmatpush.msrb.mxu2 %v5083_v53  ;;  %vm5430_vm6 = vcmask 518146  }
 0x61c   :  { %3070 = vst.msk [vmem:[#allocation3 + $0x120] sm:$0xff] %vm3033_vm9, %v2914_v45  ;;  %5185 = vmatpush.msra.mxu1 %v5082_v43 }
 0x61d   :  { %4448 = vrot.lane.b32.xlu0 %v8991_v24, %s6270_s20  ;;  %5024 = vst.msk [vmem:[#allocation5 + $0xa0] sm:$0xff] %vm4023_vm12, %v8985_v56  ;;  %6211 = vmatpush.msrb.mxu2 %v5082_v43 }
 0x61e   :  { %5312 = vmatpush.msrb.mxu1 %v5117_v30 }
 0x620   :  { %5313 = vmatpush.msrb.mxu1 %v5116_v17 }
 0x621   :  { %v4425_v6 = vpop.permute.xlu2 %4424 }
 0x622   :  { %v2537_v57 = vpop.permute.xlu1 %2536  ;;  %4472 = vst.msk [vmem:[#allocation5 + $0x18] sm:$0xff] %vm4470_vm2, %v4425_v6  ;;  %5314 = vmatpush.msrb.mxu1 %v5115_v7 }
 0x623   :  { %2689 = vst.msk [vmem:[#allocation3 + $0x140] sm:$0xff] %vm2648_vm8, %v2537_v57  ;;  %v3944_v25 = vpop.f32.mrf.mxu3  ;;  %v3299_v49 = vpop.permute.xlu0 %3298  ;;  %vm5448_vm8 = vcmask 522246  }
 0x624   :  { %v3945_v34 = vadd.f32 %v8785_v48, %v3944_v25  ;;  %3455 = vst.msk [vmem:[#allocation3 + $0x120] sm:$0xff] %vm3418_vm10, %v3299_v49  ;;  %5315 = vmatpush.msrb.mxu1 %v5114_v1  ;;  %v5072_v49 = vld [vmem:[#allocation5 + $0x130] sm:$0xff]  ;;  %v4366_v1 = vld [vmem:[#allocation4 + $0xa0] sm:$0xff] }
 0x625   :  { %4382 = vst.msk [vmem:[#allocation5 + $0xc0] sm:$0xff] %vm4023_vm12, %v4366_v1 }
 0x626   :  { %v4018_v51 = vmax.f32 %v3945_v34, 0.0  ;;  %v3863_v34 = vpop.f32.mrf.mxu0 }
 0x628   :  { %v4092_v31 = vmax.f32 %v4016_v29, %v4018_v51 }
 0x629   :  { %v4427_v55 = vpop.permute.xlu2 %4426 }
 0x62a   :  { %v4260_v21 = vrot.slane %v4092_v31, 1  ;;  %v2922_v15 = vpop.permute.xlu1 %2921  ;;  %4473 = vst.msk [vmem:[#allocation5 + $0x30] sm:$0xff] %vm4470_vm2, %v4427_v55 }
 0x62b   :  { %3074 = vst.msk [vmem:[#allocation3 + $0x140] sm:$0xff] %vm3033_vm9, %v2922_v15  ;;  %v3307_v50 = vpop.permute.xlu0 %3306  ;;  %v3519_v39 = vld [vmem:[#allocation3 + $0x120] sm:$0xff]  ;;  %vm5496_vm9 = vcmask 523264  }
 0x62c   :  { %v4292_v18 = vmax.f32 %v4092_v31, %v4260_v21  ;;  %3459 = vst.msk [vmem:[#allocation3 + $0x140] sm:$0xff] %vm3418_vm10, %v3307_v50  ;;  %6148 = vmatmul.msk.f32.gmra.mxu0 %vm3553_vm11, %v3519_v39  ;;  %v3864_v39 = vadd.f32 %v8785_v48, %v3863_v34 }
 0x62e   :  { %4308 = vst.msk [vmem:[#allocation4 + $0x115] sm:$0x1] %vm4162_vm14, %v4292_v18 }
 0x62f   :  { %4324 = vst.msk [vmem:[#allocation4 + $0x114] sm:$0x4] %vm4179_vm15, %v4292_v18 }
 0x630   :  { %4340 = vst.msk [vmem:[#allocation4 + $0x113] sm:$0x10] %vm4196_vm0, %v4292_v18 }
 0x631   :  { %4356 = vst.msk [vmem:[#allocation4 + $0x112] sm:$0x40] %vm4213_vm1, %v4292_v18  ;;  %v4429_v60 = vpop.permute.xlu2 %4428 }
 0x632   :  { %v3353_v3 = vpop.permute.xlu1 %3352  ;;  %4474 = vst.msk [vmem:[#allocation5 + $0x48] sm:$0xff] %vm4470_vm2, %v4429_v60 }
 0x633   :  { %3482 = vst.msk [vmem:[#allocation3 + $0x1f8] sm:$0xff] %vm3418_vm10, %v3353_v3  ;;  %v4520_v45 = vpop.permute.xlu0 %4519  ;;  %v3523_v62 = vld [vmem:[#allocation3 + $0x140] sm:$0xff]  ;;  %vm5503_vm10 = vcmask 1041408  }
 0x634   :  { %4568 = vst.msk [vmem:[#allocation5] sm:$0xff] %vm4567_vm3, %v4520_v45  ;;  %6152 = vmatmul.msk.f32.gmra.mxu2 %vm3553_vm11, %v3523_v62 }
 0x637   :  { %v9052_v58 = vld [vmem:[#allocation4 + $0x110] sm:$0xff] }
 0x638   :  { %v9054_v11 = vld [vmem:[#allocation4 + $0x112] sm:$0xff]  ;;  %4389 = vst.msk [vmem:[#allocation5 + $0x168] sm:$0xff] %vm4023_vm12, %v9052_v58 }
 0x639   :  { %v4431_v30 = vpop.permute.xlu2 %4430  ;;  %5031 = vst.msk [vmem:[#allocation5 + $0x148] sm:$0xff] %vm4023_vm12, %v9054_v11  ;;  %v9061_v12 = vld [vmem:[#allocation4 + $0x111] sm:$0xff] }
 0x63a   :  { %v4617_v17 = vpop.permute.xlu1 %4616  ;;  %4475 = vst.msk [vmem:[#allocation5 + $0x60] sm:$0xff] %vm4470_vm2, %v4431_v30  ;;  %v3546_v6 = vld [vmem:[#allocation3 + $0x1f8] sm:$0xff]  ;;  %v3991_v30 = vmax.f32 %v3864_v39, 0.0 }
 0x63b   :  { %4665 = vst.msk [vmem:[#allocation5] sm:$0xff] %vm4664_vm4, %v4617_v17  ;;  %6175 = vmatmul.msk.f32.gmra.mxu3 %vm3553_vm11, %v3546_v6  ;;  %v4522_v7 = vpop.permute.xlu0 %4521  ;;  %vm5511_vm11 = vcmask 1041409  }
 0x63c   :  { %4569 = vst.msk [vmem:[#allocation5 + $0x18] sm:$0xff] %vm4567_vm3, %v4522_v7  ;;  %v3866_v55 = vpop.f32.mrf.mxu0 }
 0x63d   :  { %4711 = vst.msk [vmem:[#allocation5 + $0x158] sm:$0xff] %vm4023_vm12, %v9061_v12 }
 0x640   :  { %v5075_v20 = vld [vmem:[#allocation5 + $0x148] sm:$0xff] }
 0x641   :  { %v4433_v52 = vpop.permute.xlu2 %4432 }
 0x642   :  { %v4619_v57 = vpop.permute.xlu1 %4618  ;;  %4476 = vst.msk [vmem:[#allocation5 + $0x78] sm:$0xff] %vm4470_vm2, %v4433_v52  ;;  %v5034_v25 = vld [vmem:[#allocation5] sm:$0xff] }
 0x643   :  { %4666 = vst.msk [vmem:[#allocation5 + $0x18] sm:$0xff] %vm4664_vm4, %v4619_v57  ;;  %5186 = vmatmul.f32.vlgmr.msra.gmra.mxu1 %v5034_v25  ;;  %6188 = vmatmul.msk.f32.vlgmr.msrb.gmra.mxu3 %vm4023_vm12, %v5072_v49  ;;  %v4524_v2 = vpop.permute.xlu0 %4523 }
 0x644   :  { %4570 = vst.msk [vmem:[#allocation5 + $0x30] sm:$0xff] %vm4567_vm3, %v4524_v2 }
 0x649   :  { %v4435_v47 = vpop.permute.xlu2 %4434 }
 0x64a   :  { %v4621_v29 = vpop.permute.xlu1 %4620  ;;  %4477 = vst.msk [vmem:[#allocation5 + $0x90] sm:$0xff] %vm4470_vm2, %v4435_v47  ;;  %v5037_v51 = vld [vmem:[#allocation5 + $0x18] sm:$0xff] }
 0x64b   :  { %4667 = vst.msk [vmem:[#allocation5 + $0x30] sm:$0xff] %vm4664_vm4, %v4621_v29  ;;  %5189 = vmatmul.f32.gmra.mxu1 %v5037_v51  ;;  %6189 = vmatmul.msk.f32.gmra.mxu3 %vm4023_vm12, %v5075_v20  ;;  %v4526_v31 = vpop.permute.xlu0 %4525 }
 0x64c   :  { %4571 = vst.msk [vmem:[#allocation5 + $0x48] sm:$0xff] %vm4567_vm3, %v4526_v31  ;;  %v3878_v31 = vpop.f32.mrf.mxu2 }
 0x651   :  { %v4437_v53 = vpop.permute.xlu2 %4436 }
 0x652   :  { %v4623_v21 = vpop.permute.xlu1 %4622  ;;  %4478 = vst.msk [vmem:[#allocation5 + $0xa8] sm:$0xff] %vm4470_vm2, %v4437_v53  ;;  %v5040_v15 = vld [vmem:[#allocation5 + $0x30] sm:$0xff]  ;;  %v3867_v53 = vadd.f32 %v8785_v48, %v3866_v55  ;;  %v3879_v55 = vadd.f32 %v8785_v48, %v3878_v31 }
 0x653   :  { %4668 = vst.msk [vmem:[#allocation5 + $0x48] sm:$0xff] %vm4664_vm4, %v4623_v21  ;;  %5192 = vmatmul.f32.gmra.mxu1 %v5040_v15  ;;  %v4528_v50 = vpop.permute.xlu0 %4527 }
 0x654   :  { %4572 = vst.msk [vmem:[#allocation5 + $0x60] sm:$0xff] %vm4567_vm3, %v4528_v50 }
 0x659   :  { %v4544_v43 = vpop.permute.xlu2 %4543  ;;  %v3869_v18 = vpop.f32.mrf.mxu0 }
 0x65a   :  { %v4625_v60 = vpop.permute.xlu1 %4624  ;;  %v5043_v3 = vld [vmem:[#allocation5 + $0x48] sm:$0xff]  ;;  %v3870_v45 = vadd.f32 %v8785_v48, %v3869_v18 }
 0x65b   :  { %4669 = vst.msk [vmem:[#allocation5 + $0x60] sm:$0xff] %vm4664_vm4, %v4625_v60  ;;  %5195 = vmatmul.f32.gmra.mxu1 %v5043_v3  ;;  %v4530_v62 = vpop.permute.xlu0 %4529 }
 0x65c   :  { %v3993_v17 = vmax.f32 %v3870_v45, 0.0  ;;  %4573 = vst.msk [vmem:[#allocation5 + $0x78] sm:$0xff] %vm4567_vm3, %v4530_v62 }
 0x65e   :  { %v4067_v6 = vmax.f32 %v3991_v30, %v3993_v17  ;;  %v3947_v30 = vpop.f32.mrf.mxu3 }
 0x660   :  { %v4121_v7 = vrot.slane %v4067_v6, 1 }
 0x661   :  { %v4439_v52 = vpop.permute.xlu2 %4438 }
 0x662   :  { %v4153_v57 = vmax.f32 %v4067_v6, %v4121_v7  ;;  %v4627_v25 = vpop.permute.xlu1 %4626  ;;  %4479 = vst.msk [vmem:[#allocation5 + $0xc0] sm:$0xff] %vm4470_vm2, %v4439_v52  ;;  %v5046_v49 = vld [vmem:[#allocation5 + $0x60] sm:$0xff] }
 0x663   :  { %4670 = vst.msk [vmem:[#allocation5 + $0x78] sm:$0xff] %vm4664_vm4, %v4627_v25  ;;  %5198 = vmatmul.f32.gmra.mxu1 %v5046_v49  ;;  %v4532_v2 = vpop.permute.xlu0 %4531 }
 0x664   :  { %4171 = vst.msk [vmem:[#allocation4 + $0xb1] sm:$0x1] %vm4162_vm14, %v4153_v57 }
 0x665   :  { %4188 = vst.msk [vmem:[#allocation4 + $0xb0] sm:$0x4] %vm4179_vm15, %v4153_v57 }
 0x666   :  { %4205 = vst.msk [vmem:[#allocation4 + $0xaf] sm:$0x10] %vm4196_vm0, %v4153_v57 }
 0x667   :  { %4222 = vst.msk [vmem:[#allocation4 + $0xae] sm:$0x40] %vm4213_vm1, %v4153_v57  ;;  %v3881_v3 = vpop.f32.mrf.mxu2 }
 0x668   :  { %4574 = vst.msk [vmem:[#allocation5 + $0x90] sm:$0xff] %vm4567_vm3, %v4532_v2  ;;  %v3996_v2 = vmax.f32 %v3879_v55, 0.0 }
 0x669   :  { %v4546_v57 = vpop.permute.xlu2 %4545 }
 0x66a   :  { %v4629_v1 = vpop.permute.xlu1 %4628  ;;  %v5049_v34 = vld [vmem:[#allocation5 + $0x78] sm:$0xff] }
 0x66b   :  { %4671 = vst.msk [vmem:[#allocation5 + $0x90] sm:$0xff] %vm4664_vm4, %v4629_v1  ;;  %5201 = vmatmul.f32.gmra.mxu1 %v5049_v34  ;;  %v4447_v47 = vpop.permute.xlu0 %4446 }
 0x66c   :  { %4483 = vst.msk [vmem:[#allocation5 + $0x120] sm:$0xff] %vm4470_vm2, %v4447_v47 }
 0x66d   :  { %4580 = vst.msk [vmem:[#allocation5 + $0x120] sm:$0xff] %vm4567_vm3, %v4544_v43  ;;  %v3992_v43 = vmax.f32 %v3867_v53, 0.0 }
 0x66e   :  { %v3950_v1 = vpop.f32.mrf.mxu3 }
 0x672   :  { %v4534_v29 = vpop.permute.xlu1 %4533  ;;  %v5052_v51 = vld [vmem:[#allocation5 + $0x90] sm:$0xff] }
 0x673   :  { %4575 = vst.msk [vmem:[#allocation5 + $0xa8] sm:$0xff] %vm4567_vm3, %v4534_v29  ;;  %5204 = vmatmul.f32.gmra.mxu1 %v5052_v51 }
 0x67a   :  { %v4641_v20 = vpop.permute.xlu1 %4640 }
 0x67b   :  { %4677 = vst.msk [vmem:[#allocation5 + $0x120] sm:$0xff] %vm4664_vm4, %v4641_v20 }
 0x681   :  { %v3872_v21 = vpop.f32.mrf.mxu0 }
 0x682   :  { %v4536_v15 = vpop.permute.xlu1 %4535  ;;  %v5070_v50 = vld [vmem:[#allocation5 + $0x120] sm:$0xff]  ;;  %v3873_v39 = vadd.f32 %v8785_v48, %v3872_v21  ;;  %v3948_v21 = vadd.f32 %v8785_v48, %v3947_v30  ;;  %v3882_v30 = vadd.f32 %v8785_v48, %v3881_v3 }
 0x683   :  { %4576 = vst.msk [vmem:[#allocation5 + $0xc0] sm:$0xff] %vm4567_vm3, %v4536_v15  ;;  %5222 = vmatmul.f32.vlgmr.msrb.gmra.mxu2 %v5070_v50 }
 0x684   :  { %v3994_v18 = vmax.f32 %v3873_v39, 0.0 }
 0x686   :  { %v4068_v60 = vmax.f32 %v3992_v43, %v3994_v18  ;;  %v4019_v43 = vmax.f32 %v3948_v21, 0.0 }
 0x687   :  { %v4631_v45 = vpop.permute.xlu0 %4630 }
 0x688   :  { %4672 = vst.msk [vmem:[#allocation5 + $0xa8] sm:$0xff] %vm4664_vm4, %v4631_v45  ;;  %v4254_v62 = vrot.slane %v4068_v60, 1 }
 0x68a   :  { %v4286_v17 = vmax.f32 %v4068_v60, %v4254_v62  ;;  %v4643_v49 = vpop.permute.xlu1 %4642 }
 0x68c   :  { %4302 = vst.msk [vmem:[#allocation4 + $0xb5] sm:$0x1] %vm4162_vm14, %v4286_v17 }
 0x68d   :  { %4318 = vst.msk [vmem:[#allocation4 + $0xb4] sm:$0x4] %vm4179_vm15, %v4286_v17 }
 0x68e   :  { %4334 = vst.msk [vmem:[#allocation4 + $0xb3] sm:$0x10] %vm4196_vm0, %v4286_v17 }
 0x68f   :  { %4350 = vst.msk [vmem:[#allocation4 + $0xb2] sm:$0x40] %vm4213_vm1, %v4286_v17  ;;  %v4449_v6 = vpop.permute.xlu0 %4448  ;;  %v5055_v7 = vld [vmem:[#allocation5 + $0xa8] sm:$0xff]  ;;  %v3884_v52 = vpop.f32.mrf.mxu2 }
 0x690   :  { %4484 = vst.msk [vmem:[#allocation5 + $0x138] sm:$0xff] %vm4470_vm2, %v4449_v6  ;;  %5207 = vmatmul.f32.gmra.mxu1 %v5055_v7  ;;  %v3885_v25 = vadd.f32 %v8785_v48, %v3884_v52  ;;  %v3997_v6 = vmax.f32 %v3882_v30, 0.0 }
 0x691   :  { %4581 = vst.msk [vmem:[#allocation5 + $0x138] sm:$0xff] %vm4567_vm3, %v4546_v57 }
 0x692   :  { %4678 = vst.msk [vmem:[#allocation5 + $0x138] sm:$0xff] %vm4664_vm4, %v4643_v49  ;;  %v3998_v34 = vmax.f32 %v3885_v25, 0.0  ;;  %v3894_v49 = vadd.f32 %v8785_v48, %v8270_v23 }
 0x694   :  { %v4072_v47 = vmax.f32 %v3996_v2, %v3998_v34  ;;  %v4001_v34 = vmax.f32 %v3894_v49, 0.0 }
 0x695   :  { %v4592_v29 = vld [vmem:[#allocation4 + $0xb0] sm:$0xff] }
 0x696   :  { %v4255_v51 = vrot.slane %v4072_v47, 1  ;;  %4632 = vrot.lane.b32.xlu0 %v4592_v29, %s6272_s2  ;;  %v9110_v20 = vld [vmem:[#allocation4 + $0xb2] sm:$0xff]  ;;  %4383 = vst.msk [vmem:[#allocation5 + $0xd8] sm:$0xff] %vm4023_vm12, %v4592_v29 }
 0x697   :  { %v4399_v31 = vld [vmem:[#allocation4 + $0xb1] sm:$0xff]  ;;  %4537 = vrot.lane.b32.xlu1 %v9110_v20, %s6271_s21 }
 0x698   :  { %4440 = vrot.lane.b32.xlu2 %v4399_v31, %s6270_s20  ;;  %4705 = vst.msk [vmem:[#allocation5 + $0xc8] sm:$0xff] %vm4023_vm12, %v4399_v31  ;;  %v4287_v53 = vmax.f32 %v4072_v47, %v4255_v51  ;;  %v3951_v51 = vadd.f32 %v8785_v48, %v3950_v1 }
 0x699   :  { %v5073_v15 = vld [vmem:[#allocation5 + $0x138] sm:$0xff] }
 0x69a   :  { %4303 = vst.msk [vmem:[#allocation4 + $0xc5] sm:$0x1] %vm4162_vm14, %v4287_v53  ;;  %v3953_v50 = vpop.f32.mrf.mxu3  ;;  %5225 = vmatmul.f32.gmra.mxu2 %v5073_v15 }
 0x69b   :  { %4319 = vst.msk [vmem:[#allocation4 + $0xc4] sm:$0x4] %vm4179_vm15, %v4287_v53  ;;  %v3954_v39 = vadd.f32 %v8785_v48, %v3953_v50 }
 0x69c   :  { %4335 = vst.msk [vmem:[#allocation4 + $0xc3] sm:$0x10] %vm4196_vm0, %v4287_v53 }
 0x69d   :  { %4351 = vst.msk [vmem:[#allocation4 + $0xc2] sm:$0x40] %vm4213_vm1, %v4287_v53  ;;  %v4021_v18 = vmax.f32 %v3954_v39, 0.0  ;;  %v4020_v39 = vmax.f32 %v3951_v51, 0.0 }
 0x69e   :  { %4450 = vrot.lane.b32.xlu0 %v8840_v22, %s6270_s20 }
 0x69f   :  { %v4095_v60 = vmax.f32 %v4019_v43, %v4021_v18  ;;  %4644 = vrot.lane.b32.xlu1 %v9052_v58, %s6272_s2 }
 0x6a0   :  { %4547 = vrot.lane.b32.xlu2 %v8831_v27, %s6271_s21 }
 0x6a1   :  { %v4128_v45 = vrot.slane %v4095_v60, 1 }
 0x6a3   :  { %v4160_v62 = vmax.f32 %v4095_v60, %v4128_v45 }
 0x6a5   :  { %4178 = vst.msk [vmem:[#allocation4 + $0x121] sm:$0x1] %vm4162_vm14, %v4160_v62 }
 0x6a6   :  { %4195 = vst.msk [vmem:[#allocation4 + $0x120] sm:$0x4] %vm4179_vm15, %v4160_v62 }
 0x6a7   :  { %4212 = vst.msk [vmem:[#allocation4 + $0x11f] sm:$0x10] %vm4196_vm0, %v4160_v62 }
 0x6a8   :  { %4229 = vst.msk [vmem:[#allocation4 + $0x11e] sm:$0x40] %vm4213_vm1, %v4160_v62 }
 0x6a9   :  { %v3875_v17 = vpop.f32.mrf.mxu0 }
 0x6aa   :  { %v3876_v55 = vadd.f32 %v8785_v48, %v3875_v17 }
 0x6ac   :  { %v3995_v7 = vmax.f32 %v3876_v55, 0.0 }
 0x6ae   :  { %v4071_v52 = vmax.f32 %v3995_v7, %v3997_v6 }
 0x6b0   :  { %v4122_v57 = vrot.slane %v4071_v52, 1 }
 0x6b2   :  { %v4154_v25 = vmax.f32 %v4071_v52, %v4122_v57  ;;  %v5103_v52 = vld [vmem:[%s10132_s3 + $0xa8] sm:$0xff] }
 0x6b4   :  { %4172 = vst.msk [vmem:[#allocation4 + $0xc1] sm:$0x1] %vm4162_vm14, %v4154_v25 }
 0x6b5   :  { %4189 = vst.msk [vmem:[#allocation4 + $0xc0] sm:$0x4] %vm4179_vm15, %v4154_v25 }
 0x6b6   :  { %4206 = vst.msk [vmem:[#allocation4 + $0xbf] sm:$0x10] %vm4196_vm0, %v4154_v25 }
 0x6b7   :  { %4223 = vst.msk [vmem:[#allocation4 + $0xbe] sm:$0x40] %vm4213_vm1, %v4154_v25  ;;  %v3887_v3 = vpop.f32.mrf.mxu2 }
 0x6b8   :  { %v3888_v2 = vadd.f32 %v8785_v48, %v3887_v3  ;;  %v5100_v3 = vld [vmem:[%s10132_s3 + $0x90] sm:$0xff] }
 0x6ba   :  { %v3999_v47 = vmax.f32 %v3888_v2, 0.0 }
 0x6bc   :  { %v4075_v29 = vmax.f32 %v3999_v47, %v4001_v34 }
 0x6be   :  { %v4123_v31 = vrot.slane %v4075_v29, 1  ;;  %v3956_v53 = vpop.f32.mrf.mxu3  ;;  %v9143_v21 = vld [vmem:[#allocation4 + $0xc0] sm:$0xff] }
 0x6bf   :  { %v9145_v15 = vld [vmem:[#allocation4 + $0xc2] sm:$0xff]  ;;  %v3957_v23 = vadd.f32 %v8785_v48, %v3956_v53  ;;  %4634 = vrot.lane.b32.xlu0 %v9143_v21, %s6272_s2  ;;  %4384 = vst.msk [vmem:[#allocation5 + $0xf0] sm:$0xff] %vm4023_vm12, %v9143_v21 }
 0x6c0   :  { %v9147_v50 = vld [vmem:[#allocation4 + $0xc1] sm:$0xff]  ;;  %4539 = vrot.lane.b32.xlu1 %v9145_v15, %s6271_s21  ;;  %v4155_v1 = vmax.f32 %v4075_v29, %v4123_v31  ;;  %5026 = vst.msk [vmem:[#allocation5 + $0xd0] sm:$0xff] %vm4023_vm12, %v9145_v15  ;;  %v5098_v29 = vld [vmem:[%s10132_s3 + $0x80] sm:$0xff] }
 0x6c1   :  { %4442 = vrot.lane.b32.xlu2 %v9147_v50, %s6270_s20  ;;  %4706 = vst.msk [vmem:[#allocation5 + $0xe0] sm:$0xff] %vm4023_vm12, %v9147_v50  ;;  %v4022_v43 = vmax.f32 %v3957_v23, 0.0 }
 0x6c2   :  { %4173 = vst.msk [vmem:[#allocation4 + $0xd1] sm:$0x1] %vm4162_vm14, %v4155_v1 }
 0x6c3   :  { %4190 = vst.msk [vmem:[#allocation4 + $0xd0] sm:$0x4] %vm4179_vm15, %v4155_v1  ;;  %v4096_v48 = vmax.f32 %v4020_v39, %v4022_v43 }
 0x6c4   :  { %4207 = vst.msk [vmem:[#allocation4 + $0xcf] sm:$0x10] %vm4196_vm0, %v4155_v1 }
 0x6c5   :  { %4224 = vst.msk [vmem:[#allocation4 + $0xce] sm:$0x40] %vm4213_vm1, %v4155_v1  ;;  %v4261_v18 = vrot.slane %v4096_v48, 1 }
 0x6c7   :  { %v4293_v60 = vmax.f32 %v4096_v48, %v4261_v18  ;;  %4452 = vrot.lane.b32.xlu0 %v9061_v12, %s6270_s20  ;;  %v5036_v48 = vld [vmem:[#allocation5 + $0x10] sm:$0xff] }
 0x6c9   :  { %4549 = vrot.lane.b32.xlu2 %v9054_v11, %s6271_s21  ;;  %4309 = vst.msk [vmem:[#allocation4 + $0x125] sm:$0x1] %vm4162_vm14, %v4293_v60  ;;  %vm5517_vm14 = vcmask 1047559  }
 0x6ca   :  { %4325 = vst.msk [vmem:[#allocation4 + $0x124] sm:$0x4] %vm4179_vm15, %v4293_v60  ;;  %vm5520_vm15 = vcmask 517120  }
 0x6cb   :  { %4341 = vst.msk [vmem:[#allocation4 + $0x123] sm:$0x10] %vm4196_vm0, %v4293_v60  ;;  %vm5532_vm0 = vcmask 1041920  }
 0x6cc   :  { %4357 = vst.msk [vmem:[#allocation4 + $0x122] sm:$0x40] %vm4213_vm1, %v4293_v60  ;;  %v9174_v45 = vld [vmem:[#allocation4 + $0xd0] sm:$0xff] }
 0x6cd   :  { %v9176_v62 = vld [vmem:[#allocation4 + $0xd1] sm:$0xff]  ;;  %4385 = vst.msk [vmem:[#allocation5 + $0x108] sm:$0xff] %vm4023_vm12, %v9174_v45 }
 0x6ce   :  { %v9178_v30 = vld [vmem:[#allocation4 + $0xd2] sm:$0xff]  ;;  %4707 = vst.msk [vmem:[#allocation5 + $0xf8] sm:$0xff] %vm4023_vm12, %v9176_v62 }
 0x6cf   :  { %4636 = vrot.lane.b32.xlu0 %v9174_v45, %s6272_s2  ;;  %5027 = vst.msk [vmem:[#allocation5 + $0xe8] sm:$0xff] %vm4023_vm12, %v9178_v30 }
 0x6d1   :  { %4444 = vrot.lane.b32.xlu2 %v9176_v62, %s6270_s20 }
 0x6d2   :  { %v9190_v17 = vld [vmem:[#allocation4 + $0x120] sm:$0xff] }
 0x6d3   :  { %4646 = vrot.lane.b32.xlu1 %v9190_v17, %s6272_s2  ;;  %v9194_v55 = vld [vmem:[#allocation4 + $0x122] sm:$0xff] }
 0x6d4   :  { %v9196_v6 = vld [vmem:[#allocation4 + $0x121] sm:$0xff]  ;;  %5032 = vst.msk [vmem:[#allocation5 + $0x160] sm:$0xff] %vm4023_vm12, %v9194_v55 }
 0x6d5   :  { %4712 = vst.msk [vmem:[#allocation5 + $0x170] sm:$0xff] %vm4023_vm12, %v9196_v6 }
 0x6d7   :  { %4745 = vrot.lane.b32.xlu0 %v8797_v36, %s6270_s20 }
 0x6d9   :  { %4842 = vrot.lane.b32.xlu2 %v8075_v14, %s6271_s21 }
 0x6db   :  { %v5078_v7 = vld [vmem:[#allocation5 + $0x160] sm:$0xff]  ;;  %4541 = vrot.lane.b32.xlu1 %v9178_v30, %s6271_s21 }
 0x6dc   :  { %6190 = vmatmul.msk.f32.gmra.mxu3 %vm4023_vm12, %v5078_v7 }
 0x6df   :  { %4638 = vrot.lane.b32.xlu0 %v8483_v41, %s6272_s2 }
 0x6e1   :  { %4747 = vrot.lane.b32.xlu2 %v8813_v28, %s6270_s20  ;;  %v4913_v28 = vld [vmem:[#allocation4 + $0x91] sm:$0xff] }
 0x6e3   :  { %4938 = vrot.lane.b32.xlu1 %v8805_v61, %s6272_s2  ;;  %v4817_v61 = vld [vmem:[#allocation4 + $0x90] sm:$0xff] }
 0x6e7   :  { %4844 = vrot.lane.b32.xlu0 %v8156_v44, %s6271_s21 }
 0x6e9   :  { %4749 = vrot.lane.b32.xlu2 %v8829_v13, %s6270_s20 }
 0x6eb   :  { %4940 = vrot.lane.b32.xlu1 %v8821_v38, %s6272_s2 }
 0x6ef   :  { %4846 = vrot.lane.b32.xlu0 %v8281_v16, %s6271_s21 }
 0x6f1   :  { %4751 = vrot.lane.b32.xlu2 %v8855_v40, %s6270_s20  ;;  %v5112_v40 = vld [vmem:[%s10132_s3 + $0xf0] sm:$0xff] }
 0x6f2   :  { %v4441_v14 = vpop.permute.xlu2 %4440 }
 0x6f3   :  { %4480 = vst.msk [vmem:[#allocation5 + $0xd8] sm:$0xff] %vm4470_vm2, %v4441_v14  ;;  %4942 = vrot.lane.b32.xlu1 %v8847_v33, %s6272_s2  ;;  %v5113_v33 = vld [vmem:[%s10132_s3 + $0xf8] sm:$0xff]  ;;  %v5042_v14 = vld [vmem:[#allocation5 + $0x40] sm:$0xff] }
 0x6f4   :  { %5235 = vmatpush.msra.mxu2 %v5113_v33  ;;  %v5009_v33 = vld [vmem:[#allocation4 + $0x92] sm:$0xff] }
 0x6f5   :  { %5025 = vst.msk [vmem:[#allocation5 + $0xb8] sm:$0xff] %vm4023_vm12, %v5009_v33 }
 0x6f6   :  { %5236 = vmatpush.msra.mxu2 %v5112_v40 }
 0x6f7   :  { %4848 = vrot.lane.b32.xlu0 %v8432_v26, %s6271_s21 }
 0x6f9   :  { %4753 = vrot.lane.b32.xlu2 %v8870_v35, %s6270_s20 }
 0x6fb   :  { %4944 = vrot.lane.b32.xlu1 %v8863_v9, %s6272_s2  ;;  %v5111_v9 = vld [vmem:[%s10132_s3 + $0xe8] sm:$0xff] }
 0x6fc   :  { %5237 = vmatpush.msra.mxu2 %v5111_v9  ;;  %v5048_v9 = vld [vmem:[#allocation5 + $0x70] sm:$0xff] }
 0x6ff   :  { %4850 = vrot.lane.b32.xlu0 %v8609_v0, %s6271_s21 }
 0x701   :  { %4755 = vrot.lane.b32.xlu2 %v8885_v37, %s6270_s20  ;;  %v5109_v37 = vld [vmem:[%s10132_s3 + $0xd8] sm:$0xff] }
 0x703   :  { %4946 = vrot.lane.b32.xlu1 %v8879_v4, %s6272_s2  ;;  %v5110_v4 = vld [vmem:[%s10132_s3 + $0xe0] sm:$0xff] }
 0x704   :  { %5238 = vmatpush.msra.mxu2 %v5110_v4 }
 0x706   :  { %5239 = vmatpush.msra.mxu2 %v5109_v37 }
 0x707   :  { %4852 = vrot.lane.b32.xlu0 %v8769_v54, %s6271_s21  ;;  %v4548_v54 = vpop.permute.xlu2 %4547 }
 0x708   :  { %v4633_v44 = vpop.permute.xlu0 %4632 }
 0x709   :  { %4757 = vrot.lane.b32.xlu2 %v8916_v10, %s6270_s20  ;;  %4673 = vst.msk [vmem:[#allocation5 + $0xc0] sm:$0xff] %vm4664_vm4, %v4633_v44  ;;  %v4538_v16 = vpop.permute.xlu1 %4537  ;;  %v5107_v10 = vld [vmem:[%s10132_s3 + $0xc8] sm:$0xff] }
 0x70a   :  { %4577 = vst.msk [vmem:[#allocation5 + $0xd8] sm:$0xff] %vm4567_vm3, %v4538_v16  ;;  %v9383_v16 = vpop.f32.mrf.mxu1 }
 0x70b   :  { %4948 = vrot.lane.b32.xlu1 %v8894_v32, %s6272_s2  ;;  %v5108_v32 = vld [vmem:[%s10132_s3 + $0xd0] sm:$0xff] }
 0x70c   :  { %5240 = vmatpush.msra.mxu2 %v5108_v32 }
 0x70e   :  { %5241 = vmatpush.msra.mxu2 %v5107_v10 }
 0x70f   :  { %4854 = vrot.lane.b32.xlu0 %v8960_v5, %s6271_s21 }
 0x710   :  { %v4451_v26 = vpop.permute.xlu0 %4450  ;;  %v5058_v0 = vld [vmem:[#allocation5 + $0xc0] sm:$0xff] }
 0x711   :  { %4759 = vrot.lane.b32.xlu2 %v8985_v56, %s6270_s20  ;;  %4485 = vst.msk [vmem:[#allocation5 + $0x150] sm:$0xff] %vm4470_vm2, %v4451_v26  ;;  %5210 = vmatmul.f32.gmra.mxu1 %v5058_v0  ;;  %v4645_v36 = vpop.permute.xlu1 %4644  ;;  %v5105_v56 = vld [vmem:[%s10132_s3 + $0xb8] sm:$0xff] }
 0x712   :  { %4582 = vst.msk [vmem:[#allocation5 + $0x150] sm:$0xff] %vm4567_vm3, %v4548_v54 }
 0x713   :  { %4950 = vrot.lane.b32.xlu1 %v8969_v46, %s6272_s2  ;;  %4679 = vst.msk [vmem:[#allocation5 + $0x150] sm:$0xff] %vm4664_vm4, %v4645_v36  ;;  %v5106_v46 = vld [vmem:[%s10132_s3 + $0xc0] sm:$0xff] }
 0x714   :  { %5242 = vmatpush.msra.mxu2 %v5106_v46  ;;  %v5045_v36 = vld [vmem:[#allocation5 + $0x58] sm:$0xff] }
 0x716   :  { %5243 = vmatpush.msra.mxu2 %v5105_v56 }
 0x717   :  { %4856 = vrot.lane.b32.xlu0 %v4817_v61, %s6271_s21 }
 0x719   :  { %4761 = vrot.lane.b32.xlu2 %v9110_v20, %s6270_s20  ;;  %v5104_v20 = vld [vmem:[%s10132_s3 + $0xb0] sm:$0xff] }
 0x71a   :  { %v5076_v13 = vld [vmem:[#allocation5 + $0x150] sm:$0xff]  ;;  %5244 = vmatpush.msra.mxu2 %v5104_v20 }
 0x71b   :  { %v4443_v38 = vpop.permute.xlu2 %4442  ;;  %4952 = vrot.lane.b32.xlu1 %v4913_v28, %s6272_s2  ;;  %5228 = vmatmul.f32.gmra.mxu2 %v5076_v13  ;;  %v9390_v28 = vpop.f32.mrf.mxu1 }
 0x71c   :  { %4481 = vst.msk [vmem:[#allocation5 + $0xf0] sm:$0xff] %vm4470_vm2, %v4443_v38  ;;  %5245 = vmatpush.msra.mxu2 %v5103_v52 }
 0x71f   :  { %4858 = vrot.lane.b32.xlu0 %v9143_v21, %s6271_s21  ;;  %v4921_v21 = vld [vmem:[#allocation4 + $0x131] sm:$0xff] }
 0x721   :  { %4763 = vrot.lane.b32.xlu2 %v9145_v15, %s6270_s20 }
 0x723   :  { %v4550_v35 = vpop.permute.xlu2 %4549  ;;  %4954 = vrot.lane.b32.xlu1 %v9147_v50, %s6272_s2  ;;  %v9398_v32 = vpop.f32.mrf.mxu1 }
 0x727   :  { %4860 = vrot.lane.b32.xlu0 %v9174_v45, %s6271_s21 }
 0x729   :  { %4765 = vrot.lane.b32.xlu2 %v9178_v30, %s6270_s20  ;;  %v5039_v30 = vld [vmem:[#allocation5 + $0x28] sm:$0xff] }
 0x72b   :  { %v4445_v5 = vpop.permute.xlu2 %4444  ;;  %4956 = vrot.lane.b32.xlu1 %v9176_v62, %s6272_s2  ;;  %v9404_v52 = vpop.f32.mrf.mxu1 }
 0x72c   :  { %4482 = vst.msk [vmem:[#allocation5 + $0x108] sm:$0xff] %vm4470_vm2, %v4445_v5  ;;  %v5051_v5 = vld [vmem:[#allocation5 + $0x88] sm:$0xff] }
 0x72f   :  { %4862 = vrot.lane.b32.xlu0 %v8483_v41, %s6271_s21  ;;  %v5102_v41 = vld [vmem:[%s10132_s3 + $0xa0] sm:$0xff] }
 0x730   :  { %5246 = vmatpush.msra.mxu2 %v5102_v41 }
 0x731   :  { %4767 = vrot.lane.b32.xlu2 %v8910_v63, %s6270_s20  ;;  %v4635_v57 = vpop.permute.xlu0 %4634  ;;  %v5101_v63 = vld [vmem:[%s10132_s3 + $0x98] sm:$0xff] }
 0x732   :  { %v4540_v25 = vpop.permute.xlu1 %4539  ;;  %4674 = vst.msk [vmem:[#allocation5 + $0xd8] sm:$0xff] %vm4664_vm4, %v4635_v57  ;;  %5247 = vmatpush.msra.mxu2 %v5101_v63 }
 0x733   :  { %v4843_v49 = vpop.permute.xlu2 %4842  ;;  %4958 = vrot.lane.b32.xlu1 %v8902_v19, %s6272_s2  ;;  %4578 = vst.msk [vmem:[#allocation5 + $0xf0] sm:$0xff] %vm4567_vm3, %v4540_v25  ;;  %v5099_v19 = vld [vmem:[%s10132_s3 + $0x88] sm:$0xff] }
 0x734   :  { %5248 = vmatpush.msra.mxu2 %v5100_v3  ;;  %v5054_v25 = vld [vmem:[#allocation5 + $0xa0] sm:$0xff]  ;;  %v5057_v3 = vld [vmem:[#allocation5 + $0xb8] sm:$0xff] }
 0x736   :  { %5249 = vmatpush.msra.mxu2 %v5099_v19 }
 0x737   :  { %4864 = vrot.lane.b32.xlu0 %v8671_v42, %s6271_s21 }
 0x738   :  { %5250 = vmatpush.msra.mxu2 %v5098_v29 }
 0x739   :  { %4769 = vrot.lane.b32.xlu2 %v8941_v59, %s6270_s20  ;;  %v4453_v2 = vpop.permute.xlu0 %4452  ;;  %v5061_v34 = vld [vmem:[#allocation5 + $0xd8] sm:$0xff] }
 0x73a   :  { %4486 = vst.msk [vmem:[#allocation5 + $0x168] sm:$0xff] %vm4470_vm2, %v4453_v2  ;;  %5213 = vmatmul.f32.gmra.mxu1 %v5061_v34  ;;  %v9412_v34 = vpop.f32.mrf.mxu1 }
 0x73b   :  { %v4748_v47 = vpop.permute.xlu2 %4747  ;;  %4960 = vrot.lane.b32.xlu1 %v8991_v24, %s6272_s2  ;;  %4583 = vst.msk [vmem:[#allocation5 + $0x168] sm:$0xff] %vm4567_vm3, %v4550_v35 }
 0x73c   :  { %4794 = vst.msk [vmem:[#allocation5 + $0x20] sm:$0xff] %vm4470_vm2, %v4748_v47 }
 0x73f   :  { %4866 = vrot.lane.b32.xlu0 %v8825_v8, %s6271_s21 }
 0x741   :  { %4771 = vrot.lane.b32.xlu2 %v8831_v27, %s6270_s20  ;;  %v4637_v42 = vpop.permute.xlu0 %4636 }
 0x742   :  { %4675 = vst.msk [vmem:[#allocation5 + $0xf0] sm:$0xff] %vm4664_vm4, %v4637_v42 }
 0x743   :  { %v4750_v59 = vpop.permute.xlu2 %4749  ;;  %4962 = vrot.lane.b32.xlu1 %v8840_v22, %s6272_s2 }
 0x744   :  { %4795 = vst.msk [vmem:[#allocation5 + $0x38] sm:$0xff] %vm4470_vm2, %v4750_v59  ;;  %v5060_v59 = vld [vmem:[#allocation5 + $0xd0] sm:$0xff] }
 0x745   :  { %v4647_v24 = vpop.permute.xlu1 %4646 }
 0x746   :  { %4680 = vst.msk [vmem:[#allocation5 + $0x168] sm:$0xff] %vm4664_vm4, %v4647_v24 }
 0x747   :  { %4868 = vrot.lane.b32.xlu0 %v9052_v58, %s6271_s21 }
 0x749   :  { %4773 = vrot.lane.b32.xlu2 %v9054_v11, %s6270_s20  ;;  %v4746_v8 = vpop.permute.xlu0 %4745  ;;  %v5064_v27 = vld [vmem:[#allocation5 + $0xf0] sm:$0xff] }
 0x74a   :  { %4793 = vst.msk [vmem:[#allocation5 + $0x8] sm:$0xff] %vm4470_vm2, %v4746_v8  ;;  %5216 = vmatmul.f32.gmra.mxu1 %v5064_v27  ;;  %v9419_v8 = vpop.f32.mrf.mxu1 }
 0x74b   :  { %v4752_v51 = vpop.permute.xlu2 %4751  ;;  %4964 = vrot.lane.b32.xlu1 %v9061_v12, %s6272_s2  ;;  %4890 = vst.msk [vmem:[#allocation5 + $0x8] sm:$0xff] %vm4567_vm3, %v4843_v49  ;;  %v4825_v12 = vld [vmem:[#allocation4 + $0x130] sm:$0xff] }
 0x74c   :  { %4796 = vst.msk [vmem:[#allocation5 + $0x50] sm:$0xff] %vm4470_vm2, %v4752_v51 }
 0x74d   :  { %v4542_v22 = vpop.permute.xlu1 %4541  ;;  %v5079_v31 = vld [vmem:[#allocation5 + $0x168] sm:$0xff] }
 0x74e   :  { %4579 = vst.msk [vmem:[#allocation5 + $0x108] sm:$0xff] %vm4567_vm3, %v4542_v22  ;;  %5231 = vmatmul.f32.gmra.mxu2 %v5079_v31  ;;  %v5063_v31 = vld [vmem:[#allocation5 + $0xe8] sm:$0xff] }
 0x74f   :  { %4870 = vrot.lane.b32.xlu0 %v9190_v17, %s6271_s21 }
 0x751   :  { %4775 = vrot.lane.b32.xlu2 %v9194_v55, %s6270_s20  ;;  %v4639_v58 = vpop.permute.xlu0 %4638 }
 0x752   :  { %4676 = vst.msk [vmem:[#allocation5 + $0x108] sm:$0xff] %vm4664_vm4, %v4639_v58 }
 0x753   :  { %v4754_v11 = vpop.permute.xlu2 %4753  ;;  %4966 = vrot.lane.b32.xlu1 %v9196_v6, %s6272_s2 }
 0x754   :  { %4797 = vst.msk [vmem:[#allocation5 + $0x68] sm:$0xff] %vm4470_vm2, %v4754_v11 }
 0x755   :  { %v4939_v53 = vpop.permute.xlu1 %4938 }
 0x756   :  { %4986 = vst.msk [vmem:[#allocation5 + $0x8] sm:$0xff] %vm4664_vm4, %v4939_v53  ;;  %v9426_v53 = vpop.f32.mrf.mxu1 }
 0x757   :  { %4872 = vrot.lane.b32.xlu0 %v4825_v12, %s6271_s21 }
 0x759   :  { %v4845_v15 = vpop.permute.xlu0 %4844  ;;  %v5067_v50 = vld [vmem:[#allocation5 + $0x108] sm:$0xff] }
 0x75a   :  { %4891 = vst.msk [vmem:[#allocation5 + $0x20] sm:$0xff] %vm4567_vm3, %v4845_v15  ;;  %5219 = vmatmul.f32.gmra.mxu1 %v5067_v50  ;;  %v5066_v15 = vld [vmem:[#allocation5 + $0x100] sm:$0xff] }
 0x75b   :  { %v4756_v23 = vpop.permute.xlu2 %4755  ;;  %4968 = vrot.lane.b32.xlu1 %v4921_v21, %s6272_s2 }
 0x75c   :  { %4798 = vst.msk [vmem:[#allocation5 + $0x80] sm:$0xff] %vm4470_vm2, %v4756_v23 }
 0x75d   :  { %v4941_v1 = vpop.permute.xlu1 %4940  ;;  %v5035_v39 = vld [vmem:[#allocation5 + $0x8] sm:$0xff] }
 0x75e   :  { %4987 = vst.msk [vmem:[#allocation5 + $0x20] sm:$0xff] %vm4664_vm4, %v4941_v1  ;;  %5251 = vmatmul.f32.vlgmr.msra.gmra.mxu2 %v5035_v39  ;;  %v5017_v1 = vld [vmem:[#allocation4 + $0x132] sm:$0xff]  ;;  %v9431_v39 = vpop.f32.mrf.mxu1 }
 0x75f   :  { %5033 = vst.msk [vmem:[#allocation5 + $0x178] sm:$0xff] %vm4023_vm12, %v5017_v1 }
 0x761   :  { %v4847_v43 = vpop.permute.xlu0 %4846 }
 0x762   :  { %4892 = vst.msk [vmem:[#allocation5 + $0x38] sm:$0xff] %vm4567_vm3, %v4847_v43  ;;  %6176 = vmatmul.msk.f32.vlgmr.msrb.gmra.mxu1 %vm4023_vm12, %v5036_v48  ;;  %v5069_v48 = vld [vmem:[#allocation5 + $0x118] sm:$0xff] }
 0x763   :  { %v4758_v18 = vpop.permute.xlu2 %4757 }
 0x764   :  { %4799 = vst.msk [vmem:[#allocation5 + $0x98] sm:$0xff] %vm4470_vm2, %v4758_v18 }
 0x765   :  { %v4943_v60 = vpop.permute.xlu1 %4942  ;;  %v5038_v45 = vld [vmem:[#allocation5 + $0x20] sm:$0xff] }
 0x766   :  { %4988 = vst.msk [vmem:[#allocation5 + $0x38] sm:$0xff] %vm4664_vm4, %v4943_v60  ;;  %5254 = vmatmul.f32.gmra.mxu2 %v5038_v45  ;;  %v5081_v45 = vld [vmem:[#allocation5 + $0x178] sm:$0xff] }
 0x767   :  { %6191 = vmatmul.msk.f32.gmra.mxu3 %vm4023_vm12, %v5081_v45 }
 0x769   :  { %v4849_v62 = vpop.permute.xlu0 %4848 }
 0x76a   :  { %4893 = vst.msk [vmem:[#allocation5 + $0x50] sm:$0xff] %vm4567_vm3, %v4849_v62  ;;  %6177 = vmatmul.msk.f32.gmra.mxu1 %vm4023_vm12, %v5039_v30  ;;  %v9440_v30 = vpop.f32.mrf.mxu2 }
 0x76b   :  { %v4760_v17 = vpop.permute.xlu2 %4759 }
 0x76c   :  { %4800 = vst.msk [vmem:[#allocation5 + $0xb0] sm:$0xff] %vm4470_vm2, %v4760_v17 }
 0x76d   :  { %v4945_v55 = vpop.permute.xlu1 %4944  ;;  %v5041_v6 = vld [vmem:[#allocation5 + $0x38] sm:$0xff] }
 0x76e   :  { %4989 = vst.msk [vmem:[#allocation5 + $0x50] sm:$0xff] %vm4664_vm4, %v4945_v55  ;;  %5257 = vmatmul.f32.gmra.mxu2 %v5041_v6 }
 0x771   :  { %v4851_v7 = vpop.permute.xlu0 %4850 }
 0x772   :  { %4894 = vst.msk [vmem:[#allocation5 + $0x68] sm:$0xff] %vm4567_vm3, %v4851_v7  ;;  %6178 = vmatmul.msk.f32.gmra.mxu1 %vm4023_vm12, %v5042_v14  ;;  %v9446_v14 = vpop.f32.mrf.mxu2 }
 0x773   :  { %v4762_v44 = vpop.permute.xlu2 %4761 }
 0x774   :  { %4801 = vst.msk [vmem:[#allocation5 + $0xc8] sm:$0xff] %vm4470_vm2, %v4762_v44 }
 0x775   :  { %v4947_v26 = vpop.permute.xlu1 %4946  ;;  %v5044_v0 = vld [vmem:[#allocation5 + $0x50] sm:$0xff] }
 0x776   :  { %4990 = vst.msk [vmem:[#allocation5 + $0x68] sm:$0xff] %vm4664_vm4, %v4947_v26  ;;  %5260 = vmatmul.f32.gmra.mxu2 %v5044_v0 }
 0x779   :  { %v4853_v54 = vpop.permute.xlu0 %4852 }
 0x77a   :  { %4895 = vst.msk [vmem:[#allocation5 + $0x80] sm:$0xff] %vm4567_vm3, %v4853_v54  ;;  %6179 = vmatmul.msk.f32.gmra.mxu1 %vm4023_vm12, %v5045_v36 }
 0x77b   :  { %v4764_v61 = vpop.permute.xlu2 %4763 }
 0x77c   :  { %4802 = vst.msk [vmem:[#allocation5 + $0xe0] sm:$0xff] %vm4470_vm2, %v4764_v61 }
 0x77d   :  { %v4949_v38 = vpop.permute.xlu1 %4948  ;;  %v5047_v13 = vld [vmem:[#allocation5 + $0x68] sm:$0xff] }
 0x77e   :  { %4991 = vst.msk [vmem:[#allocation5 + $0x80] sm:$0xff] %vm4664_vm4, %v4949_v38  ;;  %5263 = vmatmul.f32.gmra.mxu2 %v5047_v13 }
 0x781   :  { %v4855_v40 = vpop.permute.xlu0 %4854 }
 0x782   :  { %4896 = vst.msk [vmem:[#allocation5 + $0x98] sm:$0xff] %vm4567_vm3, %v4855_v40  ;;  %6180 = vmatmul.msk.f32.gmra.mxu1 %vm4023_vm12, %v5048_v9  ;;  %v9461_v40 = vld [vmem:[%s10133_s4] ss:$0 sm:$0xff] }
 0x783   :  { %v4766_v35 = vpop.permute.xlu2 %4765 }
 0x784   :  { %4803 = vst.msk [vmem:[#allocation5 + $0xf8] sm:$0xff] %vm4470_vm2, %v4766_v35  ;;  %v5188_v35 = vadd.f32 %v9461_v40, %v9383_v16 }
 0x785   :  { %v4951_v4 = vpop.permute.xlu1 %4950  ;;  %v5050_v37 = vld [vmem:[#allocation5 + $0x80] sm:$0xff] }
 0x786   :  { %4992 = vst.msk [vmem:[#allocation5 + $0x98] sm:$0xff] %vm4664_vm4, %v4951_v4  ;;  %5266 = vmatmul.f32.gmra.mxu2 %v5050_v37 }
 0x789   :  { %v4857_v10 = vpop.permute.xlu0 %4856 }
 0x78a   :  { %4897 = vst.msk [vmem:[#allocation5 + $0xb0] sm:$0xff] %vm4567_vm3, %v4857_v10  ;;  %6181 = vmatmul.msk.f32.gmra.mxu1 %vm4023_vm12, %v5051_v5  ;;  %v5191_v10 = vadd.f32 %v9461_v40, %v9390_v28 }
 0x78b   :  { %v4768_v46 = vpop.permute.xlu2 %4767 }
 0x78c   :  { %4804 = vst.msk [vmem:[#allocation5 + $0x110] sm:$0xff] %vm4470_vm2, %v4768_v46 }
 0x78d   :  { %v4953_v56 = vpop.permute.xlu1 %4952  ;;  %v5053_v20 = vld [vmem:[#allocation5 + $0x98] sm:$0xff] }
 0x78e   :  { %4993 = vst.msk [vmem:[#allocation5 + $0xb0] sm:$0xff] %vm4664_vm4, %v4953_v56  ;;  %5269 = vmatmul.f32.gmra.mxu2 %v5053_v20  ;;  %v9437_v62 = vpop.f32.mrf.mxu1 }
 0x791   :  { %v4859_v57 = vpop.permute.xlu0 %4858 }
 0x792   :  { %4898 = vst.msk [vmem:[#allocation5 + $0xc8] sm:$0xff] %vm4567_vm3, %v4859_v57  ;;  %6182 = vmatmul.msk.f32.gmra.mxu1 %vm4023_vm12, %v5054_v25 }
 0x793   :  { %v4770_v49 = vpop.permute.xlu2 %4769 }
 0x794   :  { %4805 = vst.msk [vmem:[#allocation5 + $0x128] sm:$0xff] %vm4470_vm2, %v4770_v49 }
 0x795   :  { %v4955_v41 = vpop.permute.xlu1 %4954  ;;  %v5056_v63 = vld [vmem:[#allocation5 + $0xb0] sm:$0xff] }
 0x796   :  { %4994 = vst.msk [vmem:[#allocation5 + $0xc8] sm:$0xff] %vm4664_vm4, %v4955_v41  ;;  %5272 = vmatmul.f32.gmra.mxu2 %v5056_v63 }
 0x799   :  { %v4861_v19 = vpop.permute.xlu0 %4860 }
 0x79a   :  { %4899 = vst.msk [vmem:[#allocation5 + $0xe0] sm:$0xff] %vm4567_vm3, %v4861_v19  ;;  %6183 = vmatmul.msk.f32.gmra.mxu1 %vm4023_vm12, %v5057_v3  ;;  %v5194_v19 = vadd.f32 %v9461_v40, %v9398_v32 }
 0x79b   :  { %v4772_v2 = vpop.permute.xlu2 %4771 }
 0x79c   :  { %4806 = vst.msk [vmem:[#allocation5 + $0x140] sm:$0xff] %vm4470_vm2, %v4772_v2 }
 0x79d   :  { %v4957_v47 = vpop.permute.xlu1 %4956  ;;  %v5059_v29 = vld [vmem:[#allocation5 + $0xc8] sm:$0xff] }
 0x79e   :  { %4995 = vst.msk [vmem:[#allocation5 + $0xe0] sm:$0xff] %vm4664_vm4, %v4957_v47  ;;  %5275 = vmatmul.f32.gmra.mxu2 %v5059_v29  ;;  %v9452_v36 = vpop.f32.mrf.mxu2  ;;  %v5197_v47 = vadd.f32 %v9461_v40, %v9404_v52  ;;  %v5200_v52 = vadd.f32 %v9461_v40, %v9412_v34 }
 0x7a1   :  { %v4863_v42 = vpop.permute.xlu0 %4862 }
 0x7a2   :  { %4900 = vst.msk [vmem:[#allocation5 + $0xf8] sm:$0xff] %vm4567_vm3, %v4863_v42  ;;  %6184 = vmatmul.msk.f32.gmra.mxu1 %vm4023_vm12, %v5060_v59 }
 0x7a3   :  { %v4774_v24 = vpop.permute.xlu2 %4773 }
 0x7a4   :  { %4807 = vst.msk [vmem:[#allocation5 + $0x158] sm:$0xff] %vm4470_vm2, %v4774_v24 }
 0x7a5   :  { %v4959_v27 = vpop.permute.xlu1 %4958  ;;  %v5062_v51 = vld [vmem:[#allocation5 + $0xe0] sm:$0xff] }
 0x7a6   :  { %4996 = vst.msk [vmem:[#allocation5 + $0xf8] sm:$0xff] %vm4664_vm4, %v4959_v27  ;;  %5278 = vmatmul.f32.gmra.mxu2 %v5062_v51 }
 0x7a9   :  { %v4865_v22 = vpop.permute.xlu0 %4864 }
 0x7aa   :  { %4901 = vst.msk [vmem:[#allocation5 + $0x110] sm:$0xff] %vm4567_vm3, %v4865_v22  ;;  %6185 = vmatmul.msk.f32.gmra.mxu1 %vm4023_vm12, %v5063_v31 }
 0x7ab   :  { %v4776_v58 = vpop.permute.xlu2 %4775 }
 0x7ac   :  { %4808 = vst.msk [vmem:[#allocation5 + $0x170] sm:$0xff] %vm4470_vm2, %v4776_v58 }
 0x7ad   :  { %v4961_v11 = vpop.permute.xlu1 %4960  ;;  %v5065_v12 = vld [vmem:[#allocation5 + $0xf8] sm:$0xff] }
 0x7ae   :  { %4997 = vst.msk [vmem:[#allocation5 + $0x110] sm:$0xff] %vm4664_vm4, %v4961_v11  ;;  %5281 = vmatmul.f32.gmra.mxu2 %v5065_v12 }
 0x7b1   :  { %v4867_v21 = vpop.permute.xlu0 %4866 }
 0x7b2   :  { %4902 = vst.msk [vmem:[#allocation5 + $0x128] sm:$0xff] %vm4567_vm3, %v4867_v21  ;;  %6186 = vmatmul.msk.f32.gmra.mxu1 %vm4023_vm12, %v5066_v15 }
 0x7b5   :  { %v4963_v50 = vpop.permute.xlu1 %4962  ;;  %v5068_v23 = vld [vmem:[#allocation5 + $0x110] sm:$0xff] }
 0x7b6   :  { %4998 = vst.msk [vmem:[#allocation5 + $0x128] sm:$0xff] %vm4664_vm4, %v4963_v50  ;;  %5284 = vmatmul.f32.gmra.mxu2 %v5068_v23  ;;  %v5203_v50 = vadd.f32 %v9461_v40, %v9419_v8  ;;  %v5206_v8 = vadd.f32 %v9461_v40, %v9426_v53 }
 0x7b7   :  { %v9444_v7 = vpop.f32.mrf.mxu1 }
 0x7b9   :  { %v4869_v43 = vpop.permute.xlu0 %4868 }
 0x7ba   :  { %4903 = vst.msk [vmem:[#allocation5 + $0x140] sm:$0xff] %vm4567_vm3, %v4869_v43  ;;  %6187 = vmatmul.msk.f32.gmra.mxu1 %vm4023_vm12, %v5069_v48  ;;  %vm5513_vm12 = vcmask 1043459  }
 0x7bd   :  { %v4965_v18 = vpop.permute.xlu1 %4964  ;;  %v5071_v60 = vld [vmem:[#allocation5 + $0x128] sm:$0xff] }
 0x7be   :  { %4999 = vst.msk [vmem:[#allocation5 + $0x140] sm:$0xff] %vm4664_vm4, %v4965_v18  ;;  %5287 = vmatmul.f32.gmra.mxu2 %v5071_v60 }
 0x7c1   :  { %v4871_v17 = vpop.permute.xlu0 %4870 }
 0x7c2   :  { %4904 = vst.msk [vmem:[#allocation5 + $0x158] sm:$0xff] %vm4567_vm3, %v4871_v17 }
 0x7c5   :  { %v4967_v55 = vpop.permute.xlu1 %4966  ;;  %v5074_v6 = vld [vmem:[#allocation5 + $0x140] sm:$0xff] }
 0x7c6   :  { %5000 = vst.msk [vmem:[#allocation5 + $0x158] sm:$0xff] %vm4664_vm4, %v4967_v55  ;;  %5290 = vmatmul.f32.gmra.mxu2 %v5074_v6 }
 0x7c7   :  { %v9450_v54 = vpop.f32.mrf.mxu1 }
 0x7c9   :  { %v4873_v44 = vpop.permute.xlu0 %4872 }
 0x7ca   :  { %4905 = vst.msk [vmem:[#allocation5 + $0x170] sm:$0xff] %vm4567_vm3, %v4873_v44 }
 0x7cd   :  { %v4969_v26 = vpop.permute.xlu1 %4968  ;;  %v5077_v0 = vld [vmem:[#allocation5 + $0x158] sm:$0xff] }
 0x7ce   :  { %5001 = vst.msk [vmem:[#allocation5 + $0x170] sm:$0xff] %vm4664_vm4, %v4969_v26  ;;  %5293 = vmatmul.f32.gmra.mxu2 %v5077_v0 }
 0x7d1   :  { %v9456_v13 = vpop.f32.mrf.mxu2 }
 0x7d5   :  { %v5080_v61 = vld [vmem:[#allocation5 + $0x170] sm:$0xff] }
 0x7d6   :  { %5296 = vmatmul.f32.gmra.mxu2 %v5080_v61  ;;  %v5209_v61 = vadd.f32 %v9461_v40, %v9431_v39 }
 0x7d7   :  { %v9454_v38 = vpop.f32.mrf.mxu1 }
 0x7df   :  { %v5317_v33 = vpop.f32.mrf.mxu1 }
 0x7e1   :  { %v5252_v9 = vpop.f32.mrf.mxu2 }
 0x7e2   :  { %v5253_v4 = vadd.f32 %v5252_v9, %v5188_v35 }
 0x7e4   :  { %v5318_v46 = vadd.f32 %v5317_v33, %v5253_v4 }
 0x7e6   :  { %v5365_v57 = vmax.f32 %v5318_v46, 0.0 }
 0x7e7   :  { %v5320_v37 = vpop.f32.mrf.mxu1 }
 0x7e9   :  { %v5255_v5 = vpop.f32.mrf.mxu2 }
 0x7ea   :  { %v5256_v56 = vadd.f32 %v5255_v5, %v5191_v10 }
 0x7ec   :  { %v5321_v20 = vadd.f32 %v5320_v37, %v5256_v56 }
 0x7ee   :  { %v5366_v25 = vmax.f32 %v5321_v20, 0.0 }
 0x7ef   :  { %v5323_v49 = vpop.f32.mrf.mxu1 }
 0x7f0   :  { %v5381_v41 = vmax.f32 %v5365_v57, %v5366_v25  ;;  %v5212_v25 = vadd.f32 %v9461_v40, %v9437_v62 }
 0x7f1   :  { %v5258_v63 = vpop.f32.mrf.mxu2 }
 0x7f2   :  { %v5397_v3 = vrot.slane %v5381_v41, 1  ;;  %v5259_v28 = vadd.f32 %v5258_v63, %v5194_v19 }
 0x7f4   :  { %v5413_v16 = vmax.f32 %v5381_v41, %v5397_v3  ;;  %v5324_v42 = vadd.f32 %v5323_v49, %v5259_v28  ;;  %v5215_v3 = vadd.f32 %v9461_v40, %v9444_v7 }
 0x7f6   :  { %5422 = vst.msk [vmem:[#allocation6] sm:$0x1] %vm5421_vm5, %v5413_v16  ;;  %v5367_v24 = vmax.f32 %v5324_v42, 0.0 }
 0x7f7   :  { %5431 = vst.msk [vmem:[#allocation6 - $0x1] sm:$0x4] %vm5430_vm6, %v5413_v16  ;;  %v5326_v2 = vpop.f32.mrf.mxu1 }
 0x7f8   :  { %5440 = vst.msk [vmem:[#allocation6 - $0x2] sm:$0x10] %vm5439_vm7, %v5413_v16 }
 0x7f9   :  { %5449 = vst.msk [vmem:[#allocation6 - $0x3] sm:$0x40] %vm5448_vm8, %v5413_v16  ;;  %v5261_v29 = vpop.f32.mrf.mxu2 }
 0x7fa   :  { %v5262_v32 = vadd.f32 %v5261_v29, %v5197_v47 }
 0x7fc   :  { %v5327_v59 = vadd.f32 %v5326_v2, %v5262_v32 }
 0x7fe   :  { %v5368_v27 = vmax.f32 %v5327_v59, 0.0 }
 0x7ff   :  { %v5329_v51 = vpop.f32.mrf.mxu1 }
 0x800   :  { %v5383_v22 = vmax.f32 %v5367_v24, %v5368_v27  ;;  %v9475_v31 = vld [vmem:[#allocation6] sm:$0xf] }
 0x801   :  { %v5264_v58 = vpop.f32.mrf.mxu2  ;;  %5473 = vst [vmem:[#allocation1] ss:$2 sm:$0xff] %v9475_v31 }
 0x802   :  { %v5398_v11 = vrot.slane %v5383_v22, 1  ;;  %v5265_v21 = vadd.f32 %v5264_v58, %v5200_v52 }
 0x804   :  { %v5414_v12 = vmax.f32 %v5383_v22, %v5398_v11  ;;  %v5330_v1 = vadd.f32 %v5329_v51, %v5265_v21  ;;  %v5218_v51 = vadd.f32 %v9461_v40, %v9450_v54  ;;  %v5221_v11 = vadd.f32 %v9461_v40, %v9454_v38 }
 0x805   :  { %v5501_v54 = vrot.slane %v9475_v31, 2 }
 0x806   :  { %5423 = vst.msk [vmem:[#allocation6 + $0x4] sm:$0x1] %vm5421_vm5, %v5414_v12  ;;  %v5369_v18 = vmax.f32 %v5330_v1, 0.0 }
 0x807   :  { %5432 = vst.msk [vmem:[#allocation6 + $0x3] sm:$0x4] %vm5430_vm6, %v5414_v12  ;;  %v5332_v15 = vpop.f32.mrf.mxu1 }
 0x808   :  { %5441 = vst.msk [vmem:[#allocation6 + $0x2] sm:$0x10] %vm5439_vm7, %v5414_v12 }
 0x809   :  { %5450 = vst.msk [vmem:[#allocation6 + $0x1] sm:$0x40] %vm5448_vm8, %v5414_v12  ;;  %v5267_v23 = vpop.f32.mrf.mxu2 }
 0x80a   :  { %v5268_v43 = vadd.f32 %v5267_v23, %v5203_v50 }
 0x80c   :  { %v5333_v48 = vadd.f32 %v5332_v15, %v5268_v43 }
 0x80e   :  { %v5370_v34 = vmax.f32 %v5333_v48, 0.0  ;;  %v5504_v48 = vsel %vm5503_vm10, %v9475_v31, %v5501_v54 }
 0x80f   :  { %v5335_v60 = vpop.f32.mrf.mxu1 }
 0x810   :  { %v9486_v45 = vld [vmem:[#allocation6 + $0x4] sm:$0xf]  ;;  %v5385_v17 = vmax.f32 %v5369_v18, %v5370_v34  ;;  %v5353_v18 = vpop.f32.mrf.mxu3 }
 0x811   :  { %5475 = vst [vmem:[#allocation1 + $0x1] ss:$2 sm:$0xff] %v9486_v45  ;;  %v5270_v55 = vpop.f32.mrf.mxu2 }
 0x812   :  { %v5399_v6 = vrot.slane %v5385_v17, 1  ;;  %v5271_v26 = vadd.f32 %v5270_v55, %v5206_v8 }
 0x814   :  { %v5415_v44 = vmax.f32 %v5385_v17, %v5399_v6  ;;  %v5336_v35 = vadd.f32 %v5335_v60, %v5271_v26  ;;  %v5522_v6 = vrot.slane %v5504_v48, 1  ;;  %v5224_v26 = vadd.f32 %v9461_v40, %v9440_v30 }
 0x816   :  { %5424 = vst.msk [vmem:[#allocation6 + $0x8] sm:$0x1] %vm5421_vm5, %v5415_v44  ;;  %v5371_v37 = vmax.f32 %v5336_v35, 0.0 }
 0x817   :  { %5433 = vst.msk [vmem:[#allocation6 + $0x7] sm:$0x4] %vm5430_vm6, %v5415_v44  ;;  %v5338_v0 = vpop.f32.mrf.mxu1 }
 0x818   :  { %5442 = vst.msk [vmem:[#allocation6 + $0x6] sm:$0x10] %vm5439_vm7, %v5415_v44  ;;  %v5480_v33 = vld.sshfl [vmem:[#allocation1] sm:$0xff pattern:$0x75316420] }
 0x819   :  { %5451 = vst.msk [vmem:[#allocation6 + $0x5] sm:$0x40] %vm5448_vm8, %v5415_v44  ;;  %v5273_v9 = vpop.f32.mrf.mxu2 }
 0x81a   :  { %v5274_v4 = vadd.f32 %v5273_v9, %v5209_v61  ;;  %5497 = vst.msk [vmem:[%s10139_s10] sm:$0xff] %vm5496_vm9, %v5480_v33 }
 0x81b   :  { %5534 = vst.sshfl [vmem:[#allocation1] sm:$0xff pattern:$0x75643120] %v9475_v31 }
 0x81c   :  { %v5339_v53 = vadd.f32 %v5338_v0, %v5274_v4 }
 0x81e   :  { %v5372_v10 = vmax.f32 %v5339_v53, 0.0 }
 0x81f   :  { %v5341_v5 = vpop.f32.mrf.mxu1 }
 0x820   :  { %v5387_v39 = vmax.f32 %v5371_v37, %v5372_v10  ;;  %v9502_v46 = vld [vmem:[#allocation6 + $0x8] sm:$0xf]  ;;  %v5227_v10 = vadd.f32 %v9461_v40, %v9446_v14 }
 0x821   :  { %v5276_v56 = vpop.f32.mrf.mxu2  ;;  %5477 = vst [vmem:[#allocation1 + $0x10] ss:$2 sm:$0xff] %v9502_v46 }
 0x822   :  { %v5400_v20 = vrot.slane %v5387_v39, 1  ;;  %v9505_v57 = vld [vmem:[#allocation1 + $0x1] ss:$2 sm:$0xff]  ;;  %v5277_v41 = vadd.f32 %v5276_v56, %v5212_v25  ;;  %v5566_v25 = vrot.slane %v9486_v45, 2 }
 0x823   :  { %5549 = vst.sshfl [vmem:[#allocation1] sm:$0xff pattern:$0x75643120] %v9475_v31 }
 0x824   :  { %v5416_v49 = vmax.f32 %v5387_v39, %v5400_v20  ;;  %v5342_v16 = vadd.f32 %v5341_v5, %v5277_v41  ;;  %v5356_v39 = vpop.f32.mrf.mxu3 }
 0x826   :  { %5425 = vst.msk [vmem:[#allocation6 + $0xc] sm:$0x1] %vm5421_vm5, %v5416_v49  ;;  %v5373_v47 = vmax.f32 %v5342_v16, 0.0 }
 0x827   :  { %5434 = vst.msk [vmem:[#allocation6 + $0xb] sm:$0x4] %vm5430_vm6, %v5416_v49  ;;  %v5344_v63 = vpop.f32.mrf.mxu1 }
 0x828   :  { %5443 = vst.msk [vmem:[#allocation6 + $0xa] sm:$0x10] %vm5439_vm7, %v5416_v49 }
 0x829   :  { %5452 = vst.msk [vmem:[#allocation6 + $0x9] sm:$0x40] %vm5448_vm8, %v5416_v49  ;;  %v5279_v19 = vpop.f32.mrf.mxu2 }
 0x82a   :  { %v5280_v28 = vadd.f32 %v5279_v19, %v5215_v3  ;;  %v9516_v2 = vld [vmem:[#allocation1 + $0x1] ss:$2 sm:$0xff] }
 0x82b   :  { %5590 = vst.sshfl [vmem:[#allocation1] sm:$0xff pattern:$0x75643120] %v9486_v45 }
 0x82c   :  { %v5345_v62 = vadd.f32 %v5344_v63, %v5280_v28 }
 0x82e   :  { %v5374_v29 = vmax.f32 %v5345_v62, 0.0 }
 0x82f   :  { %v5347_v42 = vpop.f32.mrf.mxu1 }
 0x830   :  { %v9519_v32 = vld [vmem:[#allocation6 + $0xc] sm:$0xf]  ;;  %v5382_v59 = vmax.f32 %v5373_v47, %v5374_v29  ;;  %v5568_v29 = vsel %vm5503_vm10, %v9486_v45, %v5566_v25 }
 0x831   :  { %5479 = vst [vmem:[#allocation1 + $0x11] ss:$2 sm:$0xff] %v9519_v32  ;;  %v5282_v7 = vpop.f32.mrf.mxu2 }
 0x832   :  { %v5401_v24 = vrot.slane %v5382_v59, 1  ;;  %v9522_v27 = vld [vmem:[#allocation1 + $0x1] ss:$2 sm:$0xff]  ;;  %v5283_v58 = vadd.f32 %v5282_v7, %v5218_v51 }
 0x833   :  { %5605 = vst.sshfl [vmem:[#allocation1] sm:$0xff pattern:$0x75643120] %v9486_v45 }
 0x834   :  { %v5417_v22 = vmax.f32 %v5382_v59, %v5401_v24  ;;  %v5348_v15 = vadd.f32 %v5347_v42, %v5283_v58  ;;  %v5555_v24 = vrot.slane %v9516_v2, 1  ;;  %v5230_v2 = vadd.f32 %v9461_v40, %v9452_v36 }
 0x836   :  { %5426 = vst.msk [vmem:[#allocation6 + $0x10] sm:$0x1] %vm5421_vm5, %v5417_v22  ;;  %v5375_v1 = vmax.f32 %v5348_v15, 0.0 }
 0x837   :  { %5435 = vst.msk [vmem:[#allocation6 + $0xf] sm:$0x4] %vm5430_vm6, %v5417_v22  ;;  %v5350_v21 = vpop.f32.mrf.mxu1 }
 0x838   :  { %5444 = vst.msk [vmem:[#allocation6 + $0xe] sm:$0x10] %vm5439_vm7, %v5417_v22  ;;  %v5481_v52 = vld.sshfl [vmem:[#allocation1 + $0x10] sm:$0xff pattern:$0x75316420] }
 0x839   :  { %5453 = vst.msk [vmem:[#allocation6 + $0xd] sm:$0x40] %vm5448_vm8, %v5417_v22  ;;  %v5285_v12 = vpop.f32.mrf.mxu2  ;;  %v5359_v22 = vpop.f32.mrf.mxu3 }
 0x83a   :  { %v5286_v50 = vadd.f32 %v5285_v12, %v5221_v11  ;;  %5498 = vst.msk [vmem:[%s10139_s10 + $0x8] sm:$0xff] %vm5496_vm9, %v5481_v52  ;;  %v9538_v23 = vld [vmem:[#allocation1 + $0x1] ss:$2 sm:$0xff]  ;;  %v5579_v52 = vrot.slane %v5568_v29, 1 }
 0x83b   :  { %5646 = vst.sshfl [vmem:[#allocation1] sm:$0xff pattern:$0x75643120] %v9502_v46  ;;  %v5611_v25 = vrot.slane %v9538_v23, 1 }
 0x83c   :  { %v5351_v38 = vadd.f32 %v5350_v21, %v5286_v50 }
 0x83e   :  { %v5376_v43 = vmax.f32 %v5351_v38, 0.0 }
 0x840   :  { %v5384_v34 = vmax.f32 %v5375_v1, %v5376_v43  ;;  %v5461_v60 = vld [vmem:[#allocation6 + $0x10] sm:$0xf] }
 0x841   :  { %v5288_v17 = vpop.f32.mrf.mxu2  ;;  %5483 = vst [vmem:[#allocation1 + $0x20] ss:$2 sm:$0xff] %v5461_v60  ;;  %v5502_v55 = vrot.slane %v5461_v60, 2 }
 0x842   :  { %v5402_v8 = vrot.slane %v5384_v34, 1  ;;  %5537 = vst.sshfl [vmem:[#allocation1 + $0x10] sm:$0xff pattern:$0x75643120] %v5461_v60  ;;  %v9543_v44 = vld [vmem:[#allocation1 + $0x1] ss:$2 sm:$0xff]  ;;  %v5289_v35 = vadd.f32 %v5288_v17, %v5224_v26 }
 0x843   :  { %v5505_v0 = vsel %vm5503_vm10, %v5461_v60, %v5502_v55  ;;  %5661 = vst.sshfl [vmem:[#allocation1] sm:$0xff pattern:$0x75643120] %v9502_v46  ;;  %v5233_v55 = vadd.f32 %v9461_v40, %v9456_v13  ;;  %v5783_v13 = vld [vmem:[%s10134_s5 + $0x178] sm:$0xff] }
 0x844   :  { %v5418_v31 = vmax.f32 %v5384_v34, %v5402_v8  ;;  %v5525_v61 = vsel %vm5511_vm11, %v5505_v0, %v5522_v6  ;;  %v5510_v33 = vrot.slane %v5505_v0, 7  ;;  %v5354_v41 = vadd.f32 %v5353_v18, %v5289_v35  ;;  %5929 = vmatpush.msrb.mxu2 %v5783_v13 }
 0x845   :  { %v5526_v9 = vsel %vm5513_vm12, %v5505_v0, %v5525_v61  ;;  %v5622_v35 = vrot.slane %v9502_v46, 2 }
 0x846   :  { %5427 = vst.msk [vmem:[#allocation6 + $0x14] sm:$0x1] %vm5421_vm5, %v5418_v31  ;;  %v5527_v4 = vsel %vm5515_vm13, %v5505_v0, %v5526_v9  ;;  %v5512_v53 = vsel %vm5511_vm11, %v5510_v33, %v5504_v48  ;;  %v5377_v62 = vmax.f32 %v5354_v41, 0.0 }
 0x847   :  { %5436 = vst.msk [vmem:[#allocation6 + $0x13] sm:$0x4] %vm5430_vm6, %v5418_v31  ;;  %v5528_v30 = vsel %vm5517_vm14, %v5505_v0, %v5527_v4  ;;  %v5514_v37 = vsel %vm5513_vm12, %v5510_v33, %v5512_v53 }
 0x848   :  { %5445 = vst.msk [vmem:[#allocation6 + $0x12] sm:$0x10] %vm5439_vm7, %v5418_v31  ;;  %5529 = vrot.lane.b32.xlu2 %v5528_v30, %s6271_s21  ;;  %v5516_v5 = vsel %vm5515_vm13, %v5510_v33, %v5514_v37 }
 0x849   :  { %5454 = vst.msk [vmem:[#allocation6 + $0x11] sm:$0x40] %vm5448_vm8, %v5418_v31  ;;  %v5539_v56 = vld [vmem:[#allocation1 + $0x11] ss:$2 sm:$0xff]  ;;  %v5291_v20 = vpop.f32.mrf.mxu2  ;;  %v5518_v49 = vsel %vm5517_vm14, %v5510_v33, %v5516_v5  ;;  %v5362_v31 = vpop.f32.mrf.mxu3 }
 0x84a   :  { %5552 = vst.sshfl [vmem:[#allocation1 + $0x10] sm:$0xff pattern:$0x75643120] %v5461_v60  ;;  %v5292_v63 = vadd.f32 %v5291_v20, %v5227_v10  ;;  %v9565_v14 = vld [vmem:[#allocation1 + $0x1] ss:$2 sm:$0xff]  ;;  %v5542_v3 = vrot.slane %v5539_v56, 7 }
 0x84b   :  { %5702 = vst.sshfl [vmem:[#allocation1] sm:$0xff pattern:$0x75643120] %v9519_v32 }
 0x84c   :  { %v5357_v19 = vadd.f32 %v5356_v39, %v5292_v63  ;;  %5521 = vst.msk [vmem:[#allocation7] sm:$0x3] %vm5520_vm15, %v5518_v49  ;;  %v5543_v16 = vsel %vm5511_vm11, %v5542_v3, %v9505_v57  ;;  %v5624_v39 = vsel %vm5503_vm10, %v9502_v46, %v5622_v35 }
 0x84d   :  { %v5544_v28 = vsel %vm5513_vm12, %v5542_v3, %v5543_v16  ;;  %v5635_v16 = vrot.slane %v5624_v39, 1 }
 0x84e   :  { %v5378_v47 = vmax.f32 %v5357_v19, 0.0  ;;  %v5545_v42 = vsel %vm5515_vm13, %v5542_v3, %v5544_v28 }
 0x84f   :  { %v5546_v59 = vsel %vm5517_vm14, %v5542_v3, %v5545_v42 }
 0x850   :  { %v5386_v7 = vmax.f32 %v5377_v62, %v5378_v47  ;;  %v5462_v51 = vld [vmem:[#allocation6 + $0x14] sm:$0xf]  ;;  %5548 = vst.msk [vmem:[#allocation7 + $0x2] sm:$0x3] %vm5520_vm15, %v5546_v59 }
 0x851   :  { %v5294_v58 = vpop.f32.mrf.mxu2  ;;  %v5554_v57 = vld [vmem:[#allocation1 + $0x11] ss:$2 sm:$0xff]  ;;  %5485 = vst [vmem:[#allocation1 + $0x21] ss:$2 sm:$0xff] %v5462_v51  ;;  %v5567_v11 = vrot.slane %v5462_v51, 2 }
 0x852   :  { %v5403_v12 = vrot.slane %v5386_v7, 1  ;;  %v5558_v21 = vsel %vm5511_vm11, %v5554_v57, %v5555_v24  ;;  %5593 = vst.sshfl [vmem:[#allocation1 + $0x10] sm:$0xff pattern:$0x75643120] %v5462_v51  ;;  %v9579_v45 = vld [vmem:[#allocation1 + $0x1] ss:$2 sm:$0xff]  ;;  %v5295_v34 = vadd.f32 %v5294_v58, %v5230_v2 }
 0x853   :  { %v5559_v15 = vsel %vm5513_vm12, %v5554_v57, %v5558_v21  ;;  %v5569_v50 = vsel %vm5503_vm10, %v5462_v51, %v5567_v11  ;;  %5717 = vst.sshfl [vmem:[#allocation1] sm:$0xff pattern:$0x75643120] %v9519_v32  ;;  %v5782_v24 = vld [vmem:[%s10134_s5 + $0x170] sm:$0xff]  ;;  %v5765_v21 = vld [vmem:[%s10134_s5 + $0xe8] sm:$0xff] }
 0x854   :  { %v5419_v54 = vmax.f32 %v5386_v7, %v5403_v12  ;;  %v5560_v38 = vsel %vm5515_vm13, %v5554_v57, %v5559_v15  ;;  %v5582_v1 = vsel %vm5511_vm11, %v5569_v50, %v5579_v52  ;;  %v5572_v18 = vrot.slane %v5569_v50, 7  ;;  %5930 = vmatpush.msrb.mxu2 %v5782_v24  ;;  %v5766_v11 = vld [vmem:[%s10134_s5 + $0xf0] sm:$0xff]  ;;  %v5780_v12 = vld [vmem:[%s10134_s5 + $0x160] sm:$0xff]  ;;  %v5747_v24 = vld [vmem:[%s10134_s5 + $0x58] sm:$0xff] }
 0x855   :  { %v5561_v43 = vsel %vm5517_vm14, %v5554_v57, %v5560_v38  ;;  %v5583_v48 = vsel %vm5513_vm12, %v5569_v50, %v5582_v1  ;;  %v5360_v33 = vadd.f32 %v5359_v22, %v5295_v34  ;;  %v5767_v22 = vld [vmem:[%s10134_s5 + $0xf8] sm:$0xff]  ;;  %v5678_v1 = vrot.slane %v9519_v32, 2 }
 0x856   :  { %5428 = vst.msk [vmem:[#allocation6 + $0x18] sm:$0x1] %vm5421_vm5, %v5419_v54  ;;  %5562 = vrot.lane.b32.xlu0 %v5561_v43, %s6271_s21  ;;  %v5584_v60 = vsel %vm5515_vm13, %v5569_v50, %v5583_v48  ;;  %v5573_v17 = vsel %vm5511_vm11, %v5572_v18, %v5568_v29  ;;  %5909 = vmatpush.msra.mxu1 %v5767_v22  ;;  %v5746_v22 = vld [vmem:[%s10134_s5 + $0x50] sm:$0xff] }
 0x857   :  { %5437 = vst.msk [vmem:[#allocation6 + $0x17] sm:$0x4] %vm5430_vm6, %v5419_v54  ;;  %v5585_v36 = vsel %vm5517_vm14, %v5569_v50, %v5584_v60  ;;  %v5574_v6 = vsel %vm5513_vm12, %v5572_v18, %v5573_v17  ;;  %v5379_v37 = vmax.f32 %v5360_v33, 0.0  ;;  %v5680_v34 = vsel %vm5503_vm10, %v9519_v32, %v5678_v1 }
 0x858   :  { %5446 = vst.msk [vmem:[#allocation6 + $0x16] sm:$0x10] %vm5439_vm7, %v5419_v54  ;;  %5586 = vrot.lane.b32.xlu1 %v5585_v36, %s6271_s21  ;;  %v5490_v8 = vld.sshfl [vmem:[#allocation1 + $0x20] sm:$0xff pattern:$0x75316420]  ;;  %v5575_v61 = vsel %vm5515_vm13, %v5572_v18, %v5574_v6  ;;  %5910 = vmatpush.msra.mxu1 %v5766_v11  ;;  %v5667_v36 = vrot.slane %v9565_v14, 1 }
 0x859   :  { %5455 = vst.msk [vmem:[#allocation6 + $0x15] sm:$0x40] %vm5448_vm8, %v5419_v54  ;;  %v5595_v26 = vld [vmem:[#allocation1 + $0x11] ss:$2 sm:$0xff]  ;;  %v5297_v0 = vpop.f32.mrf.mxu2  ;;  %v5576_v40 = vsel %vm5517_vm14, %v5572_v18, %v5575_v61 }
 0x85a   :  { %5608 = vst.sshfl [vmem:[#allocation1 + $0x10] sm:$0xff pattern:$0x75643120] %v5462_v51  ;;  %v5298_v9 = vadd.f32 %v5297_v0, %v5233_v55  ;;  %v5598_v4 = vrot.slane %v5595_v26, 7  ;;  %v5781_v51 = vld [vmem:[%s10134_s5 + $0x168] sm:$0xff]  ;;  %v5779_v54 = vld [vmem:[%s10134_s5 + $0x158] sm:$0xff]  ;;  %5911 = vmatpush.msra.mxu1 %v5765_v21 }
 0x85b   :  { %5578 = vst.msk [vmem:[#allocation7 + $0x4] sm:$0x3] %vm5520_vm15, %v5576_v40  ;;  %5931 = vmatpush.msrb.mxu2 %v5781_v51  ;;  %v5760_v51 = vld [vmem:[%s10134_s5 + $0xc0] sm:$0xff]  ;;  %v5743_v11 = vld [vmem:[%s10134_s5 + $0x38] sm:$0xff] }
 0x85c   :  { %v5363_v53 = vadd.f32 %v5362_v31, %v5298_v9  ;;  %5499 = vst.msk [vmem:[%s10139_s10 + $0x10] sm:$0xff] %vm5496_vm9, %v5490_v8  ;;  %v5599_v30 = vsel %vm5511_vm11, %v5598_v4, %v9522_v27  ;;  %v5691_v8 = vrot.slane %v5680_v34, 1  ;;  %v5740_v21 = vld [vmem:[%s10134_s5 + $0x20] sm:$0xff] }
 0x85d   :  { %v5600_v5 = vsel %vm5513_vm12, %v5598_v4, %v5599_v30  ;;  %5932 = vmatpush.msrb.mxu2 %v5780_v12  ;;  %v5741_v12 = vld [vmem:[%s10134_s5 + $0x28] sm:$0xff] }
 0x85e   :  { %v5380_v10 = vmax.f32 %v5363_v53, 0.0  ;;  %v5601_v56 = vsel %vm5515_vm13, %v5598_v4, %v5600_v5 }
 0x85f   :  { %v5602_v41 = vsel %vm5517_vm14, %v5598_v4, %v5601_v56  ;;  %5933 = vmatpush.msrb.mxu2 %v5779_v54  ;;  %v5737_v54 = vld [vmem:[%s10134_s5 + $0x8] sm:$0xff] }
 0x860   :  { %v5388_v20 = vmax.f32 %v5379_v37, %v5380_v10  ;;  %v5463_v49 = vld [vmem:[#allocation6 + $0x18] sm:$0xf]  ;;  %5604 = vst.msk [vmem:[#allocation7 + $0x6] sm:$0x3] %vm5520_vm15, %v5602_v41 }
 0x861   :  { %v5610_v63 = vld [vmem:[#allocation1 + $0x11] ss:$2 sm:$0xff]  ;;  %5487 = vst [vmem:[#allocation1 + $0x30] ss:$2 sm:$0xff] %v5463_v49  ;;  %v5623_v3 = vrot.slane %v5463_v49, 2 }
 0x862   :  { %v5404_v19 = vrot.slane %v5388_v20, 1  ;;  %v5614_v27 = vsel %vm5511_vm11, %v5610_v63, %v5611_v25  ;;  %5649 = vst.sshfl [vmem:[#allocation1 + $0x10] sm:$0xff pattern:$0x75643120] %v5463_v49 }
 0x863   :  { %v5615_v28 = vsel %vm5513_vm12, %v5610_v63, %v5614_v27  ;;  %v5625_v46 = vsel %vm5503_vm10, %v5463_v49, %v5623_v3  ;;  %v5750_v27 = vld [vmem:[%s10134_s5 + $0x70] sm:$0xff] }
 0x864   :  { %v5420_v62 = vmax.f32 %v5388_v20, %v5404_v19  ;;  %v5616_v23 = vsel %vm5515_vm13, %v5610_v63, %v5615_v28  ;;  %v5638_v47 = vsel %vm5511_vm11, %v5625_v46, %v5635_v16  ;;  %v5628_v29 = vrot.slane %v5625_v46, 7  ;;  %v5751_v19 = vld [vmem:[%s10134_s5 + $0x78] sm:$0xff]  ;;  %v5778_v28 = vld [vmem:[%s10134_s5 + $0x150] sm:$0xff] }
 0x865   :  { %v5617_v42 = vsel %vm5517_vm14, %v5610_v63, %v5616_v23  ;;  %v5639_v59 = vsel %vm5513_vm12, %v5625_v46, %v5638_v47  ;;  %5889 = vmatpush.msra.mxu3 %v5751_v19  ;;  %5934 = vmatpush.msrb.mxu2 %v5778_v28  ;;  %v5763_v23 = vld [vmem:[%s10134_s5 + $0xd8] sm:$0xff]  ;;  %v5777_v47 = vld [vmem:[%s10134_s5 + $0x148] sm:$0xff] }
 0x866   :  { %5429 = vst.msk [vmem:[#allocation6 + $0x1c] sm:$0x1] %vm5421_vm5, %v5420_v62  ;;  %5618 = vrot.lane.b32.xlu2 %v5617_v42, %s6271_s21  ;;  %v5640_v7 = vsel %vm5515_vm13, %v5625_v46, %v5639_v59  ;;  %v5629_v58 = vsel %vm5511_vm11, %v5628_v29, %v5624_v39  ;;  %v5719_v39 = vld [vmem:[#allocation1 + $0x1] ss:$2 sm:$0xff] }
 0x867   :  { %5438 = vst.msk [vmem:[#allocation6 + $0x1b] sm:$0x4] %vm5430_vm6, %v5420_v62  ;;  %v5641_v57 = vsel %vm5517_vm14, %v5625_v46, %v5640_v7  ;;  %v5630_v52 = vsel %vm5513_vm12, %v5628_v29, %v5629_v58  ;;  %5890 = vmatpush.msra.mxu3 %v5750_v27  ;;  %v5748_v42 = vld [vmem:[%s10134_s5 + $0x60] sm:$0xff]  ;;  %5935 = vmatpush.msrb.mxu2 %v5777_v47  ;;  %v5761_v59 = vld [vmem:[%s10134_s5 + $0xc8] sm:$0xff]  ;;  %v5806_v47 = vld [vmem:[%s10134_s5 + $0x230] sm:$0xff] }
 0x868   :  { %5447 = vst.msk [vmem:[#allocation6 + $0x1a] sm:$0x10] %vm5439_vm7, %v5420_v62  ;;  %5642 = vrot.lane.b32.xlu0 %v5641_v57, %s6271_s21  ;;  %v5631_v15 = vsel %vm5515_vm13, %v5628_v29, %v5630_v52  ;;  %v5776_v7 = vld [vmem:[%s10134_s5 + $0x140] sm:$0xff]  ;;  %v5745_v58 = vld [vmem:[%s10134_s5 + $0x48] sm:$0xff]  ;;  %v5742_v52 = vld [vmem:[%s10134_s5 + $0x30] sm:$0xff] }
 0x869   :  { %5456 = vst.msk [vmem:[#allocation6 + $0x19] sm:$0x40] %vm5448_vm8, %v5420_v62  ;;  %v5651_v50 = vld [vmem:[#allocation1 + $0x11] ss:$2 sm:$0xff]  ;;  %v5632_v2 = vsel %vm5517_vm14, %v5628_v29, %v5631_v15  ;;  %v5749_v62 = vld [vmem:[%s10134_s5 + $0x68] sm:$0xff]  ;;  %5936 = vmatpush.msrb.mxu2 %v5776_v7  ;;  %v5744_v57 = vld [vmem:[%s10134_s5 + $0x40] sm:$0xff] }
 0x86a   :  { %5664 = vst.sshfl [vmem:[#allocation1 + $0x10] sm:$0xff pattern:$0x75643120] %v5463_v49  ;;  %v5654_v38 = vrot.slane %v5651_v50, 7  ;;  %v5723_v49 = vrot.slane %v5719_v39, 1  ;;  %v5762_v29 = vld [vmem:[%s10134_s5 + $0xd0] sm:$0xff]  ;;  %5891 = vmatpush.msra.mxu3 %v5749_v62 }
 0x86b   :  { %5634 = vst.msk [vmem:[#allocation7 + $0x8] sm:$0x3] %vm5520_vm15, %v5632_v2  ;;  %v5739_v15 = vld [vmem:[%s10134_s5 + $0x18] sm:$0xff]  ;;  %v5738_v50 = vld [vmem:[%s10134_s5 + $0x10] sm:$0xff]  ;;  %v5789_v39 = vld [vmem:[%s10134_s5 + $0x1a8] sm:$0xff] }
 0x86c   :  { %v5655_v43 = vsel %vm5511_vm11, %v5654_v38, %v9543_v44  ;;  %5892 = vmatpush.msra.mxu3 %v5748_v42  ;;  %v5775_v2 = vld [vmem:[%s10134_s5 + $0x138] sm:$0xff]  ;;  %v5809_v19 = vld [vmem:[%s10134_s5 + $0x248] sm:$0xff]  ;;  %v5808_v27 = vld [vmem:[%s10134_s5 + $0x240] sm:$0xff] }
 0x86d   :  { %v5656_v48 = vsel %vm5513_vm12, %v5654_v38, %v5655_v43  ;;  %5937 = vmatpush.msrb.mxu2 %v5775_v2  ;;  %v5759_v43 = vld [vmem:[%s10134_s5 + $0xb8] sm:$0xff]  ;;  %v5829_v42 = vld [vmem:[%s10134_s5 + $0x2e8] sm:$0xff]  ;;  %v5828_v7 = vld [vmem:[%s10134_s5 + $0x2e0] sm:$0xff] }
 0x86e   :  { %v5657_v18 = vsel %vm5515_vm13, %v5654_v38, %v5656_v48  ;;  %5893 = vmatpush.msra.mxu3 %v5747_v24  ;;  %v5799_v48 = vld [vmem:[%s10134_s5 + $0x1f8] sm:$0xff]  ;;  %v5804_v24 = vld [vmem:[%s10134_s5 + $0x220] sm:$0xff] }
 0x86f   :  { %v5658_v60 = vsel %vm5517_vm14, %v5654_v38, %v5657_v18  ;;  %v5736_v38 = vld [vmem:[%s10134_s5] sm:$0xff]  ;;  %v5758_v18 = vld [vmem:[%s10134_s5 + $0xb0] sm:$0xff]  ;;  %v5831_v62 = vld [vmem:[%s10134_s5 + $0x2f8] sm:$0xff] }
 0x870   :  { %v5464_v17 = vld [vmem:[#allocation6 + $0x1c] sm:$0xf]  ;;  %5660 = vst.msk [vmem:[#allocation7 + $0xa] sm:$0x3] %vm5520_vm15, %v5658_v60  ;;  %5894 = vmatpush.msra.mxu3 %v5746_v22  ;;  %v5757_v60 = vld [vmem:[%s10134_s5 + $0xa8] sm:$0xff]  ;;  %v5803_v22 = vld [vmem:[%s10134_s5 + $0x218] sm:$0xff] }
 0x871   :  { %v5666_v55 = vld [vmem:[#allocation1 + $0x11] ss:$2 sm:$0xff]  ;;  %5489 = vst [vmem:[#allocation1 + $0x31] ss:$2 sm:$0xff] %v5464_v17  ;;  %v5679_v6 = vrot.slane %v5464_v17, 2 }
 0x872   :  { %v5670_v44 = vsel %vm5511_vm11, %v5666_v55, %v5667_v36  ;;  %5705 = vst.sshfl [vmem:[#allocation1 + $0x10] sm:$0xff pattern:$0x75643120] %v5464_v17  ;;  %5895 = vmatpush.msra.mxu3 %v5745_v58  ;;  %v5774_v36 = vld [vmem:[%s10134_s5 + $0x130] sm:$0xff]  ;;  %v5847_v2 = vld [vmem:[%s10134_s5 + $0x378] sm:$0xff] }
 0x873   :  { %v5671_v26 = vsel %vm5513_vm12, %v5666_v55, %v5670_v44  ;;  %v5681_v0 = vsel %vm5503_vm10, %v5464_v17, %v5679_v6  ;;  %5938 = vmatpush.msrb.mxu2 %v5774_v36  ;;  %v5796_v6 = vld [vmem:[%s10134_s5 + $0x1e0] sm:$0xff]  ;;  %v5755_v44 = vld [vmem:[%s10134_s5 + $0x98] sm:$0xff]  ;;  %v5826_v58 = vld [vmem:[%s10134_s5 + $0x2d0] sm:$0xff] }
 0x874   :  { %v5672_v32 = vsel %vm5515_vm13, %v5666_v55, %v5671_v26  ;;  %v5694_v31 = vsel %vm5511_vm11, %v5681_v0, %v5691_v8  ;;  %v5684_v61 = vrot.slane %v5681_v0, 7  ;;  %5896 = vmatpush.msra.mxu3 %v5744_v57  ;;  %v5795_v8 = vld [vmem:[%s10134_s5 + $0x1d8] sm:$0xff]  ;;  %v5754_v26 = vld [vmem:[%s10134_s5 + $0x90] sm:$0xff]  ;;  %v5861_v36 = vld [vmem:[%s10134_s5 + $0x3e8] sm:$0xff] }
 0x875   :  { %v5673_v14 = vsel %vm5517_vm14, %v5666_v55, %v5672_v32  ;;  %v5695_v33 = vsel %vm5513_vm12, %v5681_v0, %v5694_v31  ;;  %v5756_v55 = vld [vmem:[%s10134_s5 + $0xa0] sm:$0xff]  ;;  %v5773_v32 = vld [vmem:[%s10134_s5 + $0x128] sm:$0xff] }
 0x876   :  { %5674 = vrot.lane.b32.xlu1 %v5673_v14, %s6271_s21  ;;  %v5696_v9 = vsel %vm5515_vm13, %v5681_v0, %v5695_v33  ;;  %v5685_v13 = vsel %vm5511_vm11, %v5684_v61, %v5680_v34  ;;  %5897 = vmatpush.msra.mxu3 %v5743_v11  ;;  %v5798_v34 = vld [vmem:[%s10134_s5 + $0x1f0] sm:$0xff]  ;;  %v5753_v31 = vld [vmem:[%s10134_s5 + $0x88] sm:$0xff]  ;;  %v5772_v14 = vld [vmem:[%s10134_s5 + $0x120] sm:$0xff] }
 0x877   :  { %v5697_v40 = vsel %vm5517_vm14, %v5681_v0, %v5696_v9  ;;  %v5686_v35 = vsel %vm5513_vm12, %v5684_v61, %v5685_v13  ;;  %v5794_v0 = vld [vmem:[%s10134_s5 + $0x1d0] sm:$0xff]  ;;  %5939 = vmatpush.msrb.mxu2 %v5773_v32  ;;  %v5771_v33 = vld [vmem:[%s10134_s5 + $0x118] sm:$0xff]  ;;  %v5752_v9 = vld [vmem:[%s10134_s5 + $0x80] sm:$0xff] }
 0x878   :  { %5698 = vrot.lane.b32.xlu2 %v5697_v40, %s6271_s21  ;;  %v5687_v4 = vsel %vm5515_vm13, %v5684_v61, %v5686_v35  ;;  %v5491_v53 = vld.sshfl [vmem:[#allocation1 + $0x30] sm:$0xff pattern:$0x75316420]  ;;  %5898 = vmatpush.msra.mxu3 %v5742_v52  ;;  %v5792_v13 = vld [vmem:[%s10134_s5 + $0x1c0] sm:$0xff]  ;;  %v5815_v40 = vld [vmem:[%s10134_s5 + $0x278] sm:$0xff] }
 0x879   :  { %v5707_v30 = vld [vmem:[#allocation1 + $0x11] ss:$2 sm:$0xff]  ;;  %v5688_v37 = vsel %vm5517_vm14, %v5684_v61, %v5687_v4  ;;  %5500 = vst.msk [vmem:[%s10139_s10 + $0x18] sm:$0xff] %vm5496_vm9, %v5491_v53  ;;  %v5793_v61 = vld [vmem:[%s10134_s5 + $0x1c8] sm:$0xff]  ;;  %5940 = vmatpush.msrb.mxu2 %v5772_v14 }
 0x87a   :  { %5720 = vst.sshfl [vmem:[#allocation1 + $0x10] sm:$0xff pattern:$0x75643120] %v5464_v17  ;;  %v5710_v10 = vrot.slane %v5707_v30, 7  ;;  %5899 = vmatpush.msra.mxu3 %v5741_v12  ;;  %v5797_v17 = vld [vmem:[%s10134_s5 + $0x1e8] sm:$0xff]  ;;  %v5770_v35 = vld [vmem:[%s10134_s5 + $0x110] sm:$0xff] }
 0x87b   :  { %5690 = vst.msk [vmem:[#allocation7 + $0xc] sm:$0x3] %vm5520_vm15, %v5688_v37  ;;  %5941 = vmatpush.msrb.mxu2 %v5771_v33  ;;  %v5791_v4 = vld [vmem:[%s10134_s5 + $0x1b8] sm:$0xff]  ;;  %v5814_v53 = vld [vmem:[%s10134_s5 + $0x270] sm:$0xff]  ;;  %v5769_v30 = vld [vmem:[%s10134_s5 + $0x108] sm:$0xff] }
 0x87c   :  { %v5711_v5 = vsel %vm5511_vm11, %v5710_v10, %v9579_v45  ;;  %v5764_v45 = vld [vmem:[%s10134_s5 + $0xe0] sm:$0xff]  ;;  %5900 = vmatpush.msra.mxu3 %v5740_v21  ;;  %v5790_v37 = vld [vmem:[%s10134_s5 + $0x1b0] sm:$0xff]  ;;  %v5825_v12 = vld [vmem:[%s10134_s5 + $0x2c8] sm:$0xff] }
 0x87d   :  { %v5712_v56 = vsel %vm5513_vm12, %v5710_v10, %v5711_v5  ;;  %5912 = vmatpush.msra.mxu1 %v5764_v45  ;;  %5942 = vmatpush.msrb.mxu2 %v5770_v35  ;;  %v5768_v5 = vld [vmem:[%s10134_s5 + $0x100] sm:$0xff]  ;;  %v5785_v45 = vld [vmem:[%s10134_s5 + $0x188] sm:$0xff]  ;;  %v5802_v52 = vld [vmem:[%s10134_s5 + $0x210] sm:$0xff] }
 0x87e   :  { %v5713_v20 = vsel %vm5515_vm13, %v5710_v10, %v5712_v56  ;;  %5901 = vmatpush.msra.mxu3 %v5739_v15  ;;  %v5812_v56 = vld [vmem:[%s10134_s5 + $0x260] sm:$0xff]  ;;  %v5801_v21 = vld [vmem:[%s10134_s5 + $0x208] sm:$0xff]  ;;  %v5842_v32 = vld [vmem:[%s10134_s5 + $0x350] sm:$0xff] }
 0x87f   :  { %v5714_v25 = vsel %vm5517_vm14, %v5710_v10, %v5713_v20  ;;  %5913 = vmatpush.msra.mxu1 %v5763_v23  ;;  %v5813_v10 = vld [vmem:[%s10134_s5 + $0x268] sm:$0xff]  ;;  %5943 = vmatpush.msrb.mxu2 %v5769_v30  ;;  %v5788_v20 = vld [vmem:[%s10134_s5 + $0x1a0] sm:$0xff]  ;;  %v5818_v30 = vld [vmem:[%s10134_s5 + $0x290] sm:$0xff] }
 0x880   :  { %5716 = vst.msk [vmem:[#allocation7 + $0xe] sm:$0x3] %vm5520_vm15, %v5714_v25  ;;  %5902 = vmatpush.msra.mxu3 %v5738_v50  ;;  %v5824_v15 = vld [vmem:[%s10134_s5 + $0x2c0] sm:$0xff]  ;;  %v5841_v14 = vld [vmem:[%s10134_s5 + $0x348] sm:$0xff] }
 0x881   :  { %v5722_v41 = vld [vmem:[#allocation1 + $0x11] ss:$2 sm:$0xff]  ;;  %5914 = vmatpush.msra.mxu1 %v5762_v29  ;;  %5944 = vmatpush.msrb.mxu2 %v5768_v5  ;;  %v5800_v50 = vld [vmem:[%s10134_s5 + $0x200] sm:$0xff]  ;;  %v5817_v5 = vld [vmem:[%s10134_s5 + $0x288] sm:$0xff] }
 0x882   :  { %v5726_v63 = vsel %vm5511_vm11, %v5722_v41, %v5723_v49  ;;  %5903 = vmatpush.msra.mxu3 %v5737_v54  ;;  %v5811_v49 = vld [vmem:[%s10134_s5 + $0x258] sm:$0xff]  ;;  %v5830_v29 = vld [vmem:[%s10134_s5 + $0x2f0] sm:$0xff]  ;;  %v5820_v33 = vld [vmem:[%s10134_s5 + $0x2a0] sm:$0xff] }
 0x883   :  { %v5727_v3 = vsel %vm5513_vm12, %v5722_v41, %v5726_v63  ;;  %5915 = vmatpush.msra.mxu1 %v5761_v59  ;;  %v5810_v63 = vld [vmem:[%s10134_s5 + $0x250] sm:$0xff]  ;;  %5989 = vmatpush.msra.mxu2 %v5831_v62  ;;  %v5805_v59 = vld [vmem:[%s10134_s5 + $0x228] sm:$0xff]  ;;  %v5863_v54 = vld [vmem:[%s10134_s5 + $0x3f8] sm:$0xff] }
 0x884   :  { %v5728_v16 = vsel %vm5515_vm13, %v5722_v41, %v5727_v3  ;;  %5904 = vmatpush.msra.mxu3 %v5736_v38  ;;  %v5786_v3 = vld [vmem:[%s10134_s5 + $0x190] sm:$0xff]  ;;  %v5848_v62 = vld [vmem:[%s10134_s5 + $0x380] sm:$0xff] }
 0x885   :  { %v5729_v46 = vsel %vm5517_vm14, %v5722_v41, %v5728_v16  ;;  %5916 = vmatpush.msra.mxu1 %v5760_v51  ;;  %v5787_v41 = vld [vmem:[%s10134_s5 + $0x198] sm:$0xff]  ;;  %v5784_v16 = vld [vmem:[%s10134_s5 + $0x180] sm:$0xff]  ;;  %5990 = vmatpush.msra.mxu2 %v5830_v29 }
 0x886   :  { %5730 = vrot.lane.b32.xlu0 %v5729_v46, %s6271_s21  ;;  %5949 = vmatpush.msrb.mxu3 %v5799_v48  ;;  %v5807_v46 = vld [vmem:[%s10134_s5 + $0x238] sm:$0xff] }
 0x887   :  { %5917 = vmatpush.msra.mxu1 %v5759_v43  ;;  %5991 = vmatpush.msra.mxu2 %v5829_v42  ;;  %v5827_v51 = vld [vmem:[%s10134_s5 + $0x2d8] sm:$0xff] }
 0x888   :  { %5950 = vmatpush.msrb.mxu3 %v5798_v34  ;;  %v5862_v34 = vld [vmem:[%s10134_s5 + $0x3f0] sm:$0xff] }
 0x889   :  { %5918 = vmatpush.msra.mxu1 %v5758_v18  ;;  %5992 = vmatpush.msra.mxu2 %v5828_v7  ;;  %v5846_v18 = vld [vmem:[%s10134_s5 + $0x370] sm:$0xff]  ;;  %v6065_v7 = vld [vmem:[%s10136_s7 + $0x78] sm:$0xff] }
 0x88a   :  { %5951 = vmatpush.msrb.mxu3 %v5797_v17  ;;  %v5844_v17 = vld [vmem:[%s10134_s5 + $0x360] sm:$0xff] }
 0x88b   :  { %5919 = vmatpush.msra.mxu1 %v5757_v60  ;;  %5993 = vmatpush.msra.mxu2 %v5827_v51  ;;  %v5845_v60 = vld [vmem:[%s10134_s5 + $0x368] sm:$0xff] }
 0x88c   :  { %5952 = vmatpush.msrb.mxu3 %v5796_v6  ;;  %v5823_v6 = vld [vmem:[%s10134_s5 + $0x2b8] sm:$0xff]  ;;  %v6063_v51 = vld [vmem:[%s10136_s7 + $0x68] sm:$0xff] }
 0x88d   :  { %5920 = vmatpush.msra.mxu1 %v5756_v55  ;;  %5994 = vmatpush.msra.mxu2 %v5826_v58  ;;  %v5860_v55 = vld [vmem:[%s10134_s5 + $0x3e0] sm:$0xff]  ;;  %v6061_v58 = vld [vmem:[%s10136_s7 + $0x58] sm:$0xff] }
 0x88e   :  { %5953 = vmatpush.msrb.mxu3 %v5795_v8  ;;  %v5822_v8 = vld [vmem:[%s10134_s5 + $0x2b0] sm:$0xff] }
 0x88f   :  { %5921 = vmatpush.msra.mxu1 %v5755_v44  ;;  %5995 = vmatpush.msra.mxu2 %v5825_v12  ;;  %v5843_v44 = vld [vmem:[%s10134_s5 + $0x358] sm:$0xff] }
 0x890   :  { %5954 = vmatpush.msrb.mxu3 %v5794_v0  ;;  %v5859_v0 = vld [vmem:[%s10134_s5 + $0x3d8] sm:$0xff] }
 0x891   :  { %5922 = vmatpush.msra.mxu1 %v5754_v26  ;;  %5996 = vmatpush.msra.mxu2 %v5824_v15  ;;  %v6057_v12 = vld [vmem:[%s10136_s7 + $0x38] sm:$0xff]  ;;  %v6055_v15 = vld [vmem:[%s10136_s7 + $0x28] sm:$0xff] }
 0x892   :  { %5955 = vmatpush.msrb.mxu3 %v5793_v61  ;;  %v5858_v61 = vld [vmem:[%s10134_s5 + $0x3d0] sm:$0xff] }
 0x893   :  { %5923 = vmatpush.msra.mxu1 %v5753_v31  ;;  %5997 = vmatpush.msra.mxu2 %v5823_v6  ;;  %v5821_v31 = vld [vmem:[%s10134_s5 + $0x2a8] sm:$0xff] }
 0x894   :  { %5956 = vmatpush.msrb.mxu3 %v5792_v13  ;;  %v5840_v13 = vld [vmem:[%s10134_s5 + $0x340] sm:$0xff] }
 0x895   :  { %5924 = vmatpush.msra.mxu1 %v5752_v9  ;;  %5998 = vmatpush.msra.mxu2 %v5822_v8  ;;  %v5857_v9 = vld [vmem:[%s10134_s5 + $0x3c8] sm:$0xff] }
 0x896   :  { %5957 = vmatpush.msrb.mxu3 %v5791_v4  ;;  %v5856_v4 = vld [vmem:[%s10134_s5 + $0x3c0] sm:$0xff] }
 0x897   :  { %5969 = vmatpush.msrb.mxu1 %v5815_v40  ;;  %5999 = vmatpush.msra.mxu2 %v5821_v31  ;;  %v5819_v40 = vld [vmem:[%s10134_s5 + $0x298] sm:$0xff] }
 0x898   :  { %5958 = vmatpush.msrb.mxu3 %v5790_v37  ;;  %v5855_v37 = vld [vmem:[%s10134_s5 + $0x3b8] sm:$0xff] }
 0x899   :  { %5970 = vmatpush.msrb.mxu1 %v5814_v53  ;;  %6000 = vmatpush.msra.mxu2 %v5820_v33  ;;  %v5839_v53 = vld [vmem:[%s10134_s5 + $0x338] sm:$0xff] }
 0x89a   :  { %5959 = vmatpush.msrb.mxu3 %v5789_v39  ;;  %v5854_v39 = vld [vmem:[%s10134_s5 + $0x3b0] sm:$0xff] }
 0x89b   :  { %5971 = vmatpush.msrb.mxu1 %v5813_v10  ;;  %6001 = vmatpush.msra.mxu2 %v5819_v40  ;;  %v5838_v10 = vld [vmem:[%s10134_s5 + $0x330] sm:$0xff] }
 0x89c   :  { %5960 = vmatpush.msrb.mxu3 %v5788_v20  ;;  %v5816_v20 = vld [vmem:[%s10134_s5 + $0x280] sm:$0xff] }
 0x89d   :  { %5972 = vmatpush.msrb.mxu1 %v5812_v56  ;;  %6002 = vmatpush.msra.mxu2 %v5818_v30  ;;  %v5837_v56 = vld [vmem:[%s10134_s5 + $0x328] sm:$0xff] }
 0x89e   :  { %5961 = vmatpush.msrb.mxu3 %v5787_v41  ;;  %v5852_v41 = vld [vmem:[%s10134_s5 + $0x3a0] sm:$0xff] }
 0x89f   :  { %5973 = vmatpush.msrb.mxu1 %v5811_v49  ;;  %6003 = vmatpush.msra.mxu2 %v5817_v5  ;;  %v5836_v49 = vld [vmem:[%s10134_s5 + $0x320] sm:$0xff] }
 0x8a0   :  { %5962 = vmatpush.msrb.mxu3 %v5786_v3  ;;  %v5851_v3 = vld [vmem:[%s10134_s5 + $0x398] sm:$0xff] }
 0x8a1   :  { %5974 = vmatpush.msrb.mxu1 %v5810_v63  ;;  %6004 = vmatpush.msra.mxu2 %v5816_v20  ;;  %v5835_v63 = vld [vmem:[%s10134_s5 + $0x318] sm:$0xff] }
 0x8a2   :  { %v5530_v1 = vpop.permute.xlu2 %5529  ;;  %5963 = vmatpush.msrb.mxu3 %v5785_v45  ;;  %v5850_v45 = vld [vmem:[%s10134_s5 + $0x390] sm:$0xff] }
 0x8a3   :  { %5533 = vst.msk [vmem:[#allocation7] sm:$0x3] %vm5532_vm0, %v5530_v1  ;;  %5975 = vmatpush.msrb.mxu1 %v5809_v19  ;;  %v5834_v19 = vld [vmem:[%s10134_s5 + $0x310] sm:$0xff] }
 0x8a4   :  { %5964 = vmatpush.msrb.mxu3 %v5784_v16  ;;  %v5849_v16 = vld [vmem:[%s10134_s5 + $0x388] sm:$0xff] }
 0x8a5   :  { %5976 = vmatpush.msrb.mxu1 %v5808_v27  ;;  %v5833_v27 = vld [vmem:[%s10134_s5 + $0x308] sm:$0xff] }
 0x8a7   :  { %5977 = vmatpush.msrb.mxu1 %v5807_v46 }
 0x8a9   :  { %5978 = vmatpush.msrb.mxu1 %v5806_v47 }
 0x8ab   :  { %5979 = vmatpush.msrb.mxu1 %v5805_v59 }
 0x8ad   :  { %5980 = vmatpush.msrb.mxu1 %v5804_v24  ;;  %v6064_v24 = vld [vmem:[%s10136_s7 + $0x70] sm:$0xff] }
 0x8af   :  { %5981 = vmatpush.msrb.mxu1 %v5803_v22  ;;  %v6062_v22 = vld [vmem:[%s10136_s7 + $0x60] sm:$0xff] }
 0x8b1   :  { %5982 = vmatpush.msrb.mxu1 %v5802_v52  ;;  %v6058_v52 = vld [vmem:[%s10136_s7 + $0x40] sm:$0xff] }
 0x8b3   :  { %5983 = vmatpush.msrb.mxu1 %v5801_v21  ;;  %v6056_v21 = vld [vmem:[%s10136_s7 + $0x30] sm:$0xff] }
 0x8b5   :  { %5984 = vmatpush.msrb.mxu1 %v5800_v50  ;;  %v6054_v50 = vld [vmem:[%s10136_s7 + $0x20] sm:$0xff] }
 0x8c0   :  { %v5619_v25 = vpop.permute.xlu2 %5618 }
 0x8c1   :  { %5621 = vst.msk [vmem:[#allocation7 + $0x6] sm:$0x3] %vm5532_vm0, %v5619_v25  ;;  %v5853_v25 = vld [vmem:[%s10134_s5 + $0x3a8] sm:$0xff] }
 0x8c8   :  { %v5563_v28 = vpop.permute.xlu0 %5562 }
 0x8c9   :  { %5565 = vst.msk [vmem:[#allocation7 + $0x2] sm:$0x3] %vm5532_vm0, %v5563_v28  ;;  %v5832_v28 = vld [vmem:[%s10134_s5 + $0x300] sm:$0xff] }
 0x8ca   :  { %v5587_v23 = vpop.permute.xlu1 %5586 }
 0x8cb   :  { %5589 = vst.msk [vmem:[#allocation7 + $0x4] sm:$0x3] %vm5532_vm0, %v5587_v23 }
 0x8d2   :  { %v5734_v57 = vld [vmem:[#allocation7] sm:$0xff]  ;;  %v5699_v11 = vpop.permute.xlu2 %5698 }
 0x8d3   :  { %5870 = vst [vmem:[#allocation1] ss:$4 sm:$0xff] %v5734_v57  ;;  %v6060_v57 = vld [vmem:[%s10136_s7 + $0x50] sm:$0xff] }
 0x8d4   :  { %5701 = vst.msk [vmem:[#allocation7 + $0xc] sm:$0x3] %vm5532_vm0, %v5699_v11  ;;  %v6059_v11 = vld [vmem:[%s10136_s7 + $0x48] sm:$0xff] }
 0x8da   :  { %v5643_v38 = vpop.permute.xlu0 %5642  ;;  %v5873_v1 = vld.sshfl [vmem:[#allocation1] sm:$0xff pattern:$0x73625140]  ;;  %v5874_v43 = vld.sshfl [vmem:[#allocation1 + $0x8] sm:$0xff pattern:$0x73625140] }
 0x8db   :  { %5645 = vst.msk [vmem:[#allocation7 + $0x8] sm:$0x3] %vm5532_vm0, %v5643_v38  ;;  %5905 = vmatmul.f32.vlgmr.msra.gmra.mxu3 %v5873_v1  ;;  %5925 = vmatmul.f32.vlgmr.msra.gmra.mxu1 %v5874_v43  ;;  %v5875_v48 = vld.sshfl [vmem:[#allocation1 + $0x10] sm:$0xff pattern:$0x73625140]  ;;  %v6051_v38 = vld [vmem:[%s10136_s7 + $0x8] sm:$0xff] }
 0x8dc   :  { %5945 = vmatmul.f32.vlgmr.msrb.gmra.mxu2 %v5875_v48  ;;  %6009 = vmatpush.msra.mxu3 %v5847_v2  ;;  %v5876_v26 = vld.sshfl [vmem:[#allocation1 + $0x18] sm:$0xff pattern:$0x73625140]  ;;  %v6050_v1 = vld [vmem:[%s10136_s7] sm:$0xff] }
 0x8dd   :  { %6029 = vmatpush.msra.mxu1 %v5863_v54  ;;  %6070 = vmatpush.msrb.mxu2 %v6065_v7  ;;  %v6053_v2 = vld [vmem:[%s10136_s7 + $0x18] sm:$0xff]  ;;  %v6052_v54 = vld [vmem:[%s10136_s7 + $0x10] sm:$0xff]  ;;  %v6231_v43 = vld [vmem:[%s10135_s6] ss:$0 sm:$0xff] }
 0x8de   :  { %6010 = vmatpush.msra.mxu3 %v5846_v18 }
 0x8df   :  { %6030 = vmatpush.msra.mxu1 %v5862_v34  ;;  %6071 = vmatpush.msrb.mxu2 %v6064_v24 }
 0x8e0   :  { %6011 = vmatpush.msra.mxu3 %v5845_v60 }
 0x8e1   :  { %6031 = vmatpush.msra.mxu1 %v5861_v36  ;;  %6072 = vmatpush.msrb.mxu2 %v6063_v51 }
 0x8e2   :  { %6012 = vmatpush.msra.mxu3 %v5844_v17 }
 0x8e3   :  { %5965 = vmatmul.f32.vlgmr.msrb.gmra.mxu3 %v5876_v26  ;;  %6032 = vmatpush.msra.mxu1 %v5860_v55 }
 0x8e4   :  { %6013 = vmatpush.msra.mxu3 %v5843_v44  ;;  %6073 = vmatpush.msrb.mxu2 %v6062_v22 }
 0x8e5   :  { %6033 = vmatpush.msra.mxu1 %v5859_v0 }
 0x8e6   :  { %6014 = vmatpush.msra.mxu3 %v5842_v32  ;;  %6074 = vmatpush.msrb.mxu2 %v6061_v58 }
 0x8e7   :  { %6034 = vmatpush.msra.mxu1 %v5858_v61 }
 0x8e8   :  { %v5675_v35 = vpop.permute.xlu1 %5674  ;;  %6015 = vmatpush.msra.mxu3 %v5841_v14  ;;  %6075 = vmatpush.msrb.mxu2 %v6060_v57 }
 0x8e9   :  { %5677 = vst.msk [vmem:[#allocation7 + $0xa] sm:$0x3] %vm5532_vm0, %v5675_v35  ;;  %6035 = vmatpush.msra.mxu1 %v5857_v9  ;;  %v6232_v9 = vld [vmem:[%s10137_s8] ss:$0 sm:$0xff] }
 0x8ea   :  { %6016 = vmatpush.msra.mxu3 %v5840_v13  ;;  %6076 = vmatpush.msrb.mxu2 %v6059_v11 }
 0x8eb   :  { %6036 = vmatpush.msra.mxu1 %v5856_v4 }
 0x8ec   :  { %6017 = vmatpush.msra.mxu3 %v5839_v53  ;;  %6077 = vmatpush.msrb.mxu2 %v6058_v52 }
 0x8ed   :  { %6037 = vmatpush.msra.mxu1 %v5855_v37 }
 0x8ee   :  { %6018 = vmatpush.msra.mxu3 %v5838_v10  ;;  %6078 = vmatpush.msrb.mxu2 %v6057_v12 }
 0x8ef   :  { %6038 = vmatpush.msra.mxu1 %v5854_v39 }
 0x8f0   :  { %6019 = vmatpush.msra.mxu3 %v5837_v56  ;;  %6079 = vmatpush.msrb.mxu2 %v6056_v21 }
 0x8f1   :  { %6039 = vmatpush.msra.mxu1 %v5853_v25 }
 0x8f2   :  { %6020 = vmatpush.msra.mxu3 %v5836_v49  ;;  %6080 = vmatpush.msrb.mxu2 %v6055_v15 }
 0x8f3   :  { %6040 = vmatpush.msra.mxu1 %v5852_v41 }
 0x8f4   :  { %6021 = vmatpush.msra.mxu3 %v5835_v63  ;;  %6081 = vmatpush.msrb.mxu2 %v6054_v50 }
 0x8f5   :  { %6041 = vmatpush.msra.mxu1 %v5851_v3 }
 0x8f6   :  { %6022 = vmatpush.msra.mxu3 %v5834_v19  ;;  %6082 = vmatpush.msrb.mxu2 %v6053_v2 }
 0x8f7   :  { %6042 = vmatpush.msra.mxu1 %v5850_v45 }
 0x8f8   :  { %v5731_v46 = vpop.permute.xlu0 %5730  ;;  %6023 = vmatpush.msra.mxu3 %v5833_v27  ;;  %6083 = vmatpush.msrb.mxu2 %v6052_v54 }
 0x8f9   :  { %5733 = vst.msk [vmem:[#allocation7 + $0xe] sm:$0x3] %vm5532_vm0, %v5731_v46  ;;  %6043 = vmatpush.msra.mxu1 %v5849_v16 }
 0x8fa   :  { %6024 = vmatpush.msra.mxu3 %v5832_v28  ;;  %6084 = vmatpush.msrb.mxu2 %v6051_v38 }
 0x8fb   :  { %6044 = vmatpush.msra.mxu1 %v5848_v62 }
 0x8fc   :  { %6085 = vmatpush.msrb.mxu2 %v6050_v1 }
 0x900   :  { %v5735_v23 = vld [vmem:[#allocation7 + $0x8] sm:$0xff] }
 0x901   :  { %5872 = vst [vmem:[#allocation1 + $0x20] ss:$4 sm:$0xff] %v5735_v23 }
 0x908   :  { %v5877_v47 = vld.sshfl [vmem:[#allocation1 + $0x20] sm:$0xff pattern:$0x73625140]  ;;  %v5878_v29 = vld.sshfl [vmem:[#allocation1 + $0x28] sm:$0xff pattern:$0x73625140] }
 0x909   :  { %5985 = vmatmul.f32.vlgmr.msrb.gmra.mxu1 %v5877_v47  ;;  %6005 = vmatmul.f32.vlgmr.msra.gmra.mxu2 %v5878_v29  ;;  %v5879_v42 = vld.sshfl [vmem:[#allocation1 + $0x30] sm:$0xff pattern:$0x73625140]  ;;  %v5880_v59 = vld.sshfl [vmem:[#allocation1 + $0x38] sm:$0xff pattern:$0x73625140] }
 0x90a   :  { %6025 = vmatmul.f32.vlgmr.msra.gmra.mxu3 %v5879_v42 }
 0x911   :  { %6045 = vmatmul.f32.vlgmr.msra.gmra.mxu1 %v5880_v59 }
 0x958   :  { %v5926_v18 = vpop.f32.mrf.mxu1 }
 0x95e   :  { %v5906_v48 = vpop.f32.mrf.mxu3 }
 0x95f   :  { %v5907_v34 = vadd.f32 %v6231_v43, %v5906_v48  ;;  %v5946_v36 = vpop.f32.mrf.mxu2 }
 0x961   :  { %v5927_v60 = vadd.f32 %v5926_v18, %v5907_v34 }
 0x963   :  { %v5947_v6 = vadd.f32 %v5946_v36, %v5927_v60 }
 0x966   :  { %v5966_v17 = vpop.f32.mrf.mxu3 }
 0x967   :  { %v5967_v44 = vadd.f32 %v5966_v17, %v5947_v6 }
 0x986   :  { %v5986_v55 = vpop.f32.mrf.mxu1 }
 0x987   :  { %v5987_v8 = vadd.f32 %v5986_v55, %v5967_v44 }
 0x98c   :  { %v6006_v26 = vpop.f32.mrf.mxu2 }
 0x98d   :  { %v6007_v0 = vadd.f32 %v6006_v26, %v5987_v8  ;;  %v6026_v32 = vpop.f32.mrf.mxu3 }
 0x98e   :  { %v6046_v61 = vpop.f32.mrf.mxu1 }
 0x98f   :  { %v6027_v31 = vadd.f32 %v6026_v32, %v6007_v0 }
 0x991   :  { %v6047_v14 = vadd.f32 %v6046_v61, %v6027_v31 }
 0x993   :  { %v6049_v33 = vmax.f32 %v6047_v14, 0.0 }
 0x995   :  { %6086 = vmatmul.f32.vlgmr.msrb.gmra.mxu2 %v6049_v33 }
 0xa18   :  { %v6087_v13 = vpop.f32.mrf.mxu2 }
 0xa19   :  { %v6088_v40 = vadd.f32 %v6232_v9, %v6087_v13 }
 0xa1b   :  { %6090 = vst [vmem:[#allocation8] sm:$0x3] %v6088_v40 }
 0xa1c   :  { %6101 = dma.vmem_to_hbm [thread:$0]  %s6097_s26, 32, %s6099_s0, [#allocation9]  }
 0xa1d   :  { %6259 = dma.done.wait [#allocation9], 32  }
 0xa1e   :  { %6260 = vsyncadd [#allocation9], 4294967264 }
 0xa1f   :  { %6110 = vsyncpa [#allocation9], 1 }

</bundles_post_ra>
